<compile_context>
chip_gen: v5e
topology: v5e:2x2
jax: 0.10.0
libtpu: 0.0.40
codegen_flags: <defaults>
</compile_context>

<pallas_src>
import jax
import jax.numpy as jnp
from jax.experimental import pallas as pl
from jax.experimental.pallas import tpu as pltpu

NUM_CLASSES = 10
LAYER_SIZES = [3072, 256, 512, 1024, 512, NUM_CLASSES]
OUT_PAD = 128        # lane-dense padded width of the final layer
SUBLANE = 8          # f32/bf16 sublane granularity for batch tiles
MAX_TB = 512         # max batch tile (amortizes MXU fill/drain + per-step overhead)


def _round_up(x, m):
    return ((x + m - 1) // m) * m


def mlp_kernel(x_ref,
               w1_ref, b1_ref,
               w2_ref, b2_ref,
               w3_ref, b3_ref,
               w4_ref, b4_ref,
               w5_ref, b5_ref,
               o_ref):
    """Fused 5-layer MLP on one batch tile.

    Weights are bf16 (in, out), resident in VMEM (constant block index, single-buffered);
    matmuls accumulate in f32 on the MXU; bias add + ReLU in f32 on the VPU. Hidden
    activations are carried in bf16; the final layer output stays f32.
    """
    def layer(h, w_ref, b_ref, out_dtype):
        y = jnp.dot(h, w_ref[...], preferred_element_type=jnp.float32)
        return jnp.maximum(y + b_ref[...], 0.0).astype(out_dtype)

    h = x_ref[...]                                  # bf16 (tb, 3072)
    h = layer(h, w1_ref, b1_ref, jnp.bfloat16)
    h = layer(h, w2_ref, b2_ref, jnp.bfloat16)
    h = layer(h, w3_ref, b3_ref, jnp.bfloat16)
    h = layer(h, w4_ref, b4_ref, jnp.bfloat16)
    o_ref[...] = layer(h, w5_ref, b5_ref, o_ref.dtype)   # f32 logits (ReLU'd, per spec)


def prepare_params(params):
    """One-time prep of PyTorch-convention params.

    (out, in) f32 W -> (in, out) bf16; b -> (1, out) f32.
    Final layer is zero-padded to OUT_PAD output lanes (lane-dense stores).
    """
    prepped = []
    n = len(params)
    for i, (w, b) in enumerate(params):
        w_t = jnp.asarray(w, jnp.float32).T           # (in, out)
        b_r = jnp.asarray(b, jnp.float32)[None, :]    # (1, out)
        if i == n - 1:
            pad = OUT_PAD - w_t.shape[1]
            w_t = jnp.pad(w_t, ((0, 0), (0, pad)))
            b_r = jnp.pad(b_r, ((0, 0), (0, pad)))
        prepped.append((w_t.astype(jnp.bfloat16), b_r))
    return prepped


@jax.jit
def simple_neural_network_forward(x_nchw, prepped_params):
    """Forward pass. x_nchw: (B, 3, 32, 32); prepped_params: output of prepare_params()."""
    B = x_nchw.shape[0]
    x_flat = x_nchw.reshape(B, -1).astype(jnp.bfloat16)   # nn.Flatten semantics
    assert x_flat.shape[1] == LAYER_SIZES[0]

    # Batch tiling: pad to a sublane multiple; tile at up to MAX_TB rows per grid step,
    # but keep >= 2 grid steps when the batch allows it (v7x dual-TensorCore sharding).
    b_pad = _round_up(B, SUBLANE)
    tb = min(MAX_TB, _round_up(max(SUBLANE, b_pad // 2), SUBLANE))
    b_pad = _round_up(b_pad, tb)
    if b_pad != B:
        x_flat = jnp.pad(x_flat, ((0, b_pad - B), (0, 0)))

    kernel_args = [x_flat]
    # x is pipelined (default Buffered(2)) against compute across the batch grid.
    in_specs = [pl.BlockSpec((tb, LAYER_SIZES[0]), lambda i: (i, 0))]
    for (w, b) in prepped_params:
        kernel_args.append(w)
        # Constant block index -> fetched once, resident in VMEM; single-buffer to
        # avoid wasting ~4 MiB on a second buffer that is never used.
        in_specs.append(pl.BlockSpec(w.shape, lambda i: (0, 0),
                                     pipeline_mode=pl.Buffered(1)))
        kernel_args.append(b)
        in_specs.append(pl.BlockSpec(b.shape, lambda i: (0, 0),
                                     pipeline_mode=pl.Buffered(1)))

    out_shape = jax.ShapeDtypeStruct((b_pad, OUT_PAD), jnp.float32)
    out_specs = pl.BlockSpec((tb, OUT_PAD), lambda i: (i, 0))

    flops = 2 * b_pad * sum(int(w.shape[0]) * int(w.shape[1]) for w, _ in prepped_params)
    bytes_accessed = (
        sum(w.size * w.dtype.itemsize + b.size * b.dtype.itemsize
            for w, b in prepped_params)
        + x_flat.size * x_flat.dtype.itemsize
        + b_pad * OUT_PAD * 4
    )

    out = pl.pallas_call(
        mlp_kernel,
        out_shape=out_shape,
        grid=(b_pad // tb,),
        in_specs=in_specs,
        out_specs=out_specs,
        compiler_params=pltpu.CompilerParams(
            dimension_semantics=("parallel",),
            vmem_limit_bytes=32 << 20,
        ),
        cost_estimate=pl.CostEstimate(
            flops=flops, transcendentals=0, bytes_accessed=bytes_accessed),
    )(*kernel_args)

    return out[:B, :NUM_CLASSES]


def init_params(key):
    """Deterministic init matching PyTorch Linear shapes: W (out, in), b (out,)."""
    params = []
    for i in range(len(LAYER_SIZES) - 1):
        fan_in, fan_out = LAYER_SIZES[i], LAYER_SIZES[i + 1]
        key, kw, kb = jax.random.split(key, 3)
        bound = 1.0 / jnp.sqrt(fan_in)
        w = jax.random.uniform(kw, (fan_out, fan_in), jnp.float32, -bound, bound)
        b = jax.random.uniform(kb, (fan_out,), jnp.float32, -bound, bound)
        params.append((w, b))
    return params


def reference_forward(x_nchw, params):
    """Pure-JAX reference with the same numerics as the kernel
    (bf16 weights/activations, f32 MXU accumulation, bias + ReLU in f32)."""
    h = x_nchw.reshape(x_nchw.shape[0], -1)
    for (w, b) in params:
        w_bf = jnp.asarray(w, jnp.float32).T.astype(jnp.bfloat16)
        y = jax.lax.dot_general(h.astype(jnp.bfloat16), w_bf,
                                (((1,), (0,)), ((), ())),
                                preferred_element_type=jnp.float32)
        h = jnp.maximum(y + jnp.asarray(b, jnp.float32)[None, :], 0.0)
    return h


if __name__ == "__main__":
    key = jax.random.PRNGKey(0)
    key, kx = jax.random.split(key)
    # Input consistent with in_features = 3*32*32 = 3072 -> (B, 3, 32, 32)
    x = jax.random.normal(kx, (2, 3, 32, 32), jnp.float32)

    params = init_params(key)
    prepped = prepare_params(params)   # one-time weight transpose / pad / bf16 cast

    out = simple_neural_network_forward(x, prepped)
    out = jax.block_until_ready(out)

    ref = reference_forward(x, params)
    assert out.shape == (2, NUM_CLASSES)
    assert jnp.allclose(out, ref, atol=2e-3, rtol=2e-3), "mismatch vs reference"

    print("KERNEL_OK")
</pallas_src>

<mosaic_0001>
module attributes {stable_mosaic.version = 11 : i64} {
  func.func @mlp_kernel(%arg0: i32, %arg1: memref<8x3072xbf16, #tpu.memory_space<vmem>>, %arg2: memref<3072x256xbf16, #tpu.memory_space<vmem>>, %arg3: memref<1x256xf32, #tpu.memory_space<vmem>>, %arg4: memref<256x512xbf16, #tpu.memory_space<vmem>>, %arg5: memref<1x512xf32, #tpu.memory_space<vmem>>, %arg6: memref<512x1024xbf16, #tpu.memory_space<vmem>>, %arg7: memref<1x1024xf32, #tpu.memory_space<vmem>>, %arg8: memref<1024x512xbf16, #tpu.memory_space<vmem>>, %arg9: memref<1x512xf32, #tpu.memory_space<vmem>>, %arg10: memref<512x128xbf16, #tpu.memory_space<vmem>>, %arg11: memref<1x128xf32, #tpu.memory_space<vmem>>, %arg12: memref<8x128xf32, #tpu.memory_space<vmem>>) attributes {dimension_semantics = [#tpu.dimension_semantics<parallel>], iteration_bounds = array<i64: 1>, scalar_prefetch = 0 : i64, scratch_operands = 0 : i64, tpu.core_type = #tpu.core_type<tc>, window_params = [{transform_indices = @transform_0, window_bounds = array<i64: 8, 3072>}, {pipeline_mode = #tpu.pipeline_mode<synchronous>, transform_indices = @transform_1, window_bounds = array<i64: 3072, 256>}, {pipeline_mode = #tpu.pipeline_mode<synchronous>, transform_indices = @transform_2, window_bounds = array<i64: 1, 256>}, {pipeline_mode = #tpu.pipeline_mode<synchronous>, transform_indices = @transform_3, window_bounds = array<i64: 256, 512>}, {pipeline_mode = #tpu.pipeline_mode<synchronous>, transform_indices = @transform_4, window_bounds = array<i64: 1, 512>}, {pipeline_mode = #tpu.pipeline_mode<synchronous>, transform_indices = @transform_5, window_bounds = array<i64: 512, 1024>}, {pipeline_mode = #tpu.pipeline_mode<synchronous>, transform_indices = @transform_6, window_bounds = array<i64: 1, 1024>}, {pipeline_mode = #tpu.pipeline_mode<synchronous>, transform_indices = @transform_7, window_bounds = array<i64: 1024, 512>}, {pipeline_mode = #tpu.pipeline_mode<synchronous>, transform_indices = @transform_8, window_bounds = array<i64: 1, 512>}, {pipeline_mode = #tpu.pipeline_mode<synchronous>, transform_indices = @transform_9, window_bounds = array<i64: 512, 128>}, {pipeline_mode = #tpu.pipeline_mode<synchronous>, transform_indices = @transform_10, window_bounds = array<i64: 1, 128>}, {transform_indices = @transform_11, window_bounds = array<i64: 8, 128>}]} {
    %c0 = arith.constant 0 : index
    %c0_0 = arith.constant 0 : index
    %0 = vector.load %arg1[%c0, %c0_0] : memref<8x3072xbf16, #tpu.memory_space<vmem>>, vector<8x3072xbf16>
    %c0_1 = arith.constant 0 : index
    %c0_2 = arith.constant 0 : index
    %1 = vector.load %arg2[%c0_1, %c0_2] : memref<3072x256xbf16, #tpu.memory_space<vmem>>, vector<3072x256xbf16>
    %cst = arith.constant dense<0.000000e+00> : vector<8x256xf32>
    %2 = tpu.matmul %0, %1, %cst {dimension_numbers = #tpu.dot_dimension_numbers<[1], [0], [0], [1], [0, 0, 1, 1], [], []>} : vector<8x3072xbf16>, vector<3072x256xbf16>, vector<8x256xf32> -> vector<8x256xf32>
    %c0_3 = arith.constant 0 : index
    %c0_4 = arith.constant 0 : index
    %3 = vector.load %arg3[%c0_3, %c0_4] : memref<1x256xf32, #tpu.memory_space<vmem>>, vector<1x256xf32>
    %4 = vector.broadcast %3 : vector<1x256xf32> to vector<8x256xf32>
    %5 = arith.addf %2, %4 : vector<8x256xf32>
    %cst_5 = arith.constant 0.000000e+00 : f32
    %6 = vector.broadcast %cst_5 : f32 to vector<8x256xf32>
    %7 = arith.maximumf %5, %6 : vector<8x256xf32>
    %8 = arith.truncf %7 : vector<8x256xf32> to vector<8x256xbf16>
    %c0_6 = arith.constant 0 : index
    %c0_7 = arith.constant 0 : index
    %9 = vector.load %arg4[%c0_6, %c0_7] : memref<256x512xbf16, #tpu.memory_space<vmem>>, vector<256x512xbf16>
    %cst_8 = arith.constant dense<0.000000e+00> : vector<8x512xf32>
    %10 = tpu.matmul %8, %9, %cst_8 {dimension_numbers = #tpu.dot_dimension_numbers<[1], [0], [0], [1], [0, 0, 1, 1], [], []>} : vector<8x256xbf16>, vector<256x512xbf16>, vector<8x512xf32> -> vector<8x512xf32>
    %c0_9 = arith.constant 0 : index
    %c0_10 = arith.constant 0 : index
    %11 = vector.load %arg5[%c0_9, %c0_10] : memref<1x512xf32, #tpu.memory_space<vmem>>, vector<1x512xf32>
    %12 = vector.broadcast %11 : vector<1x512xf32> to vector<8x512xf32>
    %13 = arith.addf %10, %12 : vector<8x512xf32>
    %cst_11 = arith.constant 0.000000e+00 : f32
    %14 = vector.broadcast %cst_11 : f32 to vector<8x512xf32>
    %15 = arith.maximumf %13, %14 : vector<8x512xf32>
    %16 = arith.truncf %15 : vector<8x512xf32> to vector<8x512xbf16>
    %c0_12 = arith.constant 0 : index
    %c0_13 = arith.constant 0 : index
    %17 = vector.load %arg6[%c0_12, %c0_13] : memref<512x1024xbf16, #tpu.memory_space<vmem>>, vector<512x1024xbf16>
    %cst_14 = arith.constant dense<0.000000e+00> : vector<8x1024xf32>
    %18 = tpu.matmul %16, %17, %cst_14 {dimension_numbers = #tpu.dot_dimension_numbers<[1], [0], [0], [1], [0, 0, 1, 1], [], []>} : vector<8x512xbf16>, vector<512x1024xbf16>, vector<8x1024xf32> -> vector<8x1024xf32>
    %c0_15 = arith.constant 0 : index
    %c0_16 = arith.constant 0 : index
    %19 = vector.load %arg7[%c0_15, %c0_16] : memref<1x1024xf32, #tpu.memory_space<vmem>>, vector<1x1024xf32>
    %20 = vector.broadcast %19 : vector<1x1024xf32> to vector<8x1024xf32>
    %21 = arith.addf %18, %20 : vector<8x1024xf32>
    %cst_17 = arith.constant 0.000000e+00 : f32
    %22 = vector.broadcast %cst_17 : f32 to vector<8x1024xf32>
    %23 = arith.maximumf %21, %22 : vector<8x1024xf32>
    %24 = arith.truncf %23 : vector<8x1024xf32> to vector<8x1024xbf16>
    %c0_18 = arith.constant 0 : index
    %c0_19 = arith.constant 0 : index
    %25 = vector.load %arg8[%c0_18, %c0_19] : memref<1024x512xbf16, #tpu.memory_space<vmem>>, vector<1024x512xbf16>
    %cst_20 = arith.constant dense<0.000000e+00> : vector<8x512xf32>
    %26 = tpu.matmul %24, %25, %cst_20 {dimension_numbers = #tpu.dot_dimension_numbers<[1], [0], [0], [1], [0, 0, 1, 1], [], []>} : vector<8x1024xbf16>, vector<1024x512xbf16>, vector<8x512xf32> -> vector<8x512xf32>
    %c0_21 = arith.constant 0 : index
    %c0_22 = arith.constant 0 : index
    %27 = vector.load %arg9[%c0_21, %c0_22] : memref<1x512xf32, #tpu.memory_space<vmem>>, vector<1x512xf32>
    %28 = vector.broadcast %27 : vector<1x512xf32> to vector<8x512xf32>
    %29 = arith.addf %26, %28 : vector<8x512xf32>
    %cst_23 = arith.constant 0.000000e+00 : f32
    %30 = vector.broadcast %cst_23 : f32 to vector<8x512xf32>
    %31 = arith.maximumf %29, %30 : vector<8x512xf32>
    %32 = arith.truncf %31 : vector<8x512xf32> to vector<8x512xbf16>
    %c0_24 = arith.constant 0 : index
    %c0_25 = arith.constant 0 : index
    %33 = vector.load %arg10[%c0_24, %c0_25] : memref<512x128xbf16, #tpu.memory_space<vmem>>, vector<512x128xbf16>
    %cst_26 = arith.constant dense<0.000000e+00> : vector<8x128xf32>
    %34 = tpu.matmul %32, %33, %cst_26 {dimension_numbers = #tpu.dot_dimension_numbers<[1], [0], [0], [1], [0, 0, 1, 1], [], []>} : vector<8x512xbf16>, vector<512x128xbf16>, vector<8x128xf32> -> vector<8x128xf32>
    %c0_27 = arith.constant 0 : index
    %c0_28 = arith.constant 0 : index
    %35 = vector.load %arg11[%c0_27, %c0_28] : memref<1x128xf32, #tpu.memory_space<vmem>>, vector<1x128xf32>
    %36 = vector.broadcast %35 : vector<1x128xf32> to vector<8x128xf32>
    %37 = arith.addf %34, %36 : vector<8x128xf32>
    %cst_29 = arith.constant 0.000000e+00 : f32
    %38 = vector.broadcast %cst_29 : f32 to vector<8x128xf32>
    %39 = arith.maximumf %37, %38 : vector<8x128xf32>
    %c0_30 = arith.constant 0 : index
    %c0_31 = arith.constant 0 : index
    %40 = vector.load %arg12[%c0_30, %c0_31] : memref<8x128xf32, #tpu.memory_space<vmem>>, vector<8x128xf32>
    tpu.vector_store %arg12[%c0_30, %c0_31], %39 {strides = array<i32>} : memref<8x128xf32, #tpu.memory_space<vmem>>, vector<8x128xf32>,
    return
  }
  func.func @transform_0(%arg0: i32) -> (i32, i32) {
    %c0_i32 = arith.constant 0 : i32
    %c0_i32_0 = arith.constant 0 : i32
    return %arg0, %c0_i32 : i32, i32
  }
  func.func @transform_1(%arg0: i32) -> (i32, i32) {
    %c0_i32 = arith.constant 0 : i32
    %c0_i32_0 = arith.constant 0 : i32
    %c0_i32_1 = arith.constant 0 : i32
    return %c0_i32, %c0_i32_0 : i32, i32
  }
  func.func @transform_2(%arg0: i32) -> (i32, i32) {
    %c0_i32 = arith.constant 0 : i32
    %c0_i32_0 = arith.constant 0 : i32
    %c0_i32_1 = arith.constant 0 : i32
    return %c0_i32, %c0_i32_0 : i32, i32
  }
  func.func @transform_3(%arg0: i32) -> (i32, i32) {
    %c0_i32 = arith.constant 0 : i32
    %c0_i32_0 = arith.constant 0 : i32
    %c0_i32_1 = arith.constant 0 : i32
    return %c0_i32, %c0_i32_0 : i32, i32
  }
  func.func @transform_4(%arg0: i32) -> (i32, i32) {
    %c0_i32 = arith.constant 0 : i32
    %c0_i32_0 = arith.constant 0 : i32
    %c0_i32_1 = arith.constant 0 : i32
    return %c0_i32, %c0_i32_0 : i32, i32
  }
  func.func @transform_5(%arg0: i32) -> (i32, i32) {
    %c0_i32 = arith.constant 0 : i32
    %c0_i32_0 = arith.constant 0 : i32
    %c0_i32_1 = arith.constant 0 : i32
    return %c0_i32, %c0_i32_0 : i32, i32
  }
  func.func @transform_6(%arg0: i32) -> (i32, i32) {
    %c0_i32 = arith.constant 0 : i32
    %c0_i32_0 = arith.constant 0 : i32
    %c0_i32_1 = arith.constant 0 : i32
    return %c0_i32, %c0_i32_0 : i32, i32
  }
  func.func @transform_7(%arg0: i32) -> (i32, i32) {
    %c0_i32 = arith.constant 0 : i32
    %c0_i32_0 = arith.constant 0 : i32
    %c0_i32_1 = arith.constant 0 : i32
    return %c0_i32, %c0_i32_0 : i32, i32
  }
  func.func @transform_8(%arg0: i32) -> (i32, i32) {
    %c0_i32 = arith.constant 0 : i32
    %c0_i32_0 = arith.constant 0 : i32
    %c0_i32_1 = arith.constant 0 : i32
    return %c0_i32, %c0_i32_0 : i32, i32
  }
  func.func @transform_9(%arg0: i32) -> (i32, i32) {
    %c0_i32 = arith.constant 0 : i32
    %c0_i32_0 = arith.constant 0 : i32
    %c0_i32_1 = arith.constant 0 : i32
    return %c0_i32, %c0_i32_0 : i32, i32
  }
  func.func @transform_10(%arg0: i32) -> (i32, i32) {
    %c0_i32 = arith.constant 0 : i32
    %c0_i32_0 = arith.constant 0 : i32
    %c0_i32_1 = arith.constant 0 : i32
    return %c0_i32, %c0_i32_0 : i32, i32
  }
  func.func @transform_11(%arg0: i32) -> (i32, i32) {
    %c0_i32 = arith.constant 0 : i32
    %c0_i32_0 = arith.constant 0 : i32
    return %arg0, %c0_i32 : i32, i32
  }
}

</mosaic_0001>

<bundles_post_ra>
// kernel: simple_neural_network_forward.1
= control target key start
LH: loop header
LB: loop body
LE: loop exit
PB: predicated region body
PF: predicated region fallthrough
CT: control target
= control target key end

     0   :  { %16 = vsyncpa [#allocation3], 0  ;;  %s13742_s0 = inlined_call_operand.vmem [shape: bf16[8,3072], index: 0, kind: input, shape index: {}]   ;;  %s13743_s1 = inlined_call_operand.hbm [shape: bf16[3072,256], index: 1, kind: input, shape index: {}]   ;;  %s13744_s2 = inlined_call_operand.hbm [shape: f32[1,256], index: 2, kind: input, shape index: {}]   ;;  %s13745_s3 = inlined_call_operand.hbm [shape: bf16[256,512], index: 3, kind: input, shape index: {}]   ;;  %s13746_s4 = inlined_call_operand.hbm [shape: f32[1,512], index: 4, kind: input, shape index: {}]   ;;  %s13747_s5 = inlined_call_operand.hbm [shape: bf16[512,1024], index: 5, kind: input, shape index: {}]   ;;  %s13748_s6 = inlined_call_operand.hbm [shape: f32[1,1024], index: 6, kind: input, shape index: {}]   ;;  %s13749_s7 = inlined_call_operand.hbm [shape: bf16[1024,512], index: 7, kind: input, shape index: {}]   ;;  %s13750_s8 = inlined_call_operand.hbm [shape: f32[1,512], index: 8, kind: input, shape index: {}]   ;;  %s13751_s9 = inlined_call_operand.hbm [shape: bf16[512,128], index: 9, kind: input, shape index: {}]   ;;  %s13752_s10 = inlined_call_operand.hbm [shape: f32[1,128], index: 10, kind: input, shape index: {}]   ;;  %s13753_s11 = inlined_call_operand.vmem [shape: f32[8,128], index: 11, kind: output, shape index: {}]  }
   0x1   :  { %17 = vsyncpa [#allocation5], 0 }
   0x2   :  { %18 = vsyncpa [#allocation8], 0 }
   0x3   :  { %19 = vsyncpa [#allocation11], 0 }
   0x4   :  { %20 = vsyncpa [#allocation14], 0  ;;  %s42_s19 = sshll.u32 %s13744_s2, 4  ;;  %s43_s19 = int_to_ptr.hbm [resolvable:$true] %s42_s19 }
   0x5   :  { %21 = vsyncpa [#allocation17], 0  ;;  %s13238_s20 = smov [#allocation4]   ;;  %s66_s24 = sshll.u32 %s13746_s4, 4  ;;  %s67_s24 = int_to_ptr.hbm [resolvable:$true] %s66_s24 }
   0x6   :  { %s44_s21 = sshll.u32 %s13238_s20, 4  ;;  %s13239_s25 = smov [#allocation7]   ;;  %s45_s21 = int_to_ptr.vmem [resolvable:$true] %s44_s21 }
   0x7   :  { %47 = dma.hbm_to_vmem [thread:$0]  %s43_s19, 32, %s45_s21, [#allocation5]  }
   0x8   :  { %s68_s26 = sshll.u32 %s13239_s25, 4  ;;  %s90_s29 = sshll.u32 %s13748_s6, 4  ;;  %s69_s26 = int_to_ptr.vmem [resolvable:$true] %s68_s26  ;;  %s91_s29 = int_to_ptr.hbm [resolvable:$true] %s90_s29 }
   0x9   :  { %71 = dma.hbm_to_vmem [thread:$0]  %s67_s24, 64, %s69_s26, [#allocation8]  }
   0xa   :  { %s114_s12 = sshll.u32 %s13750_s8, 4  ;;  %s13240_s13 = smov [#allocation10]   ;;  %s115_s12 = int_to_ptr.hbm [resolvable:$true] %s114_s12 }
   0xb   :  { %s92_s14 = sshll.u32 %s13240_s13, 4  ;;  %s13241_s4 = smov [#allocation13]   ;;  %s93_s14 = int_to_ptr.vmem [resolvable:$true] %s92_s14 }
   0xc   :  { %95 = dma.hbm_to_vmem [thread:$0]  %s91_s29, 128, %s93_s14, [#allocation11]  }
   0xd   :  { %s116_s15 = sshll.u32 %s13241_s4, 4  ;;  %s28_s18 = sshll.u32 %s13743_s1, 4  ;;  %s117_s15 = int_to_ptr.vmem [resolvable:$true] %s116_s15  ;;  %s29_s18 = int_to_ptr.hbm [resolvable:$true] %s28_s18 }
   0xe   :  { %119 = dma.hbm_to_vmem [thread:$0]  %s115_s12, 64, %s117_s15, [#allocation14]  }
   0xf   :  { %s13242_s6 = smov [#allocation2]   ;;  %s52_s8 = sshll.u32 %s13745_s3, 4  ;;  %s53_s8 = int_to_ptr.hbm [resolvable:$true] %s52_s8 }
  0x10   :  { %s30_s19 = sshll.u32 %s13242_s6, 4  ;;  %s13243_s22 = smov 128   ;;  %s31_s19 = int_to_ptr.vmem [resolvable:$true] %s30_s19 }
  0x11   :  { %s13244_s23 = smov 8   ;;  %s13245_s24 = smov [#allocation6]  }
  0x12   :  { %36 = dma.hbm_to_vmem [thread:$0]  %s29_s18, 49152, %s31_s19, [#allocation3], %s13243_s22, %s13243_s22, %s13244_s23  }
  0x13   :  { %s54_s25 = sshll.u32 %s13245_s24, 4  ;;  %s13246_s26 = smov 256   ;;  %s55_s25 = int_to_ptr.vmem [resolvable:$true] %s54_s25 }
  0x14   :  { %s13247_s27 = smov 16   ;;  %s76_s29 = sshll.u32 %s13747_s5, 4  ;;  %s77_s29 = int_to_ptr.hbm [resolvable:$true] %s76_s29 }
  0x15   :  { %60 = dma.hbm_to_vmem [thread:$0]  %s53_s8, 8192, %s55_s25, [#allocation5], %s13246_s26, %s13246_s26, %s13247_s27  }
  0x16   :  { %s13248_s2 = smov [#allocation9]   ;;  %s100_s13 = sshll.u32 %s13749_s7, 4  ;;  %s101_s13 = int_to_ptr.hbm [resolvable:$true] %s100_s13 }
  0x17   :  { %s78_s30 = sshll.u32 %s13248_s2, 4  ;;  %s13249_s14 = smov 512   ;;  %s79_s30 = int_to_ptr.vmem [resolvable:$true] %s78_s30 }
  0x18   :  { %s13250_s4 = smov 32   ;;  %s13251_s15 = smov [#allocation12]  }
  0x19   :  { %84 = dma.hbm_to_vmem [thread:$0]  %s77_s29, 32768, %s79_s30, [#allocation8], %s13249_s14, %s13249_s14, %s13250_s4  }
  0x1a   :  { %s102_s16 = sshll.u32 %s13251_s15, 4  ;;  %s124_s6 = sshll.u32 %s13751_s9, 4  ;;  %s103_s16 = int_to_ptr.vmem [resolvable:$true] %s102_s16  ;;  %s125_s6 = int_to_ptr.hbm [resolvable:$true] %s124_s6 }
  0x1b   :  { %108 = dma.hbm_to_vmem [thread:$0]  %s101_s13, 32768, %s103_s16, [#allocation11], %s13246_s26, %s13246_s26, %s13247_s27  }
  0x1c   :  { %s13252_s5 = smov [#allocation15]   ;;  %s138_s7 = sshll.u32 %s13752_s10, 4  ;;  %s139_s7 = int_to_ptr.hbm [resolvable:$true] %s138_s7 }
  0x1d   :  { %s126_s19 = sshll.u32 %s13252_s5, 4  ;;  %s13253_s8 = smov 64   ;;  %s127_s19 = int_to_ptr.vmem [resolvable:$true] %s126_s19 }
  0x1e   :  { %s13254_s22 = smov 4   ;;  %s13255_s23 = smov [#allocation16]  }
  0x1f   :  { %132 = dma.hbm_to_vmem [thread:$0]  %s125_s6, 4096, %s127_s19, [#allocation14], %s13253_s8, %s13253_s8, %s13254_s22  }
  0x20   :  { %s140_s24 = sshll.u32 %s13255_s23, 4  ;;  %s141_s24 = int_to_ptr.vmem [resolvable:$true] %s140_s24 }
  0x21   :  { %143 = dma.hbm_to_vmem [thread:$0]  %s139_s7, 16, %s141_s24, [#allocation17]  }
  0x22   :  { %13226 = dma.done.wait [#allocation3], 49152  }
  0x23   :  { %13227 = vsyncadd [#allocation3], 4294918144 }
  0x24   :  { %13228 = dma.done.wait [#allocation5], 8224  }
  0x25   :  { %13229 = vsyncadd [#allocation5], 4294959072 }
  0x26   :  { %13230 = dma.done.wait [#allocation8], 32832  }
  0x27   :  { %13231 = vsyncadd [#allocation8], 4294934464 }
  0x28   :  { %13232 = dma.done.wait [#allocation11], 32896  }
  0x29   :  { %13233 = vsyncadd [#allocation11], 4294934400 }
  0x2a   :  { %13234 = dma.done.wait [#allocation14], 4160  }
  0x2b   :  { %13235 = vsyncadd [#allocation14], 4294963136 }
  0x2c   :  { %13236 = dma.done.wait [#allocation17], 16  }
  0x2d   :  { %13237 = vsyncadd [#allocation17], 4294967280  ;;  %v8062_v0 = vld [vmem:[#allocation2 + $0x70] sm:$0xf]  ;;  %v11987_v1 = vld [vmem:[#allocation2 + $0x74] sm:$0xf0] }
  0x2e   :  { %v8126_v2 = vld [vmem:[#allocation2 + $0xf0] sm:$0xf]  ;;  %v8063_v3 = vor.u32 %v11987_v1, %v8062_v0  ;;  %v12003_v4 = vld [vmem:[#allocation2 + $0xf4] sm:$0xf0]  ;;  %v8054_v11 = vld [vmem:[#allocation2 + $0x60] sm:$0xf] }
  0x2f   :  { %v8190_v5 = vld [vmem:[#allocation2 + $0x170] sm:$0xf]  ;;  %v12019_v6 = vld [vmem:[#allocation2 + $0x174] sm:$0xf0]  ;;  %v8127_v7 = vor.u32 %v12003_v4, %v8126_v2  ;;  %v11985_v13 = vld [vmem:[#allocation2 + $0x64] sm:$0xf0] }
  0x30   :  { %v8191_v8 = vor.u32 %v12019_v6, %v8190_v5  ;;  %v8254_v9 = vld [vmem:[#allocation2 + $0x1f0] sm:$0xf]  ;;  %v12035_v10 = vld [vmem:[#allocation2 + $0x1f4] sm:$0xf0]  ;;  %2590 = vmatpush.bf16.msra.mxu0 %v8063_v3  ;;  %v8118_v14 = vld [vmem:[#allocation2 + $0xe0] sm:$0xf]  ;;  %v8055_v16 = vor.u32 %v11985_v13, %v8054_v11 }
  0x31   :  { %v8255_v12 = vor.u32 %v12035_v10, %v8254_v9  ;;  %v12001_v15 = vld [vmem:[#allocation2 + $0xe4] sm:$0xf0]  ;;  %2603 = vmatpush.bf16.msra.mxu1 %v8127_v7  ;;  %v8182_v18 = vld [vmem:[#allocation2 + $0x160] sm:$0xf]  ;;  %v8046_v23 = vld [vmem:[#allocation2 + $0x50] sm:$0xf] }
  0x32   :  { %2616 = vmatpush.bf16.msra.mxu2 %v8191_v8  ;;  %v8119_v17 = vor.u32 %v12001_v15, %v8118_v14  ;;  %v12017_v19 = vld [vmem:[#allocation2 + $0x164] sm:$0xf0]  ;;  %v8246_v20 = vld [vmem:[#allocation2 + $0x1e0] sm:$0xf]  ;;  %v11983_v24 = vld [vmem:[#allocation2 + $0x54] sm:$0xf0] }
  0x33   :  { %2629 = vmatpush.bf16.msra.mxu3 %v8255_v12  ;;  %v8183_v21 = vor.u32 %v12017_v19, %v8182_v18  ;;  %v12033_v22 = vld [vmem:[#allocation2 + $0x1e4] sm:$0xf0]  ;;  %v8110_v26 = vld [vmem:[#allocation2 + $0xd0] sm:$0xf]  ;;  %v11999_v27 = vld [vmem:[#allocation2 + $0xd4] sm:$0xf0]  ;;  %v8047_v29 = vor.u32 %v11983_v24, %v8046_v23 }
  0x34   :  { %v8247_v25 = vor.u32 %v12033_v22, %v8246_v20  ;;  %v8174_v28 = vld [vmem:[#allocation2 + $0x150] sm:$0xf]  ;;  %2591 = vmatpush.bf16.msra.mxu0 %v8055_v16  ;;  %v12015_v30 = vld [vmem:[#allocation2 + $0x154] sm:$0xf0]  ;;  %v8111_v33 = vor.u32 %v11999_v27, %v8110_v26  ;;  %v8038_v35 = vld [vmem:[#allocation2 + $0x40] sm:$0xf] }
  0x35   :  { %v8238_v31 = vld [vmem:[#allocation2 + $0x1d0] sm:$0xf]  ;;  %v12031_v32 = vld [vmem:[#allocation2 + $0x1d4] sm:$0xf0]  ;;  %2604 = vmatpush.bf16.msra.mxu1 %v8119_v17  ;;  %v8175_v34 = vor.u32 %v12015_v30, %v8174_v28  ;;  %v11981_v36 = vld [vmem:[#allocation2 + $0x44] sm:$0xf0] }
  0x36   :  { %2617 = vmatpush.bf16.msra.mxu2 %v8183_v21  ;;  %v8102_v37 = vld [vmem:[#allocation2 + $0xc0] sm:$0xf]  ;;  %v8239_v38 = vor.u32 %v12031_v32, %v8238_v31  ;;  %v11997_v39 = vld [vmem:[#allocation2 + $0xc4] sm:$0xf0]  ;;  %v8039_v44 = vor.u32 %v11981_v36, %v8038_v35  ;;  %v8030_v47 = vld [vmem:[#allocation2 + $0x30] sm:$0xf] }
  0x37   :  { %2630 = vmatpush.bf16.msra.mxu3 %v8247_v25  ;;  %v8166_v40 = vld [vmem:[#allocation2 + $0x140] sm:$0xf]  ;;  %v12013_v41 = vld [vmem:[#allocation2 + $0x144] sm:$0xf0]  ;;  %v8103_v45 = vor.u32 %v11997_v39, %v8102_v37  ;;  %v11979_v48 = vld [vmem:[#allocation2 + $0x34] sm:$0xf0] }
  0x38   :  { %v8230_v42 = vld [vmem:[#allocation2 + $0x1c0] sm:$0xf]  ;;  %v12029_v43 = vld [vmem:[#allocation2 + $0x1c4] sm:$0xf0]  ;;  %2592 = vmatpush.bf16.msra.mxu0 %v8047_v29  ;;  %v8167_v46 = vor.u32 %v12013_v41, %v8166_v40  ;;  %v8094_v49 = vld [vmem:[#allocation2 + $0xb0] sm:$0xf]  ;;  %v8031_v56 = vor.u32 %v11979_v48, %v8030_v47 }
  0x39   :  { %2605 = vmatpush.bf16.msra.mxu1 %v8111_v33  ;;  %v8231_v50 = vor.u32 %v12029_v43, %v8230_v42  ;;  %v11995_v51 = vld [vmem:[#allocation2 + $0xb4] sm:$0xf0]  ;;  %v8158_v52 = vld [vmem:[#allocation2 + $0x130] sm:$0xf]  ;;  %v8022_v59 = vld [vmem:[#allocation2 + $0x20] sm:$0xf] }
  0x3a   :  { %2618 = vmatpush.bf16.msra.mxu2 %v8175_v34  ;;  %v12011_v53 = vld [vmem:[#allocation2 + $0x134] sm:$0xf0]  ;;  %v8222_v54 = vld [vmem:[#allocation2 + $0x1b0] sm:$0xf]  ;;  %v8095_v57 = vor.u32 %v11995_v51, %v8094_v49  ;;  %v11977_v60 = vld [vmem:[#allocation2 + $0x24] sm:$0xf0] }
  0x3b   :  { %2631 = vmatpush.bf16.msra.mxu3 %v8239_v38  ;;  %v12027_v55 = vld [vmem:[#allocation2 + $0x1b4] sm:$0xf0]  ;;  %v8159_v58 = vor.u32 %v12011_v53, %v8158_v52  ;;  %v8086_v61 = vld [vmem:[#allocation2 + $0xa0] sm:$0xf]  ;;  %v11993_v63 = vld [vmem:[#allocation2 + $0xa4] sm:$0xf0]  ;;  %v8023_v4 = vor.u32 %v11977_v60, %v8022_v59 }
  0x3c   :  { %2593 = vmatpush.bf16.msra.mxu0 %v8039_v44  ;;  %v8223_v62 = vor.u32 %v12027_v55, %v8222_v54  ;;  %v8150_v0 = vld [vmem:[#allocation2 + $0x120] sm:$0xf]  ;;  %v12009_v1 = vld [vmem:[#allocation2 + $0x124] sm:$0xf0]  ;;  %v8087_v5 = vor.u32 %v11993_v63, %v8086_v61  ;;  %v8014_v7 = vld [vmem:[#allocation2 + $0x10] sm:$0xf] }
  0x3d   :  { %2606 = vmatpush.bf16.msra.mxu1 %v8103_v45  ;;  %v8214_v2 = vld [vmem:[#allocation2 + $0x1a0] sm:$0xf]  ;;  %v12025_v3 = vld [vmem:[#allocation2 + $0x1a4] sm:$0xf0]  ;;  %v8151_v6 = vor.u32 %v12009_v1, %v8150_v0  ;;  %v11975_v8 = vld [vmem:[#allocation2 + $0x14] sm:$0xf0] }
  0x3e   :  { %2619 = vmatpush.bf16.msra.mxu2 %v8167_v46  ;;  %v8078_v9 = vld [vmem:[#allocation2 + $0x90] sm:$0xf]  ;;  %v8215_v10 = vor.u32 %v12025_v3, %v8214_v2  ;;  %v11991_v11 = vld [vmem:[#allocation2 + $0x94] sm:$0xf0]  ;;  %v8015_v16 = vor.u32 %v11975_v8, %v8014_v7  ;;  %v8006_v17 = vld [vmem:[#allocation2] sm:$0xf] }
  0x3f   :  { %2632 = vmatpush.bf16.msra.mxu3 %v8231_v50  ;;  %v8142_v12 = vld [vmem:[#allocation2 + $0x110] sm:$0xf]  ;;  %v12007_v13 = vld [vmem:[#allocation2 + $0x114] sm:$0xf0]  ;;  %v11973_v18 = vld [vmem:[#allocation2 + $0x4] sm:$0xf0]  ;;  %v8079_v19 = vor.u32 %v11991_v11, %v8078_v9 }
  0x40   :  { %2594 = vmatpush.bf16.msra.mxu0 %v8031_v56  ;;  %v8206_v14 = vld [vmem:[#allocation2 + $0x190] sm:$0xf]  ;;  %v12023_v15 = vld [vmem:[#allocation2 + $0x194] sm:$0xf0]  ;;  %v8143_v20 = vor.u32 %v12007_v13, %v8142_v12  ;;  %v8070_v21 = vld [vmem:[#allocation2 + $0x80] sm:$0xf]  ;;  %v8007_v31 = vor.u32 %v11973_v18, %v8006_v17 }
  0x41   :  { %2607 = vmatpush.bf16.msra.mxu1 %v8095_v57  ;;  %v11989_v22 = vld [vmem:[#allocation2 + $0x84] sm:$0xf0]  ;;  %v8134_v23 = vld [vmem:[#allocation2 + $0x100] sm:$0xf]  ;;  %v8207_v24 = vor.u32 %v12023_v15, %v8206_v14  ;;  %v8318_v28 = vld [vmem:[#allocation2 + $0x270] sm:$0xf] }
  0x42   :  { %2620 = vmatpush.bf16.msra.mxu2 %v8159_v58  ;;  %v12005_v25 = vld [vmem:[#allocation2 + $0x104] sm:$0xf0]  ;;  %v8198_v26 = vld [vmem:[#allocation2 + $0x180] sm:$0xf]  ;;  %v12051_v29 = vld [vmem:[#allocation2 + $0x274] sm:$0xf0]  ;;  %v8071_v35 = vor.u32 %v11989_v22, %v8070_v21 }
  0x43   :  { %2633 = vmatpush.bf16.msra.mxu3 %v8223_v62  ;;  %v12021_v27 = vld [vmem:[#allocation2 + $0x184] sm:$0xf0]  ;;  %v8382_v30 = vld [vmem:[#allocation2 + $0x2f0] sm:$0xf]  ;;  %v12067_v32 = vld [vmem:[#allocation2 + $0x2f4] sm:$0xf0]  ;;  %v8135_v36 = vor.u32 %v12005_v25, %v8134_v23  ;;  %v8319_v40 = vor.u32 %v12051_v29, %v8318_v28 }
  0x44   :  { %2595 = vmatpush.bf16.msra.mxu0 %v8023_v4  ;;  %v8446_v33 = vld [vmem:[#allocation2 + $0x370] sm:$0xf]  ;;  %v12083_v34 = vld [vmem:[#allocation2 + $0x374] sm:$0xf0]  ;;  %v8199_v39 = vor.u32 %v12021_v27, %v8198_v26  ;;  %v8383_v41 = vor.u32 %v12067_v32, %v8382_v30  ;;  %v8310_v43 = vld [vmem:[#allocation2 + $0x260] sm:$0xf] }
  0x45   :  { %2608 = vmatpush.bf16.msra.mxu1 %v8087_v5  ;;  %v8510_v37 = vld [vmem:[#allocation2 + $0x3f0] sm:$0xf]  ;;  %v12099_v38 = vld [vmem:[#allocation2 + $0x3f4] sm:$0xf0]  ;;  %v8447_v42 = vor.u32 %v12083_v34, %v8446_v33  ;;  %v12049_v44 = vld [vmem:[#allocation2 + $0x264] sm:$0xf0] }
  0x46   :  { %2621 = vmatpush.bf16.msra.mxu2 %v8151_v6  ;;  %v8374_v45 = vld [vmem:[#allocation2 + $0x2e0] sm:$0xf]  ;;  %v8511_v46 = vor.u32 %v12099_v38, %v8510_v37  ;;  %v12065_v47 = vld [vmem:[#allocation2 + $0x2e4] sm:$0xf0]  ;;  %v8311_v52 = vor.u32 %v12049_v44, %v8310_v43  ;;  %v8302_v53 = vld [vmem:[#allocation2 + $0x250] sm:$0xf] }
  0x47   :  { %2634 = vmatpush.bf16.msra.mxu3 %v8215_v10  ;;  %v8438_v48 = vld [vmem:[#allocation2 + $0x360] sm:$0xf]  ;;  %v12081_v49 = vld [vmem:[#allocation2 + $0x364] sm:$0xf0]  ;;  %v8375_v54 = vor.u32 %v12065_v47, %v8374_v45  ;;  %v12047_v56 = vld [vmem:[#allocation2 + $0x254] sm:$0xf0] }
  0x48   :  { %2596 = vmatpush.bf16.msra.mxu0 %v8015_v16  ;;  %v8502_v50 = vld [vmem:[#allocation2 + $0x3e0] sm:$0xf]  ;;  %v12097_v51 = vld [vmem:[#allocation2 + $0x3e4] sm:$0xf0]  ;;  %v8439_v55 = vor.u32 %v12081_v49, %v8438_v48  ;;  %v8366_v57 = vld [vmem:[#allocation2 + $0x2d0] sm:$0xf]  ;;  %v8303_v0 = vor.u32 %v12047_v56, %v8302_v53 }
  0x49   :  { %2609 = vmatpush.bf16.msra.mxu1 %v8079_v19  ;;  %v12063_v58 = vld [vmem:[#allocation2 + $0x2d4] sm:$0xf0]  ;;  %v8503_v59 = vor.u32 %v12097_v51, %v8502_v50  ;;  %v8430_v60 = vld [vmem:[#allocation2 + $0x350] sm:$0xf]  ;;  %v185_v2 = vld [vmem:[%s13742_s0 + $0x8] sm:$0xff] }
  0x4a   :  { %2622 = vmatpush.bf16.msra.mxu2 %v8143_v20  ;;  %v12079_v61 = vld [vmem:[#allocation2 + $0x354] sm:$0xf0]  ;;  %v8494_v62 = vld [vmem:[#allocation2 + $0x3d0] sm:$0xf]  ;;  %v8367_v1 = vor.u32 %v12063_v58, %v8366_v57  ;;  %v184_v3 = vld [vmem:[%s13742_s0] sm:$0xff]  ;;  %v600_v8 = vunpack.c.l.b16 %v185_v2  ;;  %v601_v10 = vunpack.c.h.b16 %v185_v2 }
  0x4b   :  { %2635 = vmatpush.bf16.msra.mxu3 %v8207_v24  ;;  %v12095_v63 = vld [vmem:[#allocation2 + $0x3d4] sm:$0xf0]  ;;  %v8431_v4 = vor.u32 %v12079_v61, %v8430_v60  ;;  %v8294_v5 = vld [vmem:[#allocation2 + $0x240] sm:$0xf]  ;;  %v12045_v6 = vld [vmem:[#allocation2 + $0x244] sm:$0xf0]  ;;  %v598_v9 = vunpack.c.l.b16 %v184_v3  ;;  %v599_v15 = vunpack.c.h.b16 %v184_v3 }
  0x4c   :  { %2597 = vmatpush.bf16.msra.mxu0 %v8007_v31  ;;  %v8358_v7 = vld [vmem:[#allocation2 + $0x2c0] sm:$0xf]  ;;  %v8495_v11 = vor.u32 %v12095_v63, %v8494_v62  ;;  %v12061_v12 = vld [vmem:[#allocation2 + $0x2c4] sm:$0xf0]  ;;  %v13352_v18 = vpack.c.b16 %v600_v8, %v600_v8  ;;  %v13356_v20 = vpack.c.b16 %v601_v10, %v601_v10  ;;  %v8295_v21 = vor.u32 %v12045_v6, %v8294_v5  ;;  %v8286_v25 = vld [vmem:[#allocation2 + $0x230] sm:$0xf] }
  0x4d   :  { %2610 = vmatpush.bf16.msra.mxu1 %v8071_v35  ;;  %v8422_v13 = vld [vmem:[#allocation2 + $0x340] sm:$0xf]  ;;  %v12077_v14 = vld [vmem:[#allocation2 + $0x344] sm:$0xf0]  ;;  %v13354_v19 = vpack.c.b16 %v598_v9, %v598_v9  ;;  %v13358_v22 = vpack.c.b16 %v599_v15, %v599_v15  ;;  %v8359_v23 = vor.u32 %v12061_v12, %v8358_v7  ;;  %v12043_v26 = vld [vmem:[#allocation2 + $0x234] sm:$0xf0] }
  0x4e   :  { %2623 = vmatpush.bf16.msra.mxu2 %v8135_v36  ;;  %v8486_v16 = vld [vmem:[#allocation2 + $0x3c0] sm:$0xf]  ;;  %v12093_v17 = vld [vmem:[#allocation2 + $0x3c4] sm:$0xf0]  ;;  %v8423_v24 = vor.u32 %v12077_v14, %v8422_v13  ;;  %v8350_v27 = vld [vmem:[#allocation2 + $0x2b0] sm:$0xf]  ;;  %v8287_v34 = vor.u32 %v12043_v26, %v8286_v25 }
  0x4f   :  { %2636 = vmatpush.bf16.msra.mxu3 %v8199_v39  ;;  %v8487_v28 = vor.u32 %v12093_v17, %v8486_v16  ;;  %v12059_v29 = vld [vmem:[#allocation2 + $0x2b4] sm:$0xf0]  ;;  %v8414_v30 = vld [vmem:[#allocation2 + $0x330] sm:$0xf]  ;;  %2598 = vmatmul.bf16.vlgmr.msra.gmra.mxu0 %v13354_v19  ;;  %v8278_v37 = vld [vmem:[#allocation2 + $0x220] sm:$0xf] }
  0x50   :  { %2642 = vmatpush.bf16.msrb.mxu0 %v8319_v40  ;;  %v12075_v31 = vld [vmem:[#allocation2 + $0x334] sm:$0xf0]  ;;  %v8478_v32 = vld [vmem:[#allocation2 + $0x3b0] sm:$0xf]  ;;  %2611 = vmatmul.bf16.vlgmr.msra.gmra.mxu1 %v13358_v22  ;;  %v8351_v35 = vor.u32 %v12059_v29, %v8350_v27  ;;  %v12041_v38 = vld [vmem:[#allocation2 + $0x224] sm:$0xf0] }
  0x51   :  { %2655 = vmatpush.bf16.msrb.mxu1 %v8383_v41  ;;  %2624 = vmatmul.bf16.vlgmr.msra.gmra.mxu2 %v13352_v18  ;;  %v12091_v33 = vld [vmem:[#allocation2 + $0x3b4] sm:$0xf0]  ;;  %v8415_v36 = vor.u32 %v12075_v31, %v8414_v30  ;;  %v8342_v39 = vld [vmem:[#allocation2 + $0x2a0] sm:$0xf]  ;;  %v12057_v41 = vld [vmem:[#allocation2 + $0x2a4] sm:$0xf0] }
  0x52   :  { %2668 = vmatpush.bf16.msrb.mxu2 %v8447_v42  ;;  %2637 = vmatmul.bf16.vlgmr.msra.gmra.mxu3 %v13356_v20  ;;  %v8479_v40 = vor.u32 %v12091_v33, %v8478_v32  ;;  %v8406_v42 = vld [vmem:[#allocation2 + $0x320] sm:$0xf]  ;;  %v12073_v43 = vld [vmem:[#allocation2 + $0x324] sm:$0xf0]  ;;  %v8343_v47 = vor.u32 %v12057_v41, %v8342_v39  ;;  %v8270_v49 = vld [vmem:[#allocation2 + $0x210] sm:$0xf] }
  0x53   :  { %2681 = vmatpush.bf16.msrb.mxu3 %v8511_v46  ;;  %v8470_v44 = vld [vmem:[#allocation2 + $0x3a0] sm:$0xf]  ;;  %v12089_v45 = vld [vmem:[#allocation2 + $0x3a4] sm:$0xf0]  ;;  %v8279_v46 = vor.u32 %v12041_v38, %v8278_v37  ;;  %v8407_v48 = vor.u32 %v12073_v43, %v8406_v42  ;;  %v12039_v50 = vld [vmem:[#allocation2 + $0x214] sm:$0xf0] }
  0x54   :  { %2643 = vmatpush.bf16.msrb.mxu0 %v8311_v52  ;;  %v8334_v51 = vld [vmem:[#allocation2 + $0x290] sm:$0xf]  ;;  %v8471_v52 = vor.u32 %v12089_v45, %v8470_v44  ;;  %v12055_v53 = vld [vmem:[#allocation2 + $0x294] sm:$0xf0]  ;;  %v8262_v58 = vld [vmem:[#allocation2 + $0x200] sm:$0xf] }
  0x55   :  { %2656 = vmatpush.bf16.msrb.mxu1 %v8375_v54  ;;  %v8398_v54 = vld [vmem:[#allocation2 + $0x310] sm:$0xf]  ;;  %v12087_v57 = vld [vmem:[#allocation2 + $0x394] sm:$0xf0]  ;;  %v12037_v60 = vld [vmem:[#allocation2 + $0x204] sm:$0xf0]  ;;  %v8335_v63 = vor.u32 %v12055_v53, %v8334_v51 }
  0x56   :  { %2669 = vmatpush.bf16.msrb.mxu2 %v8439_v55  ;;  %v12071_v55 = vld [vmem:[#allocation2 + $0x314] sm:$0xf0]  ;;  %v8462_v56 = vld [vmem:[#allocation2 + $0x390] sm:$0xf]  ;;  %v8326_v61 = vld [vmem:[#allocation2 + $0x280] sm:$0xf] }
  0x57   :  { %2682 = vmatpush.bf16.msrb.mxu3 %v8503_v59  ;;  %v8271_v59 = vor.u32 %v12039_v50, %v8270_v49  ;;  %v12053_v62 = vld [vmem:[#allocation2 + $0x284] sm:$0xf0]  ;;  %v187_v3 = vld [vmem:[%s13742_s0 + $0x18] sm:$0xff]  ;;  %v8454_v5 = vld [vmem:[#allocation2 + $0x380] sm:$0xf] }
  0x58   :  { %2644 = vmatpush.bf16.msrb.mxu0 %v8303_v0  ;;  %v8399_v0 = vor.u32 %v12071_v55, %v8398_v54  ;;  %v12069_v2 = vld [vmem:[#allocation2 + $0x304] sm:$0xf0]  ;;  %v186_v7 = vld [vmem:[%s13742_s0 + $0x10] sm:$0xff]  ;;  %v12115_v9 = vld [vmem:[#allocation2 + $0x474] sm:$0xf0]  ;;  %v604_v15 = vunpack.c.l.b16 %v187_v3  ;;  %v8327_v16 = vor.u32 %v12053_v62, %v8326_v61  ;;  %v605_v25 = vunpack.c.h.b16 %v187_v3 }
  0x59   :  { %2657 = vmatpush.bf16.msrb.mxu1 %v8367_v1  ;;  %v8390_v1 = vld [vmem:[#allocation2 + $0x300] sm:$0xf]  ;;  %v12085_v6 = vld [vmem:[#allocation2 + $0x384] sm:$0xf0]  ;;  %v8574_v8 = vld [vmem:[#allocation2 + $0x470] sm:$0xf] }
  0x5a   :  { %2670 = vmatpush.bf16.msrb.mxu2 %v8431_v4  ;;  %v8463_v4 = vor.u32 %v12087_v57, %v8462_v56  ;;  %v8638_v10 = vld [vmem:[#allocation2 + $0x4f0] sm:$0xf]  ;;  %v12131_v12 = vld [vmem:[#allocation2 + $0x4f4] sm:$0xf0]  ;;  %v8391_v17 = vor.u32 %v12069_v2, %v8390_v1  ;;  %v8455_v26 = vor.u32 %v12085_v6, %v8454_v5  ;;  %v8575_v27 = vor.u32 %v12115_v9, %v8574_v8  ;;  %v8566_v31 = vld [vmem:[#allocation2 + $0x460] sm:$0xf] }
  0x5b   :  { %2683 = vmatpush.bf16.msrb.mxu3 %v8495_v11  ;;  %v8263_v11 = vor.u32 %v12037_v60, %v8262_v58  ;;  %v8702_v13 = vld [vmem:[#allocation2 + $0x570] sm:$0xf]  ;;  %v12147_v14 = vld [vmem:[#allocation2 + $0x574] sm:$0xf0]  ;;  %v8639_v29 = vor.u32 %v12131_v12, %v8638_v10  ;;  %v12113_v32 = vld [vmem:[#allocation2 + $0x464] sm:$0xf0]  ;;  %v13370_v38 = vpack.c.b16 %v604_v15, %v604_v15  ;;  %v13374_v42 = vpack.c.b16 %v605_v25, %v605_v25 }
  0x5c   :  { %2645 = vmatpush.bf16.msrb.mxu0 %v8295_v21  ;;  %v8766_v21 = vld [vmem:[#allocation2 + $0x5f0] sm:$0xf]  ;;  %v8703_v30 = vor.u32 %v12147_v14, %v8702_v13  ;;  %v8630_v33 = vld [vmem:[#allocation2 + $0x4e0] sm:$0xf]  ;;  %v12145_v37 = vld [vmem:[#allocation2 + $0x564] sm:$0xf0]  ;;  %v8567_v43 = vor.u32 %v12113_v32, %v8566_v31 }
  0x5d   :  { %2658 = vmatpush.bf16.msrb.mxu1 %v8359_v23  ;;  %v12163_v23 = vld [vmem:[#allocation2 + $0x5f4] sm:$0xf0]  ;;  %v8758_v39 = vld [vmem:[#allocation2 + $0x5e0] sm:$0xf]  ;;  %v8622_v49 = vld [vmem:[#allocation2 + $0x4d0] sm:$0xf] }
  0x5e   :  { %2671 = vmatpush.bf16.msrb.mxu2 %v8423_v24  ;;  %v602_v24 = vunpack.c.l.b16 %v186_v7  ;;  %v12127_v51 = vld [vmem:[#allocation2 + $0x4d4] sm:$0xf0]  ;;  %v8750_v54 = vld [vmem:[#allocation2 + $0x5d0] sm:$0xf]  ;;  %v12109_v60 = vld [vmem:[#allocation2 + $0x444] sm:$0xf0] }
  0x5f   :  { %2684 = vmatpush.bf16.msrb.mxu3 %v8487_v28  ;;  %v603_v28 = vunpack.c.h.b16 %v186_v7  ;;  %v12143_v53 = vld [vmem:[#allocation2 + $0x554] sm:$0xf0]  ;;  %v8623_v57 = vor.u32 %v12127_v51, %v8622_v49  ;;  %v8614_v61 = vld [vmem:[#allocation2 + $0x4c0] sm:$0xf]  ;;  %v12141_v1 = vld [vmem:[#allocation2 + $0x544] sm:$0xf0] }
  0x60   :  { %2646 = vmatpush.bf16.msrb.mxu0 %v8287_v34  ;;  %v8767_v34 = vor.u32 %v12163_v23, %v8766_v21  ;;  %v13372_v41 = vpack.c.b16 %v602_v24, %v602_v24  ;;  %v12159_v55 = vld [vmem:[#allocation2 + $0x5d4] sm:$0xf0]  ;;  %v8742_v2 = vld [vmem:[#allocation2 + $0x5c0] sm:$0xf]  ;;  %v12157_v3 = vld [vmem:[#allocation2 + $0x5c4] sm:$0xf0] }
  0x61   :  { %2659 = vmatpush.bf16.msrb.mxu1 %v8351_v35  ;;  %v12129_v35 = vld [vmem:[#allocation2 + $0x4e4] sm:$0xf0]  ;;  %v13376_v44 = vpack.c.b16 %v603_v28, %v603_v28  ;;  %v8751_v62 = vor.u32 %v12159_v55, %v8750_v54  ;;  %v8542_v7 = vld [vmem:[#allocation2 + $0x430] sm:$0xf]  ;;  %v12107_v8 = vld [vmem:[#allocation2 + $0x434] sm:$0xf0]  ;;  %v8743_v10 = vor.u32 %v12157_v3, %v8742_v2 }
  0x62   :  { %2672 = vmatpush.bf16.msrb.mxu2 %v8415_v36  ;;  %v8694_v36 = vld [vmem:[#allocation2 + $0x560] sm:$0xf]  ;;  %v8631_v45 = vor.u32 %v12129_v35, %v8630_v33  ;;  %v8606_v9 = vld [vmem:[#allocation2 + $0x4b0] sm:$0xf]  ;;  %v12139_v13 = vld [vmem:[#allocation2 + $0x534] sm:$0xf0] }
  0x63   :  { %2685 = vmatpush.bf16.msrb.mxu3 %v8479_v40  ;;  %v12161_v40 = vld [vmem:[#allocation2 + $0x5e4] sm:$0xf0]  ;;  %v8670_v12 = vld [vmem:[#allocation2 + $0x530] sm:$0xf]  ;;  %v12155_v15 = vld [vmem:[#allocation2 + $0x5b4] sm:$0xf0] }
  0x64   :  { %2647 = vmatpush.bf16.msrb.mxu0 %v8279_v46  ;;  %v8695_v46 = vor.u32 %v12145_v37, %v8694_v36  ;;  %v8759_v50 = vor.u32 %v12161_v40, %v8758_v39  ;;  %v8734_v14 = vld [vmem:[#allocation2 + $0x5b0] sm:$0xf]  ;;  %v8671_v21 = vor.u32 %v12139_v13, %v8670_v12  ;;  %v8534_v23 = vld [vmem:[#allocation2 + $0x420] sm:$0xf]  ;;  %v12105_v24 = vld [vmem:[#allocation2 + $0x424] sm:$0xf0] }
  0x65   :  { %2660 = vmatpush.bf16.msrb.mxu1 %v8343_v47  ;;  %v8558_v47 = vld [vmem:[#allocation2 + $0x450] sm:$0xf]  ;;  %v8598_v25 = vld [vmem:[#allocation2 + $0x4a0] sm:$0xf]  ;;  %v12153_v31 = vld [vmem:[#allocation2 + $0x5a4] sm:$0xf0]  ;;  %v8535_v32 = vor.u32 %v12105_v24, %v8534_v23 }
  0x66   :  { %2673 = vmatpush.bf16.msrb.mxu2 %v8407_v48  ;;  %v12111_v48 = vld [vmem:[#allocation2 + $0x454] sm:$0xf0]  ;;  %v8662_v28 = vld [vmem:[#allocation2 + $0x520] sm:$0xf]  ;;  %v8526_v33 = vld [vmem:[#allocation2 + $0x410] sm:$0xf] }
  0x67   :  { %2686 = vmatpush.bf16.msrb.mxu3 %v8471_v52  ;;  %v8686_v52 = vld [vmem:[#allocation2 + $0x550] sm:$0xf]  ;;  %v8559_v56 = vor.u32 %v12111_v48, %v8558_v47  ;;  %v12103_v36 = vld [vmem:[#allocation2 + $0x414] sm:$0xf0]  ;;  %v8518_v48 = vld [vmem:[#allocation2 + $0x400] sm:$0xf] }
  0x68   :  { %2648 = vmatpush.bf16.msrb.mxu0 %v8271_v59  ;;  %v8687_v58 = vor.u32 %v12143_v53, %v8686_v52  ;;  %v8550_v59 = vld [vmem:[#allocation2 + $0x440] sm:$0xf]  ;;  %v8590_v37 = vld [vmem:[#allocation2 + $0x490] sm:$0xf]  ;;  %v12119_v39 = vld [vmem:[#allocation2 + $0x494] sm:$0xf0]  ;;  %v8527_v49 = vor.u32 %v12103_v36, %v8526_v33 }
  0x69   :  { %2661 = vmatpush.bf16.msrb.mxu1 %v8335_v63  ;;  %v12125_v63 = vld [vmem:[#allocation2 + $0x4c4] sm:$0xf0]  ;;  %v12151_v47 = vld [vmem:[#allocation2 + $0x594] sm:$0xf0]  ;;  %v8582_v51 = vld [vmem:[#allocation2 + $0x480] sm:$0xf]  ;;  %v8591_v53 = vor.u32 %v12119_v39, %v8590_v37 }
  0x6a   :  { %2674 = vmatpush.bf16.msrb.mxu2 %v8399_v0  ;;  %v8678_v0 = vld [vmem:[#allocation2 + $0x540] sm:$0xf]  ;;  %v8615_v5 = vor.u32 %v12125_v63, %v8614_v61  ;;  %v12117_v52 = vld [vmem:[#allocation2 + $0x484] sm:$0xf0]  ;;  %v12179_v63 = vld [vmem:[#allocation2 + $0x674] sm:$0xf0] }
  0x6b   :  { %2687 = vmatpush.bf16.msrb.mxu3 %v8463_v4  ;;  %v8551_v4 = vor.u32 %v12109_v60, %v8550_v59  ;;  %v8679_v6 = vor.u32 %v12141_v1, %v8678_v0  ;;  %v8646_v55 = vld [vmem:[#allocation2 + $0x500] sm:$0xf]  ;;  %v12149_v60 = vld [vmem:[#allocation2 + $0x584] sm:$0xf0]  ;;  %v8894_v0 = vld [vmem:[#allocation2 + $0x6f0] sm:$0xf] }
  0x6c   :  { %2649 = vmatpush.bf16.msrb.mxu0 %v8263_v11  ;;  %v12123_v11 = vld [vmem:[#allocation2 + $0x4b4] sm:$0xf0]  ;;  %v8710_v59 = vld [vmem:[#allocation2 + $0x580] sm:$0xf]  ;;  %v189_v61 = vld [vmem:[%s13742_s0 + $0x28] sm:$0xff] }
  0x6d   :  { %2662 = vmatpush.bf16.msrb.mxu1 %v8327_v16  ;;  %v8543_v16 = vor.u32 %v12107_v8, %v8542_v7  ;;  %v12195_v2 = vld [vmem:[#allocation2 + $0x6f4] sm:$0xf0]  ;;  %v8958_v3 = vld [vmem:[#allocation2 + $0x770] sm:$0xf]  ;;  %v8711_v12 = vor.u32 %v12149_v60, %v8710_v59  ;;  %v8886_v23 = vld [vmem:[#allocation2 + $0x6e0] sm:$0xf] }
  0x6e   :  { %2675 = vmatpush.bf16.msrb.mxu2 %v8391_v17  ;;  %v8607_v17 = vor.u32 %v12123_v11, %v8606_v9  ;;  %v9022_v8 = vld [vmem:[#allocation2 + $0x7f0] sm:$0xf]  ;;  %v12227_v9 = vld [vmem:[#allocation2 + $0x7f4] sm:$0xf0]  ;;  %v12205_v59 = vld [vmem:[#allocation2 + $0x744] sm:$0xf0] }
  0x6f   :  { %2688 = vmatpush.bf16.msrb.mxu3 %v8455_v26  ;;  %2650 = vmatmul.bf16.vlgmr.msrb.gmra.mxu0 %v13372_v41  ;;  %v8735_v26 = vor.u32 %v12155_v15, %v8734_v14  ;;  %v609_v14 = vunpack.c.h.b16 %v189_v61  ;;  %v8895_v15 = vor.u32 %v12195_v2, %v8894_v0  ;;  %v9023_v24 = vor.u32 %v12227_v9, %v9022_v8  ;;  %v8814_v37 = vld [vmem:[#allocation2 + $0x650] sm:$0xf]  ;;  %v12175_v39 = vld [vmem:[#allocation2 + $0x654] sm:$0xf0]  ;;  %v8998_v60 = vld [vmem:[#allocation2 + $0x7c0] sm:$0xf] }
  0x70   :  { %2694 = vmatpush.bf16.msra.mxu0 %v8575_v27  ;;  %2663 = vmatmul.bf16.vlgmr.msrb.gmra.mxu1 %v13376_v44  ;;  %v12121_v27 = vld [vmem:[#allocation2 + $0x4a4] sm:$0xf0]  ;;  %v12171_v2 = vld [vmem:[#allocation2 + $0x634] sm:$0xf0]  ;;  %v8990_v8 = vld [vmem:[#allocation2 + $0x7b0] sm:$0xf] }
  0x71   :  { %2707 = vmatpush.bf16.msra.mxu1 %v8639_v29  ;;  %2676 = vmatmul.bf16.vlgmr.msrb.gmra.mxu2 %v13370_v38  ;;  %v12137_v29 = vld [vmem:[#allocation2 + $0x524] sm:$0xf0]  ;;  %v13394_v33 = vpack.c.b16 %v609_v14, %v609_v14  ;;  %v12219_v9 = vld [vmem:[#allocation2 + $0x7b4] sm:$0xf0] }
  0x72   :  { %2720 = vmatpush.bf16.msra.mxu2 %v8703_v30  ;;  %2689 = vmatmul.bf16.vlgmr.msrb.gmra.mxu3 %v13374_v42  ;;  %v8726_v30 = vld [vmem:[#allocation2 + $0x5a0] sm:$0xf]  ;;  %v8663_v35 = vor.u32 %v12137_v29, %v8662_v28  ;;  %v12209_v28 = vld [vmem:[#allocation2 + $0x764] sm:$0xf0] }
  0x73   :  { %2733 = vmatpush.bf16.msra.mxu3 %v8767_v34  ;;  %v8599_v34 = vor.u32 %v12121_v27, %v8598_v25  ;;  %v8727_v40 = vor.u32 %v12153_v31, %v8726_v30  ;;  %v8950_v27 = vld [vmem:[#allocation2 + $0x760] sm:$0xf]  ;;  %v12169_v14 = vld [vmem:[#allocation2 + $0x624] sm:$0xf0] }
  0x74   :  { %2695 = vmatpush.bf16.msra.mxu0 %v8567_v43  ;;  %v8654_v43 = vld [vmem:[#allocation2 + $0x510] sm:$0xf]  ;;  %v9014_v31 = vld [vmem:[#allocation2 + $0x7e0] sm:$0xf]  ;;  %v8951_v36 = vor.u32 %v12209_v28, %v8950_v27 }
  0x75   :  { %2708 = vmatpush.bf16.msra.mxu1 %v8631_v45  ;;  %v12135_v45 = vld [vmem:[#allocation2 + $0x514] sm:$0xf0] }
  0x76   :  { %2721 = vmatpush.bf16.msra.mxu2 %v8695_v46  ;;  %v8718_v46 = vld [vmem:[#allocation2 + $0x590] sm:$0xf]  ;;  %v8655_v54 = vor.u32 %v12135_v45, %v8654_v43  ;;  %v12191_v45 = vld [vmem:[#allocation2 + $0x6d4] sm:$0xf0] }
  0x77   :  { %2734 = vmatpush.bf16.msra.mxu3 %v8759_v50  ;;  %v12101_v50 = vld [vmem:[#allocation2 + $0x404] sm:$0xf0] }
  0x78   :  { %2696 = vmatpush.bf16.msra.mxu0 %v8559_v56  ;;  %v12133_v56 = vld [vmem:[#allocation2 + $0x504] sm:$0xf0]  ;;  %v8519_v1 = vor.u32 %v12101_v50, %v8518_v48  ;;  %v9006_v48 = vld [vmem:[#allocation2 + $0x7d0] sm:$0xf]  ;;  %v8815_v50 = vor.u32 %v12175_v39, %v8814_v37  ;;  %v12183_v37 = vld [vmem:[#allocation2 + $0x694] sm:$0xf0] }
  0x79   :  { %2709 = vmatpush.bf16.msra.mxu1 %v8623_v57  ;;  %v188_v57 = vld [vmem:[%s13742_s0 + $0x20] sm:$0xff]  ;;  %v8647_v7 = vor.u32 %v12133_v56, %v8646_v55  ;;  %v8910_v39 = vld [vmem:[#allocation2 + $0x710] sm:$0xf] }
  0x7a   :  { %2722 = vmatpush.bf16.msra.mxu2 %v8687_v58  ;;  %v8719_v58 = vor.u32 %v12151_v47, %v8718_v46  ;;  %v607_v11 = vunpack.c.h.b16 %v188_v57  ;;  %v8942_v46 = vld [vmem:[#allocation2 + $0x750] sm:$0xf]  ;;  %v12207_v47 = vld [vmem:[#allocation2 + $0x754] sm:$0xf0]  ;;  %v8870_v55 = vld [vmem:[#allocation2 + $0x6c0] sm:$0xf] }
  0x7b   :  { %2735 = vmatpush.bf16.msra.mxu3 %v8751_v62  ;;  %v8830_v62 = vld [vmem:[#allocation2 + $0x670] sm:$0xf] }
  0x7c   :  { %2697 = vmatpush.bf16.msra.mxu0 %v8551_v4  ;;  %v12211_v4 = vld [vmem:[#allocation2 + $0x774] sm:$0xf0]  ;;  %v8831_v13 = vor.u32 %v12179_v63, %v8830_v62  ;;  %v13392_v30 = vpack.c.b16 %v607_v11, %v607_v11 }
  0x7d   :  { %2710 = vmatpush.bf16.msra.mxu1 %v8615_v5  ;;  %v606_v5 = vunpack.c.l.b16 %v188_v57  ;;  %v12189_v57 = vld [vmem:[#allocation2 + $0x6c4] sm:$0xf0] }
  0x7e   :  { %2723 = vmatpush.bf16.msra.mxu2 %v8679_v6  ;;  %v8583_v6 = vor.u32 %v12117_v52, %v8582_v51  ;;  %v8943_v52 = vor.u32 %v12207_v47, %v8942_v46  ;;  %v8871_v63 = vor.u32 %v12189_v57, %v8870_v55  ;;  %v8774_v46 = vld [vmem:[#allocation2 + $0x600] sm:$0xf]  ;;  %v190_v55 = vld [vmem:[%s13742_s0 + $0x30] sm:$0xff] }
  0x7f   :  { %2736 = vmatpush.bf16.msra.mxu3 %v8743_v10  ;;  %v608_v10 = vunpack.c.l.b16 %v189_v61  ;;  %v13388_v25 = vpack.c.b16 %v606_v5, %v606_v5  ;;  %v12221_v61 = vld [vmem:[#allocation2 + $0x7c4] sm:$0xf0]  ;;  %v12187_v5 = vld [vmem:[#allocation2 + $0x6b4] sm:$0xf0]  ;;  %v8966_v57 = vld [vmem:[#allocation2 + $0x780] sm:$0xf] }
  0x80   :  { %2698 = vmatpush.bf16.msra.mxu0 %v8543_v16  ;;  %v8959_v16 = vor.u32 %v12211_v4, %v8958_v3  ;;  %v8862_v3 = vld [vmem:[#allocation2 + $0x6b0] sm:$0xf]  ;;  %v8999_v4 = vor.u32 %v12221_v61, %v8998_v60  ;;  %v12243_v61 = vld [vmem:[#allocation2 + $0x874] sm:$0xf0] }
  0x81   :  { %2711 = vmatpush.bf16.msra.mxu1 %v8607_v17  ;;  %v8822_v17 = vld [vmem:[#allocation2 + $0x660] sm:$0xf]  ;;  %v13390_v29 = vpack.c.b16 %v608_v10, %v608_v10  ;;  %v8863_v11 = vor.u32 %v12187_v5, %v8862_v3  ;;  %v9086_v60 = vld [vmem:[#allocation2 + $0x870] sm:$0xf]  ;;  %v610_v3 = vunpack.c.l.b16 %v190_v55 }
  0x82   :  { %2724 = vmatpush.bf16.msra.mxu2 %v8671_v21  ;;  %v12177_v21 = vld [vmem:[#allocation2 + $0x664] sm:$0xf0] }
  0x83   :  { %2737 = vmatpush.bf16.msra.mxu3 %v8735_v26  ;;  %v12193_v26 = vld [vmem:[#allocation2 + $0x6e4] sm:$0xf0] }
  0x84   :  { %2699 = vmatpush.bf16.msra.mxu0 %v8535_v32  ;;  %v12225_v32 = vld [vmem:[#allocation2 + $0x7e4] sm:$0xf0] }
  0x85   :  { %2712 = vmatpush.bf16.msra.mxu1 %v8599_v34  ;;  %v8823_v34 = vor.u32 %v12177_v21, %v8822_v17  ;;  %v9015_v43 = vor.u32 %v12225_v32, %v9014_v31  ;;  %v12185_v17 = vld [vmem:[#allocation2 + $0x6a4] sm:$0xf0]  ;;  %v8918_v21 = vld [vmem:[#allocation2 + $0x720] sm:$0xf]  ;;  %v8782_v32 = vld [vmem:[#allocation2 + $0x610] sm:$0xf] }
  0x86   :  { %2725 = vmatpush.bf16.msra.mxu2 %v8663_v35  ;;  %v8887_v35 = vor.u32 %v12193_v26, %v8886_v23  ;;  %v12201_v23 = vld [vmem:[#allocation2 + $0x724] sm:$0xf0] }
  0x87   :  { %2738 = vmatpush.bf16.msra.mxu3 %v8727_v40  ;;  %v8878_v40 = vld [vmem:[#allocation2 + $0x6d0] sm:$0xf]  ;;  %v12217_v26 = vld [vmem:[#allocation2 + $0x7a4] sm:$0xf0]  ;;  %v8919_v31 = vor.u32 %v12201_v23, %v8918_v21  ;;  %v13406_v23 = vpack.c.b16 %v610_v3, %v610_v3 }
  0x88   :  { %2700 = vmatpush.bf16.msra.mxu0 %v8527_v49  ;;  %v12223_v49 = vld [vmem:[#allocation2 + $0x7d4] sm:$0xf0]  ;;  %v8879_v51 = vor.u32 %v12191_v45, %v8878_v40  ;;  %v9054_v3 = vld [vmem:[#allocation2 + $0x830] sm:$0xf] }
  0x89   :  { %2713 = vmatpush.bf16.msra.mxu1 %v8591_v53  ;;  %v8806_v53 = vld [vmem:[#allocation2 + $0x640] sm:$0xf]  ;;  %v9007_v56 = vor.u32 %v12223_v49, %v9006_v48  ;;  %v12199_v40 = vld [vmem:[#allocation2 + $0x714] sm:$0xf0]  ;;  %v12165_v48 = vld [vmem:[#allocation2 + $0x604] sm:$0xf0] }
  0x8a   :  { %2726 = vmatpush.bf16.msra.mxu2 %v8655_v54  ;;  %v12173_v54 = vld [vmem:[#allocation2 + $0x644] sm:$0xf0]  ;;  %v12215_v45 = vld [vmem:[#allocation2 + $0x794] sm:$0xf0]  ;;  %v8838_v49 = vld [vmem:[#allocation2 + $0x680] sm:$0xf] }
  0x8b   :  { %2739 = vmatpush.bf16.msra.mxu3 %v8719_v58  ;;  %v8934_v58 = vld [vmem:[#allocation2 + $0x740] sm:$0xf]  ;;  %v8807_v62 = vor.u32 %v12173_v54, %v8806_v53  ;;  %v12197_v54 = vld [vmem:[#allocation2 + $0x704] sm:$0xf0] }
  0x8c   :  { %2701 = vmatpush.bf16.msra.mxu0 %v8519_v1  ;;  %v8935_v0 = vor.u32 %v12205_v59, %v8934_v58  ;;  %v8798_v1 = vld [vmem:[#allocation2 + $0x630] sm:$0xf]  ;;  %v8902_v53 = vld [vmem:[#allocation2 + $0x700] sm:$0xf]  ;;  %v12213_v58 = vld [vmem:[#allocation2 + $0x784] sm:$0xf0] }
  0x8d   :  { %2714 = vmatpush.bf16.msra.mxu1 %v8583_v6  ;;  %v8926_v6 = vld [vmem:[#allocation2 + $0x730] sm:$0xf]  ;;  %v8799_v10 = vor.u32 %v12171_v2, %v8798_v1  ;;  %v191_v59 = vld [vmem:[%s13742_s0 + $0x38] sm:$0xff]  ;;  %v8903_v5 = vor.u32 %v12197_v54, %v8902_v53 }
  0x8e   :  { %2727 = vmatpush.bf16.msra.mxu2 %v8647_v7  ;;  %v12203_v7 = vld [vmem:[#allocation2 + $0x734] sm:$0xf0]  ;;  %v9214_v1 = vld [vmem:[#allocation2 + $0x970] sm:$0xf] }
  0x8f   :  { %2740 = vmatpush.bf16.msra.mxu3 %v8711_v12  ;;  %2702 = vmatmul.bf16.vlgmr.msra.gmra.mxu0 %v13388_v25  ;;  %v8927_v12 = vor.u32 %v12203_v7, %v8926_v6  ;;  %v12275_v2 = vld [vmem:[#allocation2 + $0x974] sm:$0xf0]  ;;  %v9278_v6 = vld [vmem:[#allocation2 + $0x9f0] sm:$0xf] }
  0x90   :  { %2746 = vmatpush.bf16.msrb.mxu0 %v8831_v13  ;;  %2715 = vmatmul.bf16.vlgmr.msra.gmra.mxu1 %v13392_v30  ;;  %v8790_v13 = vld [vmem:[#allocation2 + $0x620] sm:$0xf]  ;;  %v12291_v7 = vld [vmem:[#allocation2 + $0x9f4] sm:$0xf0] }
  0x91   :  { %2759 = vmatpush.bf16.msrb.mxu1 %v8895_v15  ;;  %2728 = vmatmul.bf16.vlgmr.msra.gmra.mxu2 %v13390_v29  ;;  %v8854_v15 = vld [vmem:[#allocation2 + $0x6a0] sm:$0xf]  ;;  %v8791_v27 = vor.u32 %v12169_v14, %v8790_v13  ;;  %v9215_v14 = vor.u32 %v12275_v2, %v9214_v1  ;;  %v9279_v21 = vor.u32 %v12291_v7, %v9278_v6  ;;  %v12251_v7 = vld [vmem:[#allocation2 + $0x8b4] sm:$0xf0] }
  0x92   :  { %2772 = vmatpush.bf16.msrb.mxu2 %v8959_v16  ;;  %2741 = vmatmul.bf16.vlgmr.msra.gmra.mxu3 %v13394_v33  ;;  %v8991_v16 = vor.u32 %v12219_v9, %v8990_v8  ;;  %v8855_v28 = vor.u32 %v12185_v17, %v8854_v15  ;;  %v612_v8 = vunpack.c.l.b16 %v191_v59  ;;  %v611_v9 = vunpack.c.h.b16 %v190_v55  ;;  %v9078_v15 = vld [vmem:[#allocation2 + $0x860] sm:$0xf] }
  0x93   :  { %2785 = vmatpush.bf16.msrb.mxu3 %v9023_v24  ;;  %v8982_v24 = vld [vmem:[#allocation2 + $0x7a0] sm:$0xf] }
  0x94   :  { %2747 = vmatpush.bf16.msrb.mxu0 %v8823_v34  ;;  %v12167_v34 = vld [vmem:[#allocation2 + $0x614] sm:$0xf0]  ;;  %v9142_v17 = vld [vmem:[#allocation2 + $0x8e0] sm:$0xf] }
  0x95   :  { %2760 = vmatpush.bf16.msrb.mxu1 %v8887_v35  ;;  %v8846_v35 = vld [vmem:[#allocation2 + $0x690] sm:$0xf]  ;;  %v8783_v47 = vor.u32 %v12167_v34, %v8782_v32  ;;  %v9270_v32 = vld [vmem:[#allocation2 + $0x9e0] sm:$0xf]  ;;  %v12289_v34 = vld [vmem:[#allocation2 + $0x9e4] sm:$0xf0] }
  0x96   :  { %2773 = vmatpush.bf16.msrb.mxu2 %v8951_v36  ;;  %v8983_v36 = vor.u32 %v12217_v26, %v8982_v24  ;;  %v12257_v24 = vld [vmem:[#allocation2 + $0x8e4] sm:$0xf0]  ;;  %v9206_v26 = vld [vmem:[#allocation2 + $0x960] sm:$0xf] }
  0x97   :  { %2786 = vmatpush.bf16.msrb.mxu3 %v9015_v43  ;;  %v8974_v43 = vld [vmem:[#allocation2 + $0x790] sm:$0xf]  ;;  %v9062_v55 = vld [vmem:[#allocation2 + $0x840] sm:$0xf] }
  0x98   :  { %2748 = vmatpush.bf16.msrb.mxu0 %v8815_v50  ;;  %v12181_v50 = vld [vmem:[#allocation2 + $0x684] sm:$0xf0] }
  0x99   :  { %2761 = vmatpush.bf16.msrb.mxu1 %v8879_v51  ;;  %v8847_v51 = vor.u32 %v12183_v37, %v8846_v35  ;;  %v9143_v37 = vor.u32 %v12257_v24, %v9142_v17  ;;  %v9110_v17 = vld [vmem:[#allocation2 + $0x8a0] sm:$0xf]  ;;  %v12249_v24 = vld [vmem:[#allocation2 + $0x8a4] sm:$0xf0] }
  0x9a   :  { %2774 = vmatpush.bf16.msrb.mxu2 %v8943_v52  ;;  %v8911_v52 = vor.u32 %v12199_v40, %v8910_v39  ;;  %v9070_v40 = vld [vmem:[#allocation2 + $0x850] sm:$0xf] }
  0x9b   :  { %2787 = vmatpush.bf16.msrb.mxu3 %v9007_v56  ;;  %v8975_v56 = vor.u32 %v12215_v45, %v8974_v43  ;;  %v12239_v43 = vld [vmem:[#allocation2 + $0x854] sm:$0xf0]  ;;  %v9134_v45 = vld [vmem:[#allocation2 + $0x8d0] sm:$0xf] }
  0x9c   :  { %2749 = vmatpush.bf16.msrb.mxu0 %v8807_v62  ;;  %v9150_v62 = vld [vmem:[#allocation2 + $0x8f0] sm:$0xf] }
  0x9d   :  { %2762 = vmatpush.bf16.msrb.mxu1 %v8871_v63  ;;  %v8775_v63 = vor.u32 %v12165_v48, %v8774_v46  ;;  %v9271_v46 = vor.u32 %v12289_v34, %v9270_v32  ;;  %v9198_v48 = vld [vmem:[#allocation2 + $0x950] sm:$0xf]  ;;  %v9238_v32 = vld [vmem:[#allocation2 + $0x9a0] sm:$0xf]  ;;  %v12281_v34 = vld [vmem:[#allocation2 + $0x9a4] sm:$0xf0] }
  0x9e   :  { %2775 = vmatpush.bf16.msrb.mxu2 %v8935_v0  ;;  %v12259_v0 = vld [vmem:[#allocation2 + $0x8f4] sm:$0xf0] }
  0x9f   :  { %2788 = vmatpush.bf16.msrb.mxu3 %v8999_v4  ;;  %v8839_v4 = vor.u32 %v12181_v50, %v8838_v49  ;;  %v9151_v13 = vor.u32 %v12259_v0, %v9150_v62  ;;  %v12271_v49 = vld [vmem:[#allocation2 + $0x954] sm:$0xf0]  ;;  %v9262_v50 = vld [vmem:[#allocation2 + $0x9d0] sm:$0xf]  ;;  %v9254_v62 = vld [vmem:[#allocation2 + $0x9c0] sm:$0xf] }
  0xa0   :  { %2750 = vmatpush.bf16.msrb.mxu0 %v8799_v10  ;;  %v8967_v10 = vor.u32 %v12213_v58, %v8966_v57  ;;  %v9199_v54 = vor.u32 %v12271_v49, %v9198_v48  ;;  %v9126_v57 = vld [vmem:[#allocation2 + $0x8c0] sm:$0xf]  ;;  %v9166_v48 = vld [vmem:[#allocation2 + $0x910] sm:$0xf]  ;;  %v12263_v49 = vld [vmem:[#allocation2 + $0x914] sm:$0xf0] }
  0xa1   :  { %2763 = vmatpush.bf16.msrb.mxu1 %v8863_v11  ;;  %v9087_v11 = vor.u32 %v12243_v61, %v9086_v60  ;;  %v9190_v60 = vld [vmem:[#allocation2 + $0x940] sm:$0xf]  ;;  %v12269_v61 = vld [vmem:[#allocation2 + $0x944] sm:$0xf0] }
  0xa2   :  { %2776 = vmatpush.bf16.msrb.mxu2 %v8927_v12  ;;  %v613_v12 = vunpack.c.h.b16 %v191_v59  ;;  %v12253_v59 = vld [vmem:[#allocation2 + $0x8c4] sm:$0xf0]  ;;  %v9191_v2 = vor.u32 %v12269_v61, %v9190_v60  ;;  %v192_v61 = vld [vmem:[%s13742_s0 + $0x40] sm:$0xff] }
  0xa3   :  { %2789 = vmatpush.bf16.msrb.mxu3 %v8991_v16  ;;  %v12241_v16 = vld [vmem:[#allocation2 + $0x864] sm:$0xf0]  ;;  %v9127_v1 = vor.u32 %v12253_v59, %v9126_v57  ;;  %v9158_v59 = vld [vmem:[#allocation2 + $0x900] sm:$0xf] }
  0xa4   :  { %2751 = vmatpush.bf16.msrb.mxu0 %v8791_v27  ;;  %v12273_v27 = vld [vmem:[#allocation2 + $0x964] sm:$0xf0]  ;;  %v13412_v35 = vpack.c.b16 %v613_v12, %v613_v12 }
  0xa5   :  { %2764 = vmatpush.bf16.msrb.mxu1 %v8855_v28  ;;  %v13408_v28 = vpack.c.b16 %v612_v8, %v612_v8  ;;  %v9207_v39 = vor.u32 %v12273_v27, %v9206_v26  ;;  %v9182_v8 = vld [vmem:[#allocation2 + $0x930] sm:$0xf]  ;;  %v9174_v26 = vld [vmem:[#allocation2 + $0x920] sm:$0xf]  ;;  %v12265_v27 = vld [vmem:[#allocation2 + $0x924] sm:$0xf0] }
  0xa6   :  { %2777 = vmatpush.bf16.msrb.mxu2 %v8919_v31  ;;  %v13410_v31 = vpack.c.b16 %v611_v9, %v611_v9  ;;  %v12267_v9 = vld [vmem:[#allocation2 + $0x934] sm:$0xf0]  ;;  %v12261_v60 = vld [vmem:[#allocation2 + $0x904] sm:$0xf0] }
  0xa7   :  { %2790 = vmatpush.bf16.msrb.mxu3 %v8983_v36  ;;  %v9079_v36 = vor.u32 %v12241_v16, %v9078_v15  ;;  %v9046_v15 = vld [vmem:[#allocation2 + $0x820] sm:$0xf]  ;;  %v12233_v16 = vld [vmem:[#allocation2 + $0x824] sm:$0xf0] }
  0xa8   :  { %2752 = vmatpush.bf16.msrb.mxu0 %v8783_v47  ;;  %v12255_v47 = vld [vmem:[#allocation2 + $0x8d4] sm:$0xf0] }
  0xa9   :  { %2765 = vmatpush.bf16.msrb.mxu1 %v8847_v51  ;;  %v12287_v51 = vld [vmem:[#allocation2 + $0x9d4] sm:$0xf0]  ;;  %v9135_v53 = vor.u32 %v12255_v47, %v9134_v45  ;;  %v9102_v45 = vld [vmem:[#allocation2 + $0x890] sm:$0xf] }
  0xaa   :  { %2778 = vmatpush.bf16.msrb.mxu2 %v8911_v52  ;;  %v9071_v52 = vor.u32 %v12239_v43, %v9070_v40  ;;  %v9263_v58 = vor.u32 %v12287_v51, %v9262_v50  ;;  %v9038_v40 = vld [vmem:[#allocation2 + $0x810] sm:$0xf]  ;;  %v12231_v43 = vld [vmem:[#allocation2 + $0x814] sm:$0xf0] }
  0xab   :  { %2791 = vmatpush.bf16.msrb.mxu3 %v8975_v56  ;;  %v12237_v56 = vld [vmem:[#allocation2 + $0x844] sm:$0xf0]  ;;  %v12247_v47 = vld [vmem:[#allocation2 + $0x894] sm:$0xf0]  ;;  %v9230_v50 = vld [vmem:[#allocation2 + $0x990] sm:$0xf] }
  0xac   :  { %2753 = vmatpush.bf16.msrb.mxu0 %v8775_v63  ;;  %v12285_v63 = vld [vmem:[#allocation2 + $0x9c4] sm:$0xf0]  ;;  %v9063_v0 = vor.u32 %v12237_v56, %v9062_v55  ;;  %v12279_v51 = vld [vmem:[#allocation2 + $0x994] sm:$0xf0]  ;;  %v9094_v55 = vld [vmem:[#allocation2 + $0x880] sm:$0xf]  ;;  %v9103_v57 = vor.u32 %v12247_v47, %v9102_v45 }
  0xad   :  { %2766 = vmatpush.bf16.msrb.mxu1 %v8839_v4  ;;  %v12235_v4 = vld [vmem:[#allocation2 + $0x834] sm:$0xf0]  ;;  %v9255_v6 = vor.u32 %v12285_v63, %v9254_v62  ;;  %v12245_v56 = vld [vmem:[#allocation2 + $0x884] sm:$0xf0]  ;;  %v9231_v62 = vor.u32 %v12279_v51, %v9230_v50  ;;  %v9222_v63 = vld [vmem:[#allocation2 + $0x980] sm:$0xf] }
  0xae   :  { %2779 = vmatpush.bf16.msrb.mxu2 %v8903_v5  ;;  %v9118_v5 = vld [vmem:[#allocation2 + $0x8b0] sm:$0xf]  ;;  %v9055_v12 = vor.u32 %v12235_v4, %v9054_v3  ;;  %v12307_v3 = vld [vmem:[#allocation2 + $0xa74] sm:$0xf0]  ;;  %v9526_v47 = vld [vmem:[#allocation2 + $0xbe0] sm:$0xf] }
  0xaf   :  { %2792 = vmatpush.bf16.msrb.mxu3 %v8967_v10  ;;  %2754 = vmatmul.bf16.vlgmr.msrb.gmra.mxu0 %v13406_v23  ;;  %v9246_v10 = vld [vmem:[#allocation2 + $0x9b0] sm:$0xf] }
  0xb0   :  { %2798 = vmatpush.bf16.msra.mxu0 %v9087_v11  ;;  %2767 = vmatmul.bf16.vlgmr.msrb.gmra.mxu1 %v13410_v31  ;;  %v12283_v11 = vld [vmem:[#allocation2 + $0x9b4] sm:$0xf0]  ;;  %v9406_v4 = vld [vmem:[#allocation2 + $0xaf0] sm:$0xf] }
  0xb1   :  { %2811 = vmatpush.bf16.msra.mxu1 %v9151_v13  ;;  %2780 = vmatmul.bf16.vlgmr.msrb.gmra.mxu2 %v13408_v28  ;;  %v9119_v13 = vor.u32 %v12251_v7, %v9118_v5  ;;  %v9470_v7 = vld [vmem:[#allocation2 + $0xb70] sm:$0xf] }
  0xb2   :  { %2824 = vmatpush.bf16.msra.mxu2 %v9215_v14  ;;  %2793 = vmatmul.bf16.vlgmr.msrb.gmra.mxu3 %v13412_v35  ;;  %v9183_v14 = vor.u32 %v12267_v9, %v9182_v8  ;;  %v12339_v8 = vld [vmem:[#allocation2 + $0xb74] sm:$0xf0]  ;;  %v614_v9 = vunpack.c.l.b16 %v192_v61 }
  0xb3   :  { %2837 = vmatpush.bf16.msra.mxu3 %v9279_v21  ;;  %v9247_v21 = vor.u32 %v12283_v11, %v9246_v10  ;;  %v9095_v10 = vor.u32 %v12245_v56, %v9094_v55  ;;  %v9159_v11 = vor.u32 %v12261_v60, %v9158_v59  ;;  %v9390_v55 = vld [vmem:[#allocation2 + $0xad0] sm:$0xf]  ;;  %v12335_v59 = vld [vmem:[#allocation2 + $0xb54] sm:$0xf0] }
  0xb4   :  { %2799 = vmatpush.bf16.msra.mxu0 %v9079_v36  ;;  %v9047_v36 = vor.u32 %v12233_v16, %v9046_v15  ;;  %v615_v15 = vunpack.c.h.b16 %v192_v61  ;;  %v9518_v60 = vld [vmem:[#allocation2 + $0xbd0] sm:$0xf]  ;;  %v12351_v61 = vld [vmem:[#allocation2 + $0xbd4] sm:$0xf0] }
  0xb5   :  { %2812 = vmatpush.bf16.msra.mxu1 %v9143_v37  ;;  %v9111_v37 = vor.u32 %v12249_v24, %v9110_v17 }
  0xb6   :  { %2825 = vmatpush.bf16.msra.mxu2 %v9207_v39  ;;  %v9175_v39 = vor.u32 %v12265_v27, %v9174_v26  ;;  %v9471_v26 = vor.u32 %v12339_v8, %v9470_v7  ;;  %v9334_v27 = vld [vmem:[#allocation2 + $0xa60] sm:$0xf]  ;;  %v12333_v7 = vld [vmem:[#allocation2 + $0xb44] sm:$0xf0] }
  0xb7   :  { %2838 = vmatpush.bf16.msra.mxu3 %v9271_v46  ;;  %v9239_v46 = vor.u32 %v12281_v34, %v9238_v32  ;;  %v12305_v32 = vld [vmem:[#allocation2 + $0xa64] sm:$0xf0]  ;;  %v9398_v34 = vld [vmem:[#allocation2 + $0xae0] sm:$0xf] }
  0xb8   :  { %2800 = vmatpush.bf16.msra.mxu0 %v9071_v52  ;;  %v9030_v52 = vld [vmem:[#allocation2 + $0x800] sm:$0xf]  ;;  %v9335_v50 = vor.u32 %v12305_v32, %v9334_v27  ;;  %v9502_v27 = vld [vmem:[#allocation2 + $0xbb0] sm:$0xf]  ;;  %v12347_v32 = vld [vmem:[#allocation2 + $0xbb4] sm:$0xf0] }
  0xb9   :  { %2813 = vmatpush.bf16.msra.mxu1 %v9135_v53  ;;  %v9039_v53 = vor.u32 %v12231_v43, %v9038_v40  ;;  %v9462_v40 = vld [vmem:[#allocation2 + $0xb60] sm:$0xf]  ;;  %v12337_v43 = vld [vmem:[#allocation2 + $0xb64] sm:$0xf0] }
  0xba   :  { %2826 = vmatpush.bf16.msra.mxu2 %v9199_v54  ;;  %v12229_v54 = vld [vmem:[#allocation2 + $0x804] sm:$0xf0]  ;;  %v9510_v8 = vld [vmem:[#allocation2 + $0xbc0] sm:$0xf] }
  0xbb   :  { %2839 = vmatpush.bf16.msra.mxu3 %v9263_v58  ;;  %v9167_v58 = vor.u32 %v12263_v49, %v9166_v48  ;;  %v9031_v5 = vor.u32 %v12229_v54, %v9030_v52  ;;  %v12353_v48 = vld [vmem:[#allocation2 + $0xbe4] sm:$0xf0]  ;;  %v9463_v52 = vor.u32 %v12337_v43, %v9462_v40  ;;  %v12303_v54 = vld [vmem:[#allocation2 + $0xa54] sm:$0xf0] }
  0xbc   :  { %2801 = vmatpush.bf16.msra.mxu0 %v9063_v0  ;;  %v12277_v0 = vld [vmem:[#allocation2 + $0x984] sm:$0xf0]  ;;  %v9527_v56 = vor.u32 %v12353_v48, %v9526_v47  ;;  %v9366_v47 = vld [vmem:[#allocation2 + $0xaa0] sm:$0xf] }
  0xbd   :  { %2814 = vmatpush.bf16.msra.mxu1 %v9127_v1  ;;  %v193_v1 = vld [vmem:[%s13742_s0 + $0x48] sm:$0xff]  ;;  %v9223_v16 = vor.u32 %v12277_v0, %v9222_v63 }
  0xbe   :  { %2827 = vmatpush.bf16.msra.mxu2 %v9191_v2  ;;  %v9342_v2 = vld [vmem:[#allocation2 + $0xa70] sm:$0xf]  ;;  %v12297_v43 = vld [vmem:[#allocation2 + $0xa24] sm:$0xf0] }
  0xbf   :  { %2840 = vmatpush.bf16.msra.mxu3 %v9255_v6  ;;  %v12323_v6 = vld [vmem:[#allocation2 + $0xaf4] sm:$0xf0]  ;;  %v9343_v17 = vor.u32 %v12307_v3, %v9342_v2  ;;  %v12301_v2 = vld [vmem:[#allocation2 + $0xa44] sm:$0xf0]  ;;  %v9382_v3 = vld [vmem:[#allocation2 + $0xac0] sm:$0xf] }
  0xc0   :  { %2802 = vmatpush.bf16.msra.mxu0 %v9055_v12  ;;  %v9534_v12 = vld [vmem:[#allocation2 + $0xbf0] sm:$0xf]  ;;  %v9407_v24 = vor.u32 %v12323_v6, %v9406_v4  ;;  %v9519_v4 = vor.u32 %v12351_v61, %v9518_v60  ;;  %v9446_v6 = vld [vmem:[#allocation2 + $0xb40] sm:$0xf]  ;;  %v12295_v61 = vld [vmem:[#allocation2 + $0xa14] sm:$0xf0] }
  0xc1   :  { %2815 = vmatpush.bf16.msra.mxu1 %v9119_v13  ;;  %v12355_v13 = vld [vmem:[#allocation2 + $0xbf4] sm:$0xf0]  ;;  %v9294_v60 = vld [vmem:[#allocation2 + $0xa10] sm:$0xf] }
  0xc2   :  { %2828 = vmatpush.bf16.msra.mxu2 %v9183_v14  ;;  %v616_v14 = vunpack.c.l.b16 %v193_v1 }
  0xc3   :  { %2841 = vmatpush.bf16.msra.mxu3 %v9247_v21  ;;  %v617_v21 = vunpack.c.h.b16 %v193_v1  ;;  %v9318_v1 = vld [vmem:[#allocation2 + $0xa40] sm:$0xf] }
  0xc4   :  { %2803 = vmatpush.bf16.msra.mxu0 %v9047_v36  ;;  %v9535_v36 = vor.u32 %v12355_v13, %v9534_v12  ;;  %v13426_v45 = vpack.c.b16 %v616_v14, %v616_v14  ;;  %v9447_v13 = vor.u32 %v12333_v7, %v9446_v6  ;;  %v12299_v14 = vld [vmem:[#allocation2 + $0xa34] sm:$0xf0]  ;;  %v9286_v7 = vld [vmem:[#allocation2 + $0xa00] sm:$0xf] }
  0xc5   :  { %2816 = vmatpush.bf16.msra.mxu1 %v9111_v37  ;;  %v13424_v37 = vpack.c.b16 %v614_v9, %v614_v9  ;;  %v13430_v49 = vpack.c.b16 %v617_v21, %v617_v21  ;;  %v12349_v9 = vld [vmem:[#allocation2 + $0xbc4] sm:$0xf0]  ;;  %v9438_v21 = vld [vmem:[#allocation2 + $0xb30] sm:$0xf]  ;;  %v12343_v6 = vld [vmem:[#allocation2 + $0xb94] sm:$0xf0] }
  0xc6   :  { %2829 = vmatpush.bf16.msra.mxu2 %v9175_v39  ;;  %v12321_v39 = vld [vmem:[#allocation2 + $0xae4] sm:$0xf0] }
  0xc7   :  { %2842 = vmatpush.bf16.msra.mxu3 %v9239_v46  ;;  %v13428_v46 = vpack.c.b16 %v615_v15, %v615_v15  ;;  %v9399_v51 = vor.u32 %v12321_v39, %v9398_v34  ;;  %v9374_v15 = vld [vmem:[#allocation2 + $0xab0] sm:$0xf] }
  0xc8   :  { %2804 = vmatpush.bf16.msra.mxu0 %v9039_v53  ;;  %v9326_v53 = vld [vmem:[#allocation2 + $0xa50] sm:$0xf] }
  0xc9   :  { %2817 = vmatpush.bf16.msra.mxu1 %v9103_v57  ;;  %v12319_v57 = vld [vmem:[#allocation2 + $0xad4] sm:$0xf0] }
  0xca   :  { %2830 = vmatpush.bf16.msra.mxu2 %v9167_v58  ;;  %v9454_v58 = vld [vmem:[#allocation2 + $0xb50] sm:$0xf]  ;;  %v9391_v63 = vor.u32 %v12319_v57, %v9390_v55  ;;  %v12345_v55 = vld [vmem:[#allocation2 + $0xba4] sm:$0xf0] }
  0xcb   :  { %2843 = vmatpush.bf16.msra.mxu3 %v9231_v62  ;;  %v9327_v62 = vor.u32 %v12303_v54, %v9326_v53  ;;  %v9455_v0 = vor.u32 %v12335_v59, %v9454_v58  ;;  %v12329_v53 = vld [vmem:[#allocation2 + $0xb24] sm:$0xf0]  ;;  %v9494_v54 = vld [vmem:[#allocation2 + $0xba0] sm:$0xf] }
  0xcc   :  { %2805 = vmatpush.bf16.msra.mxu0 %v9031_v5  ;;  %v12317_v5 = vld [vmem:[#allocation2 + $0xac4] sm:$0xf0]  ;;  %v2599_v57 = vpop.f32.mrf.mxu0 }
  0xcd   :  { %2818 = vmatpush.bf16.msra.mxu1 %v9095_v10  ;;  %v9319_v10 = vor.u32 %v12301_v2, %v9318_v1  ;;  %v9383_v12 = vor.u32 %v12317_v5, %v9382_v3  ;;  %v9495_v1 = vor.u32 %v12345_v55, %v9494_v54  ;;  %v12311_v2 = vld [vmem:[#allocation2 + $0xa94] sm:$0xf0]  ;;  %v9422_v3 = vld [vmem:[#allocation2 + $0xb10] sm:$0xf] }
  0xce   :  { %2831 = vmatpush.bf16.msra.mxu2 %v9159_v11  ;;  %v9310_v11 = vld [vmem:[#allocation2 + $0xa30] sm:$0xf] }
  0xcf   :  { %2844 = vmatpush.bf16.msra.mxu3 %v9223_v16  ;;  %2806 = vmatmul.bf16.vlgmr.msra.gmra.mxu0 %v13424_v37  ;;  %v12315_v16 = vld [vmem:[#allocation2 + $0xab4] sm:$0xf0]  ;;  %v9311_v34 = vor.u32 %v12299_v14, %v9310_v11  ;;  %v9486_v5 = vld [vmem:[#allocation2 + $0xb90] sm:$0xf]  ;;  %v9350_v11 = vld [vmem:[#allocation2 + $0xa80] sm:$0xf] }
  0xd0   :  { %2850 = vmatpush.bf16.msrb.mxu0 %v9343_v17  ;;  %2819 = vmatmul.bf16.vlgmr.msra.gmra.mxu1 %v13428_v46  ;;  %v9511_v17 = vor.u32 %v12349_v9, %v9510_v8  ;;  %v9375_v39 = vor.u32 %v12315_v16, %v9374_v15  ;;  %v9295_v9 = vor.u32 %v12295_v61, %v9294_v60  ;;  %v9414_v15 = vld [vmem:[#allocation2 + $0xb00] sm:$0xf]  ;;  %v12325_v16 = vld [vmem:[#allocation2 + $0xb04] sm:$0xf0] }
  0xd1   :  { %2863 = vmatpush.bf16.msrb.mxu1 %v9407_v24  ;;  %2832 = vmatmul.bf16.vlgmr.msra.gmra.mxu2 %v13426_v45  ;;  %v12331_v24 = vld [vmem:[#allocation2 + $0xb34] sm:$0xf0] }
  0xd2   :  { %2876 = vmatpush.bf16.msrb.mxu2 %v9471_v26  ;;  %2845 = vmatmul.bf16.vlgmr.msra.gmra.mxu3 %v13430_v49  ;;  %v580_v26 = vld [vmem:[#allocation4] sm:$0x3]  ;;  %v9439_v40 = vor.u32 %v12331_v24, %v9438_v21  ;;  %v9487_v24 = vor.u32 %v12343_v6, %v9486_v5  ;;  %v12000_v5 = vld [vmem:[#allocation2 + $0xe4] sm:$0xf] }
  0xd3   :  { %2889 = vmatpush.bf16.msrb.mxu3 %v9535_v36  ;;  %v9302_v36 = vld [vmem:[#allocation2 + $0xa20] sm:$0xf]  ;;  %v582_v48 = vperm.slane %v580_v26, 0 }
  0xd4   :  { %2851 = vmatpush.bf16.msrb.mxu0 %v9335_v50  ;;  %v9503_v50 = vor.u32 %v12347_v32, %v9502_v27  ;;  %v2625_v21 = vpop.f32.mrf.mxu2  ;;  %v9478_v26 = vld [vmem:[#allocation2 + $0xb80] sm:$0xf]  ;;  %v12341_v27 = vld [vmem:[#allocation2 + $0xb84] sm:$0xf0]  ;;  %v195_v32 = vld [vmem:[%s13742_s0 + $0x58] sm:$0xff]  ;;  %v2601_v54 = vpop.f32.mrf.mxu0 }
  0xd5   :  { %2864 = vmatpush.bf16.msrb.mxu1 %v9399_v51  ;;  %v12313_v51 = vld [vmem:[#allocation2 + $0xaa4] sm:$0xf0]  ;;  %v11980_v54 = vld [vmem:[#allocation2 + $0x44] sm:$0xf] }
  0xd6   :  { %2877 = vmatpush.bf16.msrb.mxu2 %v9463_v52  ;;  %v9430_v52 = vld [vmem:[#allocation2 + $0xb20] sm:$0xf]  ;;  %v9367_v58 = vor.u32 %v12313_v51, %v9366_v47  ;;  %v8192_v51 = vld [vmem:[#allocation2 + $0x178] sm:$0xf0] }
  0xd7   :  { %2890 = vmatpush.bf16.msrb.mxu3 %v9527_v56  ;;  %v9303_v56 = vor.u32 %v12297_v43, %v9302_v36  ;;  %v9431_v59 = vor.u32 %v12329_v53, %v9430_v52  ;;  %v2638_v36 = vpop.f32.mrf.mxu3  ;;  %v12002_v43 = vld [vmem:[#allocation2 + $0xf4] sm:$0xf] }
  0xd8   :  { %2852 = vmatpush.bf16.msrb.mxu0 %v9327_v62  ;;  %v9358_v62 = vld [vmem:[#allocation2 + $0xa90] sm:$0xf] }
  0xd9   :  { %2865 = vmatpush.bf16.msrb.mxu1 %v9391_v63  ;;  %v2600_v63 = vadd.f32 %v2599_v57, %v582_v48  ;;  %v8128_v48 = vld [vmem:[#allocation2 + $0xf8] sm:$0xf0]  ;;  %v12034_v57 = vld [vmem:[#allocation2 + $0x1f4] sm:$0xf] }
  0xda   :  { %2878 = vmatpush.bf16.msrb.mxu2 %v9455_v0  ;;  %v2612_v0 = vpop.f32.mrf.mxu1 }
  0xdb   :  { %2891 = vmatpush.bf16.msrb.mxu3 %v9519_v4  ;;  %v12327_v4 = vld [vmem:[#allocation2 + $0xb14] sm:$0xf0]  ;;  %v2613_v8 = vadd.f32 %v2612_v0, %v2600_v63  ;;  %v621_v0 = vunpack.c.h.b16 %v195_v32 }
  0xdc   :  { %2853 = vmatpush.bf16.msrb.mxu0 %v9319_v10  ;;  %v12293_v10 = vld [vmem:[#allocation2 + $0xa04] sm:$0xf0]  ;;  %v9423_v14 = vor.u32 %v12327_v4, %v9422_v3  ;;  %v11984_v3 = vld [vmem:[#allocation2 + $0x64] sm:$0xf]  ;;  %v8056_v4 = vld [vmem:[#allocation2 + $0x68] sm:$0xf0] }
  0xdd   :  { %2866 = vmatpush.bf16.msrb.mxu1 %v9383_v12  ;;  %v12309_v12 = vld [vmem:[#allocation2 + $0xa84] sm:$0xf0]  ;;  %v9287_v47 = vor.u32 %v12293_v10, %v9286_v7  ;;  %v8184_v10 = vld [vmem:[#allocation2 + $0x168] sm:$0xf0] }
  0xde   :  { %2879 = vmatpush.bf16.msrb.mxu2 %v9447_v13  ;;  %v9359_v13 = vor.u32 %v12311_v2, %v9358_v62  ;;  %v9351_v55 = vor.u32 %v12309_v12, %v9350_v11  ;;  %v9479_v62 = vor.u32 %v12341_v27, %v9478_v26  ;;  %v11982_v27 = vld [vmem:[#allocation2 + $0x54] sm:$0xf] }
  0xdf   :  { %2892 = vmatpush.bf16.msrb.mxu3 %v9511_v17  ;;  %v194_v17 = vld [vmem:[%s13742_s0 + $0x50] sm:$0xff] }
  0xe0   :  { %2854 = vmatpush.bf16.msrb.mxu0 %v9311_v34  ;;  %v2626_v34 = vadd.f32 %v2625_v21, %v2613_v8  ;;  %v618_v52 = vunpack.c.l.b16 %v194_v17  ;;  %v619_v60 = vunpack.c.h.b16 %v194_v17  ;;  %v8120_v8 = vld [vmem:[#allocation2 + $0xe8] sm:$0xf0]  ;;  %v8059_v17 = vor.u32 %v11984_v3, %v8056_v4  ;;  %v2640_v21 = vpop.f32.mrf.mxu3  ;;  %v11978_v3 = vld [vmem:[#allocation2 + $0x34] sm:$0xf]  ;;  %v8032_v4 = vld [vmem:[#allocation2 + $0x38] sm:$0xf0] }
  0xe1   :  { %2867 = vmatpush.bf16.msrb.mxu1 %v9375_v39  ;;  %v11986_v39 = vld [vmem:[#allocation2 + $0x74] sm:$0xf] }
  0xe2   :  { %2880 = vmatpush.bf16.msrb.mxu2 %v9439_v40  ;;  %v8064_v40 = vld [vmem:[#allocation2 + $0x78] sm:$0xf0]  ;;  %v13442_v53 = vadd.f32 %v2638_v36, %v2626_v34  ;;  %v2614_v61 = vpop.f32.mrf.mxu1  ;;  %v13444_v7 = vpack.c.b16 %v618_v52, %v618_v52  ;;  %v13448_v12 = vpack.c.b16 %v619_v60, %v619_v60  ;;  %v11998_v34 = vld [vmem:[#allocation2 + $0xd4] sm:$0xf]  ;;  %v8168_v60 = vld [vmem:[#allocation2 + $0x148] sm:$0xf0] }
  0xe3   :  { %2893 = vmatpush.bf16.msrb.mxu3 %v9503_v50  ;;  %v12018_v50 = vld [vmem:[#allocation2 + $0x174] sm:$0xf]  ;;  %v8067_v63 = vor.u32 %v11986_v39, %v8064_v40  ;;  %v8112_v39 = vld [vmem:[#allocation2 + $0xd8] sm:$0xf0]  ;;  %v12028_v61 = vld [vmem:[#allocation2 + $0x1c4] sm:$0xf] }
  0xe4   :  { %2855 = vmatpush.bf16.msrb.mxu0 %v9303_v56  ;;  %v9415_v56 = vor.u32 %v12325_v16, %v9414_v15  ;;  %v8195_v2 = vor.u32 %v12018_v50, %v8192_v51  ;;  %v2627_v15 = vpop.f32.mrf.mxu2  ;;  %v13450_v16 = vpack.c.b16 %v621_v0, %v621_v0  ;;  %v12014_v40 = vld [vmem:[#allocation2 + $0x154] sm:$0xf]  ;;  %v8115_v51 = vor.u32 %v11998_v34, %v8112_v39  ;;  %v8024_v34 = vld [vmem:[#allocation2 + $0x28] sm:$0xf0] }
  0xe5   :  { %2868 = vmatpush.bf16.msrb.mxu1 %v9367_v58  ;;  %v8256_v58 = vld [vmem:[#allocation2 + $0x1f8] sm:$0xf0]  ;;  %v12026_v15 = vld [vmem:[#allocation2 + $0x1b4] sm:$0xf] }
  0xe6   :  { %2881 = vmatpush.bf16.msrb.mxu2 %v9431_v59  ;;  %v620_v59 = vunpack.c.l.b16 %v195_v32  ;;  %v8259_v6 = vor.u32 %v12034_v57, %v8256_v58  ;;  %v8048_v32 = vld [vmem:[#allocation2 + $0x58] sm:$0xf0]  ;;  %v8104_v58 = vld [vmem:[#allocation2 + $0xc8] sm:$0xf0] }
  0xe7   :  { %2894 = vmatpush.bf16.msrb.mxu3 %v9495_v1  ;;  %v8131_v1 = vor.u32 %v12002_v43, %v8128_v48  ;;  %v8176_v43 = vld [vmem:[#allocation2 + $0x158] sm:$0xf0]  ;;  %v8051_v50 = vor.u32 %v11982_v27, %v8048_v32  ;;  %v11976_v32 = vld [vmem:[#allocation2 + $0x24] sm:$0xf] }
  0xe8   :  { %2856 = vmatpush.bf16.msrb.mxu0 %v9295_v9  ;;  %v12016_v9 = vld [vmem:[#allocation2 + $0x164] sm:$0xf]  ;;  %v13446_v11 = vpack.c.b16 %v620_v59, %v620_v59  ;;  %v8240_v48 = vld [vmem:[#allocation2 + $0x1d8] sm:$0xf0]  ;;  %v8179_v52 = vor.u32 %v12014_v40, %v8176_v43  ;;  %v8088_v40 = vld [vmem:[#allocation2 + $0xa8] sm:$0xf0] }
  0xe9   :  { %2869 = vmatpush.bf16.msrb.mxu1 %v9359_v13  ;;  %v12032_v13 = vld [vmem:[#allocation2 + $0x1e4] sm:$0xf]  ;;  %v8187_v26 = vor.u32 %v12016_v9, %v8184_v10  ;;  %v8096_v10 = vld [vmem:[#allocation2 + $0xb8] sm:$0xf0] }
  0xea   :  { %2882 = vmatpush.bf16.msrb.mxu2 %v9423_v14  ;;  %v8248_v14 = vld [vmem:[#allocation2 + $0x1e8] sm:$0xf0]  ;;  %v12012_v59 = vld [vmem:[#allocation2 + $0x144] sm:$0xf] }
  0xeb   :  { %2895 = vmatpush.bf16.msrb.mxu3 %v9487_v24  ;;  %v8123_v24 = vor.u32 %v12000_v5, %v8120_v8  ;;  %v8251_v36 = vor.u32 %v12032_v13, %v8248_v14  ;;  %v11994_v5 = vld [vmem:[#allocation2 + $0xb4] sm:$0xf]  ;;  %v8160_v14 = vld [vmem:[#allocation2 + $0x138] sm:$0xf0]  ;;  %v12008_v43 = vld [vmem:[#allocation2 + $0x124] sm:$0xf] }
  0xec   :  { %2857 = vmatpush.bf16.msrb.mxu0 %v9287_v47  ;;  %v12030_v47 = vld [vmem:[#allocation2 + $0x1d4] sm:$0xf]  ;;  %v2651_v0 = vpop.f32.mrf.mxu0 }
  0xed   :  { %2870 = vmatpush.bf16.msrb.mxu1 %v9351_v55  ;;  %v8040_v55 = vld [vmem:[#allocation2 + $0x48] sm:$0xf0]  ;;  %v8243_v57 = vor.u32 %v12030_v47, %v8240_v48  ;;  %v2664_v8 = vpop.f32.mrf.mxu1  ;;  %v12010_v13 = vld [vmem:[#allocation2 + $0x134] sm:$0xf] }
  0xee   :  { %2883 = vmatpush.bf16.msrb.mxu2 %v9415_v56  ;;  %v11996_v56 = vld [vmem:[#allocation2 + $0xc4] sm:$0xf]  ;;  %v8163_v27 = vor.u32 %v12010_v13, %v8160_v14  ;;  %v8152_v47 = vld [vmem:[#allocation2 + $0x128] sm:$0xf0] }
  0xef   :  { %2896 = vmatpush.bf16.msrb.mxu3 %v9479_v62  ;;  %2858 = vmatmul.bf16.vlgmr.msrb.gmra.mxu0 %v13444_v7  ;;  %v8232_v62 = vld [vmem:[#allocation2 + $0x1c8] sm:$0xf0]  ;;  %v11988_v13 = vld [vmem:[#allocation2 + $0x84] sm:$0xf] }
  0xf0   :  { %2902 = vmatpush.bf16.msra.mxu0 %v8067_v63  ;;  %2871 = vmatmul.bf16.vlgmr.msrb.gmra.mxu1 %v13448_v12  ;;  %v8043_v63 = vor.u32 %v11980_v54, %v8040_v55  ;;  %v8235_v9 = vor.u32 %v12028_v61, %v8232_v62  ;;  %v8027_v54 = vor.u32 %v11976_v32, %v8024_v34  ;;  %v11990_v61 = vld [vmem:[#allocation2 + $0x94] sm:$0xf]  ;;  %v8072_v14 = vld [vmem:[#allocation2 + $0x88] sm:$0xf0] }
  0xf1   :  { %2915 = vmatpush.bf16.msra.mxu1 %v8131_v1  ;;  %2884 = vmatmul.bf16.vlgmr.msrb.gmra.mxu2 %v13446_v11  ;;  %v8107_v1 = vor.u32 %v11996_v56, %v8104_v58  ;;  %v8155_v58 = vor.u32 %v12008_v43, %v8152_v47  ;;  %v12050_v34 = vld [vmem:[#allocation2 + $0x274] sm:$0xf]  ;;  %v8448_v47 = vld [vmem:[#allocation2 + $0x378] sm:$0xf0] }
  0xf2   :  { %2928 = vmatpush.bf16.msra.mxu2 %v8195_v2  ;;  %2897 = vmatmul.bf16.vlgmr.msrb.gmra.mxu3 %v13450_v16  ;;  %v8171_v2 = vor.u32 %v12012_v59, %v8168_v60  ;;  %v11974_v59 = vld [vmem:[#allocation2 + $0x14] sm:$0xf]  ;;  %v8016_v60 = vld [vmem:[#allocation2 + $0x18] sm:$0xf0] }
  0xf3   :  { %2941 = vmatpush.bf16.msra.mxu3 %v8259_v6  ;;  %v2652_v6 = vadd.f32 %v2651_v0, %v13442_v53  ;;  %v8080_v0 = vld [vmem:[#allocation2 + $0x98] sm:$0xf0]  ;;  %v12082_v43 = vld [vmem:[#allocation2 + $0x374] sm:$0xf] }
  0xf4   :  { %2903 = vmatpush.bf16.msra.mxu0 %v8059_v17  ;;  %v8224_v17 = vld [vmem:[#allocation2 + $0x1b8] sm:$0xf0]  ;;  %v2677_v39 = vpop.f32.mrf.mxu2  ;;  %v2653_v56 = vpop.f32.mrf.mxu0 }
  0xf5   :  { %2916 = vmatpush.bf16.msra.mxu1 %v8123_v24  ;;  %v2665_v21 = vadd.f32 %v2664_v8, %v2652_v6  ;;  %v8035_v24 = vor.u32 %v11978_v3, %v8032_v4  ;;  %v8227_v53 = vor.u32 %v12026_v15, %v8224_v17  ;;  %v2666_v62 = vpop.f32.mrf.mxu1  ;;  %v12022_v3 = vld [vmem:[#allocation2 + $0x194] sm:$0xf]  ;;  %v8208_v4 = vld [vmem:[#allocation2 + $0x198] sm:$0xf0]  ;;  %v11972_v6 = vld [vmem:[#allocation2 + $0x4] sm:$0xf] }
  0xf6   :  { %2929 = vmatpush.bf16.msra.mxu2 %v8187_v26  ;;  %v8099_v26 = vor.u32 %v11994_v5, %v8096_v10  ;;  %v8019_v5 = vor.u32 %v11974_v59, %v8016_v60  ;;  %v8008_v8 = vld [vmem:[#allocation2 + $0x8] sm:$0xf0]  ;;  %v12004_v15 = vld [vmem:[#allocation2 + $0x104] sm:$0xf] }
  0xf7   :  { %2942 = vmatpush.bf16.msra.mxu3 %v8251_v36  ;;  %v11992_v36 = vld [vmem:[#allocation2 + $0xa4] sm:$0xf]  ;;  %v2678_v48 = vadd.f32 %v2677_v39, %v2665_v21  ;;  %v8211_v21 = vor.u32 %v12022_v3, %v8208_v4  ;;  %v12066_v39 = vld [vmem:[#allocation2 + $0x2f4] sm:$0xf]  ;;  %v8312_v60 = vld [vmem:[#allocation2 + $0x268] sm:$0xf0] }
  0xf8   :  { %2904 = vmatpush.bf16.msra.mxu0 %v8051_v50  ;;  %v2690_v50 = vpop.f32.mrf.mxu3  ;;  %v12048_v59 = vld [vmem:[#allocation2 + $0x264] sm:$0xf]  ;;  %v8504_v3 = vld [vmem:[#allocation2 + $0x3e8] sm:$0xf0] }
  0xf9   :  { %2917 = vmatpush.bf16.msra.mxu1 %v8115_v51  ;;  %v12024_v51 = vld [vmem:[#allocation2 + $0x1a4] sm:$0xf]  ;;  %v13457_v55 = vadd.f32 %v2690_v50, %v2678_v48  ;;  %v8075_v48 = vor.u32 %v11988_v13, %v8072_v14  ;;  %v8315_v4 = vor.u32 %v12048_v59, %v8312_v60  ;;  %v8368_v14 = vld [vmem:[#allocation2 + $0x2d8] sm:$0xf0] }
  0xfa   :  { %2930 = vmatpush.bf16.msra.mxu2 %v8179_v52  ;;  %v8216_v52 = vld [vmem:[#allocation2 + $0x1a8] sm:$0xf0]  ;;  %v8352_v60 = vld [vmem:[#allocation2 + $0x2b8] sm:$0xf0] }
  0xfb   :  { %2943 = vmatpush.bf16.msra.mxu3 %v8243_v57  ;;  %v8091_v57 = vor.u32 %v11992_v36, %v8088_v40  ;;  %v8320_v36 = vld [vmem:[#allocation2 + $0x278] sm:$0xf0] }
  0xfc   :  { %2905 = vmatpush.bf16.msra.mxu0 %v8043_v63  ;;  %v8219_v63 = vor.u32 %v12024_v51, %v8216_v52  ;;  %v2679_v17 = vpop.f32.mrf.mxu2  ;;  %v8384_v40 = vld [vmem:[#allocation2 + $0x2f8] sm:$0xf0]  ;;  %v12098_v51 = vld [vmem:[#allocation2 + $0x3f4] sm:$0xf]  ;;  %v8323_v56 = vor.u32 %v12050_v34, %v8320_v36  ;;  %v12044_v34 = vld [vmem:[#allocation2 + $0x244] sm:$0xf] }
  0xfd   :  { %2918 = vmatpush.bf16.msra.mxu1 %v8107_v1  ;;  %v12006_v1 = vld [vmem:[#allocation2 + $0x114] sm:$0xf]  ;;  %v8512_v52 = vld [vmem:[#allocation2 + $0x3f8] sm:$0xf0]  ;;  %v8296_v36 = vld [vmem:[#allocation2 + $0x248] sm:$0xf0] }
  0xfe   :  { %2931 = vmatpush.bf16.msra.mxu2 %v8171_v2  ;;  %v8144_v2 = vld [vmem:[#allocation2 + $0x118] sm:$0xf0]  ;;  %v8515_v62 = vor.u32 %v12098_v51, %v8512_v52 }
  0xff   :  { %2944 = vmatpush.bf16.msra.mxu3 %v8235_v9  ;;  %v8083_v9 = vor.u32 %v11990_v61, %v8080_v0  ;;  %v8147_v10 = vor.u32 %v12006_v1, %v8144_v2  ;;  %v12064_v61 = vld [vmem:[#allocation2 + $0x2e4] sm:$0xf]  ;;  %v8440_v1 = vld [vmem:[#allocation2 + $0x368] sm:$0xf0]  ;;  %v8432_v17 = vld [vmem:[#allocation2 + $0x358] sm:$0xf0] }
 0x100   :  { %2906 = vmatpush.bf16.msra.mxu0 %v8035_v24  ;;  %v8136_v24 = vld [vmem:[#allocation2 + $0x108] sm:$0xf0]  ;;  %v2692_v32 = vpop.f32.mrf.mxu3  ;;  %v12080_v0 = vld [vmem:[#allocation2 + $0x364] sm:$0xf] }
 0x101   :  { %2919 = vmatpush.bf16.msra.mxu1 %v8099_v26  ;;  %v12020_v26 = vld [vmem:[#allocation2 + $0x184] sm:$0xf]  ;;  %v8139_v50 = vor.u32 %v12004_v15, %v8136_v24  ;;  %v12078_v15 = vld [vmem:[#allocation2 + $0x354] sm:$0xf]  ;;  %v8496_v24 = vld [vmem:[#allocation2 + $0x3d8] sm:$0xf0] }
 0x102   :  { %2932 = vmatpush.bf16.msra.mxu2 %v8163_v27  ;;  %v8200_v27 = vld [vmem:[#allocation2 + $0x188] sm:$0xf0]  ;;  %v12096_v2 = vld [vmem:[#allocation2 + $0x3e4] sm:$0xf]  ;;  %v8435_v32 = vor.u32 %v12078_v15, %v8432_v17 }
 0x103   :  { %2945 = vmatpush.bf16.msra.mxu3 %v8227_v53  ;;  %v8011_v53 = vor.u32 %v11972_v6, %v8008_v8  ;;  %v8443_v6 = vor.u32 %v12080_v0, %v8440_v1  ;;  %v12046_v8 = vld [vmem:[#allocation2 + $0x254] sm:$0xf]  ;;  %v8507_v13 = vor.u32 %v12096_v2, %v8504_v3  ;;  %v8480_v0 = vld [vmem:[#allocation2 + $0x3b8] sm:$0xf0]  ;;  %v12040_v3 = vld [vmem:[#allocation2 + $0x224] sm:$0xf] }
 0x104   :  { %2907 = vmatpush.bf16.msra.mxu0 %v8027_v54  ;;  %v8203_v54 = vor.u32 %v12020_v26, %v8200_v27  ;;  %v12088_v17 = vld [vmem:[#allocation2 + $0x3a4] sm:$0xf] }
 0x105   :  { %2920 = vmatpush.bf16.msra.mxu1 %v8091_v57  ;;  %v8387_v57 = vor.u32 %v12066_v39, %v8384_v40  ;;  %v12060_v39 = vld [vmem:[#allocation2 + $0x2c4] sm:$0xf] }
 0x106   :  { %2933 = vmatpush.bf16.msra.mxu2 %v8155_v58  ;;  %v8451_v58 = vor.u32 %v12082_v43, %v8448_v47  ;;  %v12076_v40 = vld [vmem:[#allocation2 + $0x344] sm:$0xf]  ;;  %v8424_v43 = vld [vmem:[#allocation2 + $0x348] sm:$0xf0] }
 0x107   :  { %2946 = vmatpush.bf16.msra.mxu3 %v8219_v63  ;;  %v8376_v63 = vld [vmem:[#allocation2 + $0x2e8] sm:$0xf0]  ;;  %v8427_v52 = vor.u32 %v12076_v40, %v8424_v43  ;;  %v8336_v43 = vld [vmem:[#allocation2 + $0x298] sm:$0xf0] }
 0x108   :  { %2908 = vmatpush.bf16.msra.mxu0 %v8019_v5  ;;  %v8379_v5 = vor.u32 %v12064_v61, %v8376_v63  ;;  %v12074_v61 = vld [vmem:[#allocation2 + $0x334] sm:$0xf] }
 0x109   :  { %2921 = vmatpush.bf16.msra.mxu1 %v8083_v9  ;;  %v8304_v9 = vld [vmem:[#allocation2 + $0x258] sm:$0xf0]  ;;  %v12090_v63 = vld [vmem:[#allocation2 + $0x3b4] sm:$0xf] }
 0x10a   :  { %2934 = vmatpush.bf16.msra.mxu2 %v8147_v10  ;;  %v12062_v10 = vld [vmem:[#allocation2 + $0x2d4] sm:$0xf]  ;;  %v8307_v26 = vor.u32 %v12046_v8, %v8304_v9  ;;  %v8344_v9 = vld [vmem:[#allocation2 + $0x2a8] sm:$0xf0] }
 0x10b   :  { %2947 = vmatpush.bf16.msra.mxu3 %v8211_v21  ;;  %v12094_v21 = vld [vmem:[#allocation2 + $0x3d4] sm:$0xf]  ;;  %v8371_v27 = vor.u32 %v12062_v10, %v8368_v14  ;;  %v12072_v10 = vld [vmem:[#allocation2 + $0x324] sm:$0xf] }
 0x10c   :  { %2909 = vmatpush.bf16.msra.mxu0 %v8011_v53  ;;  %v8499_v53 = vor.u32 %v12094_v21, %v8496_v24  ;;  %v2703_v47 = vpop.f32.mrf.mxu0  ;;  %v8472_v21 = vld [vmem:[#allocation2 + $0x3a8] sm:$0xf0] }
 0x10d   :  { %2922 = vmatpush.bf16.msra.mxu1 %v8075_v48  ;;  %v8488_v48 = vld [vmem:[#allocation2 + $0x3c8] sm:$0xf0]  ;;  %v8475_v40 = vor.u32 %v12088_v17, %v8472_v21 }
 0x10e   :  { %2935 = vmatpush.bf16.msra.mxu2 %v8139_v50  ;;  %v8299_v50 = vor.u32 %v12044_v34, %v8296_v36 }
 0x10f   :  { %2948 = vmatpush.bf16.msra.mxu3 %v8203_v54  ;;  %2910 = vmatmul.bf16.vlgmr.msra.gmra.mxu0 %v13354_v19  ;;  %v12092_v19 = vld [vmem:[#allocation2 + $0x3c4] sm:$0xf]  ;;  %v12042_v54 = vld [vmem:[#allocation2 + $0x234] sm:$0xf] }
 0x110   :  { %2954 = vmatpush.bf16.msrb.mxu0 %v8323_v56  ;;  %2923 = vmatmul.bf16.vlgmr.msra.gmra.mxu1 %v13358_v22  ;;  %v2716_v22 = vpop.f32.mrf.mxu1  ;;  %v8288_v56 = vld [vmem:[#allocation2 + $0x238] sm:$0xf0] }
 0x111   :  { %2967 = vmatpush.bf16.msrb.mxu1 %v8387_v57  ;;  %2936 = vmatmul.bf16.vlgmr.msra.gmra.mxu2 %v13352_v18  ;;  %v8360_v18 = vld [vmem:[#allocation2 + $0x2c8] sm:$0xf0]  ;;  %v12058_v57 = vld [vmem:[#allocation2 + $0x2b4] sm:$0xf]  ;;  %v8291_v1 = vor.u32 %v12042_v54, %v8288_v56  ;;  %v12052_v56 = vld [vmem:[#allocation2 + $0x284] sm:$0xf] }
 0x112   :  { %2980 = vmatpush.bf16.msrb.mxu2 %v8451_v58  ;;  %2949 = vmatmul.bf16.vlgmr.msra.gmra.mxu3 %v13356_v20  ;;  %v2704_v20 = vadd.f32 %v2703_v47, %v13457_v55  ;;  %v8363_v51 = vor.u32 %v12060_v39, %v8360_v18  ;;  %v8491_v58 = vor.u32 %v12092_v19, %v8488_v48  ;;  %v12038_v39 = vld [vmem:[#allocation2 + $0x214] sm:$0xf]  ;;  %v8400_v19 = vld [vmem:[#allocation2 + $0x318] sm:$0xf0] }
 0x113   :  { %2993 = vmatpush.bf16.msrb.mxu3 %v8515_v62  ;;  %v8416_v62 = vld [vmem:[#allocation2 + $0x338] sm:$0xf0]  ;;  %v8355_v55 = vor.u32 %v12058_v57, %v8352_v60  ;;  %v12054_v18 = vld [vmem:[#allocation2 + $0x294] sm:$0xf]  ;;  %v8328_v57 = vld [vmem:[#allocation2 + $0x288] sm:$0xf0] }
 0x114   :  { %2955 = vmatpush.bf16.msrb.mxu0 %v8315_v4  ;;  %v2717_v59 = vadd.f32 %v2716_v22, %v2704_v20  ;;  %v8419_v2 = vor.u32 %v12074_v61, %v8416_v62  ;;  %v8280_v4 = vld [vmem:[#allocation2 + $0x228] sm:$0xf0]  ;;  %v2729_v8 = vpop.f32.mrf.mxu2  ;;  %v2705_v24 = vpop.f32.mrf.mxu0  ;;  %v12070_v47 = vld [vmem:[#allocation2 + $0x314] sm:$0xf]  ;;  %v8464_v20 = vld [vmem:[#allocation2 + $0x398] sm:$0xf0] }
 0x115   :  { %2968 = vmatpush.bf16.msrb.mxu1 %v8379_v5  ;;  %v12056_v5 = vld [vmem:[#allocation2 + $0x2a4] sm:$0xf]  ;;  %v2742_v15 = vpop.f32.mrf.mxu3  ;;  %v12086_v48 = vld [vmem:[#allocation2 + $0x394] sm:$0xf]  ;;  %v8403_v54 = vor.u32 %v12070_v47, %v8400_v19  ;;  %v8392_v60 = vld [vmem:[#allocation2 + $0x308] sm:$0xf0] }
 0x116   :  { %2981 = vmatpush.bf16.msrb.mxu2 %v8443_v6  ;;  %v8483_v6 = vor.u32 %v12090_v63, %v8480_v0  ;;  %v2730_v14 = vadd.f32 %v2729_v8, %v2717_v59  ;;  %v8347_v34 = vor.u32 %v12056_v5, %v8344_v9  ;;  %v12036_v22 = vld [vmem:[#allocation2 + $0x204] sm:$0xf]  ;;  %v8467_v59 = vor.u32 %v12086_v48, %v8464_v20  ;;  %v8456_v62 = vld [vmem:[#allocation2 + $0x388] sm:$0xf0]  ;;  %v12114_v0 = vld [vmem:[#allocation2 + $0x474] sm:$0xf] }
 0x117   :  { %2994 = vmatpush.bf16.msrb.mxu3 %v8507_v13  ;;  %v8408_v13 = vld [vmem:[#allocation2 + $0x328] sm:$0xf0]  ;;  %v12084_v61 = vld [vmem:[#allocation2 + $0x384] sm:$0xf]  ;;  %v12146_v5 = vld [vmem:[#allocation2 + $0x574] sm:$0xf]  ;;  %v8331_v8 = vor.u32 %v12052_v56, %v8328_v57 }
 0x118   :  { %2956 = vmatpush.bf16.msrb.mxu0 %v8307_v26  ;;  %v8283_v26 = vor.u32 %v12040_v3, %v8280_v4  ;;  %v8411_v36 = vor.u32 %v12072_v10, %v8408_v13  ;;  %v8640_v4 = vld [vmem:[#allocation2 + $0x4f8] sm:$0xf0]  ;;  %v12162_v10 = vld [vmem:[#allocation2 + $0x5f4] sm:$0xf]  ;;  %v12112_v24 = vld [vmem:[#allocation2 + $0x464] sm:$0xf] }
 0x119   :  { %2969 = vmatpush.bf16.msrb.mxu1 %v8371_v27  ;;  %v2718_v27 = vpop.f32.mrf.mxu1  ;;  %v8768_v13 = vld [vmem:[#allocation2 + $0x5f8] sm:$0xf0]  ;;  %v12110_v48 = vld [vmem:[#allocation2 + $0x454] sm:$0xf] }
 0x11a   :  { %2982 = vmatpush.bf16.msrb.mxu2 %v8435_v32  ;;  %v13464_v32 = vadd.f32 %v2742_v15, %v2730_v14  ;;  %v8459_v14 = vor.u32 %v12084_v61, %v8456_v62  ;;  %v12128_v27 = vld [vmem:[#allocation2 + $0x4e4] sm:$0xf]  ;;  %v8560_v20 = vld [vmem:[#allocation2 + $0x458] sm:$0xf0]  ;;  %v12158_v56 = vld [vmem:[#allocation2 + $0x5d4] sm:$0xf] }
 0x11b   :  { %2995 = vmatpush.bf16.msrb.mxu3 %v8499_v53  ;;  %v8272_v53 = vld [vmem:[#allocation2 + $0x218] sm:$0xf0]  ;;  %v12108_v61 = vld [vmem:[#allocation2 + $0x444] sm:$0xf]  ;;  %v8552_v62 = vld [vmem:[#allocation2 + $0x448] sm:$0xf0] }
 0x11c   :  { %2957 = vmatpush.bf16.msrb.mxu0 %v8299_v50  ;;  %v8275_v50 = vor.u32 %v12038_v39, %v8272_v53  ;;  %v2731_v63 = vpop.f32.mrf.mxu2  ;;  %v12144_v39 = vld [vmem:[#allocation2 + $0x564] sm:$0xf]  ;;  %v8696_v53 = vld [vmem:[#allocation2 + $0x568] sm:$0xf0]  ;;  %v8752_v57 = vld [vmem:[#allocation2 + $0x5d8] sm:$0xf0] }
 0x11d   :  { %2970 = vmatpush.bf16.msrb.mxu1 %v8363_v51  ;;  %v8264_v51 = vld [vmem:[#allocation2 + $0x208] sm:$0xf0]  ;;  %v8699_v19 = vor.u32 %v12144_v39, %v8696_v53  ;;  %v8755_v63 = vor.u32 %v12158_v56, %v8752_v57  ;;  %v12120_v53 = vld [vmem:[#allocation2 + $0x4a4] sm:$0xf] }
 0x11e   :  { %2983 = vmatpush.bf16.msrb.mxu2 %v8427_v52  ;;  %v8339_v52 = vor.u32 %v12054_v18, %v8336_v43  ;;  %v8267_v3 = vor.u32 %v12036_v22, %v8264_v51  ;;  %v12160_v18 = vld [vmem:[#allocation2 + $0x5e4] sm:$0xf]  ;;  %v8624_v51 = vld [vmem:[#allocation2 + $0x4d8] sm:$0xf0]  ;;  %v8536_v39 = vld [vmem:[#allocation2 + $0x428] sm:$0xf0] }
 0x11f   :  { %2996 = vmatpush.bf16.msrb.mxu3 %v8491_v58  ;;  %v12068_v58 = vld [vmem:[#allocation2 + $0x304] sm:$0xf] }
 0x120   :  { %2958 = vmatpush.bf16.msrb.mxu0 %v8291_v1  ;;  %v8576_v1 = vld [vmem:[#allocation2 + $0x478] sm:$0xf0]  ;;  %v8395_v9 = vor.u32 %v12068_v58, %v8392_v60  ;;  %v8563_v58 = vor.u32 %v12110_v48, %v8560_v20 }
 0x121   :  { %2971 = vmatpush.bf16.msrb.mxu1 %v8355_v55  ;;  %v12130_v55 = vld [vmem:[#allocation2 + $0x4f4] sm:$0xf]  ;;  %v8579_v15 = vor.u32 %v12114_v0, %v8576_v1  ;;  %v8616_v0 = vld [vmem:[#allocation2 + $0x4c8] sm:$0xf0]  ;;  %v12140_v1 = vld [vmem:[#allocation2 + $0x544] sm:$0xf] }
 0x122   :  { %2984 = vmatpush.bf16.msrb.mxu2 %v8419_v2  ;;  %v2744_v2 = vpop.f32.mrf.mxu3  ;;  %v8643_v17 = vor.u32 %v12130_v55, %v8640_v4  ;;  %v8680_v55 = vld [vmem:[#allocation2 + $0x548] sm:$0xf0]  ;;  %v8555_v4 = vor.u32 %v12108_v61, %v8552_v62  ;;  %v12118_v61 = vld [vmem:[#allocation2 + $0x494] sm:$0xf] }
 0x123   :  { %2997 = vmatpush.bf16.msrb.mxu3 %v8483_v6  ;;  %v8704_v6 = vld [vmem:[#allocation2 + $0x578] sm:$0xf0] }
 0x124   :  { %2959 = vmatpush.bf16.msrb.mxu0 %v8283_v26  ;;  %v8707_v21 = vor.u32 %v12146_v5, %v8704_v6  ;;  %v8568_v26 = vld [vmem:[#allocation2 + $0x468] sm:$0xf0]  ;;  %v8683_v6 = vor.u32 %v12140_v1, %v8680_v55  ;;  %v12150_v1 = vld [vmem:[#allocation2 + $0x594] sm:$0xf]  ;;  %v8720_v55 = vld [vmem:[#allocation2 + $0x598] sm:$0xf0] }
 0x125   :  { %2972 = vmatpush.bf16.msrb.mxu1 %v8347_v34  ;;  %v8771_v34 = vor.u32 %v12162_v10, %v8768_v13  ;;  %v8571_v43 = vor.u32 %v12112_v24, %v8568_v26  ;;  %v12122_v10 = vld [vmem:[#allocation2 + $0x4b4] sm:$0xf]  ;;  %v8736_v26 = vld [vmem:[#allocation2 + $0x5b8] sm:$0xf0] }
 0x126   :  { %2985 = vmatpush.bf16.msrb.mxu2 %v8411_v36  ;;  %v8632_v36 = vld [vmem:[#allocation2 + $0x4e8] sm:$0xf0]  ;;  %v12154_v24 = vld [vmem:[#allocation2 + $0x5b4] sm:$0xf] }
 0x127   :  { %2998 = vmatpush.bf16.msrb.mxu3 %v8475_v40  ;;  %v8760_v40 = vld [vmem:[#allocation2 + $0x5e8] sm:$0xf0]  ;;  %v8635_v47 = vor.u32 %v12128_v27, %v8632_v36  ;;  %v12104_v36 = vld [vmem:[#allocation2 + $0x424] sm:$0xf] }
 0x128   :  { %2960 = vmatpush.bf16.msrb.mxu0 %v8275_v50  ;;  %v12126_v50 = vld [vmem:[#allocation2 + $0x4d4] sm:$0xf]  ;;  %v8763_v22 = vor.u32 %v12160_v18, %v8760_v40  ;;  %v8739_v18 = vor.u32 %v12154_v24, %v8736_v26 }
 0x129   :  { %2973 = vmatpush.bf16.msrb.mxu1 %v8339_v52  ;;  %v12142_v52 = vld [vmem:[#allocation2 + $0x554] sm:$0xf] }
 0x12a   :  { %2986 = vmatpush.bf16.msrb.mxu2 %v8403_v54  ;;  %v8688_v54 = vld [vmem:[#allocation2 + $0x558] sm:$0xf0] }
 0x12b   :  { %2999 = vmatpush.bf16.msrb.mxu3 %v8467_v59  ;;  %v8627_v59 = vor.u32 %v12126_v50, %v8624_v51  ;;  %v8691_v60 = vor.u32 %v12142_v52, %v8688_v54  ;;  %v12152_v50 = vld [vmem:[#allocation2 + $0x5a4] sm:$0xf]  ;;  %v8539_v52 = vor.u32 %v12104_v36, %v8536_v39 }
 0x12c   :  { %2961 = vmatpush.bf16.msrb.mxu0 %v8267_v3  ;;  %v2755_v2 = vpop.f32.mrf.mxu0  ;;  %v8744_v3 = vld [vmem:[#allocation2 + $0x5c8] sm:$0xf0] }
 0x12d   :  { %2974 = vmatpush.bf16.msrb.mxu1 %v8331_v8  ;;  %v12106_v8 = vld [vmem:[#allocation2 + $0x434] sm:$0xf] }
 0x12e   :  { %2987 = vmatpush.bf16.msrb.mxu2 %v8395_v9  ;;  %v8544_v9 = vld [vmem:[#allocation2 + $0x438] sm:$0xf0] }
 0x12f   :  { %3000 = vmatpush.bf16.msrb.mxu3 %v8459_v14  ;;  %2962 = vmatmul.bf16.vlgmr.msrb.gmra.mxu0 %v13372_v41  ;;  %v12156_v41 = vld [vmem:[#allocation2 + $0x5c4] sm:$0xf]  ;;  %v8547_v27 = vor.u32 %v12106_v8, %v8544_v9  ;;  %v8723_v8 = vor.u32 %v12150_v1, %v8720_v55  ;;  %v8648_v9 = vld [vmem:[#allocation2 + $0x508] sm:$0xf0]  ;;  %v8880_v1 = vld [vmem:[#allocation2 + $0x6d8] sm:$0xf0] }
 0x130   :  { %3006 = vmatpush.bf16.msra.mxu0 %v8579_v15  ;;  %2975 = vmatmul.bf16.vlgmr.msrb.gmra.mxu1 %v13376_v44  ;;  %v2768_v44 = vpop.f32.mrf.mxu1  ;;  %v8747_v13 = vor.u32 %v12156_v41, %v8744_v3  ;;  %v8608_v15 = vld [vmem:[#allocation2 + $0x4b8] sm:$0xf0]  ;;  %v12100_v41 = vld [vmem:[#allocation2 + $0x404] sm:$0xf]  ;;  %v8520_v3 = vld [vmem:[#allocation2 + $0x408] sm:$0xf0] }
 0x131   :  { %3019 = vmatpush.bf16.msra.mxu1 %v8643_v17  ;;  %2988 = vmatmul.bf16.vlgmr.msrb.gmra.mxu2 %v13370_v38  ;;  %v12124_v38 = vld [vmem:[#allocation2 + $0x4c4] sm:$0xf]  ;;  %v12138_v17 = vld [vmem:[#allocation2 + $0x534] sm:$0xf]  ;;  %v8523_v26 = vor.u32 %v12100_v41, %v8520_v3  ;;  %v9008_v3 = vld [vmem:[#allocation2 + $0x7d8] sm:$0xf0] }
 0x132   :  { %3032 = vmatpush.bf16.msra.mxu2 %v8707_v21  ;;  %3001 = vmatmul.bf16.vlgmr.msrb.gmra.mxu3 %v13374_v42  ;;  %v2756_v42 = vadd.f32 %v2755_v2, %v13464_v32  ;;  %v8619_v5 = vor.u32 %v12124_v38, %v8616_v0  ;;  %v8672_v21 = vld [vmem:[#allocation2 + $0x538] sm:$0xf0]  ;;  %v8611_v32 = vor.u32 %v12122_v10, %v8608_v15  ;;  %v12148_v10 = vld [vmem:[#allocation2 + $0x584] sm:$0xf]  ;;  %v12178_v15 = vld [vmem:[#allocation2 + $0x674] sm:$0xf] }
 0x133   :  { %3045 = vmatpush.bf16.msra.mxu3 %v8771_v34  ;;  %v8675_v34 = vor.u32 %v12138_v17, %v8672_v21  ;;  %v8592_v38 = vld [vmem:[#allocation2 + $0x498] sm:$0xf0]  ;;  %v12194_v21 = vld [vmem:[#allocation2 + $0x6f4] sm:$0xf] }
 0x134   :  { %3007 = vmatpush.bf16.msra.mxu0 %v8571_v43  ;;  %v2769_v14 = vadd.f32 %v2768_v44, %v2756_v42  ;;  %v2781_v40 = vpop.f32.mrf.mxu2  ;;  %v8600_v43 = vld [vmem:[#allocation2 + $0x4a8] sm:$0xf0]  ;;  %v2757_v51 = vpop.f32.mrf.mxu0  ;;  %v8656_v0 = vld [vmem:[#allocation2 + $0x518] sm:$0xf0]  ;;  %v8595_v42 = vor.u32 %v12118_v61, %v8592_v38  ;;  %v12116_v44 = vld [vmem:[#allocation2 + $0x484] sm:$0xf] }
 0x135   :  { %3020 = vmatpush.bf16.msra.mxu1 %v8635_v47  ;;  %v12136_v47 = vld [vmem:[#allocation2 + $0x524] sm:$0xf]  ;;  %v2794_v20 = vpop.f32.mrf.mxu3  ;;  %v8603_v57 = vor.u32 %v12120_v53, %v8600_v43  ;;  %v8832_v17 = vld [vmem:[#allocation2 + $0x678] sm:$0xf0]  ;;  %v12226_v53 = vld [vmem:[#allocation2 + $0x7f4] sm:$0xf] }
 0x136   :  { %3033 = vmatpush.bf16.msra.mxu2 %v8699_v19  ;;  %v8664_v19 = vld [vmem:[#allocation2 + $0x528] sm:$0xf0]  ;;  %v2782_v48 = vadd.f32 %v2781_v40, %v2769_v14  ;;  %v8835_v43 = vor.u32 %v12178_v15, %v8832_v17  ;;  %v8816_v38 = vld [vmem:[#allocation2 + $0x658] sm:$0xf0]  ;;  %v12206_v55 = vld [vmem:[#allocation2 + $0x754] sm:$0xf] }
 0x137   :  { %3046 = vmatpush.bf16.msra.mxu3 %v8763_v22  ;;  %v8728_v22 = vld [vmem:[#allocation2 + $0x5a8] sm:$0xf0]  ;;  %v12222_v41 = vld [vmem:[#allocation2 + $0x7d4] sm:$0xf] }
 0x138   :  { %3008 = vmatpush.bf16.msra.mxu0 %v8563_v58  ;;  %v2770_v54 = vpop.f32.mrf.mxu1  ;;  %v13471_v56 = vadd.f32 %v2794_v20, %v2782_v48  ;;  %v8667_v58 = vor.u32 %v12136_v47, %v8664_v19  ;;  %v8731_v62 = vor.u32 %v12152_v50, %v8728_v22  ;;  %v12176_v48 = vld [vmem:[#allocation2 + $0x664] sm:$0xf]  ;;  %v8824_v20 = vld [vmem:[#allocation2 + $0x668] sm:$0xf0] }
 0x139   :  { %3021 = vmatpush.bf16.msra.mxu1 %v8627_v59  ;;  %v12102_v59 = vld [vmem:[#allocation2 + $0x414] sm:$0xf]  ;;  %v12192_v50 = vld [vmem:[#allocation2 + $0x6e4] sm:$0xf]  ;;  %v8888_v51 = vld [vmem:[#allocation2 + $0x6e8] sm:$0xf0] }
 0x13a   :  { %3034 = vmatpush.bf16.msra.mxu2 %v8691_v60  ;;  %v8528_v60 = vld [vmem:[#allocation2 + $0x418] sm:$0xf0]  ;;  %v8952_v54 = vld [vmem:[#allocation2 + $0x768] sm:$0xf0] }
 0x13b   :  { %3047 = vmatpush.bf16.msra.mxu3 %v8755_v63  ;;  %v12134_v63 = vld [vmem:[#allocation2 + $0x514] sm:$0xf]  ;;  %v8531_v2 = vor.u32 %v12102_v59, %v8528_v60  ;;  %v8827_v59 = vor.u32 %v12176_v48, %v8824_v20  ;;  %v8891_v60 = vor.u32 %v12192_v50, %v8888_v51  ;;  %v12168_v48 = vld [vmem:[#allocation2 + $0x624] sm:$0xf]  ;;  %v8792_v20 = vld [vmem:[#allocation2 + $0x628] sm:$0xf0] }
 0x13c   :  { %3009 = vmatpush.bf16.msra.mxu0 %v8555_v4  ;;  %v8659_v4 = vor.u32 %v12134_v63, %v8656_v0  ;;  %v2783_v14 = vpop.f32.mrf.mxu2  ;;  %v12190_v63 = vld [vmem:[#allocation2 + $0x6d4] sm:$0xf]  ;;  %v12184_v50 = vld [vmem:[#allocation2 + $0x6a4] sm:$0xf] }
 0x13d   :  { %3022 = vmatpush.bf16.msra.mxu1 %v8619_v5  ;;  %v8584_v5 = vld [vmem:[#allocation2 + $0x488] sm:$0xf0]  ;;  %v2796_v24 = vpop.f32.mrf.mxu3 }
 0x13e   :  { %3035 = vmatpush.bf16.msra.mxu2 %v8683_v6  ;;  %v12132_v6 = vld [vmem:[#allocation2 + $0x504] sm:$0xf]  ;;  %v8587_v36 = vor.u32 %v12116_v44, %v8584_v5  ;;  %v9000_v14 = vld [vmem:[#allocation2 + $0x7c8] sm:$0xf0] }
 0x13f   :  { %3048 = vmatpush.bf16.msra.mxu3 %v8747_v13  ;;  %v8712_v13 = vld [vmem:[#allocation2 + $0x588] sm:$0xf0]  ;;  %v8651_v39 = vor.u32 %v12132_v6, %v8648_v9  ;;  %v12172_v5 = vld [vmem:[#allocation2 + $0x644] sm:$0xf] }
 0x140   :  { %3010 = vmatpush.bf16.msra.mxu0 %v8547_v27  ;;  %v8896_v27 = vld [vmem:[#allocation2 + $0x6f8] sm:$0xf0]  ;;  %v8715_v40 = vor.u32 %v12148_v10, %v8712_v13  ;;  %v12188_v6 = vld [vmem:[#allocation2 + $0x6c4] sm:$0xf]  ;;  %v8872_v9 = vld [vmem:[#allocation2 + $0x6c8] sm:$0xf0] }
 0x141   :  { %3023 = vmatpush.bf16.msra.mxu1 %v8611_v32  ;;  %v12210_v32 = vld [vmem:[#allocation2 + $0x774] sm:$0xf]  ;;  %v8899_v47 = vor.u32 %v12194_v21, %v8896_v27  ;;  %v12204_v10 = vld [vmem:[#allocation2 + $0x744] sm:$0xf]  ;;  %v8875_v21 = vor.u32 %v12188_v6, %v8872_v9  ;;  %v8800_v27 = vld [vmem:[#allocation2 + $0x638] sm:$0xf0] }
 0x142   :  { %3036 = vmatpush.bf16.msra.mxu2 %v8675_v34  ;;  %v8960_v34 = vld [vmem:[#allocation2 + $0x778] sm:$0xf0]  ;;  %v12164_v9 = vld [vmem:[#allocation2 + $0x604] sm:$0xf] }
 0x143   :  { %3049 = vmatpush.bf16.msra.mxu3 %v8739_v18  ;;  %v9024_v18 = vld [vmem:[#allocation2 + $0x7f8] sm:$0xf0]  ;;  %v8963_v19 = vor.u32 %v12210_v32, %v8960_v34  ;;  %v12186_v32 = vld [vmem:[#allocation2 + $0x6b4] sm:$0xf] }
 0x144   :  { %3011 = vmatpush.bf16.msra.mxu0 %v8539_v52  ;;  %v9027_v22 = vor.u32 %v12226_v53, %v9024_v18  ;;  %v12208_v52 = vld [vmem:[#allocation2 + $0x764] sm:$0xf]  ;;  %v12202_v53 = vld [vmem:[#allocation2 + $0x734] sm:$0xf]  ;;  %v8928_v18 = vld [vmem:[#allocation2 + $0x738] sm:$0xf0] }
 0x145   :  { %3024 = vmatpush.bf16.msra.mxu1 %v8603_v57  ;;  %v12224_v57 = vld [vmem:[#allocation2 + $0x7e4] sm:$0xf]  ;;  %v8955_v61 = vor.u32 %v12208_v52, %v8952_v54  ;;  %v8856_v52 = vld [vmem:[#allocation2 + $0x6a8] sm:$0xf0]  ;;  %v8976_v6 = vld [vmem:[#allocation2 + $0x798] sm:$0xf0] }
 0x146   :  { %3037 = vmatpush.bf16.msra.mxu2 %v8667_v58  ;;  %v9016_v58 = vld [vmem:[#allocation2 + $0x7e8] sm:$0xf0]  ;;  %v12200_v54 = vld [vmem:[#allocation2 + $0x724] sm:$0xf] }
 0x147   :  { %3050 = vmatpush.bf16.msra.mxu3 %v8731_v62  ;;  %v12174_v62 = vld [vmem:[#allocation2 + $0x654] sm:$0xf]  ;;  %v9019_v0 = vor.u32 %v12224_v57, %v9016_v58  ;;  %v8920_v57 = vld [vmem:[#allocation2 + $0x728] sm:$0xf0] }
 0x148   :  { %3012 = vmatpush.bf16.msra.mxu0 %v8531_v2  ;;  %v8944_v2 = vld [vmem:[#allocation2 + $0x758] sm:$0xf0] }
 0x149   :  { %3025 = vmatpush.bf16.msra.mxu1 %v8595_v42  ;;  %v8819_v42 = vor.u32 %v12174_v62, %v8816_v38  ;;  %v8947_v44 = vor.u32 %v12206_v55, %v8944_v2  ;;  %v8795_v38 = vor.u32 %v12168_v48, %v8792_v20  ;;  %v8923_v55 = vor.u32 %v12200_v54, %v8920_v57  ;;  %v12166_v2 = vld [vmem:[#allocation2 + $0x614] sm:$0xf]  ;;  %v12256_v54 = vld [vmem:[#allocation2 + $0x8e4] sm:$0xf] }
 0x14a   :  { %3038 = vmatpush.bf16.msra.mxu2 %v8659_v4  ;;  %v8883_v4 = vor.u32 %v12190_v63, %v8880_v1  ;;  %v8859_v1 = vor.u32 %v12184_v50, %v8856_v52  ;;  %v9080_v52 = vld [vmem:[#allocation2 + $0x868] sm:$0xf0] }
 0x14b   :  { %3051 = vmatpush.bf16.msra.mxu3 %v8723_v8  ;;  %v9011_v8 = vor.u32 %v12222_v41, %v9008_v3  ;;  %v8784_v41 = vld [vmem:[#allocation2 + $0x618] sm:$0xf0]  ;;  %v12182_v3 = vld [vmem:[#allocation2 + $0x694] sm:$0xf] }
 0x14c   :  { %3013 = vmatpush.bf16.msra.mxu0 %v8523_v26  ;;  %v2807_v13 = vpop.f32.mrf.mxu0  ;;  %v12170_v26 = vld [vmem:[#allocation2 + $0x634] sm:$0xf] }
 0x14d   :  { %3026 = vmatpush.bf16.msra.mxu1 %v8587_v36  ;;  %v2820_v17 = vpop.f32.mrf.mxu1 }
 0x14e   :  { %3039 = vmatpush.bf16.msra.mxu2 %v8651_v39  ;;  %v8864_v39 = vld [vmem:[#allocation2 + $0x6b8] sm:$0xf0] }
 0x14f   :  { %3052 = vmatpush.bf16.msra.mxu3 %v8715_v40  ;;  %3014 = vmatmul.bf16.vlgmr.msra.gmra.mxu0 %v13388_v25  ;;  %v8808_v25 = vld [vmem:[#allocation2 + $0x648] sm:$0xf0]  ;;  %v12218_v40 = vld [vmem:[#allocation2 + $0x7b4] sm:$0xf] }
 0x150   :  { %3058 = vmatpush.bf16.msrb.mxu0 %v8835_v43  ;;  %3027 = vmatmul.bf16.vlgmr.msra.gmra.mxu1 %v13392_v30  ;;  %v12220_v30 = vld [vmem:[#allocation2 + $0x7c4] sm:$0xf]  ;;  %v8811_v15 = vor.u32 %v12172_v5, %v8808_v25  ;;  %v8992_v43 = vld [vmem:[#allocation2 + $0x7b8] sm:$0xf0]  ;;  %v12214_v25 = vld [vmem:[#allocation2 + $0x794] sm:$0xf] }
 0x151   :  { %3071 = vmatpush.bf16.msrb.mxu1 %v8899_v47  ;;  %3040 = vmatmul.bf16.vlgmr.msra.gmra.mxu2 %v13390_v29  ;;  %v8936_v29 = vld [vmem:[#allocation2 + $0x748] sm:$0xf0]  ;;  %v9003_v34 = vor.u32 %v12220_v30, %v9000_v14  ;;  %v8803_v47 = vor.u32 %v12170_v26, %v8800_v27  ;;  %v8912_v5 = vld [vmem:[#allocation2 + $0x718] sm:$0xf0]  ;;  %v12180_v30 = vld [vmem:[#allocation2 + $0x684] sm:$0xf] }
 0x152   :  { %3084 = vmatpush.bf16.msrb.mxu2 %v8963_v19  ;;  %3053 = vmatmul.bf16.vlgmr.msra.gmra.mxu3 %v13394_v33  ;;  %v2808_v33 = vadd.f32 %v2807_v13, %v13471_v56  ;;  %v8939_v24 = vor.u32 %v12204_v10, %v8936_v29  ;;  %v8867_v56 = vor.u32 %v12186_v32, %v8864_v39  ;;  %v8776_v10 = vld [vmem:[#allocation2 + $0x608] sm:$0xf0]  ;;  %v12242_v27 = vld [vmem:[#allocation2 + $0x874] sm:$0xf]  ;;  %v9088_v32 = vld [vmem:[#allocation2 + $0x878] sm:$0xf0] }
 0x153   :  { %3097 = vmatpush.bf16.msrb.mxu3 %v9027_v22  ;;  %v8931_v19 = vor.u32 %v12202_v53, %v8928_v18  ;;  %v8995_v22 = vor.u32 %v12218_v40, %v8992_v43  ;;  %v8840_v14 = vld [vmem:[#allocation2 + $0x688] sm:$0xf0]  ;;  %v8779_v39 = vor.u32 %v12164_v9, %v8776_v10  ;;  %v9152_v53 = vld [vmem:[#allocation2 + $0x8f8] sm:$0xf0]  ;;  %v12274_v18 = vld [vmem:[#allocation2 + $0x974] sm:$0xf]  ;;  %v9091_v20 = vor.u32 %v12242_v27, %v9088_v32 }
 0x154   :  { %3059 = vmatpush.bf16.msrb.mxu0 %v8827_v59  ;;  %v2821_v36 = vadd.f32 %v2820_v17, %v2808_v33  ;;  %v2833_v51 = vpop.f32.mrf.mxu2  ;;  %v2809_v62 = vpop.f32.mrf.mxu0  ;;  %v12196_v33 = vld [vmem:[#allocation2 + $0x704] sm:$0xf]  ;;  %v8904_v17 = vld [vmem:[#allocation2 + $0x708] sm:$0xf0]  ;;  %v9216_v40 = vld [vmem:[#allocation2 + $0x978] sm:$0xf0]  ;;  %v8843_v43 = vor.u32 %v12180_v30, %v8840_v14 }
 0x155   :  { %3072 = vmatpush.bf16.msrb.mxu1 %v8891_v60  ;;  %v2846_v59 = vpop.f32.mrf.mxu3  ;;  %v12216_v60 = vld [vmem:[#allocation2 + $0x7a4] sm:$0xf]  ;;  %v2822_v63 = vpop.f32.mrf.mxu1  ;;  %v9272_v62 = vld [vmem:[#allocation2 + $0x9e8] sm:$0xf0]  ;;  %v12234_v27 = vld [vmem:[#allocation2 + $0x834] sm:$0xf] }
 0x156   :  { %3085 = vmatpush.bf16.msrb.mxu2 %v8955_v61  ;;  %v2834_v58 = vadd.f32 %v2833_v51, %v2821_v36  ;;  %v8984_v61 = vld [vmem:[#allocation2 + $0x7a8] sm:$0xf0]  ;;  %v12240_v51 = vld [vmem:[#allocation2 + $0x864] sm:$0xf]  ;;  %v9056_v32 = vld [vmem:[#allocation2 + $0x838] sm:$0xf0] }
 0x157   :  { %3098 = vmatpush.bf16.msrb.mxu3 %v9019_v0  ;;  %v12236_v10 = vld [vmem:[#allocation2 + $0x844] sm:$0xf]  ;;  %v9128_v30 = vld [vmem:[#allocation2 + $0x8c8] sm:$0xf0] }
 0x158   :  { %3060 = vmatpush.bf16.msrb.mxu0 %v8819_v42  ;;  %v13478_v0 = vadd.f32 %v2846_v59, %v2834_v58  ;;  %v8987_v42 = vor.u32 %v12216_v60, %v8984_v61  ;;  %v9144_v58 = vld [vmem:[#allocation2 + $0x8e8] sm:$0xf0]  ;;  %v12272_v59 = vld [vmem:[#allocation2 + $0x964] sm:$0xf] }
 0x159   :  { %3073 = vmatpush.bf16.msrb.mxu1 %v8883_v4  ;;  %v8848_v4 = vld [vmem:[#allocation2 + $0x698] sm:$0xf0]  ;;  %v9208_v60 = vld [vmem:[#allocation2 + $0x968] sm:$0xf0]  ;;  %v12288_v61 = vld [vmem:[#allocation2 + $0x9e4] sm:$0xf]  ;;  %v9147_v63 = vor.u32 %v12256_v54, %v9144_v58 }
 0x15a   :  { %3086 = vmatpush.bf16.msrb.mxu2 %v8947_v44  ;;  %v12198_v44 = vld [vmem:[#allocation2 + $0x714] sm:$0xf]  ;;  %v8851_v29 = vor.u32 %v12182_v3, %v8848_v4  ;;  %v9275_v3 = vor.u32 %v12288_v61, %v9272_v62  ;;  %v12268_v14 = vld [vmem:[#allocation2 + $0x944] sm:$0xf]  ;;  %v9240_v61 = vld [vmem:[#allocation2 + $0x9a8] sm:$0xf0] }
 0x15b   :  { %3099 = vmatpush.bf16.msrb.mxu3 %v9011_v8  ;;  %v8787_v8 = vor.u32 %v12166_v2, %v8784_v41  ;;  %v8915_v13 = vor.u32 %v12198_v44, %v8912_v5  ;;  %v9072_v2 = vld [vmem:[#allocation2 + $0x858] sm:$0xf0]  ;;  %v12254_v41 = vld [vmem:[#allocation2 + $0x8d4] sm:$0xf]  ;;  %v12264_v54 = vld [vmem:[#allocation2 + $0x924] sm:$0xf] }
 0x15c   :  { %3061 = vmatpush.bf16.msrb.mxu0 %v8811_v15  ;;  %v8979_v15 = vor.u32 %v12214_v25, %v8976_v6  ;;  %v2835_v26 = vpop.f32.mrf.mxu2  ;;  %v12270_v4 = vld [vmem:[#allocation2 + $0x954] sm:$0xf]  ;;  %v9200_v44 = vld [vmem:[#allocation2 + $0x958] sm:$0xf0] }
 0x15d   :  { %3074 = vmatpush.bf16.msrb.mxu1 %v8875_v21  ;;  %v12212_v21 = vld [vmem:[#allocation2 + $0x784] sm:$0xf]  ;;  %v2848_v36 = vpop.f32.mrf.mxu3  ;;  %v12286_v5 = vld [vmem:[#allocation2 + $0x9d4] sm:$0xf]  ;;  %v9264_v25 = vld [vmem:[#allocation2 + $0x9d8] sm:$0xf0]  ;;  %v9203_v9 = vor.u32 %v12270_v4, %v9200_v44 }
 0x15e   :  { %3087 = vmatpush.bf16.msrb.mxu2 %v8939_v24  ;;  %v8968_v24 = vld [vmem:[#allocation2 + $0x788] sm:$0xf0]  ;;  %v9104_v44 = vld [vmem:[#allocation2 + $0x898] sm:$0xf0] }
 0x15f   :  { %3100 = vmatpush.bf16.msrb.mxu3 %v9003_v34  ;;  %v12258_v34 = vld [vmem:[#allocation2 + $0x8f4] sm:$0xf]  ;;  %v8971_v48 = vor.u32 %v12212_v21, %v8968_v24 }
 0x160   :  { %3062 = vmatpush.bf16.msrb.mxu0 %v8803_v47  ;;  %v8907_v47 = vor.u32 %v12196_v33, %v8904_v17  ;;  %v9155_v50 = vor.u32 %v12258_v34, %v9152_v53  ;;  %v12250_v34 = vld [vmem:[#allocation2 + $0x8b4] sm:$0xf]  ;;  %v9120_v53 = vld [vmem:[#allocation2 + $0x8b8] sm:$0xf0] }
 0x161   :  { %3075 = vmatpush.bf16.msrb.mxu1 %v8867_v56  ;;  %v12290_v56 = vld [vmem:[#allocation2 + $0x9f4] sm:$0xf] }
 0x162   :  { %3088 = vmatpush.bf16.msrb.mxu2 %v8931_v19  ;;  %v9280_v19 = vld [vmem:[#allocation2 + $0x9f8] sm:$0xf0] }
 0x163   :  { %3101 = vmatpush.bf16.msrb.mxu3 %v8995_v22  ;;  %v9219_v22 = vor.u32 %v12274_v18, %v9216_v40  ;;  %v9283_v57 = vor.u32 %v12290_v56, %v9280_v19  ;;  %v12266_v18 = vld [vmem:[#allocation2 + $0x934] sm:$0xf]  ;;  %v9184_v40 = vld [vmem:[#allocation2 + $0x938] sm:$0xf0]  ;;  %v9059_v56 = vor.u32 %v12234_v27, %v9056_v32 }
 0x164   :  { %3063 = vmatpush.bf16.msrb.mxu0 %v8795_v38  ;;  %v9083_v38 = vor.u32 %v12240_v51, %v9080_v52  ;;  %v9187_v19 = vor.u32 %v12266_v18, %v9184_v40  ;;  %v9112_v52 = vld [vmem:[#allocation2 + $0x8a8] sm:$0xf0]  ;;  %v12354_v40 = vld [vmem:[#allocation2 + $0xbf4] sm:$0xf] }
 0x165   :  { %3076 = vmatpush.bf16.msrb.mxu1 %v8859_v1  ;;  %v9211_v1 = vor.u32 %v12272_v59, %v9208_v60  ;;  %v12280_v60 = vld [vmem:[#allocation2 + $0x9a4] sm:$0xf] }
 0x166   :  { %3089 = vmatpush.bf16.msrb.mxu2 %v8923_v55  ;;  %v12238_v55 = vld [vmem:[#allocation2 + $0x854] sm:$0xf]  ;;  %v9243_v4 = vor.u32 %v12280_v60, %v9240_v61 }
 0x167   :  { %3102 = vmatpush.bf16.msrb.mxu3 %v8987_v42  ;;  %v9136_v42 = vld [vmem:[#allocation2 + $0x8d8] sm:$0xf0]  ;;  %v9075_v6 = vor.u32 %v12238_v55, %v9072_v2 }
 0x168   :  { %3064 = vmatpush.bf16.msrb.mxu0 %v8787_v8  ;;  %v9139_v8 = vor.u32 %v12254_v41, %v9136_v42  ;;  %v12230_v41 = vld [vmem:[#allocation2 + $0x814] sm:$0xf] }
 0x169   :  { %3077 = vmatpush.bf16.msrb.mxu1 %v8851_v29  ;;  %v12252_v29 = vld [vmem:[#allocation2 + $0x8c4] sm:$0xf]  ;;  %v12246_v42 = vld [vmem:[#allocation2 + $0x894] sm:$0xf] }
 0x16a   :  { %3090 = vmatpush.bf16.msrb.mxu2 %v8915_v13  ;;  %v9267_v13 = vor.u32 %v12286_v5, %v9264_v25  ;;  %v9131_v24 = vor.u32 %v12252_v29, %v9128_v30  ;;  %v12262_v5 = vld [vmem:[#allocation2 + $0x914] sm:$0xf]  ;;  %v9168_v25 = vld [vmem:[#allocation2 + $0x918] sm:$0xf0]  ;;  %v9107_v29 = vor.u32 %v12246_v42, %v9104_v44  ;;  %v12244_v30 = vld [vmem:[#allocation2 + $0x884] sm:$0xf] }
 0x16b   :  { %3103 = vmatpush.bf16.msrb.mxu3 %v8979_v15  ;;  %v9256_v15 = vld [vmem:[#allocation2 + $0x9c8] sm:$0xf0]  ;;  %v12350_v42 = vld [vmem:[#allocation2 + $0xbd4] sm:$0xf] }
 0x16c   :  { %3065 = vmatpush.bf16.msrb.mxu0 %v8779_v39  ;;  %v2859_v33 = vpop.f32.mrf.mxu0 }
 0x16d   :  { %3078 = vmatpush.bf16.msrb.mxu1 %v8843_v43  ;;  %v2872_v21 = vpop.f32.mrf.mxu1  ;;  %v12282_v43 = vld [vmem:[#allocation2 + $0x9b4] sm:$0xf] }
 0x16e   :  { %3091 = vmatpush.bf16.msrb.mxu2 %v8907_v47  ;;  %v9248_v47 = vld [vmem:[#allocation2 + $0x9b8] sm:$0xf0] }
 0x16f   :  { %3104 = vmatpush.bf16.msrb.mxu3 %v8971_v48  ;;  %3066 = vmatmul.bf16.vlgmr.msrb.gmra.mxu0 %v13406_v23  ;;  %v9064_v23 = vld [vmem:[#allocation2 + $0x848] sm:$0xf0]  ;;  %v12232_v48 = vld [vmem:[#allocation2 + $0x824] sm:$0xf] }
 0x170   :  { %3110 = vmatpush.bf16.msra.mxu0 %v9091_v20  ;;  %3079 = vmatmul.bf16.vlgmr.msrb.gmra.mxu1 %v13410_v31  ;;  %v12284_v31 = vld [vmem:[#allocation2 + $0x9c4] sm:$0xf]  ;;  %v9067_v17 = vor.u32 %v12236_v10, %v9064_v23  ;;  %v9048_v20 = vld [vmem:[#allocation2 + $0x828] sm:$0xf0] }
 0x171   :  { %3123 = vmatpush.bf16.msra.mxu1 %v9155_v50  ;;  %3092 = vmatmul.bf16.vlgmr.msrb.gmra.mxu2 %v13408_v28  ;;  %v9192_v28 = vld [vmem:[#allocation2 + $0x948] sm:$0xf0]  ;;  %v9259_v36 = vor.u32 %v12284_v31, %v9256_v15  ;;  %v12248_v50 = vld [vmem:[#allocation2 + $0x8a4] sm:$0xf] }
 0x172   :  { %3136 = vmatpush.bf16.msra.mxu2 %v9219_v22  ;;  %3105 = vmatmul.bf16.vlgmr.msrb.gmra.mxu3 %v13412_v35  ;;  %v2860_v35 = vadd.f32 %v2859_v33, %v13478_v0  ;;  %v9195_v26 = vor.u32 %v12268_v14, %v9192_v28  ;;  %v9123_v0 = vor.u32 %v12250_v34, %v9120_v53  ;;  %v12228_v10 = vld [vmem:[#allocation2 + $0x804] sm:$0xf]  ;;  %v9032_v23 = vld [vmem:[#allocation2 + $0x808] sm:$0xf0]  ;;  %v9408_v34 = vld [vmem:[#allocation2 + $0xaf8] sm:$0xf0] }
 0x173   :  { %3149 = vmatpush.bf16.msra.mxu3 %v9283_v57  ;;  %v9251_v22 = vor.u32 %v12282_v43, %v9248_v47  ;;  %v9176_v57 = vld [vmem:[#allocation2 + $0x928] sm:$0xf0]  ;;  %v9115_v55 = vor.u32 %v12248_v50, %v9112_v52  ;;  %v12260_v28 = vld [vmem:[#allocation2 + $0x904] sm:$0xf]  ;;  %v9035_v32 = vor.u32 %v12228_v10, %v9032_v23  ;;  %v9536_v43 = vld [vmem:[#allocation2 + $0xbf8] sm:$0xf0] }
 0x174   :  { %3111 = vmatpush.bf16.msra.mxu0 %v9083_v38  ;;  %v2873_v39 = vadd.f32 %v2872_v21, %v2860_v35  ;;  %v2885_v51 = vpop.f32.mrf.mxu2  ;;  %v2861_v62 = vpop.f32.mrf.mxu0  ;;  %v9051_v38 = vor.u32 %v12232_v48, %v9048_v20  ;;  %v9179_v2 = vor.u32 %v12264_v54, %v9176_v57  ;;  %v9096_v14 = vld [vmem:[#allocation2 + $0x888] sm:$0xf0]  ;;  %v12276_v15 = vld [vmem:[#allocation2 + $0x984] sm:$0xf]  ;;  %v12306_v21 = vld [vmem:[#allocation2 + $0xa74] sm:$0xf] }
 0x175   :  { %3124 = vmatpush.bf16.msra.mxu1 %v9147_v63  ;;  %v2898_v59 = vpop.f32.mrf.mxu3  ;;  %v2874_v63 = vpop.f32.mrf.mxu1  ;;  %v9160_v31 = vld [vmem:[#allocation2 + $0x908] sm:$0xf0]  ;;  %v9099_v53 = vor.u32 %v12244_v30, %v9096_v14  ;;  %v12304_v48 = vld [vmem:[#allocation2 + $0xa64] sm:$0xf]  ;;  %v12302_v62 = vld [vmem:[#allocation2 + $0xa54] sm:$0xf] }
 0x176   :  { %3137 = vmatpush.bf16.msra.mxu2 %v9211_v1  ;;  %v2886_v58 = vadd.f32 %v2885_v51, %v2873_v39  ;;  %v9224_v35 = vld [vmem:[#allocation2 + $0x988] sm:$0xf0]  ;;  %v9472_v39 = vld [vmem:[#allocation2 + $0xb78] sm:$0xf0]  ;;  %v9163_v18 = vor.u32 %v12260_v28, %v9160_v31  ;;  %v12320_v50 = vld [vmem:[#allocation2 + $0xae4] sm:$0xf] }
 0x177   :  { %3150 = vmatpush.bf16.msra.mxu3 %v9275_v3  ;;  %v9040_v3 = vld [vmem:[#allocation2 + $0x818] sm:$0xf0]  ;;  %v9227_v47 = vor.u32 %v12276_v15, %v9224_v35  ;;  %v9336_v20 = vld [vmem:[#allocation2 + $0xa68] sm:$0xf0]  ;;  %v12336_v52 = vld [vmem:[#allocation2 + $0xb64] sm:$0xf] }
 0x178   :  { %3112 = vmatpush.bf16.msra.mxu0 %v9075_v6  ;;  %v13485_v1 = vadd.f32 %v2898_v59, %v2886_v58  ;;  %v12278_v6 = vld [vmem:[#allocation2 + $0x994] sm:$0xf]  ;;  %v9400_v51 = vld [vmem:[#allocation2 + $0xae8] sm:$0xf0]  ;;  %v12352_v57 = vld [vmem:[#allocation2 + $0xbe4] sm:$0xf]  ;;  %v9339_v59 = vor.u32 %v12304_v48, %v9336_v20 }
 0x179   :  { %3125 = vmatpush.bf16.msra.mxu1 %v9139_v8  ;;  %v9232_v8 = vld [vmem:[#allocation2 + $0x998] sm:$0xf0]  ;;  %v9464_v54 = vld [vmem:[#allocation2 + $0xb68] sm:$0xf0]  ;;  %v9403_v60 = vor.u32 %v12320_v50, %v9400_v51  ;;  %v12318_v63 = vld [vmem:[#allocation2 + $0xad4] sm:$0xf] }
 0x17a   :  { %3138 = vmatpush.bf16.msra.mxu2 %v9203_v9  ;;  %v9043_v9 = vor.u32 %v12230_v41, %v9040_v3  ;;  %v9235_v33 = vor.u32 %v12278_v6, %v9232_v8  ;;  %v9528_v58 = vld [vmem:[#allocation2 + $0xbe8] sm:$0xf0]  ;;  %v9467_v61 = vor.u32 %v12336_v52, %v9464_v54  ;;  %v12334_v41 = vld [vmem:[#allocation2 + $0xb54] sm:$0xf]  ;;  %v9456_v3 = vld [vmem:[#allocation2 + $0xb58] sm:$0xf0] }
 0x17b   :  { %3151 = vmatpush.bf16.msra.mxu3 %v9267_v13  ;;  %v9171_v13 = vor.u32 %v12262_v5, %v9168_v25  ;;  %v12300_v5 = vld [vmem:[#allocation2 + $0xa44] sm:$0xf]  ;;  %v9459_v6 = vor.u32 %v12334_v41, %v9456_v3  ;;  %v9512_v30 = vld [vmem:[#allocation2 + $0xbc8] sm:$0xf0]  ;;  %v12298_v31 = vld [vmem:[#allocation2 + $0xa34] sm:$0xf] }
 0x17c   :  { %3113 = vmatpush.bf16.msra.mxu0 %v9067_v17  ;;  %v2887_v17 = vpop.f32.mrf.mxu2  ;;  %v12316_v8 = vld [vmem:[#allocation2 + $0xac4] sm:$0xf]  ;;  %v9312_v15 = vld [vmem:[#allocation2 + $0xa38] sm:$0xf0]  ;;  %v12314_v35 = vld [vmem:[#allocation2 + $0xab4] sm:$0xf] }
 0x17d   :  { %3126 = vmatpush.bf16.msra.mxu1 %v9131_v24  ;;  %v9344_v24 = vld [vmem:[#allocation2 + $0xa78] sm:$0xf0]  ;;  %v2900_v27 = vpop.f32.mrf.mxu3  ;;  %v9368_v48 = vld [vmem:[#allocation2 + $0xaa8] sm:$0xf0]  ;;  %v12328_v20 = vld [vmem:[#allocation2 + $0xb24] sm:$0xf] }
 0x17e   :  { %3139 = vmatpush.bf16.msra.mxu2 %v9195_v26  ;;  %v12322_v26 = vld [vmem:[#allocation2 + $0xaf4] sm:$0xf]  ;;  %v9432_v50 = vld [vmem:[#allocation2 + $0xb28] sm:$0xf0]  ;;  %v12344_v52 = vld [vmem:[#allocation2 + $0xba4] sm:$0xf] }
 0x17f   :  { %3152 = vmatpush.bf16.msra.mxu3 %v9259_v36  ;;  %v12338_v36 = vld [vmem:[#allocation2 + $0xb74] sm:$0xf]  ;;  %v9496_v54 = vld [vmem:[#allocation2 + $0xba8] sm:$0xf0]  ;;  %v9360_v41 = vld [vmem:[#allocation2 + $0xa98] sm:$0xf0] }
 0x180   :  { %3114 = vmatpush.bf16.msra.mxu0 %v9059_v56  ;;  %v9347_v56 = vor.u32 %v12306_v21, %v9344_v24  ;;  %v12330_v27 = vld [vmem:[#allocation2 + $0xb34] sm:$0xf] }
 0x181   :  { %3127 = vmatpush.bf16.msra.mxu1 %v9123_v0  ;;  %v9411_v0 = vor.u32 %v12322_v26, %v9408_v34  ;;  %v9376_v26 = vld [vmem:[#allocation2 + $0xab8] sm:$0xf0]  ;;  %v12346_v34 = vld [vmem:[#allocation2 + $0xbb4] sm:$0xf] }
 0x182   :  { %3140 = vmatpush.bf16.msra.mxu2 %v9187_v19  ;;  %v9475_v19 = vor.u32 %v12338_v36, %v9472_v39  ;;  %v9504_v36 = vld [vmem:[#allocation2 + $0xbb8] sm:$0xf0]  ;;  %v12326_v3 = vld [vmem:[#allocation2 + $0xb14] sm:$0xf] }
 0x183   :  { %3153 = vmatpush.bf16.msra.mxu3 %v9251_v22  ;;  %v9539_v22 = vor.u32 %v12354_v40, %v9536_v43  ;;  %v12296_v43 = vld [vmem:[#allocation2 + $0xa24] sm:$0xf] }
 0x184   :  { %3115 = vmatpush.bf16.msra.mxu0 %v9051_v38  ;;  %v9328_v38 = vld [vmem:[#allocation2 + $0xa58] sm:$0xf0] }
 0x185   :  { %3128 = vmatpush.bf16.msra.mxu1 %v9115_v55  ;;  %v9531_v55 = vor.u32 %v12352_v57, %v9528_v58  ;;  %v9331_v44 = vor.u32 %v12302_v62, %v9328_v38  ;;  %v12294_v62 = vld [vmem:[#allocation2 + $0xa14] sm:$0xf]  ;;  %v9296_v38 = vld [vmem:[#allocation2 + $0xa18] sm:$0xf0] }
 0x186   :  { %3141 = vmatpush.bf16.msra.mxu2 %v9179_v2  ;;  %v9392_v2 = vld [vmem:[#allocation2 + $0xad8] sm:$0xf0] }
 0x187   :  { %3154 = vmatpush.bf16.msra.mxu3 %v9243_v4  ;;  %v9520_v4 = vld [vmem:[#allocation2 + $0xbd8] sm:$0xf0]  ;;  %v9395_v25 = vor.u32 %v12318_v63, %v9392_v2  ;;  %v12310_v63 = vld [vmem:[#allocation2 + $0xa94] sm:$0xf]  ;;  %v9499_v2 = vor.u32 %v12344_v52, %v9496_v54 }
 0x188   :  { %3116 = vmatpush.bf16.msra.mxu0 %v9043_v9  ;;  %v12983_v9 = vld [vmem:[#allocation4] sm:$0x3]  ;;  %v9523_v23 = vor.u32 %v12350_v42, %v9520_v4  ;;  %v9424_v42 = vld [vmem:[#allocation2 + $0xb18] sm:$0xf0]  ;;  %v12342_v4 = vld [vmem:[#allocation2 + $0xb94] sm:$0xf] }
 0x189   :  { %3129 = vmatpush.bf16.msra.mxu1 %v9107_v29  ;;  %v583_v10 = vperm.slane %v12983_v9, 1  ;;  %v12332_v29 = vld [vmem:[#allocation2 + $0xb44] sm:$0xf]  ;;  %v12370_v52 = vld [vmem:[#allocation6 + $0x6c] sm:$0xf0] }
 0x18a   :  { %3142 = vmatpush.bf16.msra.mxu2 %v9171_v13  ;;  %v12348_v13 = vld [vmem:[#allocation2 + $0xbc4] sm:$0xf] }
 0x18b   :  { %3155 = vmatpush.bf16.msra.mxu3 %v9235_v33  ;;  %v9515_v24 = vor.u32 %v12348_v13, %v9512_v30  ;;  %v12308_v9 = vld [vmem:[#allocation2 + $0xa84] sm:$0xf] }
 0x18c   :  { %3117 = vmatpush.bf16.msra.mxu0 %v9035_v32  ;;  %v2911_v14 = vpop.f32.mrf.mxu0  ;;  %v9440_v32 = vld [vmem:[#allocation2 + $0xb38] sm:$0xf0]  ;;  %v12340_v13 = vld [vmem:[#allocation2 + $0xb84] sm:$0xf] }
 0x18d   :  { %3130 = vmatpush.bf16.msra.mxu1 %v9099_v53  ;;  %v2912_v17 = vadd.f32 %v2911_v14, %v583_v10  ;;  %v2924_v21 = vpop.f32.mrf.mxu1  ;;  %v9315_v53 = vor.u32 %v12298_v31, %v9312_v15  ;;  %v9443_v40 = vor.u32 %v12330_v27, %v9440_v32  ;;  %v9352_v10 = vld [vmem:[#allocation2 + $0xa88] sm:$0xf0]  ;;  %v9654_v14 = vld [vmem:[#allocation6 + $0xe0] sm:$0xf]  ;;  %v12384_v31 = vld [vmem:[#allocation6 + $0xe4] sm:$0xf] }
 0x18e   :  { %3143 = vmatpush.bf16.msra.mxu2 %v9163_v18  ;;  %v9379_v18 = vor.u32 %v12314_v35, %v9376_v26  ;;  %v9656_v15 = vld [vmem:[#allocation6 + $0xf0] sm:$0xf0]  ;;  %v9355_v35 = vor.u32 %v12308_v9, %v9352_v10  ;;  %v9638_v27 = vld [vmem:[#allocation6 + $0xc0] sm:$0xf]  ;;  %v12382_v32 = vld [vmem:[#allocation6 + $0xcc] sm:$0xf0] }
 0x18f   :  { %3156 = vmatpush.bf16.msra.mxu3 %v9227_v47  ;;  %3118 = vmatmul.bf16.vlgmr.msra.gmra.mxu0 %v13424_v37  ;;  %v9320_v37 = vld [vmem:[#allocation2 + $0xa48] sm:$0xf0]  ;;  %v2925_v39 = vadd.f32 %v2924_v21, %v2912_v17  ;;  %v9659_v26 = vor.u32 %v12384_v31, %v9656_v15  ;;  %v3214_v15 = vmax.f32 %v13485_v1, 0.0 }
 0x190   :  { %3162 = vmatpush.bf16.msrb.mxu0 %v9347_v56  ;;  %3131 = vmatmul.bf16.vlgmr.msra.gmra.mxu1 %v13428_v46  ;;  %v9448_v46 = vld [vmem:[#allocation2 + $0xb48] sm:$0xf0]  ;;  %v12312_v56 = vld [vmem:[#allocation2 + $0xaa4] sm:$0xf] }
 0x191   :  { %3175 = vmatpush.bf16.msrb.mxu1 %v9411_v0  ;;  %3144 = vmatmul.bf16.vlgmr.msra.gmra.mxu2 %v13426_v45  ;;  %v9384_v45 = vld [vmem:[#allocation2 + $0xac8] sm:$0xf0]  ;;  %v9451_v33 = vor.u32 %v12332_v29, %v9448_v46  ;;  %v12324_v29 = vld [vmem:[#allocation2 + $0xb04] sm:$0xf] }
 0x192   :  { %3188 = vmatpush.bf16.msrb.mxu2 %v9475_v19  ;;  %3157 = vmatmul.bf16.vlgmr.msra.gmra.mxu3 %v13430_v49  ;;  %v9323_v49 = vor.u32 %v12300_v5, %v9320_v37  ;;  %v9387_v28 = vor.u32 %v12316_v8, %v9384_v45  ;;  %v9304_v47 = vld [vmem:[#allocation2 + $0xa28] sm:$0xf0]  ;;  %v9507_v19 = vor.u32 %v12346_v34, %v9504_v36  ;;  %v12380_v34 = vld [vmem:[#allocation6 + $0xc4] sm:$0xf]  ;;  %v9640_v36 = vld [vmem:[#allocation6 + $0xd0] sm:$0xf0] }
 0x193   :  { %3201 = vmatpush.bf16.msrb.mxu3 %v9539_v22  ;;  %v9307_v57 = vor.u32 %v12296_v43, %v9304_v47  ;;  %v9299_v5 = vor.u32 %v12294_v62, %v9296_v38  ;;  %v9427_v37 = vor.u32 %v12326_v3, %v9424_v42  ;;  %v9288_v8 = vld [vmem:[#allocation2 + $0xa08] sm:$0xf0]  ;;  %v12376_v43 = vld [vmem:[#allocation6 + $0xa4] sm:$0xf]  ;;  %v9624_v47 = vld [vmem:[#allocation6 + $0xb0] sm:$0xf0] }
 0x194   :  { %3163 = vmatpush.bf16.msrb.mxu0 %v9339_v59  ;;  %v2937_v0 = vpop.f32.mrf.mxu2  ;;  %v2913_v59 = vpop.f32.mrf.mxu0  ;;  %v9416_v46 = vld [vmem:[#allocation2 + $0xb08] sm:$0xf0]  ;;  %v9574_v62 = vld [vmem:[#allocation6 + $0x40] sm:$0xf]  ;;  %v12366_v38 = vld [vmem:[#allocation6 + $0x4c] sm:$0xf0] }
 0x195   :  { %3176 = vmatpush.bf16.msrb.mxu1 %v9403_v60  ;;  %v2938_v22 = vadd.f32 %v2937_v0, %v2925_v39  ;;  %v2950_v51 = vpop.f32.mrf.mxu3  ;;  %v9371_v60 = vor.u32 %v12312_v56, %v9368_v48  ;;  %v9419_v17 = vor.u32 %v12324_v29, %v9416_v46  ;;  %v9639_v39 = vor.u32 %v12382_v32, %v9638_v27  ;;  %v12374_v48 = vld [vmem:[#allocation6 + $0x8c] sm:$0xf0]  ;;  %v12356_v29 = vld [vmem:[#allocation6 + $0x4] sm:$0xf]  ;;  %v12381_v27 = vld [vmem:[#allocation6 + $0xcc] sm:$0xf] }
 0x196   :  { %3189 = vmatpush.bf16.msrb.mxu2 %v9467_v61  ;;  %v9435_v61 = vor.u32 %v12328_v20, %v9432_v50  ;;  %v9627_v0 = vor.u32 %v12376_v43, %v9624_v47  ;;  %v12372_v20 = vld [vmem:[#allocation6 + $0x84] sm:$0xf]  ;;  %v9608_v50 = vld [vmem:[#allocation6 + $0x90] sm:$0xf0]  ;;  %v9575_v42 = vor.u32 %v12366_v38, %v9574_v62  ;;  %v9648_v32 = vld [vmem:[#allocation6 + $0xd8] sm:$0xf0] }
 0x197   :  { %3202 = vmatpush.bf16.msrb.mxu3 %v9531_v55  ;;  %v13491_v58 = vadd.f32 %v2950_v51, %v2938_v22  ;;  %v2926_v55 = vpop.f32.mrf.mxu1  ;;  %v9611_v51 = vor.u32 %v12372_v20, %v9608_v50  ;;  %v12377_v1 = vld [vmem:[#allocation6 + $0xac] sm:$0xf]  ;;  %v9584_v38 = vld [vmem:[#allocation6 + $0x58] sm:$0xf0] }
 0x198   :  { %3164 = vmatpush.bf16.msrb.mxu0 %v9331_v44  ;;  %v9488_v44 = vld [vmem:[#allocation2 + $0xb98] sm:$0xf0]  ;;  %v12364_v55 = vld [vmem:[#allocation6 + $0x44] sm:$0xf]  ;;  %v12365_v62 = vld [vmem:[#allocation6 + $0x4c] sm:$0xf] }
 0x199   :  { %3177 = vmatpush.bf16.msrb.mxu1 %v9395_v25  ;;  %v12292_v25 = vld [vmem:[#allocation2 + $0xa04] sm:$0xf]  ;;  %v9491_v45 = vor.u32 %v12342_v4, %v9488_v44 }
 0x19a   :  { %3190 = vmatpush.bf16.msrb.mxu2 %v9459_v6  ;;  %v9363_v6 = vor.u32 %v12310_v63, %v9360_v41 }
 0x19b   :  { %3203 = vmatpush.bf16.msrb.mxu3 %v9523_v23 }
 0x19c   :  { %3165 = vmatpush.bf16.msrb.mxu0 %v9323_v49  ;;  %v2939_v23 = vpop.f32.mrf.mxu2  ;;  %v9480_v49 = vld [vmem:[#allocation2 + $0xb88] sm:$0xf0] }
 0x19d   :  { %3178 = vmatpush.bf16.msrb.mxu1 %v9387_v28  ;;  %v2952_v30 = vpop.f32.mrf.mxu3  ;;  %v12386_v28 = vld [vmem:[#allocation6 + $0xec] sm:$0xf0]  ;;  %v9483_v21 = vor.u32 %v12340_v13, %v9480_v49  ;;  %v9542_v23 = vld [vmem:[#allocation6] sm:$0xf]  ;;  %v9544_v13 = vld [vmem:[#allocation6 + $0x10] sm:$0xf0] }
 0x19e   :  { %3191 = vmatpush.bf16.msrb.mxu2 %v9451_v33  ;;  %v9291_v33 = vor.u32 %v12292_v25, %v9288_v8  ;;  %v12362_v25 = vld [vmem:[#allocation6 + $0x2c] sm:$0xf0]  ;;  %v9560_v8 = vld [vmem:[#allocation6 + $0x30] sm:$0xf0]  ;;  %v9662_v30 = vld [vmem:[#allocation6 + $0xe8] sm:$0xf] }
 0x19f   :  { %3204 = vmatpush.bf16.msrb.mxu3 %v9515_v24  ;;  %v9655_v24 = vor.u32 %v12386_v28, %v9654_v14  ;;  %v12387_v49 = vld [vmem:[#allocation6 + $0xf4] sm:$0xf0]  ;;  %v12385_v28 = vld [vmem:[#allocation6 + $0xec] sm:$0xf] }
 0x1a0   :  { %3166 = vmatpush.bf16.msrb.mxu0 %v9315_v53  ;;  %v9643_v53 = vor.u32 %v12380_v34, %v9640_v36  ;;  %v13499_v34 = vpack.c.bf16 %v3214_v15, %v3214_v15 }
 0x1a1   :  { %3179 = vmatpush.bf16.msrb.mxu1 %v9379_v18  ;;  %v9622_v18 = vld [vmem:[#allocation6 + $0xa0] sm:$0xf] }
 0x1a2   :  { %3192 = vmatpush.bf16.msrb.mxu2 %v9443_v40  ;;  %v12378_v40 = vld [vmem:[#allocation6 + $0xac] sm:$0xf0] }
 0x1a3   :  { %3205 = vmatpush.bf16.msrb.mxu3 %v9507_v19  ;;  %v9623_v56 = vor.u32 %v12378_v40, %v9622_v18  ;;  %v9606_v19 = vld [vmem:[#allocation6 + $0x80] sm:$0xf]  ;;  %v12379_v18 = vld [vmem:[#allocation6 + $0xb4] sm:$0xf0]  ;;  %v9632_v40 = vld [vmem:[#allocation6 + $0xb8] sm:$0xf0] }
 0x1a4   :  { %3167 = vmatpush.bf16.msrb.mxu0 %v9307_v57  ;;  %v12368_v57 = vld [vmem:[#allocation6 + $0x64] sm:$0xf]  ;;  %v9635_v47 = vor.u32 %v12377_v1, %v9632_v40  ;;  %v9752_v1 = vld [vmem:[#allocation6 + $0x1b0] sm:$0xf0] }
 0x1a5   :  { %3180 = vmatpush.bf16.msrb.mxu1 %v9371_v60 }
 0x1a6   :  { %3193 = vmatpush.bf16.msrb.mxu2 %v9435_v61 }
 0x1a7   :  { %3206 = vmatpush.bf16.msrb.mxu3 %v9499_v2  ;;  %v9576_v2 = vld [vmem:[#allocation6 + $0x50] sm:$0xf0] }
 0x1a8   :  { %3168 = vmatpush.bf16.msrb.mxu0 %v9299_v5  ;;  %v9558_v5 = vld [vmem:[#allocation6 + $0x20] sm:$0xf] }
 0x1a9   :  { %3181 = vmatpush.bf16.msrb.mxu1 %v9363_v6  ;;  %v9559_v9 = vor.u32 %v12362_v25, %v9558_v5  ;;  %v12361_v25 = vld [vmem:[#allocation6 + $0x2c] sm:$0xf] }
 0x1aa   :  { %3194 = vmatpush.bf16.msrb.mxu2 %v9427_v37  ;;  %v12360_v37 = vld [vmem:[#allocation6 + $0x24] sm:$0xf] }
 0x1ab   :  { %3207 = vmatpush.bf16.msrb.mxu3 %v9491_v45  ;;  %v9563_v10 = vor.u32 %v12360_v37, %v9560_v8  ;;  %v12358_v45 = vld [vmem:[#allocation6 + $0xc] sm:$0xf0] }
 0x1ac   :  { %3169 = vmatpush.bf16.msrb.mxu0 %v9291_v33  ;;  %v2963_v22 = vpop.f32.mrf.mxu0  ;;  %v9664_v33 = vld [vmem:[#allocation6 + $0xf8] sm:$0xf0]  ;;  %v9543_v31 = vor.u32 %v12358_v45, %v9542_v23  ;;  %v12357_v23 = vld [vmem:[#allocation6 + $0xc] sm:$0xf] }
 0x1ad   :  { %3182 = vmatpush.bf16.msrb.mxu1 %v9355_v35  ;;  %v2976_v54 = vpop.f32.mrf.mxu1  ;;  %v9547_v35 = vor.u32 %v12356_v29, %v9544_v13  ;;  %v9552_v45 = vld [vmem:[#allocation6 + $0x18] sm:$0xf0] }
 0x1ae   :  { %3195 = vmatpush.bf16.msrb.mxu2 %v9419_v17  ;;  %v9663_v17 = vor.u32 %v12387_v49, %v9662_v30  ;;  %v9555_v30 = vor.u32 %v12357_v23, %v9552_v45  ;;  %v9782_v49 = vld [vmem:[#allocation6 + $0x1e0] sm:$0xf]  ;;  %v12419_v23 = vld [vmem:[#allocation6 + $0x1f4] sm:$0xf0]  ;;  %v12417_v45 = vld [vmem:[#allocation6 + $0x1ec] sm:$0xf] }
 0x1af   :  { %3208 = vmatpush.bf16.msrb.mxu3 %v9483_v21  ;;  %3170 = vmatmul.bf16.vlgmr.msrb.gmra.mxu0 %v13444_v7  ;;  %v9607_v7 = vor.u32 %v12374_v48, %v9606_v19  ;;  %v9667_v21 = vor.u32 %v12385_v28, %v9664_v33  ;;  %v12373_v19 = vld [vmem:[#allocation6 + $0x8c] sm:$0xf]  ;;  %v9616_v48 = vld [vmem:[#allocation6 + $0x98] sm:$0xf0]  ;;  %v12416_v28 = vld [vmem:[#allocation6 + $0x1e4] sm:$0xf] }
 0x1b0   :  { %3612 = vmatpush.bf16.msra.mxu0 %v9655_v24  ;;  %3183 = vmatmul.bf16.vlgmr.msrb.gmra.mxu1 %v13448_v12  ;;  %v9590_v12 = vld [vmem:[#allocation6 + $0x60] sm:$0xf]  ;;  %v9646_v24 = vld [vmem:[#allocation6 + $0xc8] sm:$0xf] }
 0x1b1   :  { %3196 = vmatmul.bf16.vlgmr.msrb.gmra.mxu2 %v13446_v11  ;;  %v2964_v11 = vadd.f32 %v2963_v22, %v13491_v58  ;;  %v9591_v60 = vor.u32 %v12370_v52, %v9590_v12  ;;  %v9579_v58 = vor.u32 %v12364_v55, %v9576_v2  ;;  %v9619_v22 = vor.u32 %v12373_v19, %v9616_v48  ;;  %v9598_v12 = vld [vmem:[#allocation6 + $0x68] sm:$0xf]  ;;  %v12371_v52 = vld [vmem:[#allocation6 + $0x74] sm:$0xf0]  ;;  %v12406_v19 = vld [vmem:[#allocation6 + $0x18c] sm:$0xf0] }
 0x1b2   :  { %3638 = vmatpush.bf16.msra.mxu2 %v9659_v26  ;;  %3209 = vmatmul.bf16.vlgmr.msrb.gmra.mxu3 %v13450_v16  ;;  %v9592_v16 = vld [vmem:[#allocation6 + $0x70] sm:$0xf0]  ;;  %v12383_v26 = vld [vmem:[#allocation6 + $0xd4] sm:$0xf0]  ;;  %v12404_v48 = vld [vmem:[#allocation6 + $0x184] sm:$0xf] }
 0x1b3   :  { %v2977_v59 = vadd.f32 %v2976_v54, %v2964_v11  ;;  %v9595_v61 = vor.u32 %v12368_v57, %v9592_v16  ;;  %v9647_v36 = vor.u32 %v12383_v26, %v9646_v24  ;;  %v12369_v11 = vld [vmem:[#allocation6 + $0x6c] sm:$0xf]  ;;  %v9600_v54 = vld [vmem:[#allocation6 + $0x78] sm:$0xf0]  ;;  %v9599_v16 = vor.u32 %v12371_v52, %v9598_v12  ;;  %v12414_v24 = vld [vmem:[#allocation6 + $0x1cc] sm:$0xf0] }
 0x1b4   :  { %3613 = vmatpush.bf16.msra.mxu0 %v9639_v39  ;;  %v2989_v63 = vpop.f32.mrf.mxu2  ;;  %v2965_v44 = vpop.f32.mrf.mxu0  ;;  %v9651_v39 = vor.u32 %v12381_v27, %v9648_v32  ;;  %v12412_v26 = vld [vmem:[#allocation6 + $0x1c4] sm:$0xf]  ;;  %v9768_v32 = vld [vmem:[#allocation6 + $0x1d0] sm:$0xf0] }
 0x1b5   :  { %v2990_v41 = vadd.f32 %v2989_v63, %v2977_v59  ;;  %v3002_v3 = vpop.f32.mrf.mxu3  ;;  %v2978_v6 = vpop.f32.mrf.mxu1  ;;  %v9603_v59 = vor.u32 %v12369_v11, %v9600_v54  ;;  %v12363_v44 = vld [vmem:[#allocation6 + $0x34] sm:$0xf0]  ;;  %v12400_v52 = vld [vmem:[#allocation6 + $0x164] sm:$0xf]  ;;  %v9720_v11 = vld [vmem:[#allocation6 + $0x170] sm:$0xf0] }
 0x1b6   :  { %3639 = vmatpush.bf16.msra.mxu2 %v9643_v53  ;;  %v9630_v53 = vld [vmem:[#allocation6 + $0xa8] sm:$0xf]  ;;  %v9568_v6 = vld [vmem:[#allocation6 + $0x38] sm:$0xf0] }
 0x1b7   :  { %v3003_v4 = vadd.f32 %v3002_v3, %v2990_v41  ;;  %v9631_v43 = vor.u32 %v12379_v18, %v9630_v53  ;;  %v9571_v8 = vor.u32 %v12361_v25, %v9568_v6  ;;  %v12408_v53 = vld [vmem:[#allocation6 + $0x1a4] sm:$0xf]  ;;  %v12390_v25 = vld [vmem:[#allocation6 + $0x10c] sm:$0xf0] }
 0x1b8   :  { %3614 = vmatpush.bf16.msra.mxu0 %v9623_v56  ;;  %v9614_v56 = vld [vmem:[#allocation6 + $0x88] sm:$0xf]  ;;  %v12388_v6 = vld [vmem:[#allocation6 + $0x104] sm:$0xf] }
 0x1ba   :  { %3640 = vmatpush.bf16.msra.mxu2 %v9627_v0  ;;  %v12375_v0 = vld [vmem:[#allocation6 + $0x94] sm:$0xf0] }
 0x1bb   :  { %v9615_v50 = vor.u32 %v12375_v0, %v9614_v56  ;;  %v9734_v0 = vld [vmem:[#allocation6 + $0x180] sm:$0xf] }
 0x1bc   :  { %3615 = vmatpush.bf16.msra.mxu0 %v9607_v7  ;;  %v2991_v46 = vpop.f32.mrf.mxu2 }
 0x1bd   :  { %v3004_v14 = vpop.f32.mrf.mxu3 }
 0x1be   :  { %3641 = vmatpush.bf16.msra.mxu2 %v9611_v51  ;;  %v12418_v14 = vld [vmem:[#allocation6 + $0x1ec] sm:$0xf0] }
 0x1bf   :  { %v9783_v33 = vor.u32 %v12418_v14, %v9782_v49  ;;  %v9774_v49 = vld [vmem:[#allocation6 + $0x1c8] sm:$0xf]  ;;  %v12415_v14 = vld [vmem:[#allocation6 + $0x1d4] sm:$0xf0] }
 0x1c0   :  { %3616 = vmatpush.bf16.msra.mxu0 %v9591_v60  ;;  %v9582_v60 = vld [vmem:[#allocation6 + $0x48] sm:$0xf] }
 0x1c1   :  { %3625 = vmatpush.bf16.msra.mxu1 %v9783_v33 }
 0x1c2   :  { %3642 = vmatpush.bf16.msra.mxu2 %v9595_v61  ;;  %v12367_v61 = vld [vmem:[#allocation6 + $0x54] sm:$0xf0] }
 0x1c3   :  { %v9583_v41 = vor.u32 %v12367_v61, %v9582_v60  ;;  %v12396_v60 = vld [vmem:[#allocation6 + $0x144] sm:$0xf]  ;;  %v9704_v61 = vld [vmem:[#allocation6 + $0x150] sm:$0xf0] }
 0x1c4   :  { %3617 = vmatpush.bf16.msra.mxu0 %v9575_v42  ;;  %v9587_v42 = vor.u32 %v12365_v62, %v9584_v38 }
 0x1c6   :  { %3643 = vmatpush.bf16.msra.mxu2 %v9579_v58 }
 0x1c8   :  { %3618 = vmatpush.bf16.msra.mxu0 %v9559_v9  ;;  %v9550_v9 = vld [vmem:[#allocation6 + $0x8] sm:$0xf] }
 0x1ca   :  { %3644 = vmatpush.bf16.msra.mxu2 %v9563_v10  ;;  %v12359_v10 = vld [vmem:[#allocation6 + $0x14] sm:$0xf0] }
 0x1cb   :  { %v9551_v46 = vor.u32 %v12359_v10, %v9550_v9  ;;  %v9790_v10 = vld [vmem:[#allocation6 + $0x1e8] sm:$0xf] }
 0x1cc   :  { %3619 = vmatpush.bf16.msra.mxu0 %v9543_v31  ;;  %v3015_v20 = vpop.f32.mrf.mxu0  ;;  %v9784_v31 = vld [vmem:[#allocation6 + $0x1f0] sm:$0xf0] }
 0x1cd   :  { %v3016_v7 = vadd.f32 %v3015_v20, %v3003_v4  ;;  %v3028_v51 = vpop.f32.mrf.mxu1  ;;  %v9566_v4 = vld [vmem:[#allocation6 + $0x28] sm:$0xf]  ;;  %v9787_v15 = vor.u32 %v12416_v28, %v9784_v31  ;;  %v12413_v28 = vld [vmem:[#allocation6 + $0x1cc] sm:$0xf]  ;;  %v9775_v31 = vor.u32 %v12415_v14, %v9774_v49 }
 0x1ce   :  { %3645 = vmatpush.bf16.msra.mxu2 %v9547_v35  ;;  %v9567_v37 = vor.u32 %v12363_v44, %v9566_v4 }
 0x1cf   :  { %3620 = vmatmul.bf16.vlgmr.msra.gmra.mxu0 %v13499_v34  ;;  %v3029_v57 = vadd.f32 %v3028_v51, %v3016_v7  ;;  %3651 = vmatpush.bf16.msra.mxu3 %v9787_v15  ;;  %v9736_v7 = vld [vmem:[#allocation6 + $0x190] sm:$0xf0]  ;;  %v12402_v51 = vld [vmem:[#allocation6 + $0x16c] sm:$0xf0]  ;;  %v9776_v15 = vld [vmem:[#allocation6 + $0x1d8] sm:$0xf0] }
 0x1d0   :  { %3664 = vmatpush.bf16.msrb.mxu0 %v9663_v17  ;;  %v9739_v12 = vor.u32 %v12404_v48, %v9736_v7 }
 0x1d1   :  { %3646 = vmatmul.bf16.vlgmr.msra.gmra.mxu2 %v13499_v34 }
 0x1d2   :  { %3690 = vmatpush.bf16.msrb.mxu2 %v9667_v21  ;;  %v9766_v21 = vld [vmem:[#allocation6 + $0x1c0] sm:$0xf] }
 0x1d3   :  { %v9767_v27 = vor.u32 %v12414_v24, %v9766_v21  ;;  %v9779_v21 = vor.u32 %v12413_v28, %v9776_v15  ;;  %v9758_v24 = vld [vmem:[#allocation6 + $0x1a8] sm:$0xf] }
 0x1d4   :  { %3665 = vmatpush.bf16.msrb.mxu0 %v9647_v36  ;;  %v3041_v63 = vpop.f32.mrf.mxu2  ;;  %v3017_v3 = vpop.f32.mrf.mxu0  ;;  %v9771_v36 = vor.u32 %v12412_v26, %v9768_v32  ;;  %v12411_v26 = vld [vmem:[#allocation6 + $0x1b4] sm:$0xf0] }
 0x1d5   :  { %v3042_v55 = vadd.f32 %v3041_v63, %v3029_v57  ;;  %v3054_v2 = vpop.f32.mrf.mxu3  ;;  %v3030_v58 = vpop.f32.mrf.mxu1  ;;  %3626 = vmatpush.bf16.msra.mxu1 %v9767_v27  ;;  %v9723_v57 = vor.u32 %v12400_v52, %v9720_v11  ;;  %v12392_v3 = vld [vmem:[#allocation6 + $0x124] sm:$0xf]  ;;  %v12409_v27 = vld [vmem:[#allocation6 + $0x1ac] sm:$0xf]  ;;  %v9759_v32 = vor.u32 %v12411_v26, %v9758_v24  ;;  %v9728_v52 = vld [vmem:[#allocation6 + $0x178] sm:$0xf0] }
 0x1d6   :  { %3691 = vmatpush.bf16.msrb.mxu2 %v9651_v39  ;;  %3652 = vmatpush.bf16.msra.mxu3 %v9771_v36  ;;  %v12410_v39 = vld [vmem:[#allocation6 + $0x1ac] sm:$0xf0]  ;;  %v9670_v58 = vld [vmem:[#allocation6 + $0x100] sm:$0xf]  ;;  %v9760_v36 = vld [vmem:[#allocation6 + $0x1b8] sm:$0xf0] }
 0x1d7   :  { %v13503_v5 = vadd.f32 %v3054_v2, %v3042_v55  ;;  %v9707_v55 = vor.u32 %v12396_v60, %v9704_v61  ;;  %v9686_v2 = vld [vmem:[#allocation6 + $0x120] sm:$0xf]  ;;  %v9710_v11 = vld [vmem:[#allocation6 + $0x148] sm:$0xf] }
 0x1d8   :  { %3666 = vmatpush.bf16.msrb.mxu0 %v9631_v43  ;;  %v9755_v43 = vor.u32 %v12408_v53, %v9752_v1 }
 0x1da   :  { %3692 = vmatpush.bf16.msrb.mxu2 %v9635_v47  ;;  %3653 = vmatpush.bf16.msra.mxu3 %v9755_v43  ;;  %v9742_v43 = vld [vmem:[#allocation6 + $0x188] sm:$0xf] }
 0x1dc   :  { %3667 = vmatpush.bf16.msrb.mxu0 %v9615_v50  ;;  %v3043_v29 = vpop.f32.mrf.mxu2  ;;  %v9735_v50 = vor.u32 %v12406_v19, %v9734_v0  ;;  %v12405_v0 = vld [vmem:[#allocation6 + $0x18c] sm:$0xf] }
 0x1dd   :  { %v3056_v13 = vpop.f32.mrf.mxu3  ;;  %v9791_v29 = vor.u32 %v12419_v23, %v9790_v10 }
 0x1de   :  { %3693 = vmatpush.bf16.msrb.mxu2 %v9619_v22  ;;  %v9718_v22 = vld [vmem:[#allocation6 + $0x160] sm:$0xf]  ;;  %3654 = vmatpush.bf16.msra.mxu3 %v9739_v12  ;;  %v12401_v12 = vld [vmem:[#allocation6 + $0x16c] sm:$0xf] }
 0x1df   :  { %v9719_v54 = vor.u32 %v12402_v51, %v9718_v22  ;;  %v9726_v22 = vld [vmem:[#allocation6 + $0x168] sm:$0xf]  ;;  %v12403_v51 = vld [vmem:[#allocation6 + $0x174] sm:$0xf0] }
 0x1e0   :  { %3668 = vmatpush.bf16.msrb.mxu0 %v9599_v16  ;;  %v9702_v16 = vld [vmem:[#allocation6 + $0x140] sm:$0xf] }
 0x1e2   :  { %3694 = vmatpush.bf16.msrb.mxu2 %v9603_v59  ;;  %v12398_v59 = vld [vmem:[#allocation6 + $0x14c] sm:$0xf0]  ;;  %3655 = vmatpush.bf16.msra.mxu3 %v9723_v57  ;;  %v9731_v57 = vor.u32 %v12401_v12, %v9728_v52  ;;  %v10534_v12 = vld [vmem:[#allocation9 + $0x5c0] sm:$0xf] }
 0x1e3   :  { %v9703_v63 = vor.u32 %v12398_v59, %v9702_v16  ;;  %v12397_v16 = vld [vmem:[#allocation6 + $0x14c] sm:$0xf]  ;;  %v9712_v59 = vld [vmem:[#allocation6 + $0x158] sm:$0xf0] }
 0x1e4   :  { %3669 = vmatpush.bf16.msrb.mxu0 %v9583_v41  ;;  %v12394_v41 = vld [vmem:[#allocation6 + $0x12c] sm:$0xf0] }
 0x1e5   :  { %v9687_v4 = vor.u32 %v12394_v41, %v9686_v2  ;;  %v12393_v2 = vld [vmem:[#allocation6 + $0x12c] sm:$0xf]  ;;  %v9696_v41 = vld [vmem:[#allocation6 + $0x138] sm:$0xf0] }
 0x1e6   :  { %3695 = vmatpush.bf16.msrb.mxu2 %v9587_v42  ;;  %v9688_v42 = vld [vmem:[#allocation6 + $0x130] sm:$0xf0]  ;;  %3656 = vmatpush.bf16.msra.mxu3 %v9707_v55 }
 0x1e7   :  { %v9691_v44 = vor.u32 %v12392_v3, %v9688_v42  ;;  %v9699_v42 = vor.u32 %v12393_v2, %v9696_v41  ;;  %v12592_v2 = vld [vmem:[#allocation9 + $0x55c] sm:$0xf0] }
 0x1e8   :  { %3670 = vmatpush.bf16.msrb.mxu0 %v9567_v37  ;;  %v9672_v37 = vld [vmem:[#allocation6 + $0x110] sm:$0xf0] }
 0x1e9   :  { %v9675_v9 = vor.u32 %v12388_v6, %v9672_v37 }
 0x1ea   :  { %3696 = vmatpush.bf16.msrb.mxu2 %v9571_v8  ;;  %v9671_v8 = vor.u32 %v12390_v25, %v9670_v58  ;;  %3657 = vmatpush.bf16.msra.mxu3 %v9691_v44  ;;  %v12391_v44 = vld [vmem:[#allocation6 + $0x114] sm:$0xf0]  ;;  %v12389_v58 = vld [vmem:[#allocation6 + $0x10c] sm:$0xf]  ;;  %v9680_v25 = vld [vmem:[#allocation6 + $0x118] sm:$0xf0] }
 0x1ec   :  { %3671 = vmatpush.bf16.msrb.mxu0 %v9551_v46  ;;  %v13507_v35 = vpop.f32.mrf.mxu0  ;;  %v9792_v46 = vld [vmem:[#allocation6 + $0x1f8] sm:$0xf0] }
 0x1ed   :  { %v13509_v17 = vpop.f32.mrf.mxu1  ;;  %v9795_v13 = vor.u32 %v12417_v45, %v9792_v46 }
 0x1ee   :  { %3697 = vmatpush.bf16.msrb.mxu2 %v9555_v30  ;;  %3658 = vmatpush.bf16.msra.mxu3 %v9675_v9 }
 0x1ef   :  { %3672 = vmatmul.bf16.vlgmr.msrb.gmra.mxu0 %v13499_v34 }
 0x1f1   :  { %3698 = vmatmul.bf16.vlgmr.msrb.gmra.mxu2 %v13499_v34  ;;  %v9750_v34 = vld [vmem:[#allocation6 + $0x1a0] sm:$0xf] }
 0x1f2   :  { %v9751_v18 = vor.u32 %v12410_v39, %v9750_v34  ;;  %3703 = vmatpush.bf16.msrb.mxu3 %v9795_v13  ;;  %v9763_v34 = vor.u32 %v12409_v27, %v9760_v36  ;;  %v3068_v39 = vadd.f32 %v13507_v35, %v13503_v5  ;;  %v9727_v35 = vor.u32 %v12403_v51, %v9726_v22  ;;  %v12480_v36 = vld [vmem:[#allocation9 + $0x1dc] sm:$0xf0] }
 0x1f3   :  { %v10214_v22 = vld [vmem:[#allocation9 + $0x340] sm:$0xf] }
 0x1f4   :  { %v13511_v40 = vpop.f32.mrf.mxu2  ;;  %v3069_v56 = vpop.f32.mrf.mxu0  ;;  %3627 = vmatpush.bf16.msra.mxu1 %v9751_v18  ;;  %v3081_v7 = vadd.f32 %v13509_v17, %v3068_v39  ;;  %v9715_v17 = vor.u32 %v12397_v16, %v9712_v59  ;;  %v12528_v51 = vld [vmem:[#allocation9 + $0x35c] sm:$0xf0] }
 0x1f5   :  { %v13513_v47 = vpop.f32.mrf.mxu3  ;;  %v3082_v20 = vpop.f32.mrf.mxu1  ;;  %v12407_v56 = vld [vmem:[#allocation6 + $0x194] sm:$0xf0]  ;;  %v12456_v16 = vld [vmem:[#allocation9 + $0x11c] sm:$0xf0]  ;;  %v10215_v59 = vor.u32 %v12528_v51, %v10214_v22  ;;  %v12476_v22 = vld [vmem:[#allocation9 + $0x1c4] sm:$0xf] }
 0x1f6   :  { %3704 = vmatpush.bf16.msrb.mxu3 %v9779_v21  ;;  %v9743_v48 = vor.u32 %v12407_v56, %v9742_v43  ;;  %v9744_v20 = vld [vmem:[#allocation6 + $0x198] sm:$0xf0]  ;;  %v3094_v5 = vadd.f32 %v13511_v40, %v3081_v7  ;;  %v10246_v56 = vld [vmem:[#allocation9 + $0x380] sm:$0xf]  ;;  %v10024_v51 = vld [vmem:[#allocation9 + $0x1e0] sm:$0xf0] }
 0x1f8   :  { %3628 = vmatpush.bf16.msra.mxu1 %v9735_v50  ;;  %v9747_v50 = vor.u32 %v12405_v0, %v9744_v20  ;;  %v3107_v55 = vadd.f32 %v13513_v47, %v3094_v5  ;;  %v9958_v20 = vld [vmem:[#allocation9 + $0x140] sm:$0xf] }
 0x1f9   :  { %v12608_v5 = vld [vmem:[#allocation9 + $0x5dc] sm:$0xf0] }
 0x1fa   :  { %3705 = vmatpush.bf16.msrb.mxu3 %v9763_v34  ;;  %v9990_v34 = vld [vmem:[#allocation9 + $0x180] sm:$0xf] }
 0x1fc   :  { %v3095_v62 = vpop.f32.mrf.mxu2  ;;  %3629 = vmatpush.bf16.msra.mxu1 %v9719_v54  ;;  %v12399_v54 = vld [vmem:[#allocation6 + $0x154] sm:$0xf0] }
 0x1fd   :  { %v3108_v38 = vpop.f32.mrf.mxu3  ;;  %v9711_v61 = vor.u32 %v12399_v54, %v9710_v11  ;;  %v10502_v11 = vld [vmem:[#allocation9 + $0x580] sm:$0xf] }
 0x1fe   :  { %3706 = vmatpush.bf16.msrb.mxu3 %v9747_v50  ;;  %v9694_v38 = vld [vmem:[#allocation6 + $0x128] sm:$0xf]  ;;  %v12464_v50 = vld [vmem:[#allocation9 + $0x15c] sm:$0xf0] }
 0x1ff   :  { %v9959_v52 = vor.u32 %v12464_v50, %v9958_v20  ;;  %v12600_v54 = vld [vmem:[#allocation9 + $0x59c] sm:$0xf0] }
 0x200   :  { %3630 = vmatpush.bf16.msra.mxu1 %v9703_v63  ;;  %v12395_v63 = vld [vmem:[#allocation6 + $0x134] sm:$0xf0]  ;;  %v9798_v20 = vld [vmem:[#allocation9] sm:$0xf] }
 0x201   :  { %v9695_v3 = vor.u32 %v12395_v63, %v9694_v38  ;;  %v12672_v38 = vld [vmem:[#allocation9 + $0x7dc] sm:$0xf0] }
 0x202   :  { %3707 = vmatpush.bf16.msrb.mxu3 %v9731_v57  ;;  %v9926_v57 = vld [vmem:[#allocation9 + $0x100] sm:$0xf] }
 0x203   :  { %v9927_v41 = vor.u32 %v12456_v16, %v9926_v57  ;;  %v10280_v16 = vld [vmem:[#allocation9 + $0x3e0] sm:$0xf0] }
 0x204   :  { %3631 = vmatpush.bf16.msra.mxu1 %v9687_v4  ;;  %v9678_v4 = vld [vmem:[#allocation6 + $0x108] sm:$0xf] }
 0x205   :  { %v9679_v37 = vor.u32 %v12391_v44, %v9678_v4  ;;  %v12448_v4 = vld [vmem:[#allocation9 + $0xdc] sm:$0xf0] }
 0x206   :  { %3708 = vmatpush.bf16.msrb.mxu3 %v9715_v17  ;;  %v12520_v17 = vld [vmem:[#allocation9 + $0x31c] sm:$0xf0] }
 0x208   :  { %3632 = vmatpush.bf16.msra.mxu1 %v9671_v8  ;;  %v9683_v8 = vor.u32 %v12389_v58, %v9680_v25  ;;  %v10150_v58 = vld [vmem:[#allocation9 + $0x2c0] sm:$0xf] }
 0x20a   :  { %3709 = vmatpush.bf16.msrb.mxu3 %v9699_v42  ;;  %v9894_v42 = vld [vmem:[#allocation9 + $0xc0] sm:$0xf] }
 0x20c   :  { %3677 = vmatpush.bf16.msrb.mxu1 %v9791_v29  ;;  %v3119_v30 = vpop.f32.mrf.mxu0 }
 0x20d   :  { %v3132_v33 = vpop.f32.mrf.mxu1  ;;  %v3120_v40 = vadd.f32 %v3119_v30, %v3107_v55  ;;  %v10470_v55 = vld [vmem:[#allocation9 + $0x540] sm:$0xf] }
 0x20e   :  { %3710 = vmatpush.bf16.msrb.mxu3 %v9683_v8  ;;  %v10471_v25 = vor.u32 %v12592_v2, %v10470_v55  ;;  %v10438_v8 = vld [vmem:[#allocation9 + $0x500] sm:$0xf]  ;;  %v9992_v2 = vld [vmem:[#allocation9 + $0x1a0] sm:$0xf0] }
 0x20f   :  { %v3133_v6 = vadd.f32 %v3132_v33, %v3120_v40  ;;  %v10758_v40 = vld [vmem:[#allocation9 + $0x780] sm:$0xf] }
 0x210   :  { %3678 = vmatpush.bf16.msrb.mxu1 %v9775_v31 }
 0x214   :  { %v3145_v53 = vpop.f32.mrf.mxu2  ;;  %3679 = vmatpush.bf16.msrb.mxu1 %v9759_v32  ;;  %v3121_v1 = vpop.f32.mrf.mxu0  ;;  %v10022_v32 = vld [vmem:[#allocation9 + $0x1c0] sm:$0xf] }
 0x215   :  { %v3158_v18 = vpop.f32.mrf.mxu3  ;;  %v3134_v19 = vpop.f32.mrf.mxu1  ;;  %v3146_v9 = vadd.f32 %v3145_v53, %v3133_v6  ;;  %v10023_v39 = vor.u32 %v12480_v36, %v10022_v32  ;;  %v12472_v53 = vld [vmem:[#allocation9 + $0x19c] sm:$0xf0] }
 0x216   :  { %v12544_v1 = vld [vmem:[#allocation9 + $0x3dc] sm:$0xf0]  ;;  %v9991_v19 = vor.u32 %v12472_v53, %v9990_v34 }
 0x217   :  { %v3159_v47 = vadd.f32 %v3158_v18, %v3146_v9  ;;  %v10278_v18 = vld [vmem:[#allocation9 + $0x3c0] sm:$0xf]  ;;  %5278 = vmatpush.bf16.msra.mxu0 %v10023_v39 }
 0x218   :  { %3680 = vmatpush.bf16.msrb.mxu1 %v9743_v48  ;;  %v10279_v43 = vor.u32 %v12544_v1, %v10278_v18  ;;  %v12536_v48 = vld [vmem:[#allocation9 + $0x39c] sm:$0xf0] }
 0x219   :  { %v10247_v7 = vor.u32 %v12536_v48, %v10246_v56  ;;  %v12512_v6 = vld [vmem:[#allocation9 + $0x2dc] sm:$0xf0] }
 0x21a   :  { %v12584_v9 = vld [vmem:[#allocation9 + $0x51c] sm:$0xf0] }
 0x21b   :  { %5279 = vmatpush.bf16.msra.mxu0 %v9991_v19  ;;  %v9830_v32 = vld [vmem:[#allocation9 + $0x40] sm:$0xf] }
 0x21c   :  { %v3147_v60 = vpop.f32.mrf.mxu2  ;;  %3681 = vmatpush.bf16.msrb.mxu1 %v9727_v35  ;;  %v10535_v35 = vor.u32 %v12608_v5, %v10534_v12  ;;  %v12432_v36 = vld [vmem:[#allocation9 + $0x5c] sm:$0xf0] }
 0x21d   :  { %v3160_v62 = vpop.f32.mrf.mxu3  ;;  %v10503_v60 = vor.u32 %v12600_v54, %v10502_v11  ;;  %v10086_v39 = vld [vmem:[#allocation9 + $0x240] sm:$0xf]  ;;  %v9831_v48 = vor.u32 %v12432_v36, %v9830_v32  ;;  %v12540_v54 = vld [vmem:[#allocation9 + $0x3c4] sm:$0xf] }
 0x21e   :  { %5304 = vmatpush.bf16.msra.mxu2 %v10535_v35  ;;  %v10182_v62 = vld [vmem:[#allocation9 + $0x300] sm:$0xf]  ;;  %v9928_v32 = vld [vmem:[#allocation9 + $0x120] sm:$0xf0] }
 0x21f   :  { %5280 = vmatpush.bf16.msra.mxu0 %v9959_v52  ;;  %v10183_v44 = vor.u32 %v12520_v17, %v10182_v62  ;;  %v12496_v18 = vld [vmem:[#allocation9 + $0x25c] sm:$0xf0] }
 0x220   :  { %3682 = vmatpush.bf16.msrb.mxu1 %v9711_v61  ;;  %v10790_v61 = vld [vmem:[#allocation9 + $0x7c0] sm:$0xf]  ;;  %v10087_v12 = vor.u32 %v12496_v18, %v10086_v39  ;;  %v10184_v39 = vld [vmem:[#allocation9 + $0x320] sm:$0xf0] }
 0x221   :  { %v10791_v63 = vor.u32 %v12672_v38, %v10790_v61  ;;  %v12568_v56 = vld [vmem:[#allocation9 + $0x49c] sm:$0xf0]  ;;  %v10027_v38 = vor.u32 %v12476_v22, %v10024_v51  ;;  %v12508_v22 = vld [vmem:[#allocation9 + $0x2c4] sm:$0xf] }
 0x222   :  { %5305 = vmatpush.bf16.msra.mxu2 %v10503_v60  ;;  %v12640_v19 = vld [vmem:[#allocation9 + $0x6dc] sm:$0xf0]  ;;  %v10152_v51 = vld [vmem:[#allocation9 + $0x2e0] sm:$0xf0] }
 0x223   :  { %5281 = vmatpush.bf16.msra.mxu0 %v9927_v41  ;;  %v10054_v52 = vld [vmem:[#allocation9 + $0x200] sm:$0xf]  ;;  %v10283_v41 = vor.u32 %v12540_v54, %v10280_v16  ;;  %v9832_v54 = vld [vmem:[#allocation9 + $0x60] sm:$0xf0] }
 0x224   :  { %3683 = vmatpush.bf16.msrb.mxu1 %v9695_v3  ;;  %v12664_v3 = vld [vmem:[#allocation9 + $0x79c] sm:$0xf0] }
 0x225   :  { %v12488_v11 = vld [vmem:[#allocation9 + $0x21c] sm:$0xf0] }
 0x226   :  { %5306 = vmatpush.bf16.msra.mxu2 %v10471_v25  ;;  %v12560_v60 = vld [vmem:[#allocation9 + $0x45c] sm:$0xf0]  ;;  %v10055_v55 = vor.u32 %v12488_v11, %v10054_v52  ;;  %v12604_v25 = vld [vmem:[#allocation9 + $0x5c4] sm:$0xf] }
 0x227   :  { %v10630_v62 = vld [vmem:[#allocation9 + $0x680] sm:$0xf]  ;;  %v12428_v11 = vld [vmem:[#allocation9 + $0x44] sm:$0xf] }
 0x228   :  { %3684 = vmatpush.bf16.msrb.mxu1 %v9679_v37  ;;  %v10759_v37 = vor.u32 %v12664_v3, %v10758_v40  ;;  %v12632_v17 = vld [vmem:[#allocation9 + $0x69c] sm:$0xf0]  ;;  %v12532_v40 = vld [vmem:[#allocation9 + $0x384] sm:$0xf]  ;;  %v9835_v16 = vor.u32 %v12428_v11, %v9832_v54  ;;  %v10030_v11 = vld [vmem:[#allocation9 + $0x1c8] sm:$0xf] }
 0x229   :  { %v10248_v3 = vld [vmem:[#allocation9 + $0x3a0] sm:$0xf0]  ;;  %v12481_v54 = vld [vmem:[#allocation9 + $0x1e4] sm:$0xf0] }
 0x22c   :  { %v3171_v10 = vpop.f32.mrf.mxu0 }
 0x22d   :  { %v3184_v23 = vpop.f32.mrf.mxu1  ;;  %v3172_v45 = vadd.f32 %v3171_v10, %v3159_v47  ;;  %v10726_v47 = vld [vmem:[#allocation9 + $0x740] sm:$0xf]  ;;  %v9895_v10 = vor.u32 %v12448_v4, %v9894_v42  ;;  %v10631_v4 = vor.u32 %v12632_v17, %v10630_v62  ;;  %v10120_v62 = vld [vmem:[#allocation9 + $0x2a0] sm:$0xf0] }
 0x22e   :  { %v12660_v17 = vld [vmem:[#allocation9 + $0x784] sm:$0xf] }
 0x22f   :  { %v3185_v29 = vadd.f32 %v3184_v23, %v3172_v45  ;;  %v12656_v23 = vld [vmem:[#allocation9 + $0x75c] sm:$0xf0]  ;;  %5282 = vmatpush.bf16.msra.mxu0 %v9895_v10  ;;  %v12460_v10 = vld [vmem:[#allocation9 + $0x144] sm:$0xf] }
 0x230   :  { %v9862_v45 = vld [vmem:[#allocation9 + $0x80] sm:$0xf] }
 0x234   :  { %v3197_v46 = vpop.f32.mrf.mxu2  ;;  %v3173_v49 = vpop.f32.mrf.mxu0 }
 0x235   :  { %v3198_v13 = vadd.f32 %v3197_v46, %v3185_v29  ;;  %v3210_v30 = vpop.f32.mrf.mxu3  ;;  %v3186_v14 = vpop.f32.mrf.mxu1  ;;  %v12440_v29 = vld [vmem:[#allocation9 + $0x9c] sm:$0xf0]  ;;  %v10151_v46 = vor.u32 %v12512_v6, %v10150_v58  ;;  %v10536_v6 = vld [vmem:[#allocation9 + $0x5e0] sm:$0xf0] }
 0x236   :  { %v12504_v14 = vld [vmem:[#allocation9 + $0x29c] sm:$0xf0] }
 0x237   :  { %v3211_v28 = vadd.f32 %v3210_v30, %v3198_v13  ;;  %v10118_v13 = vld [vmem:[#allocation9 + $0x280] sm:$0xf]  ;;  %v10439_v30 = vor.u32 %v12584_v9, %v10438_v8 }
 0x238   :  { %v10119_v34 = vor.u32 %v12504_v14, %v10118_v13  ;;  %v12552_v58 = vld [vmem:[#allocation9 + $0x41c] sm:$0xf0]  ;;  %v10216_v13 = vld [vmem:[#allocation9 + $0x360] sm:$0xf0] }
 0x239   :  { %v3215_v31 = vmax.f32 %v3211_v28, 0.0  ;;  %v10727_v28 = vor.u32 %v12656_v23, %v10726_v47  ;;  %5307 = vmatpush.bf16.msra.mxu2 %v10439_v30  ;;  %v12624_v8 = vld [vmem:[#allocation9 + $0x65c] sm:$0xf0]  ;;  %v9960_v23 = vld [vmem:[#allocation9 + $0x160] sm:$0xf0]  ;;  %v10539_v30 = vor.u32 %v12604_v25, %v10536_v6 }
 0x23a   :  { %v12652_v25 = vld [vmem:[#allocation9 + $0x744] sm:$0xf] }
 0x23b   :  { %v3217_v33 = vpack.c.bf16 %v3215_v31, %v3215_v31  ;;  %v10406_v31 = vld [vmem:[#allocation9 + $0x4c0] sm:$0xf] }
 0x23c   :  { %v3199_v15 = vpop.f32.mrf.mxu2 }
 0x23d   :  { %v3212_v21 = vpop.f32.mrf.mxu3  ;;  %3633 = vmatmul.bf16.vlgmr.msra.gmra.mxu1 %v3217_v33  ;;  %3659 = vmatmul.bf16.vlgmr.msra.gmra.mxu3 %v3217_v33  ;;  %v10694_v15 = vld [vmem:[#allocation9 + $0x700] sm:$0xf] }
 0x23e   :  { %5291 = vmatpush.bf16.msra.mxu1 %v10279_v43  ;;  %5317 = vmatpush.bf16.msra.mxu3 %v10791_v63  ;;  %v12648_v21 = vld [vmem:[#allocation9 + $0x71c] sm:$0xf0]  ;;  %v12468_v63 = vld [vmem:[#allocation9 + $0x184] sm:$0xf] }
 0x23f   :  { %v10695_v1 = vor.u32 %v12648_v21, %v10694_v15  ;;  %v10374_v43 = vld [vmem:[#allocation9 + $0x480] sm:$0xf]  ;;  %v9995_v47 = vor.u32 %v12468_v63, %v9992_v2  ;;  %v9963_v21 = vor.u32 %v12460_v10, %v9960_v23  ;;  %v10760_v63 = vld [vmem:[#allocation9 + $0x7a0] sm:$0xf0] }
 0x240   :  { %v10375_v5 = vor.u32 %v12568_v56, %v10374_v43  ;;  %v12616_v15 = vld [vmem:[#allocation9 + $0x61c] sm:$0xf0]  ;;  %v12444_v43 = vld [vmem:[#allocation9 + $0xc4] sm:$0xf] }
 0x241   :  { %v9896_v56 = vld [vmem:[#allocation9 + $0xe0] sm:$0xf0] }
 0x242   :  { %5292 = vmatpush.bf16.msra.mxu1 %v10247_v7  ;;  %5318 = vmatpush.bf16.msra.mxu3 %v10759_v37  ;;  %v12424_v7 = vld [vmem:[#allocation9 + $0x1c] sm:$0xf0]  ;;  %v12420_v2 = vld [vmem:[#allocation9 + $0x4] sm:$0xf] }
 0x243   :  { %v9799_v61 = vor.u32 %v12424_v7, %v9798_v20  ;;  %v10598_v37 = vld [vmem:[#allocation9 + $0x640] sm:$0xf]  ;;  %v9864_v20 = vld [vmem:[#allocation9 + $0xa0] sm:$0xf0] }
 0x244   :  { %v10599_v14 = vor.u32 %v12624_v8, %v10598_v37  ;;  %v10728_v37 = vld [vmem:[#allocation9 + $0x760] sm:$0xf0] }
 0x245   :  { %v10731_v8 = vor.u32 %v12652_v25, %v10728_v37  ;;  %v12484_v23 = vld [vmem:[#allocation9 + $0x204] sm:$0xf]  ;;  %v12457_v37 = vld [vmem:[#allocation9 + $0x124] sm:$0xf0] }
 0x246   :  { %5293 = vmatpush.bf16.msra.mxu1 %v10215_v59  ;;  %5319 = vmatpush.bf16.msra.mxu3 %v10727_v28  ;;  %v10342_v59 = vld [vmem:[#allocation9 + $0x440] sm:$0xf]  ;;  %v12596_v28 = vld [vmem:[#allocation9 + $0x584] sm:$0xf] }
 0x247   :  { %v10343_v42 = vor.u32 %v12560_v60, %v10342_v59  ;;  %v10472_v59 = vld [vmem:[#allocation9 + $0x560] sm:$0xf0] }
 0x24a   :  { %5294 = vmatpush.bf16.msra.mxu1 %v10183_v44  ;;  %5320 = vmatpush.bf16.msra.mxu3 %v10695_v1  ;;  %v10310_v44 = vld [vmem:[#allocation9 + $0x400] sm:$0xf] }
 0x24c   :  { %v13520_v24 = vpop.f32.mrf.mxu0 }
 0x24d   :  { %3685 = vmatmul.bf16.vlgmr.msrb.gmra.mxu1 %v3217_v33  ;;  %3711 = vmatmul.bf16.vlgmr.msrb.gmra.mxu3 %v3217_v33  ;;  %v12576_v33 = vld [vmem:[#allocation9 + $0x4dc] sm:$0xf0] }
 0x24e   :  { %5295 = vmatpush.bf16.msra.mxu1 %v10151_v46  ;;  %v10407_v53 = vor.u32 %v12576_v33, %v10406_v31  ;;  %v12524_v46 = vld [vmem:[#allocation9 + $0x344] sm:$0xf]  ;;  %v10566_v33 = vld [vmem:[#allocation9 + $0x600] sm:$0xf] }
 0x24f   :  { %v10504_v31 = vld [vmem:[#allocation9 + $0x5a0] sm:$0xf0]  ;;  %v10219_v36 = vor.u32 %v12524_v46, %v10216_v13  ;;  %v10567_v18 = vor.u32 %v12616_v15, %v10566_v33 }
 0x250   :  { %5308 = vmatpush.bf16.msra.mxu2 %v10407_v53  ;;  %v10507_v53 = vor.u32 %v12596_v28, %v10504_v31  ;;  %v10696_v13 = vld [vmem:[#allocation9 + $0x720] sm:$0xf0] }
 0x251   :  { %v10376_v28 = vld [vmem:[#allocation9 + $0x4a0] sm:$0xf0] }
 0x252   :  { %5296 = vmatpush.bf16.msra.mxu1 %v10119_v34  ;;  %v12516_v34 = vld [vmem:[#allocation9 + $0x304] sm:$0xf] }
 0x253   :  { %v12636_v33 = vld [vmem:[#allocation9 + $0x6c4] sm:$0xf] }
 0x254   :  { %v13522_v26 = vpop.f32.mrf.mxu2  ;;  %v3623_v27 = vpop.f32.mrf.mxu0  ;;  %5309 = vmatpush.bf16.msra.mxu2 %v10375_v5  ;;  %v10155_v5 = vor.u32 %v12508_v22, %v10152_v51  ;;  %v10664_v15 = vld [vmem:[#allocation9 + $0x6e0] sm:$0xf0] }
 0x255   :  { %v9863_v27 = vor.u32 %v12440_v29, %v9862_v45  ;;  %v10251_v45 = vor.u32 %v12532_v40, %v10248_v3  ;;  %v10311_v29 = vor.u32 %v12552_v58, %v10310_v44  ;;  %v12580_v40 = vld [vmem:[#allocation9 + $0x504] sm:$0xf] }
 0x256   :  { %5297 = vmatpush.bf16.msra.mxu1 %v10087_v12  ;;  %v12668_v12 = vld [vmem:[#allocation9 + $0x7c4] sm:$0xf] }
 0x257   :  { %5283 = vmatpush.bf16.msra.mxu0 %v9863_v27  ;;  %v12452_v27 = vld [vmem:[#allocation9 + $0x104] sm:$0xf] }
 0x258   :  { %5310 = vmatpush.bf16.msra.mxu2 %v10343_v42  ;;  %v9931_v1 = vor.u32 %v12452_v27, %v9928_v32  ;;  %v10440_v42 = vld [vmem:[#allocation9 + $0x520] sm:$0xf0] }
 0x259   :  { %v12492_v44 = vld [vmem:[#allocation9 + $0x244] sm:$0xf] }
 0x25a   :  { %5298 = vmatpush.bf16.msra.mxu1 %v10055_v55  ;;  %v10763_v55 = vor.u32 %v12660_v17, %v10760_v63  ;;  %v10088_v58 = vld [vmem:[#allocation9 + $0x260] sm:$0xf0]  ;;  %v10286_v63 = vld [vmem:[#allocation9 + $0x3c8] sm:$0xf] }
 0x25b   :  { %5284 = vmatpush.bf16.msra.mxu0 %v9831_v48  ;;  %v12436_v48 = vld [vmem:[#allocation9 + $0x84] sm:$0xf]  ;;  %v10091_v6 = vor.u32 %v12492_v44, %v10088_v58  ;;  %v10254_v44 = vld [vmem:[#allocation9 + $0x388] sm:$0xf] }
 0x25c   :  { %v3649_v0 = vpop.f32.mrf.mxu2  ;;  %5311 = vmatpush.bf16.msra.mxu2 %v10311_v29  ;;  %v9867_v7 = vor.u32 %v12436_v48, %v9864_v20  ;;  %v12644_v29 = vld [vmem:[#allocation9 + $0x704] sm:$0xf]  ;;  %v13528_v48 = vld [vmem:[#allocation7] sm:$0xf]  ;;  %v12537_v58 = vld [vmem:[#allocation9 + $0x3a4] sm:$0xf0] }
 0x25d   :  { %v10662_v0 = vld [vmem:[#allocation9 + $0x6c0] sm:$0xf]  ;;  %v12556_v27 = vld [vmem:[#allocation9 + $0x444] sm:$0xf]  ;;  %v3284_v22 = vperm.slane %v13528_v48, 0 }
 0x25e   :  { %v10663_v57 = vor.u32 %v12640_v19, %v10662_v0  ;;  %5343 = vmatpush.bf16.msrb.mxu1 %v10283_v41  ;;  %v10187_v0 = vor.u32 %v12516_v34, %v10184_v39  ;;  %v9899_v19 = vor.u32 %v12444_v43, %v9896_v56  ;;  %v9800_v41 = vld [vmem:[#allocation9 + $0x20] sm:$0xf0] }
 0x25f   :  { %5285 = vmatpush.bf16.msra.mxu0 %v9799_v61  ;;  %v12500_v61 = vld [vmem:[#allocation9 + $0x284] sm:$0xf]  ;;  %v9803_v3 = vor.u32 %v12420_v2, %v9800_v41 }
 0x260   :  { %5321 = vmatpush.bf16.msra.mxu3 %v10663_v57  ;;  %5356 = vmatpush.bf16.msrb.mxu2 %v10539_v30  ;;  %v12588_v57 = vld [vmem:[#allocation9 + $0x544] sm:$0xf]  ;;  %v10699_v30 = vor.u32 %v12644_v29, %v10696_v13  ;;  %v9902_v13 = vld [vmem:[#allocation9 + $0xc8] sm:$0xf] }
 0x261   :  { %v10475_v60 = vor.u32 %v12588_v57, %v10472_v59  ;;  %v10344_v32 = vld [vmem:[#allocation9 + $0x460] sm:$0xf0] }
 0x262   :  { %5344 = vmatpush.bf16.msrb.mxu1 %v10251_v45  ;;  %v10056_v45 = vld [vmem:[#allocation9 + $0x220] sm:$0xf0] }
 0x263   :  { %5330 = vmatpush.bf16.msrb.mxu0 %v10027_v38  ;;  %v10123_v38 = vor.u32 %v12500_v61, %v10120_v62  ;;  %v10059_v46 = vor.u32 %v12484_v23, %v10056_v45  ;;  %v12628_v34 = vld [vmem:[#allocation9 + $0x684] sm:$0xf]  ;;  %v9998_v61 = vld [vmem:[#allocation9 + $0x188] sm:$0xf]  ;;  %v3287_v45 = vperm.slane %v13528_v48, 3 }
 0x264   :  { %5322 = vmatpush.bf16.msra.mxu3 %v10631_v4  ;;  %5357 = vmatpush.bf16.msrb.mxu2 %v10507_v53  ;;  %v10443_v4 = vor.u32 %v12580_v40, %v10440_v42  ;;  %v10632_v39 = vld [vmem:[#allocation9 + $0x6a0] sm:$0xf0]  ;;  %v12473_v62 = vld [vmem:[#allocation9 + $0x1a4] sm:$0xf0] }
 0x265   :  { %v10635_v53 = vor.u32 %v12628_v34, %v10632_v39  ;;  %v12620_v56 = vld [vmem:[#allocation9 + $0x644] sm:$0xf]  ;;  %v9999_v2 = vor.u32 %v12473_v62, %v9998_v61  ;;  %v9966_v40 = vld [vmem:[#allocation9 + $0x148] sm:$0xf] }
 0x266   :  { %5345 = vmatpush.bf16.msrb.mxu1 %v10219_v36  ;;  %v10347_v36 = vor.u32 %v12556_v27, %v10344_v32  ;;  %v12612_v20 = vld [vmem:[#allocation9 + $0x604] sm:$0xf]  ;;  %v12529_v23 = vld [vmem:[#allocation9 + $0x364] sm:$0xf0] }
 0x267   :  { %5331 = vmatpush.bf16.msrb.mxu0 %v9995_v47  ;;  %v10408_v47 = vld [vmem:[#allocation9 + $0x4e0] sm:$0xf0]  ;;  %v12521_v27 = vld [vmem:[#allocation9 + $0x324] sm:$0xf0] }
 0x268   :  { %5323 = vmatpush.bf16.msra.mxu3 %v10599_v14  ;;  %5358 = vmatpush.bf16.msrb.mxu2 %v10475_v60  ;;  %v12564_v14 = vld [vmem:[#allocation9 + $0x484] sm:$0xf]  ;;  %v12505_v61 = vld [vmem:[#allocation9 + $0x2a4] sm:$0xf0] }
 0x269   :  { %v10379_v31 = vor.u32 %v12564_v14, %v10376_v28  ;;  %v12449_v14 = vld [vmem:[#allocation9 + $0xe4] sm:$0xf0] }
 0x26a   :  { %5346 = vmatpush.bf16.msrb.mxu1 %v10187_v0  ;;  %v10600_v0 = vld [vmem:[#allocation9 + $0x660] sm:$0xf0]  ;;  %v10542_v28 = vld [vmem:[#allocation9 + $0x5c8] sm:$0xf]  ;;  %v9903_v32 = vor.u32 %v12449_v14, %v9902_v13  ;;  %v10000_v13 = vld [vmem:[#allocation9 + $0x1a8] sm:$0xf0] }
 0x26b   :  { %5332 = vmatpush.bf16.msrb.mxu0 %v9963_v21  ;;  %v10667_v21 = vor.u32 %v12636_v33, %v10664_v15  ;;  %v10766_v62 = vld [vmem:[#allocation9 + $0x788] sm:$0xf] }
 0x26c   :  { %v13524_v49 = vpop.f32.mrf.mxu0  ;;  %5324 = vmatpush.bf16.msra.mxu3 %v10567_v18  ;;  %5359 = vmatpush.bf16.msrb.mxu2 %v10443_v4  ;;  %v12548_v18 = vld [vmem:[#allocation9 + $0x404] sm:$0xf]  ;;  %v3286_v4 = vperm.slane %v13528_v48, 2  ;;  %v12489_v14 = vld [vmem:[#allocation9 + $0x224] sm:$0xf0] }
 0x26e   :  { %5347 = vmatpush.bf16.msrb.mxu1 %v10155_v5 }
 0x26f   :  { %5333 = vmatpush.bf16.msrb.mxu0 %v9931_v1  ;;  %v10312_v1 = vld [vmem:[#allocation9 + $0x420] sm:$0xf0] }
 0x270   :  { %v10315_v43 = vor.u32 %v12548_v18, %v10312_v1  ;;  %v10510_v18 = vld [vmem:[#allocation9 + $0x588] sm:$0xf] }
 0x271   :  { %v12601_v1 = vld [vmem:[#allocation9 + $0x5a4] sm:$0xf0] }
 0x272   :  { %5348 = vmatpush.bf16.msrb.mxu1 %v10123_v38 }
 0x273   :  { %5334 = vmatpush.bf16.msrb.mxu0 %v9899_v19  ;;  %v10603_v19 = vor.u32 %v12620_v56, %v10600_v0  ;;  %v10158_v0 = vld [vmem:[#allocation9 + $0x2c8] sm:$0xf] }
 0x274   :  { %v13526_v50 = vpop.f32.mrf.mxu2  ;;  %v3675_v35 = vpop.f32.mrf.mxu0 }
 0x275   :  { %v10792_v35 = vld [vmem:[#allocation9 + $0x7e0] sm:$0xf0]  ;;  %v3700_v34 = vadd.f32 %v13526_v50, %v3287_v45 }
 0x276   :  { %v10795_v52 = vor.u32 %v12668_v12, %v10792_v35  ;;  %5349 = vmatpush.bf16.msrb.mxu1 %v10091_v6  ;;  %v3622_v12 = vadd.f32 %v13520_v24, %v3284_v22  ;;  %v3285_v35 = vperm.slane %v13528_v48, 1  ;;  %v12545_v24 = vld [vmem:[#allocation9 + $0x3e4] sm:$0xf0] }
 0x277   :  { %5335 = vmatpush.bf16.msrb.mxu0 %v9867_v7  ;;  %v10568_v7 = vld [vmem:[#allocation9 + $0x620] sm:$0xf0]  ;;  %v10287_v42 = vor.u32 %v12545_v24, %v10286_v63  ;;  %v9934_v6 = vld [vmem:[#allocation9 + $0x108] sm:$0xf] }
 0x278   :  { %5369 = vmatpush.bf16.msrb.mxu3 %v10795_v52  ;;  %v10571_v51 = vor.u32 %v12612_v20, %v10568_v7  ;;  %v3648_v59 = vadd.f32 %v13522_v26, %v3285_v35  ;;  %v12513_v48 = vld [vmem:[#allocation9 + $0x2e4] sm:$0xf0] }
 0x279   :  { %v10798_v20 = vld [vmem:[#allocation9 + $0x7c8] sm:$0xf] }
 0x27a   :  { %5350 = vmatpush.bf16.msrb.mxu1 %v10059_v46  ;;  %v9935_v46 = vor.u32 %v12457_v37, %v9934_v6  ;;  %v12673_v7 = vld [vmem:[#allocation9 + $0x7e4] sm:$0xf0] }
 0x27b   :  { %5336 = vmatpush.bf16.msrb.mxu0 %v9835_v16  ;;  %v10031_v16 = vor.u32 %v12481_v54, %v10030_v11  ;;  %v12593_v11 = vld [vmem:[#allocation9 + $0x564] sm:$0xf0]  ;;  %v10159_v54 = vor.u32 %v12513_v48, %v10158_v0  ;;  %v10256_v48 = vld [vmem:[#allocation9 + $0x3a8] sm:$0xf0] }
 0x27c   :  { %v3701_v9 = vpop.f32.mrf.mxu2  ;;  %5370 = vmatpush.bf16.msrb.mxu3 %v10763_v55  ;;  %v9806_v24 = vld [vmem:[#allocation9 + $0x8] sm:$0xf] }
 0x27d   :  { %v12572_v9 = vld [vmem:[#allocation9 + $0x4c4] sm:$0xf]  ;;  %v10734_v6 = vld [vmem:[#allocation9 + $0x748] sm:$0xf] }
 0x27e   :  { %v10411_v10 = vor.u32 %v12572_v9, %v10408_v47  ;;  %v10255_v9 = vor.u32 %v12537_v58, %v10254_v44  ;;  %v3674_v47 = vadd.f32 %v13524_v49, %v3286_v4  ;;  %v12477_v4 = vld [vmem:[#allocation9 + $0x1cc] sm:$0xf]  ;;  %v10094_v58 = vld [vmem:[#allocation9 + $0x248] sm:$0xf] }
 0x27f   :  { %5337 = vmatpush.bf16.msrb.mxu0 %v9803_v3  ;;  %v12465_v3 = vld [vmem:[#allocation9 + $0x164] sm:$0xf0]  ;;  %v10032_v44 = vld [vmem:[#allocation9 + $0x1e8] sm:$0xf0] }
 0x280   :  { %5371 = vmatpush.bf16.msrb.mxu3 %v10731_v8  ;;  %5360 = vmatpush.bf16.msrb.mxu2 %v10411_v10  ;;  %v9967_v25 = vor.u32 %v12465_v3, %v9966_v40  ;;  %v10222_v10 = vld [vmem:[#allocation9 + $0x348] sm:$0xf] }
 0x281   :  { %v10223_v33 = vor.u32 %v12529_v23, %v10222_v10  ;;  %v12657_v37 = vld [vmem:[#allocation9 + $0x764] sm:$0xf0] }
 0x282   :  { %v10414_v10 = vld [vmem:[#allocation9 + $0x4c8] sm:$0xf] }
 0x283   :  { %v12577_v23 = vld [vmem:[#allocation9 + $0x4e4] sm:$0xf0] }
 0x284   :  { %5372 = vmatpush.bf16.msrb.mxu3 %v10699_v30  ;;  %5361 = vmatpush.bf16.msrb.mxu2 %v10379_v31  ;;  %v12609_v31 = vld [vmem:[#allocation9 + $0x5e4] sm:$0xf0] }
 0x285   :  { %v10543_v49 = vor.u32 %v12609_v31, %v10542_v28  ;;  %v10702_v28 = vld [vmem:[#allocation9 + $0x708] sm:$0xf] }
 0x286   :  { %v12649_v31 = vld [vmem:[#allocation9 + $0x724] sm:$0xf0] }
 0x288   :  { %5373 = vmatpush.bf16.msrb.mxu3 %v10667_v21  ;;  %5362 = vmatpush.bf16.msrb.mxu2 %v10347_v36  ;;  %v10190_v21 = vld [vmem:[#allocation9 + $0x308] sm:$0xf] }
 0x289   :  { %v9870_v36 = vld [vmem:[#allocation9 + $0x88] sm:$0xf]  ;;  %v10191_v56 = vor.u32 %v12521_v27, %v10190_v21  ;;  %v10288_v21 = vld [vmem:[#allocation9 + $0x3e8] sm:$0xf0] }
 0x28c   :  { %5374 = vmatpush.bf16.msrb.mxu3 %v10635_v53  ;;  %5363 = vmatpush.bf16.msrb.mxu2 %v10315_v43  ;;  %v12441_v53 = vld [vmem:[#allocation9 + $0xa4] sm:$0xf0] }
 0x28d   :  { %v9871_v22 = vor.u32 %v12441_v53, %v9870_v36  ;;  %v12461_v53 = vld [vmem:[#allocation9 + $0x14c] sm:$0xf] }
 0x290   :  { %5375 = vmatpush.bf16.msrb.mxu3 %v10603_v19 }
 0x294   :  { %5376 = vmatpush.bf16.msrb.mxu3 %v10571_v51  ;;  %v10511_v51 = vor.u32 %v12601_v1, %v10510_v18  ;;  %v9968_v18 = vld [vmem:[#allocation9 + $0x168] sm:$0xf0] }
 0x2ba   :  { %v3634_v5 = vpop.f32.mrf.mxu1 }
 0x2bb   :  { %v3635_v52 = vadd.f32 %v3634_v5, %v3622_v12  ;;  %v9838_v12 = vld [vmem:[#allocation9 + $0x48] sm:$0xf] }
 0x2bc   :  { %v12433_v5 = vld [vmem:[#allocation9 + $0x64] sm:$0xf0] }
 0x2bd   :  { %v3716_v57 = vmax.f32 %v3635_v52, 0.0  ;;  %v10478_v52 = vld [vmem:[#allocation9 + $0x548] sm:$0xf] }
 0x2be   :  { %v10479_v63 = vor.u32 %v12593_v11, %v10478_v52  ;;  %v12633_v52 = vld [vmem:[#allocation9 + $0x6a4] sm:$0xf0] }
 0x2bf   :  { %v13534_v60 = vpack.c.bf16 %v3716_v57, %v3716_v57  ;;  %v10799_v57 = vor.u32 %v12673_v7, %v10798_v20  ;;  %v9971_v20 = vor.u32 %v12461_v53, %v9968_v18  ;;  %v10350_v7 = vld [vmem:[#allocation9 + $0x448] sm:$0xf]  ;;  %v10768_v53 = vld [vmem:[#allocation9 + $0x7a8] sm:$0xf0] }
 0x2c0   :  { %v3660_v17 = vpop.f32.mrf.mxu3 }
 0x2c1   :  { %v3661_v38 = vadd.f32 %v3660_v17, %v3648_v59  ;;  %5286 = vmatmul.bf16.vlgmr.msra.gmra.mxu0 %v13534_v60  ;;  %v12665_v17 = vld [vmem:[#allocation9 + $0x7a4] sm:$0xf0] }
 0x2c2   :  { %5382 = vmatpush.bf16.msra.mxu0 %v10031_v16  ;;  %v3636_v55 = vpop.f32.mrf.mxu1  ;;  %v10126_v16 = vld [vmem:[#allocation9 + $0x288] sm:$0xf] }
 0x2c3   :  { %v3717_v41 = vmax.f32 %v3661_v38, 0.0  ;;  %v9839_v38 = vor.u32 %v12433_v5, %v9838_v12  ;;  %v12425_v55 = vld [vmem:[#allocation9 + $0x24] sm:$0xf0]  ;;  %v10127_v3 = vor.u32 %v12505_v61, %v10126_v16  ;;  %v9936_v12 = vld [vmem:[#allocation9 + $0x128] sm:$0xf0] }
 0x2c4   :  { %v10318_v61 = vld [vmem:[#allocation9 + $0x408] sm:$0xf] }
 0x2c5   :  { %v13538_v26 = vpack.c.bf16 %v3717_v41, %v3717_v41  ;;  %v12585_v41 = vld [vmem:[#allocation9 + $0x524] sm:$0xf0] }
 0x2c6   :  { %5383 = vmatpush.bf16.msra.mxu0 %v9999_v2  ;;  %v10446_v2 = vld [vmem:[#allocation9 + $0x508] sm:$0xf] }
 0x2c7   :  { %5299 = vmatmul.bf16.vlgmr.msra.gmra.mxu1 %v13538_v26 }
 0x2c8   :  { %5395 = vmatpush.bf16.msra.mxu1 %v10287_v42  ;;  %v3662_v8 = vpop.f32.mrf.mxu3  ;;  %v10767_v42 = vor.u32 %v12665_v17, %v10766_v62  ;;  %v12553_v62 = vld [vmem:[#allocation9 + $0x424] sm:$0xf0]  ;;  %v12445_v17 = vld [vmem:[#allocation9 + $0xcc] sm:$0xf] }
 0x2c9   :  { %v9807_v8 = vor.u32 %v12425_v55, %v9806_v24  ;;  %v12605_v24 = vld [vmem:[#allocation9 + $0x5cc] sm:$0xf] }
 0x2ca   :  { %5384 = vmatpush.bf16.msra.mxu0 %v9967_v25  ;;  %v3686_v29 = vpop.f32.mrf.mxu1  ;;  %v12497_v25 = vld [vmem:[#allocation9 + $0x264] sm:$0xf0]  ;;  %v10544_v55 = vld [vmem:[#allocation9 + $0x5e8] sm:$0xf0] }
 0x2cb   :  { %v3687_v30 = vadd.f32 %v3686_v29, %v3674_v47  ;;  %v10035_v47 = vor.u32 %v12477_v4, %v10032_v44  ;;  %v10095_v45 = vor.u32 %v12497_v25, %v10094_v58  ;;  %v10735_v29 = vor.u32 %v12657_v37, %v10734_v6  ;;  %v10192_v4 = vld [vmem:[#allocation9 + $0x328] sm:$0xf0] }
 0x2cc   :  { %5396 = vmatpush.bf16.msra.mxu1 %v10255_v9  ;;  %v10447_v9 = vor.u32 %v12585_v41, %v10446_v2  ;;  %v10606_v41 = vld [vmem:[#allocation9 + $0x648] sm:$0xf]  ;;  %v10547_v58 = vor.u32 %v12605_v24, %v10544_v55  ;;  %v12437_v25 = vld [vmem:[#allocation9 + $0x8c] sm:$0xf] }
 0x2cd   :  { %v3718_v15 = vmax.f32 %v3687_v30, 0.0  ;;  %v10062_v30 = vld [vmem:[#allocation9 + $0x208] sm:$0xf]  ;;  %v9872_v37 = vld [vmem:[#allocation9 + $0xa8] sm:$0xf0] }
 0x2ce   :  { %5385 = vmatpush.bf16.msra.mxu0 %v9935_v46  ;;  %v12469_v46 = vld [vmem:[#allocation9 + $0x18c] sm:$0xf]  ;;  %v10063_v36 = vor.u32 %v12489_v14, %v10062_v30  ;;  %v9875_v30 = vor.u32 %v12437_v25, %v9872_v37  ;;  %v9974_v25 = vld [vmem:[#allocation9 + $0x150] sm:$0xf] }
 0x2cf   :  { %v13544_v39 = vpack.c.bf16 %v3718_v15, %v3718_v15  ;;  %v12541_v15 = vld [vmem:[#allocation9 + $0x3cc] sm:$0xf]  ;;  %v10003_v27 = vor.u32 %v12469_v46, %v10000_v13 }
 0x2d0   :  { %5397 = vmatpush.bf16.msra.mxu1 %v10223_v33  ;;  %v3712_v43 = vpop.f32.mrf.mxu3  ;;  %v10415_v33 = vor.u32 %v12577_v23, %v10414_v10  ;;  %v10291_v1 = vor.u32 %v12541_v15, %v10288_v21  ;;  %v10574_v10 = vld [vmem:[#allocation9 + $0x608] sm:$0xf]  ;;  %v12669_v46 = vld [vmem:[#allocation9 + $0x7cc] sm:$0xf] }
 0x2d1   :  { %v3713_v19 = vadd.f32 %v3712_v43, %v3700_v34  ;;  %5312 = vmatmul.bf16.vlgmr.msra.gmra.mxu2 %v13544_v39  ;;  %5338 = vmatmul.bf16.vlgmr.msrb.gmra.mxu0 %v13534_v60  ;;  %v10703_v34 = vor.u32 %v12649_v31, %v10702_v28  ;;  %v10670_v43 = vld [vmem:[#allocation9 + $0x6c8] sm:$0xf]  ;;  %v10800_v13 = vld [vmem:[#allocation9 + $0x7e8] sm:$0xf0] }
 0x2d2   :  { %5386 = vmatpush.bf16.msra.mxu0 %v9903_v32  ;;  %5408 = vmatpush.bf16.msra.mxu2 %v10543_v49  ;;  %v3688_v50 = vpop.f32.mrf.mxu1  ;;  %v10382_v32 = vld [vmem:[#allocation9 + $0x488] sm:$0xf]  ;;  %v12429_v28 = vld [vmem:[#allocation9 + $0x4c] sm:$0xf] }
 0x2d3   :  { %v3719_v35 = vmax.f32 %v3713_v19, 0.0  ;;  %v12569_v49 = vld [vmem:[#allocation9 + $0x4a4] sm:$0xf0]  ;;  %v12533_v19 = vld [vmem:[#allocation9 + $0x38c] sm:$0xf] }
 0x2d4   :  { %5398 = vmatpush.bf16.msra.mxu1 %v10191_v56  ;;  %v12641_v56 = vld [vmem:[#allocation9 + $0x6e4] sm:$0xf0]  ;;  %v10383_v0 = vor.u32 %v12569_v49, %v10382_v32  ;;  %v10259_v5 = vor.u32 %v12533_v19, %v10256_v48  ;;  %v12589_v15 = vld [vmem:[#allocation9 + $0x54c] sm:$0xf]  ;;  %v10803_v32 = vor.u32 %v12669_v46, %v10800_v13 }
 0x2d5   :  { %v13548_v59 = vpack.c.bf16 %v3719_v35, %v3719_v35  ;;  %v12561_v50 = vld [vmem:[#allocation9 + $0x464] sm:$0xf0]  ;;  %v10480_v21 = vld [vmem:[#allocation9 + $0x568] sm:$0xf0] }
 0x2d6   :  { %5387 = vmatpush.bf16.msra.mxu0 %v9871_v22  ;;  %5409 = vmatpush.bf16.msra.mxu2 %v10511_v51  ;;  %v10671_v22 = vor.u32 %v12641_v56, %v10670_v43  ;;  %v12453_v51 = vld [vmem:[#allocation9 + $0x10c] sm:$0xf]  ;;  %v10638_v35 = vld [vmem:[#allocation9 + $0x688] sm:$0xf]  ;;  %v10351_v11 = vor.u32 %v12561_v50, %v10350_v7  ;;  %v10038_v7 = vld [vmem:[#allocation9 + $0x1d0] sm:$0xf] }
 0x2d7   :  { %5325 = vmatmul.bf16.vlgmr.msra.gmra.mxu3 %v13548_v59  ;;  %5351 = vmatmul.bf16.vlgmr.msrb.gmra.mxu1 %v13538_v26  ;;  %v9939_v16 = vor.u32 %v12453_v51, %v9936_v12  ;;  %v12617_v23 = vld [vmem:[#allocation9 + $0x624] sm:$0xf0]  ;;  %v12501_v49 = vld [vmem:[#allocation9 + $0x28c] sm:$0xf]  ;;  %v12482_v50 = vld [vmem:[#allocation9 + $0x1ec] sm:$0xf0] }
 0x2d8   :  { %5399 = vmatpush.bf16.msra.mxu1 %v10159_v54  ;;  %5421 = vmatpush.bf16.msra.mxu3 %v10799_v57  ;;  %v3714_v40 = vpop.f32.mrf.mxu3  ;;  %v12525_v54 = vld [vmem:[#allocation9 + $0x34c] sm:$0xf]  ;;  %v10575_v31 = vor.u32 %v12617_v23, %v10574_v10  ;;  %v10262_v10 = vld [vmem:[#allocation9 + $0x390] sm:$0xf] }
 0x2d9   :  { %v10224_v57 = vld [vmem:[#allocation9 + $0x368] sm:$0xf0]  ;;  %v12625_v40 = vld [vmem:[#allocation9 + $0x664] sm:$0xf0]  ;;  %v12538_v23 = vld [vmem:[#allocation9 + $0x3ac] sm:$0xf0] }
 0x2da   :  { %5388 = vmatpush.bf16.msra.mxu0 %v9839_v38  ;;  %5410 = vmatpush.bf16.msra.mxu2 %v10479_v63  ;;  %v10639_v38 = vor.u32 %v12633_v52, %v10638_v35  ;;  %v9904_v63 = vld [vmem:[#allocation9 + $0xe8] sm:$0xf0]  ;;  %v10227_v2 = vor.u32 %v12525_v54, %v10224_v57  ;;  %v10607_v6 = vor.u32 %v12625_v40, %v10606_v41  ;;  %v10294_v41 = vld [vmem:[#allocation9 + $0x3d0] sm:$0xf] }
 0x2db   :  { %v9907_v44 = vor.u32 %v12445_v17, %v9904_v63  ;;  %v12421_v43 = vld [vmem:[#allocation9 + $0xc] sm:$0xf]  ;;  %v12474_v17 = vld [vmem:[#allocation9 + $0x1ac] sm:$0xf0] }
 0x2dc   :  { %5400 = vmatpush.bf16.msra.mxu1 %v10127_v3  ;;  %5422 = vmatpush.bf16.msra.mxu3 %v10767_v42  ;;  %v10319_v3 = vor.u32 %v12553_v62, %v10318_v61  ;;  %v12517_v42 = vld [vmem:[#allocation9 + $0x30c] sm:$0xf]  ;;  %v10006_v62 = vld [vmem:[#allocation9 + $0x190] sm:$0xf] }
 0x2dd   :  { %v9808_v56 = vld [vmem:[#allocation9 + $0x28] sm:$0xf0]  ;;  %v12546_v40 = vld [vmem:[#allocation9 + $0x3ec] sm:$0xf0] }
 0x2de   :  { %5389 = vmatpush.bf16.msra.mxu0 %v9807_v8  ;;  %5411 = vmatpush.bf16.msra.mxu2 %v10447_v9  ;;  %v12597_v8 = vld [vmem:[#allocation9 + $0x58c] sm:$0xf]  ;;  %v9811_v35 = vor.u32 %v12421_v43, %v9808_v56  ;;  %v10295_v37 = vor.u32 %v12546_v40, %v10294_v41  ;;  %v12610_v43 = vld [vmem:[#allocation9 + $0x5ec] sm:$0xf0] }
 0x2df   :  { %v10512_v9 = vld [vmem:[#allocation9 + $0x5a8] sm:$0xf0] }
 0x2e0   :  { %5401 = vmatpush.bf16.msra.mxu1 %v10095_v45  ;;  %5423 = vmatpush.bf16.msra.mxu3 %v10735_v29  ;;  %v12509_v45 = vld [vmem:[#allocation9 + $0x2cc] sm:$0xf]  ;;  %v10515_v14 = vor.u32 %v12597_v8, %v10512_v9 }
 0x2e1   :  { %5364 = vmatmul.bf16.vlgmr.msrb.gmra.mxu2 %v13544_v39  ;;  %5390 = vmatmul.bf16.vlgmr.msra.gmra.mxu0 %v13534_v60  ;;  %v10160_v29 = vld [vmem:[#allocation9 + $0x2e8] sm:$0xf0] }
 0x2e2   :  { %5434 = vmatpush.bf16.msrb.mxu0 %v10035_v47  ;;  %5412 = vmatpush.bf16.msra.mxu2 %v10415_v33  ;;  %v10195_v47 = vor.u32 %v12517_v42, %v10192_v4  ;;  %v9840_v33 = vld [vmem:[#allocation9 + $0x68] sm:$0xf0] }
 0x2e3   :  { %v9843_v18 = vor.u32 %v12429_v28, %v9840_v33  ;;  %v10448_v19 = vld [vmem:[#allocation9 + $0x528] sm:$0xf0]  ;;  %v10263_v28 = vor.u32 %v12538_v23, %v10262_v10  ;;  %v12586_v10 = vld [vmem:[#allocation9 + $0x52c] sm:$0xf0] }
 0x2e4   :  { %5402 = vmatpush.bf16.msra.mxu1 %v10063_v36  ;;  %5424 = vmatpush.bf16.msra.mxu3 %v10703_v34  ;;  %v10128_v36 = vld [vmem:[#allocation9 + $0x2a8] sm:$0xf0] }
 0x2e5   :  { %v12661_v34 = vld [vmem:[#allocation9 + $0x78c] sm:$0xf]  ;;  %v10131_v48 = vor.u32 %v12501_v49, %v10128_v36 }
 0x2e6   :  { %5435 = vmatpush.bf16.msrb.mxu0 %v10003_v27  ;;  %5413 = vmatpush.bf16.msra.mxu2 %v10383_v0  ;;  %v10163_v27 = vor.u32 %v12509_v45, %v10160_v29  ;;  %v12581_v0 = vld [vmem:[#allocation9 + $0x50c] sm:$0xf] }
 0x2e7   :  { %5377 = vmatmul.bf16.vlgmr.msrb.gmra.mxu3 %v13548_v59  ;;  %5403 = vmatmul.bf16.vlgmr.msra.gmra.mxu1 %v13538_v26  ;;  %v10096_v51 = vld [vmem:[#allocation9 + $0x268] sm:$0xf0]  ;;  %v10451_v52 = vor.u32 %v12581_v0, %v10448_v19 }
 0x2e8   :  { %5447 = vmatpush.bf16.msrb.mxu1 %v10291_v1  ;;  %5425 = vmatpush.bf16.msra.mxu3 %v10671_v22  ;;  %v10483_v1 = vor.u32 %v12589_v15, %v10480_v21  ;;  %v12493_v22 = vld [vmem:[#allocation9 + $0x24c] sm:$0xf]  ;;  %v10230_v21 = vld [vmem:[#allocation9 + $0x350] sm:$0xf] }
 0x2e9   :  { %v12653_v12 = vld [vmem:[#allocation9 + $0x74c] sm:$0xf] }
 0x2ea   :  { %5436 = vmatpush.bf16.msrb.mxu0 %v9971_v20  ;;  %5414 = vmatpush.bf16.msra.mxu2 %v10351_v11  ;;  %v10771_v20 = vor.u32 %v12661_v34, %v10768_v53  ;;  %v10039_v11 = vor.u32 %v12482_v50, %v10038_v7  ;;  %v12573_v54 = vld [vmem:[#allocation9 + $0x4cc] sm:$0xf]  ;;  %v9910_v34 = vld [vmem:[#allocation9 + $0xd0] sm:$0xf] }
 0x2eb   :  { %v10416_v57 = vld [vmem:[#allocation9 + $0x4e8] sm:$0xf0]  ;;  %v12522_v7 = vld [vmem:[#allocation9 + $0x32c] sm:$0xf0] }
 0x2ec   :  { %5448 = vmatpush.bf16.msrb.mxu1 %v10259_v5  ;;  %5426 = vmatpush.bf16.msra.mxu3 %v10639_v38  ;;  %v10736_v5 = vld [vmem:[#allocation9 + $0x768] sm:$0xf0] }
 0x2ed   :  { %v10739_v61 = vor.u32 %v12653_v12, %v10736_v5  ;;  %v12485_v38 = vld [vmem:[#allocation9 + $0x20c] sm:$0xf]  ;;  %v12442_v5 = vld [vmem:[#allocation9 + $0xac] sm:$0xf0] }
 0x2ee   :  { %5437 = vmatpush.bf16.msrb.mxu0 %v9939_v16  ;;  %5415 = vmatpush.bf16.msra.mxu2 %v10319_v3  ;;  %v10099_v16 = vor.u32 %v12493_v22, %v10096_v51  ;;  %v10064_v63 = vld [vmem:[#allocation9 + $0x228] sm:$0xf0]  ;;  %v10007_v3 = vor.u32 %v12474_v17, %v10006_v62  ;;  %v9878_v51 = vld [vmem:[#allocation9 + $0x90] sm:$0xf] }
 0x2ef   :  { %v12645_v24 = vld [vmem:[#allocation9 + $0x70c] sm:$0xf]  ;;  %v10806_v62 = vld [vmem:[#allocation9 + $0x7d0] sm:$0xf] }
 0x2f0   :  { %5449 = vmatpush.bf16.msrb.mxu1 %v10227_v2  ;;  %5427 = vmatpush.bf16.msra.mxu3 %v10607_v6  ;;  %v10704_v55 = vld [vmem:[#allocation9 + $0x728] sm:$0xf0]  ;;  %v10419_v2 = vor.u32 %v12573_v54, %v10416_v57  ;;  %v12466_v6 = vld [vmem:[#allocation9 + $0x16c] sm:$0xf0] }
 0x2f1   :  { %5416 = vmatmul.bf16.vlgmr.msra.gmra.mxu2 %v13544_v39  ;;  %v12565_v42 = vld [vmem:[#allocation9 + $0x48c] sm:$0xf]  ;;  %v9975_v45 = vor.u32 %v12466_v6, %v9974_v25  ;;  %v12674_v17 = vld [vmem:[#allocation9 + $0x7ec] sm:$0xf0] }
 0x2f2   :  { %5438 = vmatpush.bf16.msrb.mxu0 %v9907_v44  ;;  %5460 = vmatpush.bf16.msrb.mxu2 %v10547_v58  ;;  %v10384_v4 = vld [vmem:[#allocation9 + $0x4a8] sm:$0xf0]  ;;  %v10067_v44 = vor.u32 %v12485_v38, %v10064_v63  ;;  %v10707_v58 = vor.u32 %v12645_v24, %v10704_v55  ;;  %v9879_v38 = vor.u32 %v12442_v5, %v9878_v51  ;;  %v9846_v55 = vld [vmem:[#allocation9 + $0x50] sm:$0xf]  ;;  %v12462_v51 = vld [vmem:[#allocation9 + $0x154] sm:$0xf] }
 0x2f3   :  { %v12637_v8 = vld [vmem:[#allocation9 + $0x6cc] sm:$0xf]  ;;  %v10807_v40 = vor.u32 %v12674_v17, %v10806_v62  ;;  %v12666_v25 = vld [vmem:[#allocation9 + $0x7ac] sm:$0xf0]  ;;  %v9976_v5 = vld [vmem:[#allocation9 + $0x170] sm:$0xf0] }
 0x2f4   :  { %5450 = vmatpush.bf16.msrb.mxu1 %v10195_v47  ;;  %5428 = vmatpush.bf16.msra.mxu3 %v10575_v31  ;;  %v10672_v9 = vld [vmem:[#allocation9 + $0x6e8] sm:$0xf0]  ;;  %v10387_v47 = vor.u32 %v12565_v42, %v10384_v4  ;;  %v12594_v42 = vld [vmem:[#allocation9 + $0x56c] sm:$0xf0] }
 0x2f5   :  { %v12557_v29 = vld [vmem:[#allocation9 + $0x44c] sm:$0xf]  ;;  %v10675_v13 = vor.u32 %v12637_v8, %v10672_v9  ;;  %v10134_v4 = vld [vmem:[#allocation9 + $0x290] sm:$0xf] }
 0x2f6   :  { %5439 = vmatpush.bf16.msrb.mxu0 %v9875_v30  ;;  %5461 = vmatpush.bf16.msrb.mxu2 %v10515_v14  ;;  %v10352_v46 = vld [vmem:[#allocation9 + $0x468] sm:$0xf0]  ;;  %v9942_v30 = vld [vmem:[#allocation9 + $0x110] sm:$0xf] }
 0x2f7   :  { %5429 = vmatmul.bf16.vlgmr.msra.gmra.mxu3 %v13548_v59  ;;  %v12458_v14 = vld [vmem:[#allocation9 + $0x12c] sm:$0xf0]  ;;  %v12629_v31 = vld [vmem:[#allocation9 + $0x68c] sm:$0xf]  ;;  %v10355_v15 = vor.u32 %v12557_v29, %v10352_v46  ;;  %v12478_v29 = vld [vmem:[#allocation9 + $0x1d4] sm:$0xf] }
 0x2f8   :  { %5451 = vmatpush.bf16.msrb.mxu1 %v10163_v27  ;;  %5473 = vmatpush.bf16.msrb.mxu3 %v10803_v32  ;;  %v10640_v33 = vld [vmem:[#allocation9 + $0x6a8] sm:$0xf0]  ;;  %v12530_v27 = vld [vmem:[#allocation9 + $0x36c] sm:$0xf0]  ;;  %v9943_v32 = vor.u32 %v12458_v14, %v9942_v30  ;;  %v10040_v46 = vld [vmem:[#allocation9 + $0x1f0] sm:$0xf0] }
 0x2f9   :  { %v12549_v49 = vld [vmem:[#allocation9 + $0x40c] sm:$0xf]  ;;  %v10643_v53 = vor.u32 %v12629_v31, %v10640_v33  ;;  %v10231_v56 = vor.u32 %v12530_v27, %v10230_v21  ;;  %v12426_v9 = vld [vmem:[#allocation9 + $0x2c] sm:$0xf0] }
 0x2fa   :  { %5440 = vmatpush.bf16.msrb.mxu0 %v9843_v18  ;;  %5462 = vmatpush.bf16.msrb.mxu2 %v10483_v1  ;;  %v10320_v36 = vld [vmem:[#allocation9 + $0x428] sm:$0xf0]  ;;  %v12450_v18 = vld [vmem:[#allocation9 + $0xec] sm:$0xf0] }
 0x2fb   :  { %v10550_v1 = vld [vmem:[#allocation9 + $0x5d0] sm:$0xf]  ;;  %v12621_v0 = vld [vmem:[#allocation9 + $0x64c] sm:$0xf]  ;;  %v9911_v50 = vor.u32 %v12450_v18, %v9910_v34  ;;  %v10008_v34 = vld [vmem:[#allocation9 + $0x1b0] sm:$0xf0] }
 0x2fc   :  { %5452 = vmatpush.bf16.msrb.mxu1 %v10131_v48  ;;  %5474 = vmatpush.bf16.msrb.mxu3 %v10771_v20  ;;  %v10608_v19 = vld [vmem:[#allocation9 + $0x668] sm:$0xf0]  ;;  %v10323_v48 = vor.u32 %v12549_v49, %v10320_v36  ;;  %v10198_v20 = vld [vmem:[#allocation9 + $0x310] sm:$0xf]  ;;  %v10551_v22 = vor.u32 %v12610_v43, %v10550_v1  ;;  %v12470_v36 = vld [vmem:[#allocation9 + $0x194] sm:$0xf] }
 0x2fd   :  { %v10611_v12 = vor.u32 %v12621_v0, %v10608_v19  ;;  %v12613_v54 = vld [vmem:[#allocation9 + $0x60c] sm:$0xf]  ;;  %v12498_v30 = vld [vmem:[#allocation9 + $0x26c] sm:$0xf0]  ;;  %v10296_v0 = vld [vmem:[#allocation9 + $0x3f0] sm:$0xf0] }
 0x2fe   :  { %5441 = vmatpush.bf16.msrb.mxu0 %v9811_v35  ;;  %5463 = vmatpush.bf16.msrb.mxu2 %v10451_v52  ;;  %v10518_v35 = vld [vmem:[#allocation9 + $0x590] sm:$0xf]  ;;  %v10576_v57 = vld [vmem:[#allocation9 + $0x628] sm:$0xf0] }
 0x2ff   :  { %v12602_v52 = vld [vmem:[#allocation9 + $0x5ac] sm:$0xf0]  ;;  %v10579_v24 = vor.u32 %v12613_v54, %v10576_v57  ;;  %v10264_v54 = vld [vmem:[#allocation9 + $0x3b0] sm:$0xf0] }
 0x300   :  { %5453 = vmatpush.bf16.msrb.mxu1 %v10099_v16  ;;  %5475 = vmatpush.bf16.msrb.mxu3 %v10739_v61  ;;  %v10166_v16 = vld [vmem:[#allocation9 + $0x2d0] sm:$0xf]  ;;  %v10519_v63 = vor.u32 %v12602_v52, %v10518_v35 }
 0x301   :  { %5442 = vmatmul.bf16.vlgmr.msrb.gmra.mxu0 %v13534_v60  ;;  %v12514_v61 = vld [vmem:[#allocation9 + $0x2ec] sm:$0xf0] }
 0x302   :  { %5486 = vmatpush.bf16.msra.mxu0 %v10039_v11  ;;  %5464 = vmatpush.bf16.msrb.mxu2 %v10419_v2  ;;  %v10199_v11 = vor.u32 %v12522_v7, %v10198_v20  ;;  %v12434_v2 = vld [vmem:[#allocation9 + $0x6c] sm:$0xf0]  ;;  %v10167_v41 = vor.u32 %v12514_v61, %v10166_v16  ;;  %v9979_v16 = vor.u32 %v12462_v51, %v9976_v5  ;;  %v10776_v51 = vld [vmem:[#allocation9 + $0x7b0] sm:$0xf0] }
 0x303   :  { %v9847_v6 = vor.u32 %v12434_v2, %v9846_v55  ;;  %v10742_v14 = vld [vmem:[#allocation9 + $0x750] sm:$0xf]  ;;  %v12422_v5 = vld [vmem:[#allocation9 + $0x14] sm:$0xf] }
 0x304   :  { %5454 = vmatpush.bf16.msrb.mxu1 %v10067_v44  ;;  %5476 = vmatpush.bf16.msrb.mxu3 %v10707_v58  ;;  %v12506_v44 = vld [vmem:[#allocation9 + $0x2ac] sm:$0xf0] }
 0x305   :  { %v10774_v58 = vld [vmem:[#allocation9 + $0x790] sm:$0xf]  ;;  %v10135_v23 = vor.u32 %v12506_v44, %v10134_v4 }
 0x306   :  { %5487 = vmatpush.bf16.msra.mxu0 %v10007_v3  ;;  %5465 = vmatpush.bf16.msrb.mxu2 %v10387_v47  ;;  %v10486_v3 = vld [vmem:[#allocation9 + $0x550] sm:$0xf] }
 0x307   :  { %5455 = vmatmul.bf16.vlgmr.msrb.gmra.mxu1 %v13538_v26  ;;  %v10487_v8 = vor.u32 %v12594_v42, %v10486_v3  ;;  %v10454_v47 = vld [vmem:[#allocation9 + $0x510] sm:$0xf] }
 0x308   :  { %5499 = vmatpush.bf16.msra.mxu1 %v10295_v37  ;;  %5477 = vmatpush.bf16.msrb.mxu3 %v10675_v13  ;;  %v9814_v37 = vld [vmem:[#allocation9 + $0x10] sm:$0xf]  ;;  %v10455_v33 = vor.u32 %v12586_v10, %v10454_v47 }
 0x309   :  { %v10102_v13 = vld [vmem:[#allocation9 + $0x250] sm:$0xf]  ;;  %v9815_v31 = vor.u32 %v12426_v9, %v9814_v37  ;;  %v10552_v9 = vld [vmem:[#allocation9 + $0x5f0] sm:$0xf0] }
 0x30a   :  { %5488 = vmatpush.bf16.msra.mxu0 %v9975_v45  ;;  %5466 = vmatpush.bf16.msrb.mxu2 %v10355_v15  ;;  %v10775_v45 = vor.u32 %v12666_v25, %v10774_v58  ;;  %v10043_v15 = vor.u32 %v12478_v29, %v10040_v46  ;;  %v10422_v21 = vld [vmem:[#allocation9 + $0x4d0] sm:$0xf]  ;;  %v12446_v25 = vld [vmem:[#allocation9 + $0xd4] sm:$0xf] }
 0x30b   :  { %v12578_v27 = vld [vmem:[#allocation9 + $0x4ec] sm:$0xf0] }
 0x30c   :  { %5500 = vmatpush.bf16.msra.mxu1 %v10263_v28  ;;  %5478 = vmatpush.bf16.msrb.mxu3 %v10643_v53  ;;  %v12658_v28 = vld [vmem:[#allocation9 + $0x76c] sm:$0xf0]  ;;  %v10423_v19 = vor.u32 %v12578_v27, %v10422_v21 }
 0x30d   :  { %v10743_v49 = vor.u32 %v12658_v28, %v10742_v14  ;;  %v10070_v53 = vld [vmem:[#allocation9 + $0x210] sm:$0xf]  ;;  %v9880_v14 = vld [vmem:[#allocation9 + $0xb0] sm:$0xf0] }
 0x30e   :  { %5489 = vmatpush.bf16.msra.mxu0 %v9943_v32  ;;  %5467 = vmatpush.bf16.msrb.mxu2 %v10323_v48  ;;  %v10103_v32 = vor.u32 %v12498_v30, %v10102_v13  ;;  %v12490_v18 = vld [vmem:[#allocation9 + $0x22c] sm:$0xf0]  ;;  %v10011_v48 = vor.u32 %v12470_v36, %v10008_v34  ;;  %v12438_v30 = vld [vmem:[#allocation9 + $0x94] sm:$0xf] }
 0x30f   :  { %v10710_v1 = vld [vmem:[#allocation9 + $0x710] sm:$0xf]  ;;  %v10071_v20 = vor.u32 %v12490_v18, %v10070_v53  ;;  %v12670_v36 = vld [vmem:[#allocation9 + $0x7d4] sm:$0xf]  ;;  %v9883_v53 = vor.u32 %v12438_v30, %v9880_v14  ;;  %v9982_v30 = vld [vmem:[#allocation9 + $0x158] sm:$0xf] }
 0x310   :  { %5501 = vmatpush.bf16.msra.mxu1 %v10231_v56  ;;  %5479 = vmatpush.bf16.msrb.mxu3 %v10611_v12  ;;  %v12650_v43 = vld [vmem:[#allocation9 + $0x72c] sm:$0xf0]  ;;  %v12542_v56 = vld [vmem:[#allocation9 + $0x3d4] sm:$0xf] }
 0x311   :  { %5468 = vmatmul.bf16.vlgmr.msrb.gmra.mxu2 %v13544_v39  ;;  %v10711_v7 = vor.u32 %v12650_v43, %v10710_v1  ;;  %v10299_v12 = vor.u32 %v12542_v56, %v10296_v0  ;;  %v10678_v35 = vld [vmem:[#allocation9 + $0x6d0] sm:$0xf]  ;;  %v10808_v34 = vld [vmem:[#allocation9 + $0x7f0] sm:$0xf0] }
 0x312   :  { %5490 = vmatpush.bf16.msra.mxu0 %v9911_v50  ;;  %5512 = vmatpush.bf16.msra.mxu2 %v10551_v22  ;;  %v10390_v50 = vld [vmem:[#allocation9 + $0x490] sm:$0xf]  ;;  %v12430_v56 = vld [vmem:[#allocation9 + $0x54] sm:$0xf] }
 0x313   :  { %v12570_v22 = vld [vmem:[#allocation9 + $0x4ac] sm:$0xf0]  ;;  %v9848_v0 = vld [vmem:[#allocation9 + $0x70] sm:$0xf0] }
 0x314   :  { %5502 = vmatpush.bf16.msra.mxu1 %v10199_v11  ;;  %5480 = vmatpush.bf16.msrb.mxu3 %v10579_v24  ;;  %v12642_v52 = vld [vmem:[#allocation9 + $0x6ec] sm:$0xf0]  ;;  %v12534_v11 = vld [vmem:[#allocation9 + $0x394] sm:$0xf]  ;;  %v10391_v57 = vor.u32 %v12570_v22, %v10390_v50 }
 0x315   :  { %v10679_v61 = vor.u32 %v12642_v52, %v10678_v35  ;;  %v10358_v62 = vld [vmem:[#allocation9 + $0x450] sm:$0xf]  ;;  %v9944_v24 = vld [vmem:[#allocation9 + $0x130] sm:$0xf0] }
 0x316   :  { %5491 = vmatpush.bf16.msra.mxu0 %v9879_v38  ;;  %5513 = vmatpush.bf16.msra.mxu2 %v10519_v63  ;;  %v12562_v17 = vld [vmem:[#allocation9 + $0x46c] sm:$0xf0]  ;;  %v12454_v38 = vld [vmem:[#allocation9 + $0x114] sm:$0xf]  ;;  %v10267_v63 = vor.u32 %v12534_v11, %v10264_v54 }
 0x317   :  { %5481 = vmatmul.bf16.vlgmr.msrb.gmra.mxu3 %v13548_v59  ;;  %v10646_v55 = vld [vmem:[#allocation9 + $0x690] sm:$0xf]  ;;  %v10359_v3 = vor.u32 %v12562_v17, %v10358_v62  ;;  %v9947_v4 = vor.u32 %v12454_v38, %v9944_v24  ;;  %v10136_v50 = vld [vmem:[#allocation9 + $0x2b0] sm:$0xf0]  ;;  %v12483_v62 = vld [vmem:[#allocation9 + $0x1f4] sm:$0xf0] }
 0x318   :  { %5503 = vmatpush.bf16.msra.mxu1 %v10167_v41  ;;  %5525 = vmatpush.bf16.msra.mxu3 %v10807_v40  ;;  %v12634_v2 = vld [vmem:[#allocation9 + $0x6ac] sm:$0xf0]  ;;  %v12526_v41 = vld [vmem:[#allocation9 + $0x354] sm:$0xf] }
 0x319   :  { %v10232_v40 = vld [vmem:[#allocation9 + $0x370] sm:$0xf0]  ;;  %v10326_v42 = vld [vmem:[#allocation9 + $0x410] sm:$0xf]  ;;  %v10647_v44 = vor.u32 %v12634_v2, %v10646_v55 }
 0x31a   :  { %5492 = vmatpush.bf16.msra.mxu0 %v9847_v6  ;;  %5514 = vmatpush.bf16.msra.mxu2 %v10487_v8  ;;  %v12554_v58 = vld [vmem:[#allocation9 + $0x42c] sm:$0xf0]  ;;  %v9912_v6 = vld [vmem:[#allocation9 + $0xf0] sm:$0xf0]  ;;  %v10235_v37 = vor.u32 %v12526_v41, %v10232_v40 }
 0x31b   :  { %v12606_v8 = vld [vmem:[#allocation9 + $0x5d4] sm:$0xf]  ;;  %v10614_v47 = vld [vmem:[#allocation9 + $0x650] sm:$0xf]  ;;  %v10327_v29 = vor.u32 %v12554_v58, %v10326_v42  ;;  %v9915_v46 = vor.u32 %v12446_v25, %v9912_v6  ;;  %v12475_v58 = vld [vmem:[#allocation9 + $0x1b4] sm:$0xf0] }
 0x31c   :  { %5504 = vmatpush.bf16.msra.mxu1 %v10135_v23  ;;  %5526 = vmatpush.bf16.msra.mxu3 %v10775_v45  ;;  %v12626_v10 = vld [vmem:[#allocation9 + $0x66c] sm:$0xf0]  ;;  %v12518_v23 = vld [vmem:[#allocation9 + $0x314] sm:$0xf]  ;;  %v10555_v13 = vor.u32 %v12606_v8, %v10552_v9  ;;  %v10302_v9 = vld [vmem:[#allocation9 + $0x3d8] sm:$0xf] }
 0x31d   :  { %v10200_v45 = vld [vmem:[#allocation9 + $0x330] sm:$0xf0]  ;;  %v10615_v28 = vor.u32 %v12626_v10, %v10614_v47  ;;  %v10582_v21 = vld [vmem:[#allocation9 + $0x610] sm:$0xf]  ;;  %v12547_v47 = vld [vmem:[#allocation9 + $0x3f4] sm:$0xf0] }
 0x31e   :  { %5493 = vmatpush.bf16.msra.mxu0 %v9815_v31  ;;  %5515 = vmatpush.bf16.msra.mxu2 %v10455_v33  ;;  %v10203_v31 = vor.u32 %v12518_v23, %v10200_v45  ;;  %v12598_v33 = vld [vmem:[#allocation9 + $0x594] sm:$0xf]  ;;  %v12618_v27 = vld [vmem:[#allocation9 + $0x62c] sm:$0xf0]  ;;  %v10303_v14 = vor.u32 %v12547_v47, %v10302_v9  ;;  %v12515_v9 = vld [vmem:[#allocation9 + $0x2f4] sm:$0xf0] }
 0x31f   :  { %v10583_v1 = vor.u32 %v12618_v27, %v10582_v21  ;;  %v12662_v22 = vld [vmem:[#allocation9 + $0x794] sm:$0xf]  ;;  %v12539_v21 = vld [vmem:[#allocation9 + $0x3b4] sm:$0xf0] }
 0x320   :  { %5505 = vmatpush.bf16.msra.mxu1 %v10103_v32  ;;  %5527 = vmatpush.bf16.msra.mxu3 %v10743_v49  ;;  %v12510_v32 = vld [vmem:[#allocation9 + $0x2d4] sm:$0xf]  ;;  %v10814_v47 = vld [vmem:[#allocation9 + $0x7d8] sm:$0xf] }
 0x321   :  { %5494 = vmatmul.bf16.vlgmr.msra.gmra.mxu0 %v13534_v60  ;;  %v10168_v49 = vld [vmem:[#allocation9 + $0x2f0] sm:$0xf0] }
 0x322   :  { %5538 = vmatpush.bf16.msrb.mxu0 %v10043_v15  ;;  %5516 = vmatpush.bf16.msra.mxu2 %v10423_v19  ;;  %v10520_v15 = vld [vmem:[#allocation9 + $0x5b0] sm:$0xf0]  ;;  %v10171_v43 = vor.u32 %v12510_v32, %v10168_v49  ;;  %v13567_v32 = vld [vmem:[#allocation10] sm:$0xff] }
 0x323   :  { %v10523_v18 = vor.u32 %v12598_v33, %v10520_v15  ;;  %v12590_v19 = vld [vmem:[#allocation9 + $0x554] sm:$0xf]  ;;  %v10270_v15 = vld [vmem:[#allocation9 + $0x398] sm:$0xf] }
 0x324   :  { %5506 = vmatpush.bf16.msra.mxu1 %v10071_v20  ;;  %5528 = vmatpush.bf16.msra.mxu3 %v10711_v7  ;;  %v10488_v20 = vld [vmem:[#allocation9 + $0x570] sm:$0xf0] }
 0x325   :  { %v12502_v7 = vld [vmem:[#allocation9 + $0x294] sm:$0xf]  ;;  %v10491_v35 = vor.u32 %v12590_v19, %v10488_v20  ;;  %v12531_v20 = vld [vmem:[#allocation9 + $0x374] sm:$0xf0] }
 0x326   :  { %5539 = vmatpush.bf16.msrb.mxu0 %v10011_v48  ;;  %5517 = vmatpush.bf16.msra.mxu2 %v10391_v57  ;;  %v10811_v48 = vor.u32 %v12670_v36, %v10808_v34  ;;  %v10139_v52 = vor.u32 %v12502_v7, %v10136_v50  ;;  %v9816_v11 = vld [vmem:[#allocation9 + $0x30] sm:$0xf0]  ;;  %v3982_v7 = vperm.slane %v13567_v32, 0 }
 0x327   :  { %5507 = vmatmul.bf16.vlgmr.msra.gmra.mxu1 %v13538_v26  ;;  %v12582_v54 = vld [vmem:[#allocation9 + $0x514] sm:$0xf]  ;;  %v9819_v55 = vor.u32 %v12422_v5, %v9816_v11 }
 0x328   :  { %5551 = vmatpush.bf16.msrb.mxu1 %v10299_v12  ;;  %5529 = vmatpush.bf16.msra.mxu3 %v10679_v61  ;;  %v9851_v12 = vor.u32 %v12430_v56, %v9848_v0  ;;  %v10456_v57 = vld [vmem:[#allocation9 + $0x530] sm:$0xf0]  ;;  %v10046_v61 = vld [vmem:[#allocation9 + $0x1d8] sm:$0xf] }
 0x329   :  { %v12494_v17 = vld [vmem:[#allocation9 + $0x254] sm:$0xf]  ;;  %v10459_v2 = vor.u32 %v12582_v54, %v10456_v57  ;;  %v10047_v41 = vor.u32 %v12483_v62, %v10046_v61  ;;  %v10558_v54 = vld [vmem:[#allocation9 + $0x5d8] sm:$0xf] }
 0x32a   :  { %5540 = vmatpush.bf16.msrb.mxu0 %v9979_v16  ;;  %5518 = vmatpush.bf16.msra.mxu2 %v10359_v3  ;;  %v10779_v16 = vor.u32 %v12662_v22, %v10776_v51  ;;  %v10104_v38 = vld [vmem:[#allocation9 + $0x270] sm:$0xf0]  ;;  %v12611_v57 = vld [vmem:[#allocation9 + $0x5f4] sm:$0xf0] }
 0x32b   :  { %v10744_v24 = vld [vmem:[#allocation9 + $0x770] sm:$0xf0]  ;;  %v10107_v42 = vor.u32 %v12494_v17, %v10104_v38  ;;  %v10206_v62 = vld [vmem:[#allocation9 + $0x318] sm:$0xf] }
 0x32c   :  { %5552 = vmatpush.bf16.msrb.mxu1 %v10267_v63  ;;  %5530 = vmatpush.bf16.msra.mxu3 %v10647_v44  ;;  %v12654_v63 = vld [vmem:[#allocation9 + $0x754] sm:$0xf]  ;;  %v10014_v44 = vld [vmem:[#allocation9 + $0x198] sm:$0xf] }
 0x32d   :  { %v12574_v40 = vld [vmem:[#allocation9 + $0x4d4] sm:$0xf]  ;;  %v10015_v23 = vor.u32 %v12475_v58, %v10014_v44  ;;  %v12523_v17 = vld [vmem:[#allocation9 + $0x334] sm:$0xf0] }
 0x32e   :  { %5541 = vmatpush.bf16.msrb.mxu0 %v9947_v4  ;;  %5519 = vmatpush.bf16.msra.mxu2 %v10327_v29  ;;  %v10424_v3 = vld [vmem:[#allocation9 + $0x4f0] sm:$0xf0]  ;;  %v10747_v4 = vor.u32 %v12654_v63, %v10744_v24  ;;  %v10526_v44 = vld [vmem:[#allocation9 + $0x598] sm:$0xf] }
 0x32f   :  { %v12486_v25 = vld [vmem:[#allocation9 + $0x214] sm:$0xf]  ;;  %v10427_v10 = vor.u32 %v12574_v40, %v10424_v3  ;;  %v12443_v40 = vld [vmem:[#allocation9 + $0xb4] sm:$0xf0] }
 0x330   :  { %5553 = vmatpush.bf16.msrb.mxu1 %v10235_v37  ;;  %5531 = vmatpush.bf16.msra.mxu3 %v10615_v28  ;;  %v10072_v6 = vld [vmem:[#allocation9 + $0x230] sm:$0xf0]  ;;  %v12467_v28 = vld [vmem:[#allocation9 + $0x174] sm:$0xf0] }
 0x331   :  { %5520 = vmatmul.bf16.vlgmr.msra.gmra.mxu2 %v13544_v39  ;;  %v12646_v37 = vld [vmem:[#allocation9 + $0x714] sm:$0xf]  ;;  %v10075_v45 = vor.u32 %v12486_v25, %v10072_v6  ;;  %v9983_v49 = vor.u32 %v12467_v28, %v9982_v30  ;;  %v12603_v58 = vld [vmem:[#allocation9 + $0x5b4] sm:$0xf0] }
 0x332   :  { %5542 = vmatpush.bf16.msrb.mxu0 %v9915_v46  ;;  %5564 = vmatpush.bf16.msrb.mxu2 %v10555_v13  ;;  %v10712_v8 = vld [vmem:[#allocation9 + $0x730] sm:$0xf0]  ;;  %v12435_v30 = vld [vmem:[#allocation9 + $0x74] sm:$0xf0] }
 0x333   :  { %v10715_v29 = vor.u32 %v12646_v37, %v10712_v8  ;;  %v12566_v46 = vld [vmem:[#allocation9 + $0x494] sm:$0xf]  ;;  %v10174_v8 = vld [vmem:[#allocation9 + $0x2d8] sm:$0xf] }
 0x334   :  { %5554 = vmatpush.bf16.msrb.mxu1 %v10203_v31  ;;  %5532 = vmatpush.bf16.msra.mxu3 %v10583_v1  ;;  %v10392_v13 = vld [vmem:[#allocation9 + $0x4b0] sm:$0xf0]  ;;  %v10271_v1 = vor.u32 %v12539_v21, %v10270_v15  ;;  %v12507_v15 = vld [vmem:[#allocation9 + $0x2b4] sm:$0xf0] }
 0x335   :  { %v12638_v31 = vld [vmem:[#allocation9 + $0x6d4] sm:$0xf]  ;;  %v10395_v27 = vor.u32 %v12566_v46, %v10392_v13  ;;  %v10175_v46 = vor.u32 %v12515_v9, %v10174_v8  ;;  %v9854_v13 = vld [vmem:[#allocation9 + $0x58] sm:$0xf]  ;;  %v9984_v9 = vld [vmem:[#allocation9 + $0x178] sm:$0xf0] }
 0x336   :  { %5543 = vmatpush.bf16.msrb.mxu0 %v9883_v53  ;;  %5565 = vmatpush.bf16.msrb.mxu2 %v10523_v18  ;;  %v10680_v33 = vld [vmem:[#allocation9 + $0x6f0] sm:$0xf0]  ;;  %v9950_v18 = vld [vmem:[#allocation9 + $0x118] sm:$0xf] }
 0x337   :  { %5533 = vmatmul.bf16.vlgmr.msra.gmra.mxu3 %v13548_v59  ;;  %v10683_v36 = vor.u32 %v12638_v31, %v10680_v33  ;;  %v12558_v34 = vld [vmem:[#allocation9 + $0x454] sm:$0xf]  ;;  %v12595_v31 = vld [vmem:[#allocation9 + $0x574] sm:$0xf0] }
 0x338   :  { %5555 = vmatpush.bf16.msrb.mxu1 %v10171_v43  ;;  %5577 = vmatpush.bf16.msrb.mxu3 %v10811_v48  ;;  %v10360_v53 = vld [vmem:[#allocation9 + $0x470] sm:$0xf0]  ;;  %v12459_v43 = vld [vmem:[#allocation9 + $0x134] sm:$0xf0] }
 0x339   :  { %v12630_v56 = vld [vmem:[#allocation9 + $0x694] sm:$0xf]  ;;  %v10238_v48 = vld [vmem:[#allocation9 + $0x358] sm:$0xf]  ;;  %v10363_v50 = vor.u32 %v12558_v34, %v10360_v53  ;;  %v9951_v51 = vor.u32 %v12459_v43, %v9950_v18 }
 0x33a   :  { %5544 = vmatpush.bf16.msrb.mxu0 %v9851_v12  ;;  %5566 = vmatpush.bf16.msrb.mxu2 %v10491_v35  ;;  %v10648_v0 = vld [vmem:[#allocation9 + $0x6b0] sm:$0xf0]  ;;  %v9918_v35 = vld [vmem:[#allocation9 + $0xd8] sm:$0xf]  ;;  %v10239_v11 = vor.u32 %v12531_v20, %v10238_v48  ;;  %v12479_v48 = vld [vmem:[#allocation9 + $0x1dc] sm:$0xf] }
 0x33b   :  { %v12550_v22 = vld [vmem:[#allocation9 + $0x414] sm:$0xf]  ;;  %v10651_v12 = vor.u32 %v12630_v56, %v10648_v0  ;;  %v10142_v33 = vld [vmem:[#allocation9 + $0x298] sm:$0xf]  ;;  %v10048_v20 = vld [vmem:[#allocation9 + $0x1f8] sm:$0xf0] }
 0x33c   :  { %5556 = vmatpush.bf16.msrb.mxu1 %v10139_v52  ;;  %5578 = vmatpush.bf16.msrb.mxu3 %v10779_v16  ;;  %v10328_v5 = vld [vmem:[#allocation9 + $0x430] sm:$0xf0]  ;;  %v12451_v52 = vld [vmem:[#allocation9 + $0xf4] sm:$0xf0]  ;;  %v10143_v18 = vor.u32 %v12507_v15, %v10142_v33  ;;  %v9952_v15 = vld [vmem:[#allocation9 + $0x138] sm:$0xf0] }
 0x33d   :  { %v12622_v16 = vld [vmem:[#allocation9 + $0x654] sm:$0xf]  ;;  %v10331_v63 = vor.u32 %v12550_v22, %v10328_v5  ;;  %v10782_v21 = vld [vmem:[#allocation9 + $0x798] sm:$0xf] }
 0x33e   :  { %5545 = vmatpush.bf16.msrb.mxu0 %v9819_v55  ;;  %5567 = vmatpush.bf16.msrb.mxu2 %v10459_v2  ;;  %v5287_v19 = vpop.f32.mrf.mxu0  ;;  %v10616_v61 = vld [vmem:[#allocation9 + $0x670] sm:$0xf0]  ;;  %v9919_v55 = vor.u32 %v12451_v52, %v9918_v35  ;;  %v10559_v2 = vor.u32 %v12611_v57, %v10558_v54  ;;  %v9822_v34 = vld [vmem:[#allocation9 + $0x18] sm:$0xf]  ;;  %v10051_v35 = vor.u32 %v12479_v48, %v10048_v20  ;;  %v12447_v20 = vld [vmem:[#allocation9 + $0xdc] sm:$0xf] }
 0x33f   :  { %v5288_v38 = vadd.f32 %v5287_v19, %v3982_v7  ;;  %v12614_v25 = vld [vmem:[#allocation9 + $0x614] sm:$0xf]  ;;  %v10462_v43 = vld [vmem:[#allocation9 + $0x518] sm:$0xf] }
 0x340   :  { %5557 = vmatpush.bf16.msrb.mxu1 %v10107_v42  ;;  %5579 = vmatpush.bf16.msrb.mxu3 %v10747_v4  ;;  %v10619_v42 = vor.u32 %v12622_v16, %v10616_v61  ;;  %v10207_v4 = vor.u32 %v12523_v17, %v10206_v62  ;;  %v10584_v37 = vld [vmem:[#allocation9 + $0x630] sm:$0xf0]  ;;  %v12587_v56 = vld [vmem:[#allocation9 + $0x534] sm:$0xf0]  ;;  %v12471_v16 = vld [vmem:[#allocation9 + $0x19c] sm:$0xf] }
 0x341   :  { %5546 = vmatmul.bf16.vlgmr.msrb.gmra.mxu0 %v13534_v60  ;;  %v10110_v7 = vld [vmem:[#allocation9 + $0x258] sm:$0xf]  ;;  %v10463_v5 = vor.u32 %v12587_v56, %v10462_v43  ;;  %v10016_v61 = vld [vmem:[#allocation9 + $0x1b8] sm:$0xf0] }
 0x342   :  { %5590 = vmatpush.bf16.msra.mxu0 %v10047_v41  ;;  %5568 = vmatpush.bf16.msrb.mxu2 %v10427_v10  ;;  %v9886_v41 = vld [vmem:[#allocation9 + $0x98] sm:$0xf] }
 0x343   :  { %v12675_v10 = vld [vmem:[#allocation9 + $0x7f4] sm:$0xf0] }
 0x344   :  { %5558 = vmatpush.bf16.msrb.mxu1 %v10075_v45  ;;  %5580 = vmatpush.bf16.msrb.mxu3 %v10715_v29  ;;  %v5300_v24 = vpop.f32.mrf.mxu1  ;;  %v10527_v45 = vor.u32 %v12603_v58, %v10526_v44  ;;  %v10587_v29 = vor.u32 %v12614_v25, %v10584_v37  ;;  %v10815_v28 = vor.u32 %v12675_v10, %v10814_v47  ;;  %v10750_v22 = vld [vmem:[#allocation9 + $0x758] sm:$0xf]  ;;  %v12463_v37 = vld [vmem:[#allocation9 + $0x15c] sm:$0xf] }
 0x345   :  { %v13571_v3 = vadd.f32 %v5300_v24, %v5288_v38  ;;  %v10430_v52 = vld [vmem:[#allocation9 + $0x4d8] sm:$0xf] }
 0x346   :  { %5591 = vmatpush.bf16.msra.mxu0 %v10015_v23  ;;  %5569 = vmatpush.bf16.msrb.mxu2 %v10395_v27  ;;  %v5289_v6 = vpop.f32.mrf.mxu0  ;;  %v9887_v23 = vor.u32 %v12443_v40, %v9886_v41  ;;  %v12667_v27 = vld [vmem:[#allocation9 + $0x7b4] sm:$0xf0]  ;;  %v10304_v41 = vld [vmem:[#allocation9 + $0x3f8] sm:$0xf0] }
 0x347   :  { %5559 = vmatmul.bf16.vlgmr.msrb.gmra.mxu1 %v13538_v26  ;;  %v10783_v19 = vor.u32 %v12667_v27, %v10782_v21  ;;  %v10078_v62 = vld [vmem:[#allocation9 + $0x218] sm:$0xf] }
 0x348   :  { %5603 = vmatpush.bf16.msra.mxu1 %v10303_v14  ;;  %5581 = vmatpush.bf16.msrb.mxu3 %v10683_v36  ;;  %v10494_v14 = vld [vmem:[#allocation9 + $0x558] sm:$0xf]  ;;  %v9855_v36 = vor.u32 %v12435_v30, %v9854_v13  ;;  %v9987_v13 = vor.u32 %v12463_v37, %v9984_v9 }
 0x349   :  { %v10495_v53 = vor.u32 %v12595_v31, %v10494_v14  ;;  %v12491_v17 = vld [vmem:[#allocation9 + $0x234] sm:$0xf0]  ;;  %v12455_v31 = vld [vmem:[#allocation9 + $0x11c] sm:$0xf] }
 0x34a   :  { %5592 = vmatpush.bf16.msra.mxu0 %v9983_v49  ;;  %5570 = vmatpush.bf16.msrb.mxu2 %v10363_v50  ;;  %v12499_v50 = vld [vmem:[#allocation9 + $0x274] sm:$0xf0]  ;;  %v10079_v44 = vor.u32 %v12491_v17, %v10078_v62  ;;  %v9955_v56 = vor.u32 %v12455_v31, %v9952_v15  ;;  %v9888_v62 = vld [vmem:[#allocation9 + $0xb8] sm:$0xf0] }
 0x34b   :  { %v10111_v54 = vor.u32 %v12499_v50, %v10110_v7  ;;  %v10718_v38 = vld [vmem:[#allocation9 + $0x718] sm:$0xf]  ;;  %v9920_v7 = vld [vmem:[#allocation9 + $0xf8] sm:$0xf0] }
 0x34c   :  { %5604 = vmatpush.bf16.msra.mxu1 %v10271_v1  ;;  %5582 = vmatpush.bf16.msrb.mxu3 %v10651_v12  ;;  %v5302_v49 = vpop.f32.mrf.mxu1  ;;  %v12427_v1 = vld [vmem:[#allocation9 + $0x34] sm:$0xf0]  ;;  %v12663_v31 = vld [vmem:[#allocation9 + $0x79c] sm:$0xf] }
 0x34d   :  { %v9823_v12 = vor.u32 %v12427_v1, %v9822_v34  ;;  %v10398_v25 = vld [vmem:[#allocation9 + $0x498] sm:$0xf]  ;;  %v12527_v34 = vld [vmem:[#allocation9 + $0x35c] sm:$0xf] }
 0x34e   :  { %5593 = vmatpush.bf16.msra.mxu0 %v9951_v51  ;;  %5571 = vmatpush.bf16.msrb.mxu2 %v10331_v63  ;;  %v13574_v0 = vpop.f32.mrf.mxu0  ;;  %v12659_v51 = vld [vmem:[#allocation9 + $0x774] sm:$0xf0] }
 0x34f   :  { %v10751_v57 = vor.u32 %v12659_v51, %v10750_v22  ;;  %v12651_v63 = vld [vmem:[#allocation9 + $0x734] sm:$0xf0]  ;;  %v12607_v22 = vld [vmem:[#allocation9 + $0x5dc] sm:$0xf] }
 0x350   :  { %5605 = vmatpush.bf16.msra.mxu1 %v10239_v11  ;;  %5583 = vmatpush.bf16.msrb.mxu3 %v10619_v42  ;;  %v12579_v11 = vld [vmem:[#allocation9 + $0x4f4] sm:$0xf0]  ;;  %v10019_v42 = vor.u32 %v12471_v16, %v10016_v61  ;;  %v10719_v58 = vor.u32 %v12651_v63, %v10718_v38  ;;  %v10560_v51 = vld [vmem:[#allocation9 + $0x5f8] sm:$0xf0] }
 0x351   :  { %5572 = vmatmul.bf16.vlgmr.msrb.gmra.mxu2 %v13544_v39  ;;  %v10431_v40 = vor.u32 %v12579_v11, %v10430_v52  ;;  %v12571_v6 = vld [vmem:[#allocation9 + $0x4b4] sm:$0xf0]  ;;  %v10208_v52 = vld [vmem:[#allocation9 + $0x338] sm:$0xf0]  ;;  %v10563_v16 = vor.u32 %v12607_v22, %v10560_v51 }
 0x352   :  { %5594 = vmatpush.bf16.msra.mxu0 %v9919_v55  ;;  %5616 = vmatpush.bf16.msra.mxu2 %v10559_v2  ;;  %v12543_v2 = vld [vmem:[#allocation9 + $0x3dc] sm:$0xf]  ;;  %v10686_v47 = vld [vmem:[#allocation9 + $0x6d8] sm:$0xf] }
 0x353   :  { %v10307_v8 = vor.u32 %v12543_v2, %v10304_v41  ;;  %v12643_v10 = vld [vmem:[#allocation9 + $0x6f4] sm:$0xf0]  ;;  %v12439_v61 = vld [vmem:[#allocation9 + $0x9c] sm:$0xf] }
 0x354   :  { %5606 = vmatpush.bf16.msra.mxu1 %v10207_v4  ;;  %5584 = vmatpush.bf16.msrb.mxu3 %v10587_v29  ;;  %v13577_v24 = vpop.f32.mrf.mxu2  ;;  %v13579_v55 = vpop.f32.mrf.mxu1  ;;  %v10399_v29 = vor.u32 %v12571_v6, %v10398_v25  ;;  %v10687_v30 = vor.u32 %v12643_v10, %v10686_v47  ;;  %v10366_v14 = vld [vmem:[#allocation9 + $0x458] sm:$0xf]  ;;  %v12599_v63 = vld [vmem:[#allocation9 + $0x59c] sm:$0xf] }
 0x355   :  { %v10654_v21 = vld [vmem:[#allocation9 + $0x698] sm:$0xf]  ;;  %v10528_v2 = vld [vmem:[#allocation9 + $0x5b8] sm:$0xf0] }
 0x356   :  { %5595 = vmatpush.bf16.msra.mxu0 %v9887_v23  ;;  %5617 = vmatpush.bf16.msra.mxu2 %v10527_v45  ;;  %v5341_v4 = vpop.f32.mrf.mxu0  ;;  %v12535_v23 = vld [vmem:[#allocation9 + $0x39c] sm:$0xf]  ;;  %v12635_v27 = vld [vmem:[#allocation9 + $0x6b4] sm:$0xf0]  ;;  %v10531_v9 = vor.u32 %v12599_v63, %v10528_v2 }
 0x357   :  { %5585 = vmatmul.bf16.vlgmr.msrb.gmra.mxu3 %v13548_v59  ;;  %v10272_v45 = vld [vmem:[#allocation9 + $0x3b8] sm:$0xf0]  ;;  %v10334_v1 = vld [vmem:[#allocation9 + $0x418] sm:$0xf] }
 0x358   :  { %5607 = vmatpush.bf16.msra.mxu1 %v10175_v46  ;;  %5629 = vmatpush.bf16.msra.mxu3 %v10815_v28  ;;  %v12563_v28 = vld [vmem:[#allocation9 + $0x474] sm:$0xf0]  ;;  %v10275_v33 = vor.u32 %v12535_v23, %v10272_v45  ;;  %v12511_v4 = vld [vmem:[#allocation9 + $0x2dc] sm:$0xf] }
 0x359   :  { %v12555_v48 = vld [vmem:[#allocation9 + $0x434] sm:$0xf0]  ;;  %v12671_v25 = vld [vmem:[#allocation9 + $0x7dc] sm:$0xf] }
 0x35a   :  { %5596 = vmatpush.bf16.msra.mxu0 %v9855_v36  ;;  %5618 = vmatpush.bf16.msra.mxu2 %v10495_v53  ;;  %v13582_v46 = vpop.f32.mrf.mxu3  ;;  %v10240_v53 = vld [vmem:[#allocation9 + $0x378] sm:$0xf0]  ;;  %v10335_v11 = vor.u32 %v12555_v48, %v10334_v1  ;;  %v10590_v41 = vld [vmem:[#allocation9 + $0x618] sm:$0xf] }
 0x35b   :  { %v10243_v50 = vor.u32 %v12527_v34, %v10240_v53  ;;  %v10816_v6 = vld [vmem:[#allocation9 + $0x7f8] sm:$0xf0]  ;;  %v12706_v48 = vld [vmem:[#allocation12 + $0xec] sm:$0xf0] }
 0x35c   :  { %5608 = vmatpush.bf16.msra.mxu1 %v10143_v18  ;;  %5630 = vmatpush.bf16.msra.mxu3 %v10783_v19  ;;  %v5315_v49 = vpop.f32.mrf.mxu2  ;;  %v5354_v36 = vpop.f32.mrf.mxu1  ;;  %v10367_v18 = vor.u32 %v12563_v28, %v10366_v14  ;;  %v10655_v19 = vor.u32 %v12635_v27, %v10654_v21  ;;  %v12431_v23 = vld [vmem:[#allocation9 + $0x5c] sm:$0xf] }
 0x35d   :  { %v9856_v45 = vld [vmem:[#allocation9 + $0x78] sm:$0xf0] }
 0x35e   :  { %5597 = vmatpush.bf16.msra.mxu0 %v9823_v12  ;;  %5619 = vmatpush.bf16.msra.mxu2 %v10463_v5  ;;  %v13585_v43 = vpop.f32.mrf.mxu0  ;;  %v10622_v12 = vld [vmem:[#allocation9 + $0x658] sm:$0xf]  ;;  %v12503_v14 = vld [vmem:[#allocation9 + $0x29c] sm:$0xf]  ;;  %v9859_v21 = vor.u32 %v12431_v23, %v9856_v45 }
 0x35f   :  { %v12627_v5 = vld [vmem:[#allocation9 + $0x674] sm:$0xf0]  ;;  %v10144_v28 = vld [vmem:[#allocation9 + $0x2b8] sm:$0xf0] }
 0x360   :  { %5609 = vmatpush.bf16.msra.mxu1 %v10111_v54  ;;  %5631 = vmatpush.bf16.msra.mxu3 %v10751_v57  ;;  %v9923_v57 = vor.u32 %v12447_v20, %v9920_v7  ;;  %v10623_v17 = vor.u32 %v12627_v5, %v10622_v12  ;;  %v12423_v27 = vld [vmem:[#allocation9 + $0x1c] sm:$0xf]  ;;  %v10147_v36 = vor.u32 %v12503_v14, %v10144_v28  ;;  %v12698_v23 = vld [vmem:[#allocation12 + $0xac] sm:$0xf0] }
 0x361   :  { %5598 = vmatmul.bf16.vlgmr.msra.gmra.mxu0 %v13534_v60  ;;  %v9824_v34 = vld [vmem:[#allocation9 + $0x38] sm:$0xf0] }
 0x362   :  { %5642 = vmatpush.bf16.msrb.mxu0 %v10051_v35  ;;  %5620 = vmatpush.bf16.msra.mxu2 %v10431_v40  ;;  %v12519_v35 = vld [vmem:[#allocation9 + $0x31c] sm:$0xf]  ;;  %v5328_v54 = vpop.f32.mrf.mxu3  ;;  %v9827_v12 = vor.u32 %v12423_v27, %v9824_v34  ;;  %v10886_v27 = vld [vmem:[#allocation12 + $0x80] sm:$0xf] }
 0x363   :  { %v10211_v38 = vor.u32 %v12519_v35, %v10208_v52  ;;  %v12583_v53 = vld [vmem:[#allocation9 + $0x51c] sm:$0xf] }
 0x364   :  { %5610 = vmatpush.bf16.msra.mxu1 %v10079_v44  ;;  %5632 = vmatpush.bf16.msra.mxu3 %v10719_v58  ;;  %v13587_v40 = vpop.f32.mrf.mxu2  ;;  %v10176_v44 = vld [vmem:[#allocation9 + $0x2f8] sm:$0xf0]  ;;  %v13589_v58 = vpop.f32.mrf.mxu1 }
 0x365   :  { %v10179_v10 = vor.u32 %v12511_v4, %v10176_v44  ;;  %v12495_v20 = vld [vmem:[#allocation9 + $0x25c] sm:$0xf] }
 0x366   :  { %5643 = vmatpush.bf16.msrb.mxu0 %v10019_v42  ;;  %5621 = vmatpush.bf16.msra.mxu2 %v10399_v29  ;;  %v12619_v42 = vld [vmem:[#allocation9 + $0x634] sm:$0xf0]  ;;  %v5393_v37 = vpop.f32.mrf.mxu0  ;;  %v12591_v29 = vld [vmem:[#allocation9 + $0x55c] sm:$0xf] }
 0x367   :  { %5611 = vmatmul.bf16.vlgmr.msra.gmra.mxu1 %v13538_v26  ;;  %v10591_v47 = vor.u32 %v12619_v42, %v10590_v41  ;;  %v12655_v22 = vld [vmem:[#allocation9 + $0x75c] sm:$0xf]  ;;  %v11062_v41 = vld [vmem:[#allocation12 + $0x1e0] sm:$0xf]  ;;  %v12738_v42 = vld [vmem:[#allocation12 + $0x1ec] sm:$0xf0] }
 0x368   :  { %5655 = vmatpush.bf16.msrb.mxu1 %v10307_v8  ;;  %5633 = vmatpush.bf16.msra.mxu3 %v10687_v30  ;;  %v9891_v8 = vor.u32 %v12439_v61, %v9888_v62  ;;  %v10496_v30 = vld [vmem:[#allocation9 + $0x578] sm:$0xf0]  ;;  %v12702_v61 = vld [vmem:[#allocation12 + $0xcc] sm:$0xf0] }
 0x369   :  { %v10499_v49 = vor.u32 %v12591_v29, %v10496_v30  ;;  %v10752_v51 = vld [vmem:[#allocation9 + $0x778] sm:$0xf0]  ;;  %v12734_v30 = vld [vmem:[#allocation12 + $0x1cc] sm:$0xf0] }
 0x36a   :  { %5644 = vmatpush.bf16.msrb.mxu0 %v9987_v13  ;;  %5622 = vmatpush.bf16.msra.mxu2 %v10367_v18  ;;  %v10819_v13 = vor.u32 %v12671_v25, %v10816_v6  ;;  %v13592_v15 = vpop.f32.mrf.mxu3  ;;  %v10464_v18 = vld [vmem:[#allocation9 + $0x538] sm:$0xf0] }
 0x36b   :  { %v10467_v5 = vor.u32 %v12583_v53, %v10464_v18  ;;  %v12575_v52 = vld [vmem:[#allocation9 + $0x4dc] sm:$0xf]  ;;  %v11030_v53 = vld [vmem:[#allocation12 + $0x1a0] sm:$0xf]  ;;  %v12730_v18 = vld [vmem:[#allocation12 + $0x1ac] sm:$0xf0] }
 0x36c   :  { %5656 = vmatpush.bf16.msrb.mxu1 %v10275_v33  ;;  %5634 = vmatpush.bf16.msra.mxu3 %v10655_v19  ;;  %v10784_v33 = vld [vmem:[#allocation9 + $0x7b8] sm:$0xf0]  ;;  %v5367_v1 = vpop.f32.mrf.mxu2  ;;  %v10934_v19 = vld [vmem:[#allocation12 + $0xe0] sm:$0xf]  ;;  %v5406_v7 = vpop.f32.mrf.mxu1 }
 0x36d   :  { %v10935_v35 = vor.u32 %v12706_v48, %v10934_v19  ;;  %v12487_v62 = vld [vmem:[#allocation9 + $0x21c] sm:$0xf] }
 0x36e   :  { %5645 = vmatpush.bf16.msrb.mxu0 %v9955_v56  ;;  %5623 = vmatpush.bf16.msra.mxu2 %v10335_v11  ;;  %v10787_v56 = vor.u32 %v12663_v31, %v10784_v33  ;;  %v10432_v11 = vld [vmem:[#allocation9 + $0x4f8] sm:$0xf0] }
 0x36f   :  { %v10720_v63 = vld [vmem:[#allocation9 + $0x738] sm:$0xf0]  ;;  %v10435_v4 = vor.u32 %v12575_v52, %v10432_v11  ;;  %v12770_v52 = vld [vmem:[#allocation12 + $0x2ec] sm:$0xf0] }
 0x370   :  { %5657 = vmatpush.bf16.msrb.mxu1 %v10243_v50  ;;  %5635 = vmatpush.bf16.msra.mxu3 %v10623_v17  ;;  %v10112_v50 = vld [vmem:[#allocation9 + $0x278] sm:$0xf0] }
 0x371   :  { %5624 = vmatmul.bf16.vlgmr.msra.gmra.mxu2 %v13544_v39  ;;  %v10115_v54 = vor.u32 %v12495_v20, %v10112_v50  ;;  %v10080_v17 = vld [vmem:[#allocation9 + $0x238] sm:$0xf0] }
 0x372   :  { %5646 = vmatpush.bf16.msrb.mxu0 %v9923_v57  ;;  %5668 = vmatpush.bf16.msrb.mxu2 %v10563_v16  ;;  %v10755_v57 = vor.u32 %v12655_v22, %v10752_v51  ;;  %v10918_v16 = vld [vmem:[#allocation12 + $0xc0] sm:$0xf]  ;;  %v5380_v2 = vpop.f32.mrf.mxu3  ;;  %v10083_v6 = vor.u32 %v12487_v62, %v10080_v17  ;;  %v12639_v45 = vld [vmem:[#allocation9 + $0x6dc] sm:$0xf] }
 0x373   :  { %v10919_v44 = vor.u32 %v12702_v61, %v10918_v16  ;;  %v10688_v29 = vld [vmem:[#allocation9 + $0x6f8] sm:$0xf0]  ;;  %v10870_v51 = vld [vmem:[#allocation12 + $0x60] sm:$0xf]  ;;  %v3983_v61 = vperm.slane %v13567_v32, 1 }
 0x374   :  { %5658 = vmatpush.bf16.msrb.mxu1 %v10211_v38  ;;  %5636 = vmatpush.bf16.msra.mxu3 %v10591_v47  ;;  %v12647_v38 = vld [vmem:[#allocation9 + $0x71c] sm:$0xf]  ;;  %v13595_v25 = vpop.f32.mrf.mxu2  ;;  %v10902_v47 = vld [vmem:[#allocation12 + $0xa0] sm:$0xf]  ;;  %v10691_v31 = vor.u32 %v12639_v45, %v10688_v29  ;;  %v12802_v45 = vld [vmem:[#allocation12 + $0x3ec] sm:$0xf0] }
 0x375   :  { %v10723_v37 = vor.u32 %v12647_v38, %v10720_v63  ;;  %v10903_v28 = vor.u32 %v12698_v23, %v10902_v47  ;;  %v12559_v33 = vld [vmem:[#allocation9 + $0x45c] sm:$0xf]  ;;  %v10854_v38 = vld [vmem:[#allocation12 + $0x40] sm:$0xf]  ;;  %v12686_v63 = vld [vmem:[#allocation12 + $0x4c] sm:$0xf0] }
 0x376   :  { %5647 = vmatpush.bf16.msrb.mxu0 %v9891_v8  ;;  %5669 = vmatpush.bf16.msrb.mxu2 %v10531_v9  ;;  %v12567_v8 = vld [vmem:[#allocation9 + $0x49c] sm:$0xf]  ;;  %v11318_v23 = vld [vmem:[#allocation12 + $0x3e0] sm:$0xf]  ;;  %v10855_v29 = vor.u32 %v12686_v63, %v10854_v38 }
 0x377   :  { %5637 = vmatmul.bf16.vlgmr.msra.gmra.mxu3 %v13548_v59  ;;  %v10400_v9 = vld [vmem:[#allocation9 + $0x4b8] sm:$0xf0] }
 0x378   :  { %5659 = vmatpush.bf16.msrb.mxu1 %v10179_v10  ;;  %5681 = vmatpush.bf16.msrb.mxu3 %v10819_v13  ;;  %v11063_v10 = vor.u32 %v12738_v42, %v11062_v41  ;;  %v11046_v13 = vld [vmem:[#allocation12 + $0x1c0] sm:$0xf]  ;;  %v10403_v14 = vor.u32 %v12567_v8, %v10400_v9  ;;  %v10656_v34 = vld [vmem:[#allocation9 + $0x6b8] sm:$0xf0]  ;;  %v12722_v9 = vld [vmem:[#allocation12 + $0x16c] sm:$0xf0] }
 0x379   :  { %v12551_v48 = vld [vmem:[#allocation9 + $0x41c] sm:$0xf]  ;;  %v10998_v8 = vld [vmem:[#allocation12 + $0x160] sm:$0xf] }
 0x37a   :  { %5648 = vmatpush.bf16.msrb.mxu0 %v9859_v21  ;;  %5670 = vmatpush.bf16.msrb.mxu2 %v10499_v49  ;;  %v10368_v21 = vld [vmem:[#allocation9 + $0x478] sm:$0xf0]  ;;  %v11047_v49 = vor.u32 %v12734_v30, %v11046_v13  ;;  %v13599_v1 = vpop.f32.mrf.mxu3 }
 0x37b   :  { %v10371_v19 = vor.u32 %v12559_v33, %v10368_v21  ;;  %v10336_v22 = vld [vmem:[#allocation9 + $0x438] sm:$0xf0]  ;;  %v11158_v33 = vld [vmem:[#allocation12 + $0x2a0] sm:$0xf]  ;;  %v5340_v21 = vadd.f32 %v13574_v0, %v3983_v61 }
 0x37c   :  { %5660 = vmatpush.bf16.msrb.mxu1 %v10147_v36  ;;  %5682 = vmatpush.bf16.msrb.mxu3 %v10787_v56  ;;  %v12694_v36 = vld [vmem:[#allocation12 + $0x8c] sm:$0xf0]  ;;  %v5419_v7 = vpop.f32.mrf.mxu2  ;;  %v12623_v11 = vld [vmem:[#allocation9 + $0x65c] sm:$0xf]  ;;  %v10339_v16 = vor.u32 %v12551_v48, %v10336_v22 }
 0x37d   :  { %v10887_v20 = vor.u32 %v12694_v36, %v10886_v27  ;;  %v11319_v27 = vor.u32 %v12802_v45, %v11318_v23  ;;  %v10982_v36 = vld [vmem:[#allocation12 + $0x140] sm:$0xf]  ;;  %v12678_v22 = vld [vmem:[#allocation12 + $0xc] sm:$0xf0] }
 0x37e   :  { %5649 = vmatpush.bf16.msrb.mxu0 %v9827_v12  ;;  %5671 = vmatpush.bf16.msrb.mxu2 %v10467_v5  ;;  %v13601_v56 = vpop.f32.mrf.mxu0  ;;  %v12690_v12 = vld [vmem:[#allocation12 + $0x6c] sm:$0xf0]  ;;  %v11031_v5 = vor.u32 %v12730_v18, %v11030_v53  ;;  %v11302_v53 = vld [vmem:[#allocation12 + $0x3c0] sm:$0xf] }
 0x37f   :  { %v10871_v62 = vor.u32 %v12690_v12, %v10870_v51  ;;  %v12798_v18 = vld [vmem:[#allocation12 + $0x3cc] sm:$0xf0]  ;;  %v11142_v51 = vld [vmem:[#allocation12 + $0x280] sm:$0xf] }
 0x380   :  { %5661 = vmatpush.bf16.msrb.mxu1 %v10115_v54  ;;  %5683 = vmatpush.bf16.msrb.mxu3 %v10755_v57  ;;  %v11014_v54 = vld [vmem:[#allocation12 + $0x180] sm:$0xf]  ;;  %v12726_v57 = vld [vmem:[#allocation12 + $0x18c] sm:$0xf0] }
 0x381   :  { %5650 = vmatmul.bf16.vlgmr.msrb.gmra.mxu0 %v13534_v60  ;;  %v12631_v60 = vld [vmem:[#allocation9 + $0x69c] sm:$0xf]  ;;  %v11015_v42 = vor.u32 %v12726_v57, %v11014_v54  ;;  %v12758_v12 = vld [vmem:[#allocation12 + $0x28c] sm:$0xf0] }
 0x382   :  { %7256 = vmatpush.bf16.msra.mxu0 %v10935_v35  ;;  %5672 = vmatpush.bf16.msrb.mxu2 %v10435_v4  ;;  %v10659_v50 = vor.u32 %v12631_v60, %v10656_v34  ;;  %v11190_v35 = vld [vmem:[#allocation12 + $0x2e0] sm:$0xf]  ;;  %v5432_v47 = vpop.f32.mrf.mxu3  ;;  %v12718_v60 = vld [vmem:[#allocation12 + $0x14c] sm:$0xf0]  ;;  %v5314_v34 = vadd.f32 %v13577_v24, %v13571_v3  ;;  %v11303_v3 = vor.u32 %v12798_v18, %v11302_v53 }
 0x383   :  { %v11191_v17 = vor.u32 %v12770_v52, %v11190_v35  ;;  %v11174_v4 = vld [vmem:[#allocation12 + $0x2c0] sm:$0xf]  ;;  %v12714_v52 = vld [vmem:[#allocation12 + $0x12c] sm:$0xf0] }
 0x384   :  { %5662 = vmatpush.bf16.msrb.mxu1 %v10083_v6  ;;  %5684 = vmatpush.bf16.msrb.mxu3 %v10723_v37  ;;  %v13604_v2 = vpop.f32.mrf.mxu1  ;;  %v12615_v6 = vld [vmem:[#allocation9 + $0x61c] sm:$0xf]  ;;  %v5327_v7 = vadd.f32 %v13582_v46, %v5314_v34  ;;  %v11446_v24 = vld [vmem:[#allocation12 + $0x4e0] sm:$0xf] }
 0x385   :  { %v10592_v37 = vld [vmem:[#allocation9 + $0x638] sm:$0xf0]  ;;  %v10966_v35 = vld [vmem:[#allocation12 + $0x120] sm:$0xf] }
 0x386   :  { %7257 = vmatpush.bf16.msra.mxu0 %v10919_v44  ;;  %5673 = vmatpush.bf16.msrb.mxu2 %v10403_v14  ;;  %v12766_v44 = vld [vmem:[#allocation12 + $0x2cc] sm:$0xf0]  ;;  %v10595_v30 = vor.u32 %v12615_v6, %v10592_v37  ;;  %v10999_v14 = vor.u32 %v12722_v9, %v10998_v8  ;;  %v5694_v54 = vmax.f32 %v5327_v7, 0.0  ;;  %v10967_v38 = vor.u32 %v12714_v52, %v10966_v35  ;;  %v11574_v37 = vld [vmem:[#allocation12 + $0x5e0] sm:$0xf] }
 0x387   :  { %5663 = vmatmul.bf16.vlgmr.msrb.gmra.mxu1 %v13538_v26  ;;  %v10624_v26 = vld [vmem:[#allocation9 + $0x678] sm:$0xf0]  ;;  %v11175_v13 = vor.u32 %v12766_v44, %v11174_v4  ;;  %v12710_v4 = vld [vmem:[#allocation12 + $0x10c] sm:$0xf0]  ;;  %v11270_v44 = vld [vmem:[#allocation12 + $0x380] sm:$0xf] }
 0x388   :  { %7269 = vmatpush.bf16.msra.mxu1 %v11063_v10  ;;  %5685 = vmatpush.bf16.msrb.mxu3 %v10691_v31  ;;  %v10627_v41 = vor.u32 %v12623_v11, %v10624_v26  ;;  %v5445_v10 = vpop.f32.mrf.mxu0  ;;  %v12682_v31 = vld [vmem:[#allocation12 + $0x2c] sm:$0xf0]  ;;  %v11286_v11 = vld [vmem:[#allocation12 + $0x3a0] sm:$0xf]  ;;  %v3984_v6 = vperm.slane %v13567_v32, 2  ;;  %v13616_v8 = vpack.c.bf16 %v5694_v54, %v5694_v54 }
 0x389   :  { %v12794_v26 = vld [vmem:[#allocation12 + $0x3ac] sm:$0xf0]  ;;  %v11398_v7 = vld [vmem:[#allocation12 + $0x480] sm:$0xf] }
 0x38a   :  { %7258 = vmatpush.bf16.msra.mxu0 %v10903_v28  ;;  %5674 = vmatpush.bf16.msrb.mxu2 %v10371_v19  ;;  %v10838_v28 = vld [vmem:[#allocation12 + $0x20] sm:$0xf]  ;;  %v5353_v19 = vadd.f32 %v13579_v55, %v5340_v21  ;;  %v11287_v63 = vor.u32 %v12794_v26, %v11286_v11 }
 0x38b   :  { %v10839_v48 = vor.u32 %v12682_v31, %v10838_v28  ;;  %v12826_v28 = vld [vmem:[#allocation12 + $0x4ac] sm:$0xf0]  ;;  %v11254_v31 = vld [vmem:[#allocation12 + $0x360] sm:$0xf] }
 0x38c   :  { %7270 = vmatpush.bf16.msra.mxu1 %v11047_v49  ;;  %5686 = vmatpush.bf16.msrb.mxu3 %v10659_v50  ;;  %v12762_v49 = vld [vmem:[#allocation12 + $0x2ac] sm:$0xf0]  ;;  %v5458_v0 = vpop.f32.mrf.mxu1  ;;  %v10983_v50 = vor.u32 %v12718_v60, %v10982_v36  ;;  %v5366_v55 = vadd.f32 %v13587_v40, %v5353_v19  ;;  %v11430_v40 = vld [vmem:[#allocation12 + $0x4c0] sm:$0xf]  ;;  %v3985_v60 = vperm.slane %v13567_v32, 3 }
 0x38d   :  { %v12862_v36 = vld [vmem:[#allocation12 + $0x5cc] sm:$0xf0]  ;;  %v11078_v26 = vld [vmem:[#allocation12 + $0x200] sm:$0xf] }
 0x38e   :  { %7259 = vmatpush.bf16.msra.mxu0 %v10887_v20  ;;  %5675 = vmatpush.bf16.msrb.mxu2 %v10339_v16  ;;  %v10822_v20 = vld [vmem:[#allocation12] sm:$0xf]  ;;  %v5379_v57 = vadd.f32 %v13592_v15, %v5366_v55  ;;  %v11143_v16 = vor.u32 %v12758_v12, %v11142_v51  ;;  %v12866_v15 = vld [vmem:[#allocation12 + $0x5ec] sm:$0xf0] }
 0x38f   :  { %v10823_v46 = vor.u32 %v12678_v22, %v10822_v20  ;;  %v11575_v21 = vor.u32 %v12866_v15, %v11574_v37  ;;  %v12746_v20 = vld [vmem:[#allocation12 + $0x22c] sm:$0xf0]  ;;  %v11206_v15 = vld [vmem:[#allocation12 + $0x300] sm:$0xf] }
 0x390   :  { %7271 = vmatpush.bf16.msra.mxu1 %v11031_v5  ;;  %5687 = vmatpush.bf16.msrb.mxu3 %v10627_v41  ;;  %v12834_v5 = vld [vmem:[#allocation12 + $0x4ec] sm:$0xf0]  ;;  %v5695_v9 = vmax.f32 %v5379_v57, 0.0 }
 0x391   :  { %5676 = vmatmul.bf16.vlgmr.msrb.gmra.mxu2 %v13544_v39  ;;  %v11159_v39 = vor.u32 %v12762_v49, %v11158_v33  ;;  %v11447_v61 = vor.u32 %v12834_v5, %v11446_v24  ;;  %v12830_v41 = vld [vmem:[#allocation12 + $0x4cc] sm:$0xf0]  ;;  %v11558_v49 = vld [vmem:[#allocation12 + $0x5c0] sm:$0xf]  ;;  %v5444_v24 = vadd.f32 %v13601_v56, %v3985_v60 }
 0x392   :  { %7260 = vmatpush.bf16.msra.mxu0 %v10871_v62  ;;  %7282 = vmatpush.bf16.msra.mxu2 %v11191_v17  ;;  %v11126_v62 = vld [vmem:[#allocation12 + $0x260] sm:$0xf]  ;;  %v12754_v17 = vld [vmem:[#allocation12 + $0x26c] sm:$0xf0]  ;;  %v11431_v23 = vor.u32 %v12830_v41, %v11430_v40  ;;  %v11559_v32 = vor.u32 %v12862_v36, %v11558_v49 }
 0x393   :  { %v11127_v47 = vor.u32 %v12754_v17, %v11126_v62  ;;  %v12786_v33 = vld [vmem:[#allocation12 + $0x36c] sm:$0xf0]  ;;  %v5457_v54 = vadd.f32 %v13604_v2, %v5444_v24  ;;  %v11526_v62 = vld [vmem:[#allocation12 + $0x580] sm:$0xf] }
 0x394   :  { %7272 = vmatpush.bf16.msra.mxu1 %v11015_v42  ;;  %5688 = vmatpush.bf16.msrb.mxu3 %v10595_v30  ;;  %v10950_v42 = vld [vmem:[#allocation12 + $0x100] sm:$0xf]  ;;  %v5469_v10 = vpop.f32.mrf.mxu2  ;;  %v12750_v30 = vld [vmem:[#allocation12 + $0x24c] sm:$0xf0]  ;;  %v11255_v19 = vor.u32 %v12786_v33, %v11254_v31 }
 0x395   :  { %v10951_v45 = vor.u32 %v12710_v4, %v10950_v42  ;;  %v12782_v22 = vld [vmem:[#allocation12 + $0x34c] sm:$0xf0]  ;;  %v11366_v2 = vld [vmem:[#allocation12 + $0x440] sm:$0xf] }
 0x396   :  { %7261 = vmatpush.bf16.msra.mxu0 %v10855_v29  ;;  %7283 = vmatpush.bf16.msra.mxu2 %v11175_v13  ;;  %v11110_v13 = vld [vmem:[#allocation12 + $0x240] sm:$0xf]  ;;  %v12818_v57 = vld [vmem:[#allocation12 + $0x46c] sm:$0xf0] }
 0x397   :  { %5689 = vmatmul.bf16.vlgmr.msrb.gmra.mxu3 %v13548_v59  ;;  %v12790_v59 = vld [vmem:[#allocation12 + $0x38c] sm:$0xf0]  ;;  %v11111_v34 = vor.u32 %v12750_v30, %v11110_v13  ;;  %v11686_v13 = vld [vmem:[#allocation12 + $0x6c0] sm:$0xf] }
 0x398   :  { %7273 = vmatpush.bf16.msra.mxu1 %v10999_v14  ;;  %7295 = vmatpush.bf16.msra.mxu3 %v11319_v27  ;;  %v11271_v29 = vor.u32 %v12790_v59, %v11270_v44  ;;  %v11414_v14 = vld [vmem:[#allocation12 + $0x4a0] sm:$0xf]  ;;  %v5392_v27 = vadd.f32 %v13585_v43, %v3984_v6  ;;  %v12822_v43 = vld [vmem:[#allocation12 + $0x48c] sm:$0xf0] }
 0x399   :  { %v11415_v18 = vor.u32 %v12826_v28, %v11414_v14  ;;  %v11399_v52 = vor.u32 %v12822_v43, %v11398_v7  ;;  %v12854_v17 = vld [vmem:[#allocation12 + $0x58c] sm:$0xf0]  ;;  %v11494_v60 = vld [vmem:[#allocation12 + $0x540] sm:$0xf]  ;;  %v12704_v43 = vld [vmem:[#allocation12 + $0xe4] sm:$0xf] }
 0x39a   :  { %7262 = vmatpush.bf16.msra.mxu0 %v10839_v48  ;;  %7284 = vmatpush.bf16.msra.mxu2 %v11159_v39  ;;  %v5405_v53 = vadd.f32 %v13589_v58, %v5392_v27  ;;  %v11094_v48 = vld [vmem:[#allocation12 + $0x220] sm:$0xf]  ;;  %v13622_v39 = vpack.c.bf16 %v5695_v9, %v5695_v9  ;;  %v5482_v0 = vpop.f32.mrf.mxu3  ;;  %v12898_v40 = vld [vmem:[#allocation12 + $0x6ec] sm:$0xf0] }
 0x39b   :  { %v11542_v58 = vld [vmem:[#allocation12 + $0x5a0] sm:$0xf]  ;;  %v11095_v5 = vor.u32 %v12746_v20, %v11094_v48  ;;  %v12814_v37 = vld [vmem:[#allocation12 + $0x44c] sm:$0xf0] }
 0x39c   :  { %7274 = vmatpush.bf16.msra.mxu1 %v10983_v50  ;;  %7296 = vmatpush.bf16.msra.mxu3 %v11303_v3  ;;  %v11238_v50 = vld [vmem:[#allocation12 + $0x340] sm:$0xf]  ;;  %v5418_v51 = vadd.f32 %v13595_v25, %v5405_v53  ;;  %v12858_v3 = vld [vmem:[#allocation12 + $0x5ac] sm:$0xf0]  ;;  %v5471_v35 = vpop.f32.mrf.mxu2  ;;  %v11367_v28 = vor.u32 %v12814_v37, %v11366_v2 }
 0x39d   :  { %v11239_v11 = vor.u32 %v12782_v22, %v11238_v50  ;;  %v11382_v25 = vld [vmem:[#allocation12 + $0x460] sm:$0xf]  ;;  %v11543_v56 = vor.u32 %v12858_v3, %v11542_v58  ;;  %v12774_v9 = vld [vmem:[#allocation12 + $0x30c] sm:$0xf0]  ;;  %v13639_v35 = vld [vmem:[#allocation10] sm:$0xff] }
 0x39e   :  { %7263 = vmatpush.bf16.msra.mxu0 %v10823_v46  ;;  %7285 = vmatpush.bf16.msra.mxu2 %v11143_v16  ;;  %v13625_v12 = vpop.f32.mrf.mxu0  ;;  %v5431_v55 = vadd.f32 %v13599_v1, %v5418_v51  ;;  %v12742_v46 = vld [vmem:[#allocation12 + $0x20c] sm:$0xf0]  ;;  %v11222_v16 = vld [vmem:[#allocation12 + $0x320] sm:$0xf]  ;;  %v11383_v42 = vor.u32 %v12818_v57, %v11382_v25  ;;  %v11207_v31 = vor.u32 %v12774_v9, %v11206_v15  ;;  %v12736_v57 = vld [vmem:[#allocation12 + $0x1e4] sm:$0xf] }
 0x39f   :  { %v11702_v1 = vld [vmem:[#allocation12 + $0x6e0] sm:$0xf]  ;;  %v12894_v30 = vld [vmem:[#allocation12 + $0x6cc] sm:$0xf0] }
 0x3a0   :  { %7275 = vmatpush.bf16.msra.mxu1 %v10967_v38  ;;  %7297 = vmatpush.bf16.msra.mxu3 %v11287_v63  ;;  %v5470_v38 = vadd.f32 %v5469_v10, %v5457_v54  ;;  %v11079_v63 = vor.u32 %v12742_v46, %v11078_v26  ;;  %v5696_v41 = vmax.f32 %v5431_v55, 0.0  ;;  %v11703_v10 = vor.u32 %v12898_v40, %v11702_v1  ;;  %v12810_v27 = vld [vmem:[#allocation12 + $0x42c] sm:$0xf0]  ;;  %v11670_v53 = vld [vmem:[#allocation12 + $0x6a0] sm:$0xf] }
 0x3a1   :  { %7264 = vmatmul.bf16.vlgmr.msra.gmra.mxu0 %v13616_v8  ;;  %v11687_v36 = vor.u32 %v12894_v30, %v11686_v13  ;;  %v11334_v7 = vld [vmem:[#allocation12 + $0x400] sm:$0xf]  ;;  %v12842_v58 = vld [vmem:[#allocation12 + $0x52c] sm:$0xf0]  ;;  %v3986_v55 = vperm.slane %v13639_v35, 4 }
 0x3a2   :  { %7308 = vmatpush.bf16.msrb.mxu0 %v11447_v61  ;;  %7286 = vmatpush.bf16.msra.mxu2 %v11127_v47  ;;  %v12778_v61 = vld [vmem:[#allocation12 + $0x32c] sm:$0xf0]  ;;  %v5483_v59 = vadd.f32 %v5482_v0, %v5470_v38  ;;  %v5484_v6 = vpop.f32.mrf.mxu3  ;;  %v11527_v47 = vor.u32 %v12854_v17, %v11526_v62  ;;  %v13633_v14 = vpack.c.bf16 %v5696_v41, %v5696_v41  ;;  %v11478_v51 = vld [vmem:[#allocation12 + $0x520] sm:$0xf]  ;;  %v10920_v26 = vld [vmem:[#allocation12 + $0xd0] sm:$0xf0] }
 0x3a3   :  { %v11223_v44 = vor.u32 %v12778_v61, %v11222_v16  ;;  %v12806_v0 = vld [vmem:[#allocation12 + $0x40c] sm:$0xf0]  ;;  %v11654_v3 = vld [vmem:[#allocation12 + $0x680] sm:$0xf]  ;;  %v11479_v46 = vor.u32 %v12842_v58, %v11478_v51  ;;  %v11064_v61 = vld [vmem:[#allocation12 + $0x1f0] sm:$0xf0]  ;;  %v5496_v1 = vadd.f32 %v13625_v12, %v3986_v55 }
 0x3a4   :  { %7276 = vmatpush.bf16.msra.mxu1 %v10951_v45  ;;  %7298 = vmatpush.bf16.msra.mxu3 %v11271_v29  ;;  %v13631_v4 = vpop.f32.mrf.mxu1  ;;  %v11510_v45 = vld [vmem:[#allocation12 + $0x560] sm:$0xf]  ;;  %v12850_v29 = vld [vmem:[#allocation12 + $0x56c] sm:$0xf0]  ;;  %v5697_v33 = vmax.f32 %v5483_v59, 0.0 }
 0x3a5   :  { %v11511_v49 = vor.u32 %v12850_v29, %v11510_v45  ;;  %v12886_v24 = vld [vmem:[#allocation12 + $0x68c] sm:$0xf0]  ;;  %v11462_v25 = vld [vmem:[#allocation12 + $0x500] sm:$0xf]  ;;  %v12696_v40 = vld [vmem:[#allocation12 + $0xa4] sm:$0xf]  ;;  %v5509_v15 = vadd.f32 %v13631_v4, %v5496_v1 }
 0x3a6   :  { %7309 = vmatpush.bf16.msrb.mxu0 %v11431_v23  ;;  %7287 = vmatpush.bf16.msra.mxu2 %v11111_v34  ;;  %v5497_v23 = vpop.f32.mrf.mxu0  ;;  %v12846_v34 = vld [vmem:[#allocation12 + $0x54c] sm:$0xf0]  ;;  %v13636_v20 = vpack.c.bf16 %v5697_v33, %v5697_v33  ;;  %v11655_v16 = vor.u32 %v12886_v24, %v11654_v3  ;;  %v10904_v41 = vld [vmem:[#allocation12 + $0xb0] sm:$0xf0]  ;;  %v11622_v6 = vld [vmem:[#allocation12 + $0x640] sm:$0xf] }
 0x3a7   :  { %7277 = vmatmul.bf16.vlgmr.msra.gmra.mxu1 %v13622_v39  ;;  %v11495_v50 = vor.u32 %v12846_v34, %v11494_v60  ;;  %v12838_v54 = vld [vmem:[#allocation12 + $0x50c] sm:$0xf0]  ;;  %v11048_v59 = vld [vmem:[#allocation12 + $0x1d0] sm:$0xf0]  ;;  %v10907_v9 = vor.u32 %v12696_v40, %v10904_v41  ;;  %v12728_v13 = vld [vmem:[#allocation12 + $0x1a4] sm:$0xf] }
 0x3a8   :  { %7321 = vmatpush.bf16.msrb.mxu1 %v11575_v21  ;;  %7299 = vmatpush.bf16.msra.mxu3 %v11255_v19  ;;  %v11350_v21 = vld [vmem:[#allocation12 + $0x420] sm:$0xf]  ;;  %v12882_v62 = vld [vmem:[#allocation12 + $0x66c] sm:$0xf0]  ;;  %v10888_v23 = vld [vmem:[#allocation12 + $0x90] sm:$0xf0] }
 0x3a9   :  { %v11351_v19 = vor.u32 %v12810_v27, %v11350_v21  ;;  %v12878_v37 = vld [vmem:[#allocation12 + $0x64c] sm:$0xf0]  ;;  %v11032_v30 = vld [vmem:[#allocation12 + $0x1b0] sm:$0xf0]  ;;  %v11606_v33 = vld [vmem:[#allocation12 + $0x620] sm:$0xf] }
 0x3aa   :  { %7310 = vmatpush.bf16.msrb.mxu0 %v11415_v18  ;;  %7288 = vmatpush.bf16.msra.mxu2 %v11095_v5  ;;  %v12890_v18 = vld [vmem:[#allocation12 + $0x6ac] sm:$0xf0]  ;;  %v11335_v5 = vor.u32 %v12806_v0, %v11334_v7  ;;  %v11623_v12 = vor.u32 %v12878_v37, %v11622_v6  ;;  %v10872_v60 = vld [vmem:[#allocation12 + $0x70] sm:$0xf0]  ;;  %v11035_v34 = vor.u32 %v12728_v13, %v11032_v30  ;;  %v12768_v51 = vld [vmem:[#allocation12 + $0x2e4] sm:$0xf] }
 0x3ab   :  { %v11671_v22 = vor.u32 %v12890_v18, %v11670_v53  ;;  %v12874_v21 = vld [vmem:[#allocation12 + $0x62c] sm:$0xf0]  ;;  %v12724_v53 = vld [vmem:[#allocation12 + $0x184] sm:$0xf]  ;;  %v11016_v18 = vld [vmem:[#allocation12 + $0x190] sm:$0xf0] }
 0x3ac   :  { %7322 = vmatpush.bf16.msrb.mxu1 %v11559_v32  ;;  %7300 = vmatpush.bf16.msra.mxu3 %v11239_v11  ;;  %v5510_v48 = vpop.f32.mrf.mxu1  ;;  %v10936_v32 = vld [vmem:[#allocation12 + $0xf0] sm:$0xf0]  ;;  %v12700_v11 = vld [vmem:[#allocation12 + $0xc4] sm:$0xf]  ;;  %v12870_v0 = vld [vmem:[#allocation12 + $0x60c] sm:$0xf0]  ;;  %v11019_v55 = vor.u32 %v12724_v53, %v11016_v18 }
 0x3ad   :  { %v10923_v38 = vor.u32 %v12700_v11, %v10920_v26  ;;  %v11590_v48 = vld [vmem:[#allocation12 + $0x600] sm:$0xf]  ;;  %v11192_v58 = vld [vmem:[#allocation12 + $0x2f0] sm:$0xf0]  ;;  %v12684_v24 = vld [vmem:[#allocation12 + $0x44] sm:$0xf] }
 0x3ae   :  { %7311 = vmatpush.bf16.msrb.mxu0 %v11399_v52  ;;  %7289 = vmatpush.bf16.msra.mxu2 %v11079_v63  ;;  %v10939_v52 = vor.u32 %v12704_v43, %v10936_v32  ;;  %v11463_v63 = vor.u32 %v12838_v54, %v11462_v25  ;;  %v11830_v43 = vld [vmem:[#allocation12 + $0x7e0] sm:$0xf]  ;;  %v12720_v11 = vld [vmem:[#allocation12 + $0x164] sm:$0xf]  ;;  %v11000_v26 = vld [vmem:[#allocation12 + $0x170] sm:$0xf0]  ;;  %v11195_v54 = vor.u32 %v12768_v51, %v11192_v58 }
 0x3af   :  { %v11003_v1 = vor.u32 %v12720_v11, %v11000_v26  ;;  %v12716_v40 = vld [vmem:[#allocation12 + $0x144] sm:$0xf]  ;;  %v10984_v41 = vld [vmem:[#allocation12 + $0x150] sm:$0xf0]  ;;  %v11750_v11 = vld [vmem:[#allocation12 + $0x740] sm:$0xf] }
 0x3b0   :  { %7323 = vmatpush.bf16.msrb.mxu1 %v11543_v56  ;;  %7301 = vmatpush.bf16.msra.mxu3 %v11223_v44  ;;  %v11638_v56 = vld [vmem:[#allocation12 + $0x660] sm:$0xf]  ;;  %v12732_v44 = vld [vmem:[#allocation12 + $0x1c4] sm:$0xf]  ;;  %v10968_v13 = vld [vmem:[#allocation12 + $0x130] sm:$0xf0] }
 0x3b1   :  { %7290 = vmatmul.bf16.vlgmr.msra.gmra.mxu2 %v13633_v14  ;;  %v11639_v2 = vor.u32 %v12882_v62, %v11638_v56  ;;  %v11051_v45 = vor.u32 %v12732_v44, %v11048_v59  ;;  %v12764_v62 = vld [vmem:[#allocation12 + $0x2c4] sm:$0xf]  ;;  %v11798_v44 = vld [vmem:[#allocation12 + $0x7a0] sm:$0xf]  ;;  %v11432_v53 = vld [vmem:[#allocation12 + $0x4d0] sm:$0xf0] }
 0x3b2   :  { %7312 = vmatpush.bf16.msrb.mxu0 %v11383_v42  ;;  %7334 = vmatpush.bf16.msrb.mxu2 %v11703_v10  ;;  %v11067_v42 = vor.u32 %v12736_v57, %v11064_v61  ;;  %v12692_v10 = vld [vmem:[#allocation12 + $0x84] sm:$0xf]  ;;  %v11814_v57 = vld [vmem:[#allocation12 + $0x7c0] sm:$0xf]  ;;  %v11128_v51 = vld [vmem:[#allocation12 + $0x270] sm:$0xf0] }
 0x3b3   :  { %v10891_v27 = vor.u32 %v12692_v10, %v10888_v23  ;;  %v12760_v37 = vld [vmem:[#allocation12 + $0x2a4] sm:$0xf]  ;;  %v10824_v10 = vld [vmem:[#allocation12 + $0x10] sm:$0xf0]  ;;  %v12910_v26 = vld [vmem:[#allocation12 + $0x74c] sm:$0xf0] }
 0x3b4   :  { %7324 = vmatpush.bf16.msrb.mxu1 %v11527_v47  ;;  %7302 = vmatpush.bf16.msra.mxu3 %v11207_v31  ;;  %v5521_v17 = vpop.f32.mrf.mxu2  ;;  %v12832_v23 = vld [vmem:[#allocation12 + $0x4e4] sm:$0xf] }
 0x3b5   :  { %v5522_v47 = vadd.f32 %v5521_v17, %v5509_v15  ;;  %v11176_v17 = vld [vmem:[#allocation12 + $0x2d0] sm:$0xf0]  ;;  %v12708_v18 = vld [vmem:[#allocation12 + $0x104] sm:$0xf] }
 0x3b6   :  { %7313 = vmatpush.bf16.msrb.mxu0 %v11367_v28  ;;  %7335 = vmatpush.bf16.msrb.mxu2 %v11687_v36  ;;  %v12688_v36 = vld [vmem:[#allocation12 + $0x64] sm:$0xf]  ;;  %v11160_v15 = vld [vmem:[#allocation12 + $0x2b0] sm:$0xf0] }
 0x3b7   :  { %7303 = vmatmul.bf16.vlgmr.msra.gmra.mxu3 %v13636_v20  ;;  %v11163_v30 = vor.u32 %v12760_v37, %v11160_v15  ;;  %v11576_v37 = vld [vmem:[#allocation12 + $0x5f0] sm:$0xf0] }
 0x3b8   :  { %7325 = vmatpush.bf16.msrb.mxu1 %v11511_v49 }
 0x3ba   :  { %7314 = vmatpush.bf16.msrb.mxu0 %v11351_v19  ;;  %7336 = vmatpush.bf16.msrb.mxu2 %v11671_v22  ;;  %v5534_v29 = vpop.f32.mrf.mxu3  ;;  %v11607_v19 = vor.u32 %v12874_v21, %v11606_v33  ;;  %v10875_v22 = vor.u32 %v12688_v36, %v10872_v60  ;;  %v12918_v33 = vld [vmem:[#allocation12 + $0x78c] sm:$0xf0]  ;;  %v12828_v60 = vld [vmem:[#allocation12 + $0x4c4] sm:$0xf] }
 0x3bb   :  { %v5535_v28 = vadd.f32 %v5534_v29, %v5522_v47  ;;  %v12676_v47 = vld [vmem:[#allocation12 + $0x4] sm:$0xf]  ;;  %v11435_v58 = vor.u32 %v12828_v60, %v11432_v53 }
 0x3bc   :  { %7326 = vmatpush.bf16.msrb.mxu1 %v11495_v50  ;;  %v5523_v4 = vpop.f32.mrf.mxu2  ;;  %v12930_v50 = vld [vmem:[#allocation12 + $0x7ec] sm:$0xf0]  ;;  %v12712_v29 = vld [vmem:[#allocation12 + $0x124] sm:$0xf]  ;;  %v10827_v21 = vor.u32 %v12676_v47, %v10824_v10  ;;  %v11384_v47 = vld [vmem:[#allocation12 + $0x470] sm:$0xf0] }
 0x3bd   :  { %v5698_v49 = vmax.f32 %v5535_v28, 0.0  ;;  %v11831_v32 = vor.u32 %v12930_v50, %v11830_v43  ;;  %v11782_v28 = vld [vmem:[#allocation12 + $0x780] sm:$0xf]  ;;  %v12914_v50 = vld [vmem:[#allocation12 + $0x76c] sm:$0xf0] }
 0x3be   :  { %7315 = vmatpush.bf16.msrb.mxu0 %v11335_v5  ;;  %7337 = vmatpush.bf16.msrb.mxu2 %v11655_v16  ;;  %v13644_v31 = vpop.f32.mrf.mxu0  ;;  %v10856_v5 = vld [vmem:[#allocation12 + $0x50] sm:$0xf0]  ;;  %v12926_v16 = vld [vmem:[#allocation12 + $0x7cc] sm:$0xf0]  ;;  %v11783_v4 = vor.u32 %v12918_v33, %v11782_v28  ;;  %v11766_v43 = vld [vmem:[#allocation12 + $0x760] sm:$0xf] }
 0x3bf   :  { %v13646_v7 = vpack.c.bf16 %v5698_v49, %v5698_v49  ;;  %7347 = vmatpush.bf16.msrb.mxu3 %v11831_v32  ;;  %v10859_v61 = vor.u32 %v12684_v24, %v10856_v5  ;;  %v11815_v56 = vor.u32 %v12926_v16, %v11814_v57  ;;  %v11144_v49 = vld [vmem:[#allocation12 + $0x290] sm:$0xf0]  ;;  %v12752_v32 = vld [vmem:[#allocation12 + $0x264] sm:$0xf] }
 0x3c0   :  { %7327 = vmatpush.bf16.msrb.mxu1 %v11479_v46  ;;  %v11591_v46 = vor.u32 %v12870_v0, %v11590_v48  ;;  %v3987_v48 = vperm.slane %v13639_v35, 5  ;;  %v12824_v24 = vld [vmem:[#allocation12 + $0x4a4] sm:$0xf]  ;;  %v11112_v16 = vld [vmem:[#allocation12 + $0x250] sm:$0xf0] }
 0x3c1   :  { %7316 = vmatmul.bf16.vlgmr.msrb.gmra.mxu0 %v13646_v7  ;;  %v12748_v57 = vld [vmem:[#allocation12 + $0x244] sm:$0xf]  ;;  %v11080_v28 = vld [vmem:[#allocation12 + $0x210] sm:$0xf0] }
 0x3c2   :  { %7360 = vmatpush.bf16.msra.mxu0 %v10939_v52  ;;  %7338 = vmatpush.bf16.msrb.mxu2 %v11639_v2  ;;  %v5536_v52 = vpop.f32.mrf.mxu3  ;;  %v12922_v2 = vld [vmem:[#allocation12 + $0x7ac] sm:$0xf0]  ;;  %v12800_v60 = vld [vmem:[#allocation12 + $0x3e4] sm:$0xf] }
 0x3c3   :  { %7348 = vmatpush.bf16.msrb.mxu3 %v11815_v56  ;;  %v11799_v6 = vor.u32 %v12922_v2, %v11798_v44  ;;  %v11416_v52 = vld [vmem:[#allocation12 + $0x4b0] sm:$0xf0] }
 0x3c4   :  { %7328 = vmatpush.bf16.msrb.mxu1 %v11463_v63  ;;  %v13648_v3 = vpop.f32.mrf.mxu1  ;;  %v10840_v63 = vld [vmem:[#allocation12 + $0x30] sm:$0xf0]  ;;  %v11419_v56 = vor.u32 %v12824_v24, %v11416_v52  ;;  %v12808_v24 = vld [vmem:[#allocation12 + $0x424] sm:$0xf] }
 0x3c5   :  { %v11096_v44 = vld [vmem:[#allocation12 + $0x230] sm:$0xf0] }
 0x3c6   :  { %7361 = vmatpush.bf16.msra.mxu0 %v10923_v38  ;;  %7339 = vmatpush.bf16.msrb.mxu2 %v11623_v12  ;;  %v5549_v25 = vpop.f32.mrf.mxu0  ;;  %v12680_v38 = vld [vmem:[#allocation12 + $0x24] sm:$0xf]  ;;  %v11448_v12 = vld [vmem:[#allocation12 + $0x4f0] sm:$0xf0] }
 0x3c7   :  { %v10843_v59 = vor.u32 %v12680_v38, %v10840_v63  ;;  %7349 = vmatpush.bf16.msrb.mxu3 %v11799_v6  ;;  %v11451_v36 = vor.u32 %v12832_v23, %v11448_v12  ;;  %v11131_v25 = vor.u32 %v12752_v32, %v11128_v51  ;;  %v11115_v63 = vor.u32 %v12748_v57, %v11112_v16  ;;  %v12864_v6 = vld [vmem:[#allocation12 + $0x5e4] sm:$0xf]  ;;  %v12902_v12 = vld [vmem:[#allocation12 + $0x70c] sm:$0xf0]  ;;  %v11544_v51 = vld [vmem:[#allocation12 + $0x5b0] sm:$0xf0] }
 0x3c8   :  { %7373 = vmatpush.bf16.msra.mxu1 %v11067_v42  ;;  %v11179_v42 = vor.u32 %v12764_v62, %v11176_v17  ;;  %v12820_v62 = vld [vmem:[#allocation12 + $0x484] sm:$0xf]  ;;  %v11400_v17 = vld [vmem:[#allocation12 + $0x490] sm:$0xf0] }
 0x3c9   :  { %v12856_v32 = vld [vmem:[#allocation12 + $0x5a4] sm:$0xf] }
 0x3ca   :  { %7362 = vmatpush.bf16.msra.mxu0 %v10907_v9  ;;  %7340 = vmatpush.bf16.msrb.mxu2 %v11607_v19  ;;  %v10952_v19 = vld [vmem:[#allocation12 + $0x110] sm:$0xf0]  ;;  %v11547_v52 = vor.u32 %v12856_v32, %v11544_v51  ;;  %v12804_v16 = vld [vmem:[#allocation12 + $0x404] sm:$0xf] }
 0x3cb   :  { %7350 = vmatpush.bf16.msrb.mxu3 %v11783_v4  ;;  %v10955_v5 = vor.u32 %v12708_v18, %v10952_v19  ;;  %v12812_v4 = vld [vmem:[#allocation12 + $0x444] sm:$0xf]  ;;  %v11464_v32 = vld [vmem:[#allocation12 + $0x510] sm:$0xf0] }
 0x3cc   :  { %7374 = vmatpush.bf16.msra.mxu1 %v11051_v45  ;;  %v5562_v9 = vpop.f32.mrf.mxu1  ;;  %v10987_v45 = vor.u32 %v12716_v40, %v10984_v41 }
 0x3cd   :  { %v12816_v9 = vld [vmem:[#allocation12 + $0x464] sm:$0xf] }
 0x3ce   :  { %7363 = vmatpush.bf16.msra.mxu0 %v10891_v27  ;;  %7341 = vmatpush.bf16.msrb.mxu2 %v11591_v46  ;;  %v12756_v27 = vld [vmem:[#allocation12 + $0x284] sm:$0xf]  ;;  %v5548_v46 = vadd.f32 %v13644_v31, %v3987_v48  ;;  %v12906_v31 = vld [vmem:[#allocation12 + $0x72c] sm:$0xf0] }
 0x3cf   :  { %v11147_v0 = vor.u32 %v12756_v27, %v11144_v49  ;;  %v12860_v27 = vld [vmem:[#allocation12 + $0x5c4] sm:$0xf]  ;;  %v11560_v49 = vld [vmem:[#allocation12 + $0x5d0] sm:$0xf0] }
 0x3d0   :  { %7375 = vmatpush.bf16.msra.mxu1 %v11035_v34  ;;  %v10971_v34 = vor.u32 %v12712_v29, %v10968_v13  ;;  %v11579_v29 = vor.u32 %v12864_v6, %v11576_v37  ;;  %v12784_v37 = vld [vmem:[#allocation12 + $0x364] sm:$0xf] }
 0x3d2   :  { %7364 = vmatpush.bf16.msra.mxu0 %v10875_v22  ;;  %7386 = vmatpush.bf16.msra.mxu2 %v11195_v54  ;;  %v11767_v22 = vor.u32 %v12914_v50, %v11766_v43  ;;  %v11751_v54 = vor.u32 %v12910_v26, %v11750_v11  ;;  %v12796_v43 = vld [vmem:[#allocation12 + $0x3c4] sm:$0xf]  ;;  %v11288_v26 = vld [vmem:[#allocation12 + $0x3b0] sm:$0xf0] }
 0x3d3   :  { %v12792_v11 = vld [vmem:[#allocation12 + $0x3a4] sm:$0xf] }
 0x3d4   :  { %7376 = vmatpush.bf16.msra.mxu1 %v11019_v55  ;;  %v5573_v55 = vpop.f32.mrf.mxu2  ;;  %7351 = vmatpush.bf16.msrb.mxu3 %v11767_v22  ;;  %v11291_v57 = vor.u32 %v12792_v11, %v11288_v26  ;;  %v12896_v26 = vld [vmem:[#allocation12 + $0x6e4] sm:$0xf] }
 0x3d6   :  { %7365 = vmatpush.bf16.msra.mxu0 %v10859_v61  ;;  %7387 = vmatpush.bf16.msra.mxu2 %v11179_v42  ;;  %v5561_v61 = vadd.f32 %v13648_v3, %v5548_v46  ;;  %v12744_v42 = vld [vmem:[#allocation12 + $0x224] sm:$0xf]  ;;  %v11403_v3 = vor.u32 %v12820_v62, %v11400_v17  ;;  %v10942_v62 = vld [vmem:[#allocation12 + $0xe8] sm:$0xf]  ;;  %v12707_v17 = vld [vmem:[#allocation12 + $0xf4] sm:$0xf0] }
 0x3d7   :  { %v11099_v23 = vor.u32 %v12744_v42, %v11096_v44  ;;  %v10943_v44 = vor.u32 %v12707_v17, %v10942_v62 }
 0x3d8   :  { %7377 = vmatpush.bf16.msra.mxu1 %v11003_v1  ;;  %7352 = vmatpush.bf16.msrb.mxu3 %v11751_v54  ;;  %v5574_v38 = vadd.f32 %v5573_v55, %v5561_v61  ;;  %v11734_v1 = vld [vmem:[#allocation12 + $0x720] sm:$0xf]  ;;  %v11528_v54 = vld [vmem:[#allocation12 + $0x590] sm:$0xf0] }
 0x3d9   :  { %v11735_v41 = vor.u32 %v12906_v31, %v11734_v1  ;;  %v11336_v61 = vld [vmem:[#allocation12 + $0x410] sm:$0xf0] }
 0x3da   :  { %7366 = vmatpush.bf16.msra.mxu0 %v10843_v59  ;;  %7388 = vmatpush.bf16.msra.mxu2 %v11163_v30  ;;  %v5586_v40 = vpop.f32.mrf.mxu3  ;;  %v12740_v30 = vld [vmem:[#allocation12 + $0x204] sm:$0xf]  ;;  %v11272_v1 = vld [vmem:[#allocation12 + $0x390] sm:$0xf0]  ;;  %v11339_v31 = vor.u32 %v12804_v16, %v11336_v61 }
 0x3db   :  { %v5587_v2 = vadd.f32 %v5586_v40, %v5574_v38  ;;  %v11083_v18 = vor.u32 %v12740_v30, %v11080_v28  ;;  %v12848_v40 = vld [vmem:[#allocation12 + $0x564] sm:$0xf]  ;;  %v11240_v30 = vld [vmem:[#allocation12 + $0x350] sm:$0xf0] }
 0x3dc   :  { %7378 = vmatpush.bf16.msra.mxu1 %v10987_v45  ;;  %v5575_v15 = vpop.f32.mrf.mxu2  ;;  %7353 = vmatpush.bf16.msrb.mxu3 %v11735_v41  ;;  %v11718_v45 = vld [vmem:[#allocation12 + $0x700] sm:$0xf]  ;;  %v11512_v41 = vld [vmem:[#allocation12 + $0x570] sm:$0xf0] }
 0x3dd   :  { %v5699_v10 = vmax.f32 %v5587_v2, 0.0  ;;  %v11719_v13 = vor.u32 %v12902_v12, %v11718_v45  ;;  %v10926_v2 = vld [vmem:[#allocation12 + $0xc8] sm:$0xf]  ;;  %v11515_v6 = vor.u32 %v12848_v40, %v11512_v41  ;;  %v11256_v15 = vld [vmem:[#allocation12 + $0x370] sm:$0xf0] }
 0x3de   :  { %7367 = vmatpush.bf16.msra.mxu0 %v10827_v21  ;;  %7389 = vmatpush.bf16.msra.mxu2 %v11147_v0  ;;  %v13655_v59 = vpop.f32.mrf.mxu0  ;;  %v11387_v21 = vor.u32 %v12816_v9, %v11384_v47  ;;  %v11563_v0 = vor.u32 %v12860_v27, %v11560_v49  ;;  %v3988_v9 = vperm.slane %v13639_v35, 6  ;;  %v12844_v47 = vld [vmem:[#allocation12 + $0x544] sm:$0xf]  ;;  %v10910_v12 = vld [vmem:[#allocation12 + $0xa8] sm:$0xf] }
 0x3df   :  { %v13657_v33 = vpack.c.bf16 %v5699_v10, %v5699_v10  ;;  %v11496_v10 = vld [vmem:[#allocation12 + $0x550] sm:$0xf0]  ;;  %v12840_v27 = vld [vmem:[#allocation12 + $0x524] sm:$0xf]  ;;  %v12687_v40 = vld [vmem:[#allocation12 + $0x54] sm:$0xf0] }
 0x3e0   :  { %7379 = vmatpush.bf16.msra.mxu1 %v10971_v34  ;;  %7354 = vmatpush.bf16.msrb.mxu3 %v11719_v13  ;;  %v11320_v34 = vld [vmem:[#allocation12 + $0x3f0] sm:$0xf0]  ;;  %v12780_v13 = vld [vmem:[#allocation12 + $0x344] sm:$0xf] }
 0x3e1   :  { %7368 = vmatmul.bf16.vlgmr.msra.gmra.mxu0 %v13616_v8  ;;  %7329 = vmatmul.bf16.vlgmr.msrb.gmra.mxu1 %v13657_v33  ;;  %v11323_v19 = vor.u32 %v12800_v60, %v11320_v34  ;;  %v11480_v49 = vld [vmem:[#allocation12 + $0x530] sm:$0xf0]  ;;  %v12892_v41 = vld [vmem:[#allocation12 + $0x6c4] sm:$0xf] }
 0x3e2   :  { %7412 = vmatpush.bf16.msrb.mxu0 %v11451_v36  ;;  %7390 = vmatpush.bf16.msra.mxu2 %v11131_v25  ;;  %v11368_v36 = vld [vmem:[#allocation12 + $0x450] sm:$0xf0]  ;;  %v5588_v48 = vpop.f32.mrf.mxu3  ;;  %v12852_v25 = vld [vmem:[#allocation12 + $0x584] sm:$0xf] }
 0x3e3   :  { %v11371_v22 = vor.u32 %v12812_v4, %v11368_v36  ;;  %v11531_v38 = vor.u32 %v12852_v25, %v11528_v54  ;;  %v5600_v4 = vadd.f32 %v13655_v59, %v3988_v9  ;;  %v11243_v36 = vor.u32 %v12780_v13, %v11240_v30  ;;  %v11208_v16 = vld [vmem:[#allocation12 + $0x310] sm:$0xf0]  ;;  %v10846_v9 = vld [vmem:[#allocation12 + $0x28] sm:$0xf] }
 0x3e4   :  { %7380 = vmatpush.bf16.msra.mxu1 %v10955_v5  ;;  %v13659_v53 = vpop.f32.mrf.mxu1  ;;  %7399 = vmatpush.bf16.msra.mxu3 %v11323_v19  ;;  %v11352_v5 = vld [vmem:[#allocation12 + $0x430] sm:$0xf0]  ;;  %v12695_v19 = vld [vmem:[#allocation12 + $0x94] sm:$0xf0]  ;;  %v11483_v48 = vor.u32 %v12840_v27, %v11480_v49 }
 0x3e5   :  { %v11355_v46 = vor.u32 %v12808_v24, %v11352_v5  ;;  %v5613_v34 = vadd.f32 %v13659_v53, %v5600_v4  ;;  %v10878_v24 = vld [vmem:[#allocation12 + $0x68] sm:$0xf]  ;;  %v12691_v53 = vld [vmem:[#allocation12 + $0x74] sm:$0xf0] }
 0x3e6   :  { %7413 = vmatpush.bf16.msrb.mxu0 %v11435_v58  ;;  %7391 = vmatpush.bf16.msra.mxu2 %v11115_v63  ;;  %v5601_v50 = vpop.f32.mrf.mxu0  ;;  %v11304_v58 = vld [vmem:[#allocation12 + $0x3d0] sm:$0xf0]  ;;  %v12788_v63 = vld [vmem:[#allocation12 + $0x384] sm:$0xf]  ;;  %v11070_v5 = vld [vmem:[#allocation12 + $0x1e8] sm:$0xf]  ;;  %v10879_v62 = vor.u32 %v12691_v53, %v10878_v24 }
 0x3e7   :  { %v11307_v55 = vor.u32 %v12796_v43, %v11304_v58  ;;  %v11275_v42 = vor.u32 %v12788_v63, %v11272_v1  ;;  %v11224_v43 = vld [vmem:[#allocation12 + $0x330] sm:$0xf0]  ;;  %v11054_v63 = vld [vmem:[#allocation12 + $0x1c8] sm:$0xf]  ;;  %v12735_v1 = vld [vmem:[#allocation12 + $0x1d4] sm:$0xf0] }
 0x3e8   :  { %7425 = vmatpush.bf16.msrb.mxu1 %v11579_v29  ;;  %v12699_v29 = vld [vmem:[#allocation12 + $0xb4] sm:$0xf0]  ;;  %v11022_v4 = vld [vmem:[#allocation12 + $0x188] sm:$0xf]  ;;  %v12876_v53 = vld [vmem:[#allocation12 + $0x644] sm:$0xf] }
 0x3e9   :  { %7400 = vmatpush.bf16.msra.mxu3 %v11307_v55  ;;  %v10911_v60 = vor.u32 %v12699_v29, %v10910_v12  ;;  %v12739_v55 = vld [vmem:[#allocation12 + $0x1f4] sm:$0xf0]  ;;  %v12888_v12 = vld [vmem:[#allocation12 + $0x6a4] sm:$0xf]  ;;  %v11672_v29 = vld [vmem:[#allocation12 + $0x6b0] sm:$0xf0] }
 0x3ea   :  { %7414 = vmatpush.bf16.msrb.mxu0 %v11419_v56  ;;  %7392 = vmatpush.bf16.msra.mxu2 %v11099_v23  ;;  %v11259_v23 = vor.u32 %v12784_v37, %v11256_v15  ;;  %v12727_v27 = vld [vmem:[#allocation12 + $0x194] sm:$0xf0] }
 0x3eb   :  { %v12679_v49 = vld [vmem:[#allocation12 + $0x14] sm:$0xf0] }
 0x3ec   :  { %7426 = vmatpush.bf16.msrb.mxu1 %v11563_v0  ;;  %v5614_v56 = vpop.f32.mrf.mxu1  ;;  %v12776_v0 = vld [vmem:[#allocation12 + $0x324] sm:$0xf]  ;;  %v12831_v24 = vld [vmem:[#allocation12 + $0x4d4] sm:$0xf0] }
 0x3ed   :  { %7401 = vmatpush.bf16.msra.mxu3 %v11291_v57  ;;  %v11227_v51 = vor.u32 %v12776_v0, %v11224_v43  ;;  %v12772_v57 = vld [vmem:[#allocation12 + $0x304] sm:$0xf]  ;;  %v11071_v56 = vor.u32 %v12739_v55, %v11070_v5  ;;  %v3989_v5 = vperm.slane %v13639_v35, 7 }
 0x3ee   :  { %7415 = vmatpush.bf16.msrb.mxu0 %v11403_v3  ;;  %7393 = vmatpush.bf16.msra.mxu2 %v11083_v18  ;;  %v12703_v3 = vld [vmem:[#allocation12 + $0xd4] sm:$0xf0]  ;;  %v10894_v18 = vld [vmem:[#allocation12 + $0x88] sm:$0xf] }
 0x3ef   :  { %v10927_v45 = vor.u32 %v12703_v3, %v10926_v2  ;;  %v10895_v58 = vor.u32 %v12695_v19, %v10894_v18  ;;  %v11055_v3 = vor.u32 %v12735_v1, %v11054_v63  ;;  %v12835_v18 = vld [vmem:[#allocation12 + $0x4f4] sm:$0xf0]  ;;  %v11608_v63 = vld [vmem:[#allocation12 + $0x630] sm:$0xf0]  ;;  %v10974_v1 = vld [vmem:[#allocation12 + $0x128] sm:$0xf] }
 0x3f0   :  { %7427 = vmatpush.bf16.msrb.mxu1 %v11547_v52 }
 0x3f1   :  { %7402 = vmatpush.bf16.msra.mxu3 %v11275_v42  ;;  %7381 = vmatmul.bf16.vlgmr.msra.gmra.mxu1 %v13622_v39  ;;  %v11688_v42 = vld [vmem:[#allocation12 + $0x6d0] sm:$0xf0] }
 0x3f2   :  { %7416 = vmatpush.bf16.msrb.mxu0 %v11387_v21  ;;  %v11499_v21 = vor.u32 %v12844_v47, %v11496_v10  ;;  %v11691_v15 = vor.u32 %v12892_v41, %v11688_v42  ;;  %v11038_v47 = vld [vmem:[#allocation12 + $0x1a8] sm:$0xf]  ;;  %v12731_v10 = vld [vmem:[#allocation12 + $0x1b4] sm:$0xf0] }
 0x3f3   :  { %v11039_v13 = vor.u32 %v12731_v10, %v11038_v47  ;;  %v11406_v41 = vld [vmem:[#allocation12 + $0x488] sm:$0xf]  ;;  %v12823_v42 = vld [vmem:[#allocation12 + $0x494] sm:$0xf0] }
 0x3f4   :  { %7428 = vmatpush.bf16.msrb.mxu1 %v11531_v38  ;;  %v5625_v28 = vpop.f32.mrf.mxu2  ;;  %v10862_v38 = vld [vmem:[#allocation12 + $0x48] sm:$0xf]  ;;  %v11407_v47 = vor.u32 %v12823_v42, %v11406_v41  ;;  %v12859_v41 = vld [vmem:[#allocation12 + $0x5b4] sm:$0xf0] }
 0x3f5   :  { %7403 = vmatpush.bf16.msra.mxu3 %v11259_v23  ;;  %v5626_v50 = vadd.f32 %v5625_v28, %v5613_v34  ;;  %v10863_v37 = vor.u32 %v12687_v40, %v10862_v38  ;;  %v11675_v28 = vor.u32 %v12888_v12, %v11672_v29  ;;  %v11454_v34 = vld [vmem:[#allocation12 + $0x4e8] sm:$0xf]  ;;  %v12715_v40 = vld [vmem:[#allocation12 + $0x134] sm:$0xf0] }
 0x3f6   :  { %7417 = vmatpush.bf16.msrb.mxu0 %v11371_v22  ;;  %v12836_v22 = vld [vmem:[#allocation12 + $0x504] sm:$0xf]  ;;  %v10958_v10 = vld [vmem:[#allocation12 + $0x108] sm:$0xf]  ;;  %v12819_v29 = vld [vmem:[#allocation12 + $0x474] sm:$0xf0] }
 0x3f7   :  { %v11467_v54 = vor.u32 %v12836_v22, %v11464_v32  ;;  %v11455_v22 = vor.u32 %v12835_v18, %v11454_v34  ;;  %v11640_v32 = vld [vmem:[#allocation12 + $0x670] sm:$0xf0]  ;;  %v11390_v12 = vld [vmem:[#allocation12 + $0x468] sm:$0xf]  ;;  %v12867_v18 = vld [vmem:[#allocation12 + $0x5f4] sm:$0xf0] }
 0x3f8   :  { %7429 = vmatpush.bf16.msrb.mxu1 %v11515_v6  ;;  %v11582_v34 = vld [vmem:[#allocation12 + $0x5e8] sm:$0xf] }
 0x3f9   :  { %7404 = vmatpush.bf16.msra.mxu3 %v11243_v36  ;;  %v12884_v36 = vld [vmem:[#allocation12 + $0x684] sm:$0xf] }
 0x3fa   :  { %7418 = vmatpush.bf16.msrb.mxu0 %v11355_v46  ;;  %v5638_v59 = vpop.f32.mrf.mxu3  ;;  %v11704_v46 = vld [vmem:[#allocation12 + $0x6f0] sm:$0xf0] }
 0x3fb   :  { %v5639_v52 = vadd.f32 %v5638_v59, %v5626_v50  ;;  %v11707_v17 = vor.u32 %v12896_v26, %v11704_v46  ;;  %v12880_v50 = vld [vmem:[#allocation12 + $0x664] sm:$0xf]  ;;  %v12723_v59 = vld [vmem:[#allocation12 + $0x174] sm:$0xf0]  ;;  %v11624_v46 = vld [vmem:[#allocation12 + $0x650] sm:$0xf0] }
 0x3fc   :  { %7430 = vmatpush.bf16.msrb.mxu1 %v11499_v21  ;;  %v5627_v25 = vpop.f32.mrf.mxu2  ;;  %v10830_v21 = vld [vmem:[#allocation12 + $0x8] sm:$0xf]  ;;  %v11643_v55 = vor.u32 %v12880_v50, %v11640_v32  ;;  %v11627_v35 = vor.u32 %v12876_v53, %v11624_v46  ;;  %v12924_v32 = vld [vmem:[#allocation12 + $0x7c4] sm:$0xf]  ;;  %v12863_v53 = vld [vmem:[#allocation12 + $0x5d4] sm:$0xf0] }
 0x3fd   :  { %v5700_v61 = vmax.f32 %v5639_v52, 0.0  ;;  %7405 = vmatpush.bf16.msra.mxu3 %v11227_v51  ;;  %v10831_v0 = vor.u32 %v12679_v49, %v10830_v21  ;;  %v11006_v51 = vld [vmem:[#allocation12 + $0x168] sm:$0xf] }
 0x3fe   :  { %7419 = vmatpush.bf16.msrb.mxu0 %v11339_v31  ;;  %v13667_v11 = vpop.f32.mrf.mxu0  ;;  %v11007_v52 = vor.u32 %v12723_v59, %v11006_v51  ;;  %v10990_v25 = vld [vmem:[#allocation12 + $0x148] sm:$0xf]  ;;  %v11583_v59 = vor.u32 %v12867_v18, %v11582_v34  ;;  %v12755_v34 = vld [vmem:[#allocation12 + $0x274] sm:$0xf0] }
 0x3ff   :  { %v13669_v31 = vpack.c.bf16 %v5700_v61, %v5700_v61  ;;  %v11198_v21 = vld [vmem:[#allocation12 + $0x2e8] sm:$0xf] }
 0x400   :  { %7431 = vmatpush.bf16.msrb.mxu1 %v11483_v48  ;;  %v11023_v48 = vor.u32 %v12727_v27, %v11022_v4  ;;  %v12771_v4 = vld [vmem:[#allocation12 + $0x2f4] sm:$0xf0]  ;;  %v11374_v50 = vld [vmem:[#allocation12 + $0x448] sm:$0xf] }
 0x401   :  { %7420 = vmatmul.bf16.vlgmr.msrb.gmra.mxu0 %v13646_v7  ;;  %7342 = vmatmul.bf16.vlgmr.msrb.gmra.mxu2 %v13669_v31  ;;  %v11518_v18 = vld [vmem:[#allocation12 + $0x568] sm:$0xf] }
 0x402   :  { %7464 = vmatpush.bf16.msra.mxu0 %v10943_v44  ;;  %v11211_v44 = vor.u32 %v12772_v57, %v11208_v16  ;;  %7438 = vmatpush.bf16.msrb.mxu2 %v11707_v17  ;;  %v5640_v6 = vpop.f32.mrf.mxu3  ;;  %v11422_v57 = vld [vmem:[#allocation12 + $0x4a8] sm:$0xf]  ;;  %v12827_v16 = vld [vmem:[#allocation12 + $0x4b4] sm:$0xf0]  ;;  %v5652_v17 = vadd.f32 %v13667_v11, %v3989_v5  ;;  %v11592_v11 = vld [vmem:[#allocation12 + $0x610] sm:$0xf0] }
 0x403   :  { %v11423_v38 = vor.u32 %v12827_v16, %v11422_v57  ;;  %v12767_v5 = vld [vmem:[#allocation12 + $0x2d4] sm:$0xf0] }
 0x404   :  { %7432 = vmatpush.bf16.msrb.mxu1 %v11467_v54  ;;  %v13671_v2 = vpop.f32.mrf.mxu1  ;;  %7406 = vmatpush.bf16.msra.mxu3 %v11211_v44  ;;  %v12719_v54 = vld [vmem:[#allocation12 + $0x154] sm:$0xf0] }
 0x405   :  { %v5665_v44 = vadd.f32 %v13671_v2, %v5652_v17  ;;  %v11832_v2 = vld [vmem:[#allocation12 + $0x7f0] sm:$0xf0] }
 0x406   :  { %7465 = vmatpush.bf16.msra.mxu0 %v10927_v45  ;;  %v5653_v23 = vpop.f32.mrf.mxu0  ;;  %v12683_v45 = vld [vmem:[#allocation12 + $0x34] sm:$0xf0]  ;;  %7439 = vmatpush.bf16.msrb.mxu2 %v11691_v15  ;;  %v12868_v15 = vld [vmem:[#allocation12 + $0x604] sm:$0xf] }
 0x407   :  { %7433 = vmatmul.bf16.vlgmr.msrb.gmra.mxu1 %v13657_v33  ;;  %v10847_v30 = vor.u32 %v12683_v45, %v10846_v9  ;;  %v12711_v23 = vld [vmem:[#allocation12 + $0x114] sm:$0xf0] }
 0x408   :  { %7477 = vmatpush.bf16.msra.mxu1 %v11071_v56  ;;  %v10991_v56 = vor.u32 %v12719_v54, %v10990_v25 }
 0x40a   :  { %7466 = vmatpush.bf16.msra.mxu0 %v10911_v60  ;;  %v11656_v60 = vld [vmem:[#allocation12 + $0x690] sm:$0xf0]  ;;  %7440 = vmatpush.bf16.msrb.mxu2 %v11675_v28 }
 0x40b   :  { %v11659_v43 = vor.u32 %v12884_v36, %v11656_v60  ;;  %v11595_v36 = vor.u32 %v12868_v15, %v11592_v11  ;;  %v10959_v60 = vor.u32 %v12711_v23, %v10958_v10  ;;  %v12807_v15 = vld [vmem:[#allocation12 + $0x414] sm:$0xf0]  ;;  %v11150_v10 = vld [vmem:[#allocation12 + $0x288] sm:$0xf] }
 0x40c   :  { %7478 = vmatpush.bf16.msra.mxu1 %v11055_v3  ;;  %v5666_v19 = vpop.f32.mrf.mxu1  ;;  %v13680_v3 = vld [vmem:[#allocation13] sm:$0xf]  ;;  %v12759_v23 = vld [vmem:[#allocation12 + $0x294] sm:$0xf0] }
 0x40d   :  { %v5968_v27 = vperm.slane %v13680_v3, 0 }
 0x40e   :  { %7467 = vmatpush.bf16.msra.mxu0 %v10895_v58  ;;  %v11438_v58 = vld [vmem:[#allocation12 + $0x4c8] sm:$0xf]  ;;  %7441 = vmatpush.bf16.msrb.mxu2 %v11659_v43  ;;  %v11199_v43 = vor.u32 %v12771_v4, %v11198_v21  ;;  %v11151_v21 = vor.u32 %v12759_v23, %v11150_v10  ;;  %v12912_v4 = vld [vmem:[#allocation12 + $0x764] sm:$0xf]  ;;  %v12839_v23 = vld [vmem:[#allocation12 + $0x514] sm:$0xf0] }
 0x40f   :  { %v11439_v26 = vor.u32 %v12831_v24, %v11438_v58  ;;  %v11816_v58 = vld [vmem:[#allocation12 + $0x7d0] sm:$0xf0]  ;;  %v11182_v24 = vld [vmem:[#allocation12 + $0x2c8] sm:$0xf] }
 0x410   :  { %7479 = vmatpush.bf16.msra.mxu1 %v11039_v13  ;;  %v12928_v13 = vld [vmem:[#allocation12 + $0x7e4] sm:$0xf]  ;;  %v11819_v57 = vor.u32 %v12924_v32, %v11816_v58  ;;  %v11183_v16 = vor.u32 %v12767_v5, %v11182_v24  ;;  %v11752_v32 = vld [vmem:[#allocation12 + $0x750] sm:$0xf0]  ;;  %v11118_v24 = vld [vmem:[#allocation12 + $0x248] sm:$0xf] }
 0x411   :  { %7394 = vmatmul.bf16.vlgmr.msra.gmra.mxu2 %v13633_v14  ;;  %v12751_v5 = vld [vmem:[#allocation12 + $0x254] sm:$0xf0]  ;;  %v11470_v10 = vld [vmem:[#allocation12 + $0x508] sm:$0xf] }
 0x412   :  { %7468 = vmatpush.bf16.msra.mxu0 %v10879_v62  ;;  %7442 = vmatpush.bf16.msrb.mxu2 %v11643_v55  ;;  %v12872_v62 = vld [vmem:[#allocation12 + $0x624] sm:$0xf] }
 0x413   :  { %v11611_v6 = vor.u32 %v12872_v62, %v11608_v63  ;;  %v11166_v63 = vld [vmem:[#allocation12 + $0x2a8] sm:$0xf] }
 0x414   :  { %7480 = vmatpush.bf16.msra.mxu1 %v11023_v48  ;;  %v5677_v61 = vpop.f32.mrf.mxu2  ;;  %v11391_v48 = vor.u32 %v12819_v29, %v11390_v12  ;;  %v12855_v12 = vld [vmem:[#allocation12 + $0x594] sm:$0xf0]  ;;  %v12705_v29 = vld [vmem:[#allocation12 + $0xec] sm:$0xf] }
 0x415   :  { %v5678_v9 = vadd.f32 %v5677_v61, %v5665_v44  ;;  %v11358_v61 = vld [vmem:[#allocation12 + $0x428] sm:$0xf] }
 0x416   :  { %7469 = vmatpush.bf16.msra.mxu0 %v10863_v37  ;;  %7443 = vmatpush.bf16.msrb.mxu2 %v11627_v35  ;;  %v10975_v37 = vor.u32 %v12715_v40, %v10974_v1  ;;  %v12811_v35 = vld [vmem:[#allocation12 + $0x434] sm:$0xf0]  ;;  %v11550_v40 = vld [vmem:[#allocation12 + $0x5a8] sm:$0xf] }
 0x417   :  { %v12763_v1 = vld [vmem:[#allocation12 + $0x2b4] sm:$0xf0]  ;;  %v11359_v42 = vor.u32 %v12811_v35, %v11358_v61  ;;  %v11342_v44 = vld [vmem:[#allocation12 + $0x408] sm:$0xf]  ;;  %v11551_v11 = vor.u32 %v12859_v41, %v11550_v40  ;;  %v11736_v61 = vld [vmem:[#allocation12 + $0x730] sm:$0xf0] }
 0x418   :  { %7481 = vmatpush.bf16.msra.mxu1 %v11007_v52  ;;  %v11566_v52 = vld [vmem:[#allocation12 + $0x5c8] sm:$0xf]  ;;  %v12693_v40 = vld [vmem:[#allocation12 + $0x8c] sm:$0xf]  ;;  %v10896_v41 = vld [vmem:[#allocation12 + $0x98] sm:$0xf0] }
 0x419   :  { %v11567_v17 = vor.u32 %v12863_v53, %v11566_v52  ;;  %v12847_v52 = vld [vmem:[#allocation12 + $0x554] sm:$0xf0]  ;;  %v12697_v53 = vld [vmem:[#allocation12 + $0xac] sm:$0xf] }
 0x41a   :  { %7470 = vmatpush.bf16.msra.mxu0 %v10847_v30  ;;  %v5690_v45 = vpop.f32.mrf.mxu3  ;;  %7444 = vmatpush.bf16.msrb.mxu2 %v11611_v6 }
 0x41b   :  { %v5691_v30 = vadd.f32 %v5690_v45, %v5678_v9  ;;  %v12916_v9 = vld [vmem:[#allocation12 + $0x784] sm:$0xf]  ;;  %v11534_v45 = vld [vmem:[#allocation12 + $0x588] sm:$0xf] }
 0x41c   :  { %7482 = vmatpush.bf16.msra.mxu1 %v10991_v56  ;;  %v5679_v49 = vpop.f32.mrf.mxu2  ;;  %v12920_v56 = vld [vmem:[#allocation12 + $0x7a4] sm:$0xf] }
 0x41d   :  { %v5701_v19 = vmax.f32 %v5691_v30, 0.0  ;;  %v11535_v49 = vor.u32 %v12855_v12, %v11534_v45  ;;  %v12689_v12 = vld [vmem:[#allocation12 + $0x6c] sm:$0xf] }
 0x41e   :  { %7471 = vmatpush.bf16.msra.mxu0 %v10831_v0  ;;  %v7265_v28 = vpop.f32.mrf.mxu0  ;;  %v11835_v0 = vor.u32 %v12928_v13, %v11832_v2  ;;  %7445 = vmatpush.bf16.msrb.mxu2 %v11595_v36  ;;  %v10944_v13 = vld [vmem:[#allocation12 + $0xf8] sm:$0xf0] }
 0x41f   :  { %v13683_v51 = vpack.c.bf16 %v5701_v19, %v5701_v19  ;;  %v7266_v55 = vadd.f32 %v7265_v28, %v5968_v27  ;;  %v11343_v28 = vor.u32 %v12807_v15, %v11342_v44  ;;  %v11768_v27 = vld [vmem:[#allocation12 + $0x770] sm:$0xf0]  ;;  %v10947_v36 = vor.u32 %v12705_v29, %v10944_v13  ;;  %v12851_v19 = vld [vmem:[#allocation12 + $0x574] sm:$0xf0]  ;;  %v11086_v15 = vld [vmem:[#allocation12 + $0x208] sm:$0xf] }
 0x420   :  { %7483 = vmatpush.bf16.msra.mxu1 %v10975_v37  ;;  %v11167_v37 = vor.u32 %v12763_v1, %v11166_v63  ;;  %v11486_v63 = vld [vmem:[#allocation12 + $0x528] sm:$0xf]  ;;  %v12843_v1 = vld [vmem:[#allocation12 + $0x534] sm:$0xf0]  ;;  %v10880_v29 = vld [vmem:[#allocation12 + $0x78] sm:$0xf0] }
 0x421   :  { %7472 = vmatmul.bf16.vlgmr.msra.gmra.mxu0 %v13616_v8  ;;  %7355 = vmatmul.bf16.vlgmr.msrb.gmra.mxu3 %v13683_v51  ;;  %v11326_v13 = vld [vmem:[#allocation12 + $0x3e8] sm:$0xf] }
 0x422   :  { %7516 = vmatpush.bf16.msrb.mxu0 %v11455_v22  ;;  %v12815_v22 = vld [vmem:[#allocation12 + $0x454] sm:$0xf0]  ;;  %7451 = vmatpush.bf16.msrb.mxu3 %v11835_v0  ;;  %v5692_v54 = vpop.f32.mrf.mxu3  ;;  %v10928_v0 = vld [vmem:[#allocation12 + $0xd8] sm:$0xf0] }
 0x423   :  { %v11375_v46 = vor.u32 %v12815_v22, %v11374_v50  ;;  %7490 = vmatpush.bf16.msra.mxu2 %v11199_v43  ;;  %v11771_v43 = vor.u32 %v12912_v4, %v11768_v27  ;;  %v12908_v22 = vld [vmem:[#allocation12 + $0x744] sm:$0xf] }
 0x424   :  { %7484 = vmatpush.bf16.msra.mxu1 %v10959_v60  ;;  %7446 = vmatmul.bf16.vlgmr.msrb.gmra.mxu2 %v13669_v31  ;;  %v11134_v60 = vld [vmem:[#allocation12 + $0x268] sm:$0xf]  ;;  %v11755_v54 = vor.u32 %v12908_v22, %v11752_v32  ;;  %v12799_v22 = vld [vmem:[#allocation12 + $0x3d4] sm:$0xf0] }
 0x425   :  { %v11135_v50 = vor.u32 %v12755_v34, %v11134_v60  ;;  %v11471_v60 = vor.u32 %v12839_v23, %v11470_v10  ;;  %v10883_v34 = vor.u32 %v12689_v12, %v10880_v29  ;;  %v11694_v32 = vld [vmem:[#allocation12 + $0x6c8] sm:$0xf]  ;;  %v11456_v10 = vld [vmem:[#allocation12 + $0x4f8] sm:$0xf0] }
 0x426   :  { %7517 = vmatpush.bf16.msrb.mxu0 %v11439_v26  ;;  %v7278_v26 = vpop.f32.mrf.mxu1  ;;  %v7267_v62 = vpop.f32.mrf.mxu0  ;;  %7452 = vmatpush.bf16.msrb.mxu3 %v11819_v57  ;;  %v11119_v57 = vor.u32 %v12751_v5, %v11118_v24  ;;  %v11056_v24 = vld [vmem:[#allocation12 + $0x1d8] sm:$0xf0] }
 0x427   :  { %v13686_v25 = vadd.f32 %v7278_v26, %v7266_v55  ;;  %7485 = vmatmul.bf16.vlgmr.msra.gmra.mxu1 %v13622_v39  ;;  %7491 = vmatpush.bf16.msra.mxu2 %v11183_v16  ;;  %v11502_v55 = vld [vmem:[#allocation12 + $0x548] sm:$0xf]  ;;  %v10912_v26 = vld [vmem:[#allocation12 + $0xb8] sm:$0xf0]  ;;  %v12904_v16 = vld [vmem:[#allocation12 + $0x724] sm:$0xf] }
 0x428   :  { %7529 = vmatpush.bf16.msrb.mxu1 %v11583_v59  ;;  %v11519_v59 = vor.u32 %v12851_v19, %v11518_v18  ;;  %v10915_v62 = vor.u32 %v12697_v53, %v10912_v26  ;;  %v12681_v26 = vld [vmem:[#allocation12 + $0x2c] sm:$0xf] }
 0x42a   :  { %7518 = vmatpush.bf16.msrb.mxu0 %v11423_v38  ;;  %v11800_v38 = vld [vmem:[#allocation12 + $0x7b0] sm:$0xf0] }
 0x42b   :  { %v11803_v6 = vor.u32 %v12920_v56, %v11800_v38  ;;  %7492 = vmatpush.bf16.msra.mxu2 %v11167_v37  ;;  %v11503_v56 = vor.u32 %v12847_v52, %v11502_v55  ;;  %v12747_v38 = vld [vmem:[#allocation12 + $0x234] sm:$0xf0]  ;;  %v11720_v37 = vld [vmem:[#allocation12 + $0x710] sm:$0xf0] }
 0x42c   :  { %7530 = vmatpush.bf16.msrb.mxu1 %v11567_v17  ;;  %v11102_v17 = vld [vmem:[#allocation12 + $0x228] sm:$0xf] }
 0x42d   :  { %7453 = vmatpush.bf16.msrb.mxu3 %v11803_v6  ;;  %v11103_v44 = vor.u32 %v12747_v38, %v11102_v17  ;;  %v12900_v6 = vld [vmem:[#allocation12 + $0x704] sm:$0xf]  ;;  %v12677_v38 = vld [vmem:[#allocation12 + $0xc] sm:$0xf] }
 0x42e   :  { %7519 = vmatpush.bf16.msrb.mxu0 %v11407_v47  ;;  %v11784_v47 = vld [vmem:[#allocation12 + $0x790] sm:$0xf0]  ;;  %v7280_v30 = vpop.f32.mrf.mxu1  ;;  %v11723_v4 = vor.u32 %v12900_v6, %v11720_v37 }
 0x42f   :  { %v11787_v2 = vor.u32 %v12916_v9, %v11784_v47  ;;  %7493 = vmatpush.bf16.msra.mxu2 %v11151_v21  ;;  %v11487_v9 = vor.u32 %v12843_v1, %v11486_v63  ;;  %v10899_v47 = vor.u32 %v12693_v40, %v10896_v41  ;;  %v12803_v30 = vld [vmem:[#allocation12 + $0x3f4] sm:$0xf0]  ;;  %v10832_v41 = vld [vmem:[#allocation12 + $0x18] sm:$0xf0] }
 0x430   :  { %7531 = vmatpush.bf16.msrb.mxu1 %v11551_v11  ;;  %v12743_v11 = vld [vmem:[#allocation12 + $0x214] sm:$0xf0]  ;;  %v11327_v18 = vor.u32 %v12803_v30, %v11326_v13  ;;  %v10835_v23 = vor.u32 %v12677_v38, %v10832_v41  ;;  %v11262_v13 = vld [vmem:[#allocation12 + $0x368] sm:$0xf] }
 0x431   :  { %7454 = vmatpush.bf16.msrb.mxu3 %v11787_v2  ;;  %v12899_v2 = vld [vmem:[#allocation12 + $0x6f4] sm:$0xf0]  ;;  %v11087_v27 = vor.u32 %v12743_v11, %v11086_v15  ;;  %v11662_v15 = vld [vmem:[#allocation12 + $0x688] sm:$0xf]  ;;  %v12833_v11 = vld [vmem:[#allocation12 + $0x4ec] sm:$0xf] }
 0x432   :  { %7520 = vmatpush.bf16.msrb.mxu0 %v11391_v48  ;;  %v12701_v48 = vld [vmem:[#allocation12 + $0xcc] sm:$0xf]  ;;  %7407 = vmatmul.bf16.vlgmr.msra.gmra.mxu3 %v13636_v20  ;;  %v12787_v30 = vld [vmem:[#allocation12 + $0x374] sm:$0xf0] }
 0x433   :  { %v10931_v58 = vor.u32 %v12701_v48, %v10928_v0  ;;  %7494 = vmatpush.bf16.msra.mxu2 %v11135_v50  ;;  %v12685_v48 = vld [vmem:[#allocation12 + $0x4c] sm:$0xf]  ;;  %v10864_v0 = vld [vmem:[#allocation12 + $0x58] sm:$0xf0]  ;;  %v12775_v38 = vld [vmem:[#allocation12 + $0x314] sm:$0xf0] }
 0x434   :  { %7532 = vmatpush.bf16.msrb.mxu1 %v11535_v49  ;;  %v12737_v49 = vld [vmem:[#allocation12 + $0x1ec] sm:$0xf]  ;;  %v10867_v55 = vor.u32 %v12685_v48, %v10864_v0  ;;  %v12783_v48 = vld [vmem:[#allocation12 + $0x354] sm:$0xf0] }
 0x435   :  { %7455 = vmatpush.bf16.msrb.mxu3 %v11771_v43  ;;  %v11310_v43 = vld [vmem:[#allocation12 + $0x3c8] sm:$0xf]  ;;  %v12871_v41 = vld [vmem:[#allocation12 + $0x614] sm:$0xf0] }
 0x436   :  { %7521 = vmatpush.bf16.msrb.mxu0 %v11375_v46  ;;  %v7291_v46 = vpop.f32.mrf.mxu2  ;;  %v11311_v52 = vor.u32 %v12799_v22, %v11310_v43  ;;  %v12879_v22 = vld [vmem:[#allocation12 + $0x654] sm:$0xf0] }
 0x437   :  { %v7292_v35 = vadd.f32 %v7291_v46, %v13686_v25  ;;  %7495 = vmatpush.bf16.msra.mxu2 %v11119_v57  ;;  %v10848_v46 = vld [vmem:[#allocation12 + $0x38] sm:$0xf0] }
 0x438   :  { %7533 = vmatpush.bf16.msrb.mxu1 %v11519_v59  ;;  %v12895_v59 = vld [vmem:[#allocation12 + $0x6d4] sm:$0xf0]  ;;  %v10851_v17 = vor.u32 %v12681_v26, %v10848_v46 }
 0x439   :  { %7456 = vmatpush.bf16.msrb.mxu3 %v11755_v54  ;;  %v11695_v53 = vor.u32 %v12895_v59, %v11694_v32  ;;  %v11294_v54 = vld [vmem:[#allocation12 + $0x3a8] sm:$0xf]  ;;  %v12717_v32 = vld [vmem:[#allocation12 + $0x14c] sm:$0xf]  ;;  %v10992_v59 = vld [vmem:[#allocation12 + $0x158] sm:$0xf0] }
 0x43a   :  { %7522 = vmatpush.bf16.msrb.mxu0 %v11359_v42  ;;  %v11739_v42 = vor.u32 %v12904_v16, %v11736_v61  ;;  %v7304_v25 = vpop.f32.mrf.mxu3  ;;  %v12795_v16 = vld [vmem:[#allocation12 + $0x3b4] sm:$0xf0]  ;;  %v11678_v61 = vld [vmem:[#allocation12 + $0x6a8] sm:$0xf]  ;;  %v10995_v26 = vor.u32 %v12717_v32, %v10992_v59  ;;  %v11360_v32 = vld [vmem:[#allocation12 + $0x438] sm:$0xf0] }
 0x43b   :  { %v13693_v45 = vadd.f32 %v7304_v25, %v7292_v35  ;;  %7496 = vmatpush.bf16.msra.mxu2 %v11103_v44  ;;  %v12891_v35 = vld [vmem:[#allocation12 + $0x6b4] sm:$0xf0]  ;;  %v11295_v63 = vor.u32 %v12795_v16, %v11294_v54  ;;  %v11614_v54 = vld [vmem:[#allocation12 + $0x628] sm:$0xf]  ;;  %v12713_v16 = vld [vmem:[#allocation12 + $0x12c] sm:$0xf] }
 0x43c   :  { %7534 = vmatpush.bf16.msrb.mxu1 %v11503_v56  ;;  %v12729_v56 = vld [vmem:[#allocation12 + $0x1ac] sm:$0xf]  ;;  %v11679_v1 = vor.u32 %v12891_v35, %v11678_v61  ;;  %v12791_v44 = vld [vmem:[#allocation12 + $0x394] sm:$0xf0]  ;;  %v10976_v61 = vld [vmem:[#allocation12 + $0x138] sm:$0xf0] }
 0x43d   :  { %7457 = vmatpush.bf16.msrb.mxu3 %v11739_v42  ;;  %v11278_v42 = vld [vmem:[#allocation12 + $0x388] sm:$0xf]  ;;  %v12887_v25 = vld [vmem:[#allocation12 + $0x694] sm:$0xf0]  ;;  %v12821_v35 = vld [vmem:[#allocation12 + $0x48c] sm:$0xf] }
 0x43e   :  { %7523 = vmatpush.bf16.msrb.mxu0 %v11343_v28  ;;  %v11710_v28 = vld [vmem:[#allocation12 + $0x6e8] sm:$0xf]  ;;  %v7293_v21 = vpop.f32.mrf.mxu2  ;;  %v7317_v40 = vpop.f32.mrf.mxu0  ;;  %v11279_v12 = vor.u32 %v12791_v44, %v11278_v42  ;;  %v11663_v29 = vor.u32 %v12887_v25, %v11662_v15  ;;  %v12709_v42 = vld [vmem:[#allocation12 + $0x10c] sm:$0xf]  ;;  %v10960_v44 = vld [vmem:[#allocation12 + $0x118] sm:$0xf0] }
 0x43f   :  { %v11711_v19 = vor.u32 %v12899_v2, %v11710_v28  ;;  %7497 = vmatpush.bf16.msra.mxu2 %v11087_v27  ;;  %v13699_v37 = vadd.f32 %v7317_v40, %v13693_v45  ;;  %v11459_v2 = vor.u32 %v12833_v11, %v11456_v10  ;;  %v11646_v21 = vld [vmem:[#allocation12 + $0x668] sm:$0xf]  ;;  %v12883_v45 = vld [vmem:[#allocation12 + $0x674] sm:$0xf0]  ;;  %v11008_v27 = vld [vmem:[#allocation12 + $0x178] sm:$0xf0] }
 0x440   :  { %7535 = vmatpush.bf16.msrb.mxu1 %v11487_v9  ;;  %v12725_v9 = vld [vmem:[#allocation12 + $0x18c] sm:$0xf]  ;;  %v11392_v25 = vld [vmem:[#allocation12 + $0x478] sm:$0xf0]  ;;  %v11806_v59 = vld [vmem:[#allocation12 + $0x7a8] sm:$0xf] }
 0x441   :  { %7524 = vmatmul.bf16.vlgmr.msrb.gmra.mxu0 %v13646_v7  ;;  %7458 = vmatpush.bf16.msrb.mxu3 %v11723_v4  ;;  %v12721_v4 = vld [vmem:[#allocation12 + $0x16c] sm:$0xf]  ;;  %v11200_v10 = vld [vmem:[#allocation12 + $0x2f8] sm:$0xf0] }
 0x442   :  { %7568 = vmatpush.bf16.msra.mxu0 %v10947_v36  ;;  %v11072_v36 = vld [vmem:[#allocation12 + $0x1f8] sm:$0xf0]  ;;  %v7306_v5 = vpop.f32.mrf.mxu3  ;;  %7498 = vmatmul.bf16.vlgmr.msra.gmra.mxu2 %v13633_v14  ;;  %v11011_v0 = vor.u32 %v12721_v4, %v11008_v27  ;;  %v12817_v15 = vld [vmem:[#allocation12 + $0x46c] sm:$0xf]  ;;  %v11822_v27 = vld [vmem:[#allocation12 + $0x7c8] sm:$0xf] }
 0x443   :  { %v11075_v50 = vor.u32 %v12737_v49, %v11072_v36  ;;  %7542 = vmatpush.bf16.msrb.mxu2 %v11711_v19  ;;  %v12829_v49 = vld [vmem:[#allocation12 + $0x4cc] sm:$0xf]  ;;  %v11440_v36 = vld [vmem:[#allocation12 + $0x4d8] sm:$0xf0]  ;;  %v11246_v19 = vld [vmem:[#allocation12 + $0x348] sm:$0xf] }
 0x444   :  { %7536 = vmatpush.bf16.msrb.mxu1 %v11471_v60  ;;  %7459 = vmatmul.bf16.vlgmr.msrb.gmra.mxu3 %v13683_v51  ;;  %v11263_v60 = vor.u32 %v12787_v30, %v11262_v13  ;;  %v11443_v43 = vor.u32 %v12829_v49, %v11440_v36  ;;  %v11247_v5 = vor.u32 %v12783_v48, %v11246_v19  ;;  %v12769_v11 = vld [vmem:[#allocation12 + $0x2ec] sm:$0xf]  ;;  %v11584_v13 = vld [vmem:[#allocation12 + $0x5f8] sm:$0xf0]  ;;  %v12927_v36 = vld [vmem:[#allocation12 + $0x7d4] sm:$0xf0] }
 0x445   :  { %7503 = vmatpush.bf16.msra.mxu3 %v11327_v18  ;;  %v10963_v30 = vor.u32 %v12709_v42, %v10960_v44  ;;  %v11376_v4 = vld [vmem:[#allocation12 + $0x458] sm:$0xf0]  ;;  %v12915_v44 = vld [vmem:[#allocation12 + $0x774] sm:$0xf0] }
 0x446   :  { %7569 = vmatpush.bf16.msra.mxu0 %v10931_v58  ;;  %v12733_v58 = vld [vmem:[#allocation12 + $0x1cc] sm:$0xf]  ;;  %v7319_v18 = vpop.f32.mrf.mxu0  ;;  %v11568_v19 = vld [vmem:[#allocation12 + $0x5d8] sm:$0xf0] }
 0x447   :  { %v11059_v57 = vor.u32 %v12733_v58, %v11056_v24  ;;  %7537 = vmatmul.bf16.vlgmr.msrb.gmra.mxu1 %v13657_v33  ;;  %7543 = vmatpush.bf16.msrb.mxu2 %v11695_v53  ;;  %v12825_v58 = vld [vmem:[#allocation12 + $0x4ac] sm:$0xf]  ;;  %v11424_v24 = vld [vmem:[#allocation12 + $0x4b8] sm:$0xf0]  ;;  %v12779_v53 = vld [vmem:[#allocation12 + $0x334] sm:$0xf0] }
 0x448   :  { %7581 = vmatpush.bf16.msra.mxu1 %v11075_v50  ;;  %v11630_v50 = vld [vmem:[#allocation12 + $0x648] sm:$0xf]  ;;  %v11427_v46 = vor.u32 %v12825_v58, %v11424_v24  ;;  %v12861_v18 = vld [vmem:[#allocation12 + $0x5cc] sm:$0xf]  ;;  %v12923_v24 = vld [vmem:[#allocation12 + $0x7b4] sm:$0xf0] }
 0x449   :  { %7504 = vmatpush.bf16.msra.mxu3 %v11311_v52  ;;  %v11230_v52 = vld [vmem:[#allocation12 + $0x328] sm:$0xf]  ;;  %v11571_v58 = vor.u32 %v12861_v18, %v11568_v19  ;;  %v12745_v18 = vld [vmem:[#allocation12 + $0x22c] sm:$0xf]  ;;  %v11104_v19 = vld [vmem:[#allocation12 + $0x238] sm:$0xf0] }
 0x44a   :  { %7570 = vmatpush.bf16.msra.mxu0 %v10915_v62  ;;  %v11040_v62 = vld [vmem:[#allocation12 + $0x1b8] sm:$0xf0] }
 0x44b   :  { %v11043_v6 = vor.u32 %v12729_v56, %v11040_v62  ;;  %7544 = vmatpush.bf16.msrb.mxu2 %v11679_v1  ;;  %v11408_v56 = vld [vmem:[#allocation12 + $0x498] sm:$0xf0]  ;;  %v10979_v1 = vor.u32 %v12713_v16, %v10976_v61  ;;  %v12805_v16 = vld [vmem:[#allocation12 + $0x40c] sm:$0xf] }
 0x44c   :  { %7582 = vmatpush.bf16.msra.mxu1 %v11059_v57  ;;  %v12875_v57 = vld [vmem:[#allocation12 + $0x634] sm:$0xf0]  ;;  %v11411_v40 = vor.u32 %v12821_v35, %v11408_v56  ;;  %v11344_v61 = vld [vmem:[#allocation12 + $0x418] sm:$0xf0]  ;;  %v11790_v35 = vld [vmem:[#allocation12 + $0x788] sm:$0xf] }
 0x44d   :  { %7505 = vmatpush.bf16.msra.mxu3 %v11295_v63  ;;  %v11615_v62 = vor.u32 %v12875_v57, %v11614_v54  ;;  %v11598_v63 = vld [vmem:[#allocation12 + $0x608] sm:$0xf] }
 0x44e   :  { %7571 = vmatpush.bf16.msra.mxu0 %v10899_v47  ;;  %v11024_v47 = vld [vmem:[#allocation12 + $0x198] sm:$0xf0] }
 0x44f   :  { %v11027_v28 = vor.u32 %v12725_v9, %v11024_v47  ;;  %7545 = vmatpush.bf16.msrb.mxu2 %v11663_v29  ;;  %v11838_v9 = vld [vmem:[#allocation12 + $0x7e8] sm:$0xf]  ;;  %v12931_v47 = vld [vmem:[#allocation12 + $0x7f4] sm:$0xf0]  ;;  %v12865_v29 = vld [vmem:[#allocation12 + $0x5ec] sm:$0xf] }
 0x450   :  { %7583 = vmatpush.bf16.msra.mxu1 %v11043_v6  ;;  %v11587_v49 = vor.u32 %v12865_v29, %v11584_v13  ;;  %v12911_v13 = vld [vmem:[#allocation12 + $0x754] sm:$0xf0] }
 0x451   :  { %7506 = vmatpush.bf16.msra.mxu3 %v11279_v12  ;;  %v11599_v12 = vor.u32 %v12871_v41, %v11598_v63  ;;  %v11347_v63 = vor.u32 %v12805_v16, %v11344_v61  ;;  %v11774_v41 = vld [vmem:[#allocation12 + $0x768] sm:$0xf]  ;;  %v11712_v16 = vld [vmem:[#allocation12 + $0x6f8] sm:$0xf0] }
 0x452   :  { %7572 = vmatpush.bf16.msra.mxu0 %v10883_v34  ;;  %v11647_v34 = vor.u32 %v12883_v45, %v11646_v21  ;;  %v11203_v21 = vor.u32 %v12769_v11, %v11200_v10  ;;  %v12813_v45 = vld [vmem:[#allocation12 + $0x44c] sm:$0xf]  ;;  %v11775_v11 = vor.u32 %v12915_v44, %v11774_v41  ;;  %v12936_v41 = vld [vmem:[#allocation15 + $0x20] sm:$0xff] }
 0x453   :  { %v11379_v48 = vor.u32 %v12813_v45, %v11376_v4  ;;  %v5969_v45 = vperm.slane %v13680_v3, 1  ;;  %v11107_v3 = vor.u32 %v12745_v18, %v11104_v19  ;;  %v12781_v19 = vld [vmem:[#allocation12 + $0x34c] sm:$0xf] }
 0x454   :  { %7584 = vmatpush.bf16.msra.mxu1 %v11027_v28  ;;  %7546 = vmatpush.bf16.msrb.mxu2 %v11647_v34  ;;  %v11395_v28 = vor.u32 %v12817_v15, %v11392_v25  ;;  %v11184_v34 = vld [vmem:[#allocation12 + $0x2d8] sm:$0xf0]  ;;  %v12753_v15 = vld [vmem:[#allocation12 + $0x26c] sm:$0xf] }
 0x455   :  { %7507 = vmatpush.bf16.msra.mxu3 %v11263_v60  ;;  %v12765_v60 = vld [vmem:[#allocation12 + $0x2cc] sm:$0xf]  ;;  %v11136_v25 = vld [vmem:[#allocation12 + $0x278] sm:$0xf0] }
 0x456   :  { %7573 = vmatpush.bf16.msra.mxu0 %v10867_v55  ;;  %v11631_v55 = vor.u32 %v12879_v22, %v11630_v50  ;;  %v11187_v50 = vor.u32 %v12765_v60, %v11184_v34  ;;  %v12809_v22 = vld [vmem:[#allocation12 + $0x42c] sm:$0xf]  ;;  %v11139_v10 = vor.u32 %v12753_v15, %v11136_v25  ;;  %v12907_v34 = vld [vmem:[#allocation12 + $0x734] sm:$0xf0] }
 0x457   :  { %v12793_v25 = vld [vmem:[#allocation12 + $0x3ac] sm:$0xf] }
 0x458   :  { %7585 = vmatpush.bf16.msra.mxu1 %v11011_v0  ;;  %7547 = vmatpush.bf16.msrb.mxu2 %v11631_v55  ;;  %v11168_v55 = vld [vmem:[#allocation12 + $0x2b8] sm:$0xf0] }
 0x459   :  { %7508 = vmatpush.bf16.msra.mxu3 %v11247_v5  ;;  %v12761_v5 = vld [vmem:[#allocation12 + $0x2ac] sm:$0xf] }
 0x45a   :  { %7574 = vmatpush.bf16.msra.mxu0 %v10851_v17  ;;  %v11214_v17 = vld [vmem:[#allocation12 + $0x308] sm:$0xf]  ;;  %v11171_v54 = vor.u32 %v12761_v5, %v11168_v55  ;;  %v12741_v55 = vld [vmem:[#allocation12 + $0x20c] sm:$0xf] }
 0x45c   :  { %7586 = vmatpush.bf16.msra.mxu1 %v10995_v26  ;;  %7548 = vmatpush.bf16.msrb.mxu2 %v11615_v62  ;;  %v11363_v26 = vor.u32 %v12809_v22, %v11360_v32  ;;  %v12757_v62 = vld [vmem:[#allocation12 + $0x28c] sm:$0xf]  ;;  %v11726_v22 = vld [vmem:[#allocation12 + $0x708] sm:$0xf]  ;;  %v12903_v32 = vld [vmem:[#allocation12 + $0x714] sm:$0xf0] }
 0x45d   :  { %v11727_v61 = vor.u32 %v12903_v32, %v11726_v22  ;;  %v12777_v32 = vld [vmem:[#allocation12 + $0x32c] sm:$0xf] }
 0x45e   :  { %7575 = vmatpush.bf16.msra.mxu0 %v10835_v23  ;;  %v13702_v6 = vpop.f32.mrf.mxu0  ;;  %v11215_v23 = vor.u32 %v12775_v38, %v11214_v17  ;;  %v13707_v57 = vpop.f32.mrf.mxu1  ;;  %v11152_v17 = vld [vmem:[#allocation12 + $0x298] sm:$0xf0]  ;;  %v12853_v38 = vld [vmem:[#allocation12 + $0x58c] sm:$0xf] }
 0x460   :  { %7587 = vmatpush.bf16.msra.mxu1 %v10979_v1  ;;  %7549 = vmatpush.bf16.msrb.mxu2 %v11599_v12  ;;  %v11758_v12 = vld [vmem:[#allocation12 + $0x748] sm:$0xf] }
 0x461   :  { %7576 = vmatmul.bf16.vlgmr.msra.gmra.mxu0 %v13616_v8  ;;  %v11231_v8 = vor.u32 %v12779_v53, %v11230_v52  ;;  %v12857_v52 = vld [vmem:[#allocation12 + $0x5ac] sm:$0xf]  ;;  %v11552_v53 = vld [vmem:[#allocation12 + $0x5b8] sm:$0xf0]  ;;  %v11759_v4 = vor.u32 %v12911_v13, %v11758_v12 }
 0x462   :  { %7620 = vmatpush.bf16.msrb.mxu0 %v11459_v2  ;;  %v11839_v2 = vor.u32 %v12931_v47, %v11838_v9  ;;  %v11555_v56 = vor.u32 %v12857_v52, %v11552_v53  ;;  %v12849_v9 = vld [vmem:[#allocation12 + $0x56c] sm:$0xf]  ;;  %v11520_v47 = vld [vmem:[#allocation12 + $0x578] sm:$0xf0] }
 0x463   :  { %7509 = vmatpush.bf16.msra.mxu3 %v11231_v8  ;;  %7550 = vmatmul.bf16.vlgmr.msrb.gmra.mxu2 %v13669_v31  ;;  %v12919_v8 = vld [vmem:[#allocation12 + $0x794] sm:$0xf0]  ;;  %v11523_v29 = vor.u32 %v12849_v9, %v11520_v47  ;;  %v11088_v52 = vld [vmem:[#allocation12 + $0x218] sm:$0xf0]  ;;  %v12837_v53 = vld [vmem:[#allocation12 + $0x50c] sm:$0xf] }
 0x464   :  { %7588 = vmatpush.bf16.msra.mxu1 %v10963_v30  ;;  %7594 = vmatpush.bf16.msra.mxu2 %v11203_v21  ;;  %v11791_v1 = vor.u32 %v12919_v8, %v11790_v35  ;;  %v12749_v30 = vld [vmem:[#allocation12 + $0x24c] sm:$0xf]  ;;  %v11504_v21 = vld [vmem:[#allocation12 + $0x558] sm:$0xf0]  ;;  %v11091_v35 = vor.u32 %v12741_v55, %v11088_v52 }
 0x465   :  { %v11296_v9 = vld [vmem:[#allocation12 + $0x3b8] sm:$0xf0] }
 0x466   :  { %7621 = vmatpush.bf16.msrb.mxu0 %v11443_v43  ;;  %v7371_v0 = vpop.f32.mrf.mxu0  ;;  %v11823_v43 = vor.u32 %v12927_v36, %v11822_v27  ;;  %v12939_v36 = vld [vmem:[#allocation15 + $0x38] sm:$0xff] }
 0x467   :  { %7510 = vmatpush.bf16.msra.mxu3 %v11215_v23  ;;  %7589 = vmatmul.bf16.vlgmr.msra.gmra.mxu1 %v13622_v39  ;;  %v11536_v39 = vld [vmem:[#allocation12 + $0x598] sm:$0xf0]  ;;  %v7332_v23 = vpop.f32.mrf.mxu1 }
 0x468   :  { %7633 = vmatpush.bf16.msrb.mxu1 %v11587_v49  ;;  %7595 = vmatpush.bf16.msra.mxu2 %v11187_v50  ;;  %v11539_v42 = vor.u32 %v12853_v38, %v11536_v39  ;;  %v11742_v49 = vld [vmem:[#allocation12 + $0x728] sm:$0xf]  ;;  %v11488_v0 = vld [vmem:[#allocation12 + $0x538] sm:$0xf0]  ;;  %v12797_v38 = vld [vmem:[#allocation12 + $0x3cc] sm:$0xf]  ;;  %v11299_v23 = vor.u32 %v12793_v25, %v11296_v9 }
 0x469   :  { %v11312_v39 = vld [vmem:[#allocation12 + $0x3d8] sm:$0xf0]  ;;  %v12944_v9 = vld [vmem:[#allocation15 + $0x60] sm:$0xff] }
 0x46a   :  { %7622 = vmatpush.bf16.msrb.mxu0 %v11427_v46  ;;  %7511 = vmatmul.bf16.vlgmr.msra.gmra.mxu3 %v13636_v20  ;;  %v11807_v46 = vor.u32 %v12923_v24, %v11806_v59  ;;  %v12938_v59 = vld [vmem:[#allocation15 + $0x30] sm:$0xff]  ;;  %v11315_v44 = vor.u32 %v12797_v38, %v11312_v39  ;;  %v12935_v47 = vld [vmem:[#allocation15 + $0x18] sm:$0xff] }
 0x46b   :  { %7555 = vmatpush.bf16.msrb.mxu3 %v11839_v2  ;;  %v12845_v2 = vld [vmem:[#allocation12 + $0x54c] sm:$0xf]  ;;  %v11280_v13 = vld [vmem:[#allocation12 + $0x398] sm:$0xf0] }
 0x46c   :  { %7634 = vmatpush.bf16.msrb.mxu1 %v11571_v58  ;;  %7596 = vmatpush.bf16.msra.mxu2 %v11171_v54  ;;  %v11507_v60 = vor.u32 %v12845_v2, %v11504_v21  ;;  %v12897_v54 = vld [vmem:[#allocation12 + $0x6ec] sm:$0xf]  ;;  %v12934_v21 = vld [vmem:[#allocation15 + $0x10] sm:$0xff]  ;;  %v11616_v55 = vld [vmem:[#allocation12 + $0x638] sm:$0xf0] }
 0x46d   :  { %v12947_v52 = vld [vmem:[#allocation15 + $0x78] sm:$0xff] }
 0x46e   :  { %7623 = vmatpush.bf16.msrb.mxu0 %v11411_v40  ;;  %v11155_v40 = vor.u32 %v12757_v62, %v11152_v17  ;;  %v11715_v17 = vor.u32 %v12897_v54, %v11712_v16  ;;  %v11216_v16 = vld [vmem:[#allocation12 + $0x318] sm:$0xf0] }
 0x46f   :  { %7556 = vmatpush.bf16.msrb.mxu3 %v11823_v43  ;;  %v11743_v43 = vor.u32 %v12907_v34, %v11742_v49  ;;  %v7382_v50 = vpop.f32.mrf.mxu1  ;;  %v11648_v49 = vld [vmem:[#allocation12 + $0x678] sm:$0xf0] }
 0x470   :  { %7635 = vmatpush.bf16.msrb.mxu1 %v11555_v56  ;;  %7597 = vmatpush.bf16.msra.mxu2 %v11155_v40  ;;  %v12937_v56 = vld [vmem:[#allocation15 + $0x28] sm:$0xff]  ;;  %v11808_v25 = vld [vmem:[#allocation12 + $0x7b8] sm:$0xf0] }
 0x472   :  { %7624 = vmatpush.bf16.msrb.mxu0 %v11395_v28  ;;  %v11120_v28 = vld [vmem:[#allocation12 + $0x258] sm:$0xf0] }
 0x473   :  { %7557 = vmatpush.bf16.msrb.mxu3 %v11807_v46  ;;  %v11123_v27 = vor.u32 %v12749_v30, %v11120_v28  ;;  %v12801_v46 = vld [vmem:[#allocation12 + $0x3ec] sm:$0xf]  ;;  %v11664_v28 = vld [vmem:[#allocation12 + $0x698] sm:$0xf0] }
 0x474   :  { %7636 = vmatpush.bf16.msrb.mxu1 %v11539_v42  ;;  %7598 = vmatpush.bf16.msra.mxu2 %v11139_v10  ;;  %v11680_v10 = vld [vmem:[#allocation12 + $0x6b8] sm:$0xf0]  ;;  %v12885_v30 = vld [vmem:[#allocation12 + $0x68c] sm:$0xf] }
 0x476   :  { %7625 = vmatpush.bf16.msrb.mxu0 %v11379_v48  ;;  %v12841_v48 = vld [vmem:[#allocation12 + $0x52c] sm:$0xf] }
 0x477   :  { %7558 = vmatpush.bf16.msrb.mxu3 %v11791_v1  ;;  %v11491_v24 = vor.u32 %v12841_v48, %v11488_v0  ;;  %v11696_v1 = vld [vmem:[#allocation12 + $0x6d8] sm:$0xf0]  ;;  %v7384_v40 = vpop.f32.mrf.mxu1  ;;  %v12877_v0 = vld [vmem:[#allocation12 + $0x64c] sm:$0xf] }
 0x478   :  { %7637 = vmatpush.bf16.msrb.mxu1 %v11523_v29  ;;  %7599 = vmatpush.bf16.msra.mxu2 %v11123_v27  ;;  %v12789_v29 = vld [vmem:[#allocation12 + $0x38c] sm:$0xf]  ;;  %v11264_v27 = vld [vmem:[#allocation12 + $0x378] sm:$0xf0] }
 0x479   :  { %v11248_v48 = vld [vmem:[#allocation12 + $0x358] sm:$0xf0] }
 0x47a   :  { %7626 = vmatpush.bf16.msrb.mxu0 %v11363_v26  ;;  %v11472_v26 = vld [vmem:[#allocation12 + $0x518] sm:$0xf0] }
 0x47b   :  { %7559 = vmatpush.bf16.msrb.mxu3 %v11775_v11  ;;  %v11475_v8 = vor.u32 %v12837_v53, %v11472_v26  ;;  %v12889_v11 = vld [vmem:[#allocation12 + $0x6ac] sm:$0xf] }
 0x47c   :  { %7638 = vmatpush.bf16.msrb.mxu1 %v11507_v60  ;;  %7600 = vmatpush.bf16.msra.mxu2 %v11107_v3  ;;  %v11683_v12 = vor.u32 %v12889_v11, %v11680_v10  ;;  %v12933_v60 = vld [vmem:[#allocation15 + $0x8] sm:$0xff] }
 0x47e   :  { %7627 = vmatpush.bf16.msrb.mxu0 %v11347_v63  ;;  %v13712_v58 = vpop.f32.mrf.mxu0  ;;  %v12893_v63 = vld [vmem:[#allocation12 + $0x6cc] sm:$0xf] }
 0x47f   :  { %7560 = vmatpush.bf16.msrb.mxu3 %v11759_v4  ;;  %v11699_v15 = vor.u32 %v12893_v63, %v11696_v1  ;;  %v12785_v4 = vld [vmem:[#allocation12 + $0x36c] sm:$0xf]  ;;  %v11824_v1 = vld [vmem:[#allocation12 + $0x7d8] sm:$0xf0] }
 0x480   :  { %7639 = vmatpush.bf16.msrb.mxu1 %v11491_v24  ;;  %7601 = vmatpush.bf16.msra.mxu2 %v11091_v35  ;;  %v11267_v34 = vor.u32 %v12785_v4, %v11264_v27  ;;  %v12873_v24 = vld [vmem:[#allocation12 + $0x62c] sm:$0xf]  ;;  %v12946_v35 = vld [vmem:[#allocation15 + $0x70] sm:$0xff] }
 0x481   :  { %7628 = vmatmul.bf16.vlgmr.msrb.gmra.mxu0 %v13646_v7  ;;  %v7370_v7 = vadd.f32 %v13702_v6, %v5969_v45  ;;  %v11328_v6 = vld [vmem:[#allocation12 + $0x3f8] sm:$0xf0]  ;;  %v11283_v45 = vor.u32 %v12789_v29, %v11280_v13  ;;  %v11619_v54 = vor.u32 %v12873_v24, %v11616_v55  ;;  %v12925_v63 = vld [vmem:[#allocation12 + $0x7cc] sm:$0xf] }
 0x482   :  { %7940 = vmatpush.bf16.msra.mxu0 %v12939_v36  ;;  %v11331_v62 = vor.u32 %v12801_v46, %v11328_v6  ;;  %v12773_v46 = vld [vmem:[#allocation12 + $0x30c] sm:$0xf]  ;;  %v12943_v29 = vld [vmem:[#allocation15 + $0x58] sm:$0xff] }
 0x483   :  { %v13714_v5 = vadd.f32 %v7382_v50, %v7370_v7  ;;  %7561 = vmatpush.bf16.msrb.mxu3 %v11743_v43  ;;  %7602 = vmatmul.bf16.vlgmr.msra.gmra.mxu2 %v13633_v14  ;;  %v11667_v14 = vor.u32 %v12885_v30, %v11664_v28  ;;  %v11632_v7 = vld [vmem:[#allocation12 + $0x658] sm:$0xf0]  ;;  %v12932_v43 = vld [vmem:[#allocation15] sm:$0xff]  ;;  %v11251_v50 = vor.u32 %v12781_v19, %v11248_v48  ;;  %v12941_v48 = vld [vmem:[#allocation15 + $0x48] sm:$0xff] }
 0x484   :  { %7640 = vmatpush.bf16.msrb.mxu1 %v11475_v8  ;;  %7646 = vmatpush.bf16.msrb.mxu2 %v11715_v17  ;;  %v13719_v2 = vpop.f32.mrf.mxu1  ;;  %v13721_v36 = vpop.f32.mrf.mxu2  ;;  %v11635_v22 = vor.u32 %v12877_v0, %v11632_v7  ;;  %v12929_v8 = vld [vmem:[#allocation12 + $0x7ec] sm:$0xf]  ;;  %v11219_v17 = vor.u32 %v12773_v46, %v11216_v16  ;;  %v11728_v24 = vld [vmem:[#allocation12 + $0x718] sm:$0xf0] }
 0x486   :  { %7941 = vmatpush.bf16.msra.mxu0 %v12938_v59  ;;  %v7423_v42 = vpop.f32.mrf.mxu0  ;;  %v11232_v59 = vld [vmem:[#allocation12 + $0x338] sm:$0xf0] }
 0x487   :  { %7562 = vmatpush.bf16.msrb.mxu3 %v11727_v61  ;;  %7641 = vmatmul.bf16.vlgmr.msrb.gmra.mxu1 %v13657_v33  ;;  %v12881_v33 = vld [vmem:[#allocation12 + $0x66c] sm:$0xf]  ;;  %v11235_v26 = vor.u32 %v12777_v32, %v11232_v59 }
 0x488   :  { %7647 = vmatpush.bf16.msrb.mxu2 %v11699_v15  ;;  %v11651_v18 = vor.u32 %v12881_v33, %v11648_v49  ;;  %7953 = vmatpush.bf16.msra.mxu1 %v12947_v52  ;;  %v12869_v61 = vld [vmem:[#allocation12 + $0x60c] sm:$0xf] }
 0x489   :  { %v12921_v15 = vld [vmem:[#allocation12 + $0x7ac] sm:$0xf] }
 0x48a   :  { %7942 = vmatpush.bf16.msra.mxu0 %v12937_v56  ;;  %7563 = vmatmul.bf16.vlgmr.msrb.gmra.mxu3 %v13683_v51  ;;  %v11600_v56 = vld [vmem:[#allocation12 + $0x618] sm:$0xf0]  ;;  %v11811_v10 = vor.u32 %v12921_v15, %v11808_v25  ;;  %v12901_v59 = vld [vmem:[#allocation12 + $0x70c] sm:$0xf]  ;;  %v12950_v25 = vld [vmem:[#allocation15 + $0x90] sm:$0xff] }
 0x48b   :  { %7607 = vmatpush.bf16.msra.mxu3 %v11331_v62  ;;  %v11840_v62 = vld [vmem:[#allocation12 + $0x7f8] sm:$0xf0]  ;;  %v11603_v38 = vor.u32 %v12869_v61, %v11600_v56  ;;  %v11731_v52 = vor.u32 %v12901_v59, %v11728_v24  ;;  %v12956_v24 = vld [vmem:[#allocation15 + $0xc0] sm:$0xff] }
 0x48c   :  { %7648 = vmatpush.bf16.msrb.mxu2 %v11683_v12  ;;  %v7436_v3 = vpop.f32.mrf.mxu1  ;;  %v7345_v53 = vpop.f32.mrf.mxu2  ;;  %7954 = vmatpush.bf16.msra.mxu1 %v12946_v35  ;;  %v11843_v39 = vor.u32 %v12929_v8, %v11840_v62  ;;  %v11792_v12 = vld [vmem:[#allocation12 + $0x798] sm:$0xf0] }
 0x48d   :  { %v11744_v3 = vld [vmem:[#allocation12 + $0x738] sm:$0xf0] }
 0x48e   :  { %7943 = vmatpush.bf16.msra.mxu0 %v12936_v41  ;;  %v12945_v41 = vld [vmem:[#allocation15 + $0x68] sm:$0xff] }
 0x48f   :  { %7608 = vmatpush.bf16.msra.mxu3 %v11315_v44  ;;  %v11827_v44 = vor.u32 %v12925_v63, %v11824_v1 }
 0x490   :  { %7649 = vmatpush.bf16.msrb.mxu2 %v11667_v14  ;;  %7955 = vmatpush.bf16.msra.mxu1 %v12945_v41  ;;  %v12942_v14 = vld [vmem:[#allocation15 + $0x50] sm:$0xff] }
 0x492   :  { %7944 = vmatpush.bf16.msra.mxu0 %v12935_v47  ;;  %v13725_v47 = vld [vmem:[#allocation13] sm:$0xf] }
 0x493   :  { %7609 = vmatpush.bf16.msra.mxu3 %v11299_v23  ;;  %v5970_v11 = vperm.slane %v13725_v47, 2  ;;  %v12917_v23 = vld [vmem:[#allocation12 + $0x78c] sm:$0xf]  ;;  %v5971_v15 = vperm.slane %v13725_v47, 3 }
 0x494   :  { %7650 = vmatpush.bf16.msrb.mxu2 %v11651_v18  ;;  %v7395_v40 = vpop.f32.mrf.mxu2  ;;  %7956 = vmatpush.bf16.msra.mxu1 %v12944_v9  ;;  %v11795_v28 = vor.u32 %v12917_v23, %v11792_v12  ;;  %v11760_v18 = vld [vmem:[#allocation12 + $0x758] sm:$0xf0]  ;;  %v12949_v23 = vld [vmem:[#allocation15 + $0x88] sm:$0xff] }
 0x495   :  { %v7396_v53 = vadd.f32 %v7395_v40, %v13714_v5  ;;  %v12954_v40 = vld [vmem:[#allocation15 + $0xb0] sm:$0xff] }
 0x496   :  { %7945 = vmatpush.bf16.msra.mxu0 %v12934_v21  ;;  %v7331_v21 = vadd.f32 %v13707_v57, %v13699_v37 }
 0x497   :  { %7610 = vmatpush.bf16.msra.mxu3 %v11283_v45  ;;  %v12913_v45 = vld [vmem:[#allocation12 + $0x76c] sm:$0xf] }
 0x498   :  { %7651 = vmatpush.bf16.msrb.mxu2 %v11635_v22  ;;  %7957 = vmatpush.bf16.msra.mxu1 %v12943_v29  ;;  %v7344_v27 = vadd.f32 %v13721_v36, %v7331_v21 }
 0x49a   :  { %7946 = vmatpush.bf16.msra.mxu0 %v12933_v60 }
 0x49b   :  { %7611 = vmatpush.bf16.msra.mxu3 %v11267_v34  ;;  %v12909_v34 = vld [vmem:[#allocation12 + $0x74c] sm:$0xf] }
 0x49c   :  { %7652 = vmatpush.bf16.msrb.mxu2 %v11619_v54  ;;  %v7397_v13 = vpop.f32.mrf.mxu2  ;;  %7958 = vmatpush.bf16.msra.mxu1 %v12942_v14  ;;  %v11763_v37 = vor.u32 %v12909_v34, %v11760_v18 }
 0x49e   :  { %7947 = vmatpush.bf16.msra.mxu0 %v12932_v43  ;;  %v7473_v6 = vpop.f32.mrf.mxu0  ;;  %v12905_v43 = vld [vmem:[#allocation12 + $0x72c] sm:$0xf] }
 0x49f   :  { %7612 = vmatpush.bf16.msra.mxu3 %v11251_v50  ;;  %v7474_v30 = vadd.f32 %v7473_v6, %v5970_v11  ;;  %v12940_v50 = vld [vmem:[#allocation15 + $0x40] sm:$0xff]  ;;  %v11747_v22 = vor.u32 %v12905_v43, %v11744_v3 }
 0x4a0   :  { %7653 = vmatpush.bf16.msrb.mxu2 %v11603_v38  ;;  %7959 = vmatpush.bf16.msra.mxu1 %v12941_v48  ;;  %v12960_v3 = vld [vmem:[#allocation15 + $0xe0] sm:$0xff] }
 0x4a3   :  { %7613 = vmatpush.bf16.msra.mxu3 %v11235_v26  ;;  %7654 = vmatmul.bf16.vlgmr.msrb.gmra.mxu2 %v13669_v31  ;;  %v11776_v31 = vld [vmem:[#allocation12 + $0x778] sm:$0xf0] }
 0x4a4   :  { %v7356_v33 = vpop.f32.mrf.mxu3  ;;  %v11779_v49 = vor.u32 %v12913_v45, %v11776_v31  ;;  %7960 = vmatpush.bf16.msra.mxu1 %v12940_v50  ;;  %v12959_v50 = vld [vmem:[#allocation15 + $0xd8] sm:$0xff] }
 0x4a5   :  { %v7357_v60 = vadd.f32 %v7356_v33, %v7344_v27 }
 0x4a6   :  { %v7475_v42 = vpop.f32.mrf.mxu0 }
 0x4a7   :  { %7614 = vmatpush.bf16.msra.mxu3 %v11219_v17  ;;  %v7447_v19 = vpop.f32.mrf.mxu2  ;;  %v7672_v0 = vmax.f32 %v7357_v60, 0.0  ;;  %v12952_v42 = vld [vmem:[#allocation15 + $0xa0] sm:$0xff] }
 0x4a9   :  { %v7676_v57 = vpack.c.bf16 %v7672_v0, %v7672_v0 }
 0x4aa   :  { %7615 = vmatmul.bf16.vlgmr.msra.gmra.mxu3 %v13636_v20  ;;  %v7486_v20 = vpop.f32.mrf.mxu1 }
 0x4ab   :  { %7659 = vmatpush.bf16.msrb.mxu3 %v11843_v39  ;;  %v13730_v4 = vadd.f32 %v7486_v20, %v7474_v30  ;;  %7948 = vmatmul.bf16.vlgmr.msra.gmra.mxu0 %v7676_v57  ;;  %v12955_v39 = vld [vmem:[#allocation15 + $0xb8] sm:$0xff]  ;;  %v12961_v57 = vld [vmem:[#allocation15 + $0xe8] sm:$0xff] }
 0x4ac   :  { %v7358_v36 = vpop.f32.mrf.mxu3  ;;  %7966 = vmatpush.bf16.msra.mxu2 %v12955_v39 }
 0x4ad   :  { %v12958_v36 = vld [vmem:[#allocation15 + $0xd0] sm:$0xff] }
 0x4af   :  { %7660 = vmatpush.bf16.msrb.mxu3 %v11827_v44  ;;  %v7449_v55 = vpop.f32.mrf.mxu2 }
 0x4b0   :  { %7967 = vmatpush.bf16.msra.mxu2 %v12954_v40 }
 0x4b2   :  { %v7488_v7 = vpop.f32.mrf.mxu1 }
 0x4b3   :  { %7661 = vmatpush.bf16.msrb.mxu3 %v11811_v10 }
 0x4b5   :  { %v7408_v26 = vpop.f32.mrf.mxu3 }
 0x4b6   :  { %v7409_v46 = vadd.f32 %v7408_v26, %v7396_v53 }
 0x4b7   :  { %7662 = vmatpush.bf16.msrb.mxu3 %v11795_v28  ;;  %v12948_v28 = vld [vmem:[#allocation15 + $0x80] sm:$0xff] }
 0x4b8   :  { %v7422_v54 = vadd.f32 %v13712_v58, %v7409_v46 }
 0x4ba   :  { %v7435_v35 = vadd.f32 %v13719_v2, %v7422_v54  ;;  %v12951_v2 = vld [vmem:[#allocation15 + $0x98] sm:$0xff] }
 0x4bb   :  { %7663 = vmatpush.bf16.msrb.mxu3 %v11779_v49 }
 0x4bc   :  { %v7448_v8 = vadd.f32 %v7447_v19, %v7435_v35  ;;  %v12963_v19 = vld [vmem:[#allocation15 + $0xf8] sm:$0xff] }
 0x4bd   :  { %v7410_v16 = vpop.f32.mrf.mxu3 }
 0x4be   :  { %v7525_v32 = vpop.f32.mrf.mxu0 }
 0x4bf   :  { %7664 = vmatpush.bf16.msrb.mxu3 %v11763_v37  ;;  %v12962_v37 = vld [vmem:[#allocation15 + $0xf0] sm:$0xff] }
 0x4c3   :  { %7665 = vmatpush.bf16.msrb.mxu3 %v11747_v22  ;;  %v12957_v22 = vld [vmem:[#allocation15 + $0xc8] sm:$0xff] }
 0x4c4   :  { %v7538_v61 = vpop.f32.mrf.mxu1 }
 0x4c5   :  { %v7499_v56 = vpop.f32.mrf.mxu2 }
 0x4c6   :  { %v7527_v6 = vpop.f32.mrf.mxu0  ;;  %v7500_v12 = vadd.f32 %v7499_v56, %v13730_v4 }
 0x4c7   :  { %7666 = vmatpush.bf16.msrb.mxu3 %v11731_v52  ;;  %v7460_v62 = vpop.f32.mrf.mxu3 }
 0x4c8   :  { %v7461_v17 = vadd.f32 %v7460_v62, %v7448_v8 }
 0x4ca   :  { %7667 = vmatmul.bf16.vlgmr.msrb.gmra.mxu3 %v13683_v51  ;;  %v7673_v63 = vmax.f32 %v7461_v17, 0.0  ;;  %v12953_v51 = vld [vmem:[#allocation15 + $0xa8] sm:$0xff] }
 0x4cb   :  { %7968 = vmatpush.bf16.msra.mxu2 %v12953_v51  ;;  %7979 = vmatpush.bf16.msra.mxu3 %v12963_v19 }
 0x4cc   :  { %v7540_v38 = vpop.f32.mrf.mxu1  ;;  %v7677_v5 = vpack.c.bf16 %v7673_v63, %v7673_v63 }
 0x4cd   :  { %v7501_v41 = vpop.f32.mrf.mxu2  ;;  %v12982_v38 = vld [vmem:[#allocation16] ss:$0 sm:$0xff] }
 0x4ce   :  { %7961 = vmatmul.bf16.vlgmr.msra.gmra.mxu1 %v7677_v5 }
 0x4cf   :  { %v7462_v58 = vpop.f32.mrf.mxu3  ;;  %7969 = vmatpush.bf16.msra.mxu2 %v12952_v42  ;;  %7980 = vmatpush.bf16.msra.mxu3 %v12962_v37 }
 0x4d3   :  { %7970 = vmatpush.bf16.msra.mxu2 %v12951_v2  ;;  %7981 = vmatpush.bf16.msra.mxu3 %v12961_v57 }
 0x4d7   :  { %7971 = vmatpush.bf16.msra.mxu2 %v12950_v25  ;;  %7982 = vmatpush.bf16.msra.mxu3 %v12960_v3 }
 0x4db   :  { %7972 = vmatpush.bf16.msra.mxu2 %v12949_v23  ;;  %7983 = vmatpush.bf16.msra.mxu3 %v12959_v50 }
 0x4de   :  { %v7577_v1 = vpop.f32.mrf.mxu0 }
 0x4df   :  { %v7578_v9 = vadd.f32 %v7577_v1, %v5971_v15  ;;  %7973 = vmatpush.bf16.msra.mxu2 %v12948_v28  ;;  %7984 = vmatpush.bf16.msra.mxu3 %v12958_v36 }
 0x4e3   :  { %7985 = vmatpush.bf16.msra.mxu3 %v12957_v22 }
 0x4e4   :  { %v7590_v11 = vpop.f32.mrf.mxu1 }
 0x4e5   :  { %v7591_v10 = vadd.f32 %v7590_v11, %v7578_v9 }
 0x4e6   :  { %v7579_v44 = vpop.f32.mrf.mxu0  ;;  %v7551_v30 = vpop.f32.mrf.mxu2 }
 0x4e7   :  { %7986 = vmatpush.bf16.msra.mxu3 %v12956_v24 }
 0x4ec   :  { %v7592_v20 = vpop.f32.mrf.mxu1 }
 0x4ed   :  { %v7512_v29 = vpop.f32.mrf.mxu3 }
 0x4ee   :  { %v7513_v13 = vadd.f32 %v7512_v29, %v7500_v12  ;;  %v7553_v47 = vpop.f32.mrf.mxu2 }
 0x4f0   :  { %v7526_v21 = vadd.f32 %v7525_v32, %v7513_v13 }
 0x4f2   :  { %v7539_v27 = vadd.f32 %v7538_v61, %v7526_v21 }
 0x4f4   :  { %v7552_v49 = vadd.f32 %v7551_v30, %v7539_v27 }
 0x4f5   :  { %v7514_v31 = vpop.f32.mrf.mxu3 }
 0x4fe   :  { %v7629_v45 = vpop.f32.mrf.mxu0 }
 0x504   :  { %v7642_v33 = vpop.f32.mrf.mxu1 }
 0x506   :  { %v7631_v14 = vpop.f32.mrf.mxu0  ;;  %v7603_v34 = vpop.f32.mrf.mxu2 }
 0x507   :  { %v7604_v32 = vadd.f32 %v7603_v34, %v7591_v10 }
 0x50c   :  { %v7644_v48 = vpop.f32.mrf.mxu1 }
 0x50d   :  { %v7564_v60 = vpop.f32.mrf.mxu3 }
 0x50e   :  { %v7565_v18 = vadd.f32 %v7564_v60, %v7552_v49  ;;  %v7605_v43 = vpop.f32.mrf.mxu2 }
 0x510   :  { %v7674_v4 = vmax.f32 %v7565_v18, 0.0 }
 0x512   :  { %v7678_v0 = vpack.c.bf16 %v7674_v4, %v7674_v4 }
 0x514   :  { %7974 = vmatmul.bf16.vlgmr.msra.gmra.mxu2 %v7678_v0 }
 0x515   :  { %v7566_v7 = vpop.f32.mrf.mxu3 }
 0x526   :  { %v7655_v52 = vpop.f32.mrf.mxu2 }
 0x528   :  { %v7949_v6 = vpop.f32.mrf.mxu0 }
 0x529   :  { %v7950_v39 = vadd.f32 %v12982_v38, %v7949_v6 }
 0x52d   :  { %v7616_v59 = vpop.f32.mrf.mxu3 }
 0x52e   :  { %v7617_v55 = vadd.f32 %v7616_v59, %v7604_v32  ;;  %v7657_v46 = vpop.f32.mrf.mxu2 }
 0x530   :  { %v7630_v53 = vadd.f32 %v7629_v45, %v7617_v55  ;;  %v7951_v54 = vpop.f32.mrf.mxu0 }
 0x532   :  { %v7643_v16 = vadd.f32 %v7642_v33, %v7630_v53 }
 0x534   :  { %v7656_v61 = vadd.f32 %v7655_v52, %v7643_v16 }
 0x535   :  { %v7618_v26 = vpop.f32.mrf.mxu3 }
 0x54b   :  { %v7962_v63 = vpop.f32.mrf.mxu1 }
 0x54c   :  { %v7963_v5 = vadd.f32 %v7962_v63, %v7950_v39 }
 0x54d   :  { %v7668_v35 = vpop.f32.mrf.mxu3 }
 0x54e   :  { %v7669_v56 = vadd.f32 %v7668_v35, %v7656_v61 }
 0x550   :  { %v7675_v8 = vmax.f32 %v7669_v56, 0.0 }
 0x552   :  { %v7679_v62 = vpack.c.bf16 %v7675_v8, %v7675_v8 }
 0x553   :  { %v7964_v1 = vpop.f32.mrf.mxu1 }
 0x554   :  { %7987 = vmatmul.bf16.vlgmr.msra.gmra.mxu3 %v7679_v62 }
 0x555   :  { %v7670_v17 = vpop.f32.mrf.mxu3 }
 0x597   :  { %v7975_v40 = vpop.f32.mrf.mxu2 }
 0x598   :  { %v7976_v58 = vadd.f32 %v7975_v40, %v7963_v5 }
 0x59f   :  { %v7977_v41 = vpop.f32.mrf.mxu2 }
 0x5d7   :  { %v7988_v51 = vpop.f32.mrf.mxu3 }
 0x5d8   :  { %v7989_v42 = vadd.f32 %v7988_v51, %v7976_v58 }
 0x5da   :  { %v7992_v44 = vmax.f32 %v7989_v42, 0.0 }
 0x5dc   :  { %7993 = vst [vmem:[%s13753_s11] sm:$0xff] %v7992_v44 }
 0x5df   :  { %v7990_v2 = vpop.f32.mrf.mxu3 }
 0x5e0   :  { %7998 = vsyncpa [#allocation3], 1 }
 0x5e1   :  { %7999 = vsyncpa [#allocation5], 1 }
 0x5e2   :  { %8000 = vsyncpa [#allocation8], 1 }
 0x5e3   :  { %8001 = vsyncpa [#allocation11], 1 }
 0x5e4   :  { %8002 = vsyncpa [#allocation14], 1 }
 0x5e5   :  { %8003 = vsyncpa [#allocation17], 1 }

</bundles_post_ra>
